<compile_context>
chip_gen: v7x
topology: tpu7x:2x2x1
jax: 0.10.0
libtpu: 0.0.40
codegen_flags: <defaults>
</compile_context>

<pallas_src>
import functools
import math

import jax
import jax.numpy as jnp
from jax import lax
from jax.experimental import pallas as pl
from jax.experimental.pallas import tpu as pltpu


# ----------------------------------------------------------------------------
# VMEM budget per TPU generation (review: 64 MiB on v5e/v6e, <=40 MiB on v7x).
# ----------------------------------------------------------------------------
def _pick_vmem_limit():
    try:
        kind = jax.devices()[0].device_kind.lower()
    except Exception:
        kind = ""
    if "v5" in kind or "v6" in kind:
        return 64 * 1024 * 1024      # 128 MiB physical VMEM: room for P up to 512
    if "v7" in kind:
        return 40 * 1024 * 1024      # 64 MiB / TensorCore physical: keep headroom
    return 32 * 1024 * 1024


_VMEM_LIMIT = _pick_vmem_limit()


def _apply_act(acc, act):
    if act == "relu":
        return jnp.maximum(acc, 0.0)
    if act == "sigmoid":
        # tanh identity -> EUP transcendental slot, no VALU divide sequence.
        return 0.5 * (jnp.tanh(0.5 * acc) + 1.0)
    return acc


def _bf16_round(a):
    return a.astype(jnp.bfloat16).astype(jnp.float32)


# ----------------------------------------------------------------------------
# Kernel A: pixels-on-lanes (HW >= 128).  (Cout, K) @ (K, P) + bias + act.
# ----------------------------------------------------------------------------
def _px_kernel(x_ref, w_ref, b_ref, o_ref, *, act):
    """x_ref: (1, K, P) bf16 patches; w_ref: (Cout, K) bf16 (VMEM-resident);
       b_ref: (Cout, 1) f32; o_ref: (1, Cout, P) f32 (lane-dense pixels)."""
    acc = jnp.dot(w_ref[...], x_ref[0], preferred_element_type=jnp.float32)
    acc = acc + b_ref[...]
    o_ref[0] = _apply_act(acc, act).astype(o_ref.dtype)


def _matmul_px(x_nkp, w_ck, b, act):
    """x_nkp: (N, K, HW) bf16; w_ck: (C, K) bf16; b: (C,) f32 -> (N, C, HW) f32."""
    n, k, hw = x_nkp.shape
    c = w_ck.shape[0]
    hw_pad = ((hw + 127) // 128) * 128           # keep stores lane-dense
    if hw_pad != hw:
        x_nkp = jnp.pad(x_nkp, ((0, 0), (0, 0), (0, hw_pad - hw)))
    p = 128
    for cand in (512, 384, 256, 128):            # biggest 128-multiple divisor <=512
        if hw_pad % cand == 0:
            p = cand
            break
    grid = (n, hw_pad // p)
    b2 = b.reshape(c, 1).astype(jnp.float32)
    out = pl.pallas_call(
        functools.partial(_px_kernel, act=act),
        out_shape=jax.ShapeDtypeStruct((n, c, hw_pad), jnp.float32),
        grid=grid,
        in_specs=[
            pl.BlockSpec((1, k, p), lambda i, j: (i, 0, j)),   # patch tile
            pl.BlockSpec((c, k), lambda i, j: (0, 0)),         # weights: resident
            pl.BlockSpec((c, 1), lambda i, j: (0, 0)),         # bias: resident
        ],
        out_specs=pl.BlockSpec((1, c, p), lambda i, j: (i, 0, j)),
        compiler_params=pltpu.CompilerParams(
            dimension_semantics=("parallel", "parallel"),      # megacore on v7x
            vmem_limit_bytes=_VMEM_LIMIT,
        ),
    )(x_nkp, w_ck, b2)
    return out[:, :, :hw] if hw_pad != hw else out


# ----------------------------------------------------------------------------
# Kernel B: channels-on-lanes, batch folded into pixels (HW < 128).
# (N*HW, K) @ (K, Cout) + bias + act -> Cout lane-dense, full-width MXU N-dim.
# ----------------------------------------------------------------------------
def _rows_kernel(x_ref, w_ref, b_ref, o_ref, *, act):
    """x_ref: (TM, K) bf16; w_ref: (K, Cout) bf16 (resident); b_ref: (1, Cout) f32;
       o_ref: (TM, Cout) f32 (channels lane-dense)."""
    acc = jnp.dot(x_ref[...], w_ref[...], preferred_element_type=jnp.float32)
    acc = acc + b_ref[...]
    o_ref[...] = _apply_act(acc, act).astype(o_ref.dtype)


def _matmul_rows(x_mk, w_kc, b, act):
    """x_mk: (M, K) bf16; w_kc: (K, C) bf16; b: (C,) f32 -> (M, C) f32."""
    m, k = x_mk.shape
    c = w_kc.shape[1]
    tm = m if m <= 512 else 512
    m_pad = ((m + tm - 1) // tm) * tm
    if m_pad != m:
        x_mk = jnp.pad(x_mk, ((0, m_pad - m), (0, 0)))
    grid = (m_pad // tm,)
    b2 = b.reshape(1, c).astype(jnp.float32)
    out = pl.pallas_call(
        functools.partial(_rows_kernel, act=act),
        out_shape=jax.ShapeDtypeStruct((m_pad, c), jnp.float32),
        grid=grid,
        in_specs=[
            pl.BlockSpec((tm, k), lambda i: (i, 0)),
            pl.BlockSpec((k, c), lambda i: (0, 0)),            # weights: resident
            pl.BlockSpec((1, c), lambda i: (0, 0)),            # bias: resident
        ],
        out_specs=pl.BlockSpec((tm, c), lambda i: (i, 0)),
        compiler_params=pltpu.CompilerParams(
            dimension_semantics=("parallel",),
            vmem_limit_bytes=_VMEM_LIMIT,
        ),
    )(x_mk, w_kc, b2)
    return out[:m] if m_pad != m else out


# ----------------------------------------------------------------------------
# Conv building blocks (activations stay NCHW f32 between layers; im2col glue
# runs in bf16; all matmuls go through the Pallas kernels above).
# ----------------------------------------------------------------------------
def conv3x3(x, w_ohwi, b, act="relu"):
    """x: (N, C, H, W); w_ohwi: (Cout, 3, 3, Cin); stride 1, padding 1."""
    n, c, h, w = x.shape
    cout = w_ohwi.shape[0]
    hw = h * w
    xb = x.astype(jnp.bfloat16)
    if hw >= 128:
        # Pixels-on-lanes: NCHW im2col, K index = (dy*3+dx)*Cin + ci.
        xp = jnp.pad(xb, ((0, 0), (0, 0), (1, 1), (1, 1)))
        cols = [xp[:, :, dy:dy + h, dx:dx + w] for dy in range(3) for dx in range(3)]
        patches = jnp.concatenate(cols, axis=1).reshape(n, 9 * c, hw)
        wk = w_ohwi.reshape(cout, 9 * c).astype(jnp.bfloat16)
        y = _matmul_px(patches, wk, b, act)                    # (N, Cout, HW)
        return y.reshape(n, cout, h, w)
    # Channels-on-lanes, batch folded: NHWC im2col, same K ordering.
    xh = jnp.transpose(xb, (0, 2, 3, 1))                       # (N, H, W, C)
    xp = jnp.pad(xh, ((0, 0), (1, 1), (1, 1), (0, 0)))
    cols = [xp[:, dy:dy + h, dx:dx + w, :] for dy in range(3) for dx in range(3)]
    patches = jnp.concatenate(cols, axis=-1).reshape(n * hw, 9 * c)
    wk = jnp.transpose(w_ohwi, (1, 2, 3, 0)).reshape(9 * c, cout).astype(jnp.bfloat16)
    y = _matmul_rows(patches, wk, b, act)                      # (N*HW, Cout)
    return jnp.transpose(y.reshape(n, h, w, cout), (0, 3, 1, 2))


def conv1x1(x, w_oi, b, act):
    """x: (N, C, H, W); w_oi: (Cout, Cin)."""
    n, c, h, w = x.shape
    hw = h * w
    xb = x.astype(jnp.bfloat16)
    if hw >= 128:
        y = _matmul_px(xb.reshape(n, c, hw), w_oi.astype(jnp.bfloat16), b, act)
        return y.reshape(n, -1, h, w)
    xh = jnp.transpose(xb, (0, 2, 3, 1)).reshape(n * hw, c)
    y = _matmul_rows(xh, jnp.transpose(w_oi).astype(jnp.bfloat16), b, act)
    return jnp.transpose(y.reshape(n, h, w, -1), (0, 3, 1, 2))


def conv_transpose2x2(x, w_t, b):
    """ConvTranspose2d(Cin -> Chalf, kernel=2, stride=2).
       w_t: (Chalf, 2, 2, Cin); out[n,co,2y+dy,2x+dx] = sum_ci w_t[co,dy,dx,ci]*x[n,ci,y,x] + b[co]."""
    n, c, h, w = x.shape
    chalf = w_t.shape[0]
    hw = h * w
    bm = jnp.repeat(b, 4)                                      # bias per (co, dy, dx)
    xb = x.astype(jnp.bfloat16)
    if hw >= 128:
        wk = w_t.reshape(chalf * 4, c).astype(jnp.bfloat16)    # row = co*4 + dy*2 + dx
        y = _matmul_px(xb.reshape(n, c, hw), wk, bm, "none")   # (N, 4*Chalf, HW)
        y = y.reshape(n, chalf, 2, 2, h, w)
        # TODO(synk): fold this 2x2 pixel shuffle into the kernel's output store.
        return y.transpose(0, 1, 4, 2, 5, 3).reshape(n, chalf, 2 * h, 2 * w)
    wk = jnp.transpose(w_t, (3, 0, 1, 2)).reshape(c, chalf * 4).astype(jnp.bfloat16)
    xh = jnp.transpose(xb, (0, 2, 3, 1)).reshape(n * hw, c)
    y = _matmul_rows(xh, wk, bm, "none")                       # (N*HW, 4*Chalf)
    y = y.reshape(n, h, w, chalf, 2, 2)
    return jnp.transpose(y, (0, 3, 1, 4, 2, 5)).reshape(n, chalf, 2 * h, 2 * w)


def maxpool2(x):
    n, c, h, w = x.shape
    return x.reshape(n, c, h // 2, 2, w // 2, 2).max(axis=(3, 5))


def double_conv(x, p):
    # TODO(synk): DoubleConv's exact definition (incl. any BatchNorm) is not in
    # the spec; implemented as Conv3x3+ReLU twice (BN would be folded into w/b).
    # TODO(synk): fuse both convs into one pallas_call with a VMEM intermediate.
    x = conv3x3(x, p["w1"], p["b1"], act="relu")
    x = conv3x3(x, p["w2"], p["b2"], act="relu")
    return x


def up_block(x, skip, p):
    y = conv_transpose2x2(x, p["wt"], p["bt"])
    # TODO(synk): drop this concat by splitting the first DoubleConv weight
    # along K and accumulating two matmuls in-kernel.
    x = jnp.concatenate([skip, y], axis=1)
    return double_conv(x, p)


# ----------------------------------------------------------------------------
# RebuildNet forward (matches the PyTorch module structure).
# ----------------------------------------------------------------------------
def rebuildnet_forward(params, x):
    x = double_conv(x, params["inconv"])                       # InConv
    skips = [x]
    for p in params["downs"]:                                  # MakeDownLayers
        x = maxpool2(x)                                        # Down = pool + DC
        x = double_conv(x, p)
        # TODO(synk): SCAM_P attention (class definition not provided) -> identity.
        skips.append(x)
    skips[-1] = double_conv(skips[-1], params["middle"])       # Middle
    x = skips[-1]
    for i, p in enumerate(params["ups"]):                      # MakeUpLayers
        x = up_block(x, skips[-i - 2], p)
        # TODO(synk): SCAM_P attention -> identity (see above).
    x = conv1x1(x, params["outconv"]["w"], params["outconv"]["b"], act="sigmoid")
    return x


# ----------------------------------------------------------------------------
# Deterministic parameter init (PyTorch-like uniform(-1/sqrt(fan_in), ...)).
# ----------------------------------------------------------------------------
def _conv_params(key, cin, cout, k):
    kw, kb = jax.random.split(key)
    bound = 1.0 / math.sqrt(cin * k * k)
    w = jax.random.uniform(kw, (cout, k, k, cin), jnp.float32, -bound, bound)
    b = jax.random.uniform(kb, (cout,), jnp.float32, -bound, bound)
    return w, b


def init_rebuildnet_params(key, n_channels=4, n_classes=4, feature_root=16,
                           sampling_number=4):
    it = iter(jax.random.split(key, 64))

    def dconv(cin, cout):
        w1, b1 = _conv_params(next(it), cin, cout, 3)
        w2, b2 = _conv_params(next(it), cout, cout, 3)
        return {"w1": w1, "b1": b1, "w2": w2, "b2": b2}

    params = {"inconv": dconv(n_channels, feature_root)}
    ch = feature_root
    downs = []
    for _ in range(sampling_number):
        downs.append(dconv(ch, ch * 2))
        ch *= 2
    params["downs"] = downs
    params["middle"] = dconv(ch, ch)
    ups = []
    for _ in range(sampling_number):
        half = ch // 2
        kt_w, kt_b = jax.random.split(next(it))
        bound = 1.0 / math.sqrt(ch * 4)
        wt = jax.random.uniform(kt_w, (half, 2, 2, ch), jnp.float32, -bound, bound)
        bt = jax.random.uniform(kt_b, (half,), jnp.float32, -bound, bound)
        blk = dconv(ch, half)
        blk["wt"] = wt
        blk["bt"] = bt
        ups.append(blk)
        ch = half
    params["ups"] = ups
    wo, bo = _conv_params(next(it), feature_root, n_classes, 1)
    params["outconv"] = {"w": wo.reshape(n_classes, feature_root), "b": bo}
    return params


# ----------------------------------------------------------------------------
# Reference helpers for spot checks (bf16-rounded operands, f32 accumulation).
# ----------------------------------------------------------------------------
def _conv3x3_reference(x, w_ohwi, b):
    w_oihw = jnp.transpose(_bf16_round(w_ohwi), (0, 3, 1, 2))
    y = lax.conv_general_dilated(_bf16_round(x), w_oihw, window_strides=(1, 1),
                                 padding=((1, 1), (1, 1)),
                                 dimension_numbers=("NCHW", "OIHW", "NCHW"))
    return jnp.maximum(y + b.reshape(1, -1, 1, 1), 0.0)


if __name__ == "__main__":
    key = jax.random.PRNGKey(0)
    kx, kp, ks1, ks2, ks3 = jax.random.split(key, 5)

    N, C, H, W = 2, 4, 16, 16                                  # NChannels=4
    x = jax.random.normal(kx, (N, C, H, W), dtype=jnp.float32)
    params = init_rebuildnet_params(kp, n_channels=C, n_classes=4,
                                    feature_root=16, sampling_number=4)

    fwd = jax.jit(rebuildnet_forward)
    out = jax.block_until_ready(fwd(params, x))

    assert out.shape == (N, 4, H, W), out.shape
    assert bool(jnp.all(jnp.isfinite(out)))
    assert bool(jnp.all((out >= 0.0) & (out <= 1.0)))          # sigmoid range

    # Spot-check 1: pixels-on-lanes 3x3 conv (HW = 256 >= 128).
    p1 = params["inconv"]
    got = conv3x3(x, p1["w1"], p1["b1"], act="relu")
    ref = _conv3x3_reference(x, p1["w1"], p1["b1"])
    assert jnp.allclose(got, ref, atol=2e-3, rtol=2e-3), \
        float(jnp.max(jnp.abs(got - ref)))

    # Spot-check 2: channels-on-lanes 3x3 conv (HW = 16 < 128, batch folded).
    xs = jax.random.normal(ks1, (2, 8, 4, 4), dtype=jnp.float32)
    ws, bs = _conv_params(ks2, 8, 24, 3)
    got2 = conv3x3(xs, ws, bs, act="relu")
    ref2 = _conv3x3_reference(xs, ws, bs)
    assert jnp.allclose(got2, ref2, atol=2e-3, rtol=2e-3), \
        float(jnp.max(jnp.abs(got2 - ref2)))

    # Spot-check 3: 2x2 stride-2 transposed conv (channels-on-lanes path).
    xt = jax.random.normal(ks3, (2, 16, 4, 4), dtype=jnp.float32)
    kw_, kb_ = jax.random.split(jax.random.PRNGKey(7))
    bound = 1.0 / math.sqrt(16 * 4)
    wt = jax.random.uniform(kw_, (8, 2, 2, 16), jnp.float32, -bound, bound)
    bt = jax.random.uniform(kb_, (8,), jnp.float32, -bound, bound)
    got3 = conv_transpose2x2(xt, wt, bt)
    ref3 = jnp.einsum("opqc,nchw->nohpwq", _bf16_round(wt), _bf16_round(xt))
    ref3 = ref3.reshape(2, 8, 8, 8) + bt[None, :, None, None]
    assert jnp.allclose(got3, ref3, atol=2e-3, rtol=2e-3), \
        float(jnp.max(jnp.abs(got3 - ref3)))

    print("KERNEL_OK")
</pallas_src>

<mosaic_0001>
module attributes {stable_mosaic.version = 11 : i64} {
  func.func @_px_kernel(%arg0: i32, %arg1: i32, %arg2: memref<1x36x256xbf16, #tpu.memory_space<vmem>>, %arg3: memref<16x36xbf16, #tpu.memory_space<vmem>>, %arg4: memref<16x1xf32, #tpu.memory_space<vmem>>, %arg5: memref<1x16x256xf32, #tpu.memory_space<vmem>>) attributes {dimension_semantics = [#tpu.dimension_semantics<parallel>, #tpu.dimension_semantics<parallel>], iteration_bounds = array<i64: 2, 1>, scalar_prefetch = 0 : i64, scratch_operands = 0 : i64, tpu.core_type = #tpu.core_type<tc>, window_params = [{transform_indices = @transform_0, window_bounds = array<i64: 1, 36, 256>}, {pipeline_mode = #tpu.pipeline_mode<synchronous>, transform_indices = @transform_1, window_bounds = array<i64: 16, 36>}, {pipeline_mode = #tpu.pipeline_mode<synchronous>, transform_indices = @transform_2, window_bounds = array<i64: 16, 1>}, {transform_indices = @transform_3, window_bounds = array<i64: 1, 16, 256>}]} {
    %c0 = arith.constant 0 : index
    %c0_0 = arith.constant 0 : index
    %0 = vector.load %arg3[%c0, %c0_0] : memref<16x36xbf16, #tpu.memory_space<vmem>>, vector<16x36xbf16>
    %c0_1 = arith.constant 0 : index
    %c0_2 = arith.constant 0 : index
    %c0_3 = arith.constant 0 : index
    %1 = vector.load %arg2[%c0_1, %c0_2, %c0_3] : memref<1x36x256xbf16, #tpu.memory_space<vmem>>, vector<1x36x256xbf16>
    %2 = vector.shape_cast %1 : vector<1x36x256xbf16> to vector<36x256xbf16>
    %cst = arith.constant dense<0.000000e+00> : vector<16x256xf32>
    %3 = tpu.matmul %0, %2, %cst {dimension_numbers = #tpu.dot_dimension_numbers<[1], [0], [0], [1], [0, 0, 1, 1], [], []>} : vector<16x36xbf16>, vector<36x256xbf16>, vector<16x256xf32> -> vector<16x256xf32>
    %c0_4 = arith.constant 0 : index
    %c0_5 = arith.constant 0 : index
    %4 = vector.load %arg4[%c0_4, %c0_5] : memref<16x1xf32, #tpu.memory_space<vmem>>, vector<16x1xf32>
    %5 = vector.broadcast %4 : vector<16x1xf32> to vector<16x256xf32>
    %6 = arith.addf %3, %5 : vector<16x256xf32>
    %cst_6 = arith.constant 0.000000e+00 : f32
    %7 = vector.broadcast %cst_6 : f32 to vector<16x256xf32>
    %8 = arith.maximumf %6, %7 : vector<16x256xf32>
    %c0_7 = arith.constant 0 : index
    %c0_8 = arith.constant 0 : index
    %c0_9 = arith.constant 0 : index
    %9 = vector.load %arg5[%c0_7, %c0_8, %c0_9] : memref<1x16x256xf32, #tpu.memory_space<vmem>>, vector<1x16x256xf32>
    %10 = vector.shape_cast %9 : vector<1x16x256xf32> to vector<16x256xf32>
    %11 = vector.shape_cast %8 : vector<16x256xf32> to vector<1x16x256xf32>
    tpu.vector_store %arg5[%c0_7, %c0_8, %c0_9], %11 {strides = array<i32>} : memref<1x16x256xf32, #tpu.memory_space<vmem>>, vector<1x16x256xf32>,
    return
  }
  func.func @transform_0(%arg0: i32, %arg1: i32) -> (i32, i32, i32) {
    %c0_i32 = arith.constant 0 : i32
    %c0_i32_0 = arith.constant 0 : i32
    return %arg0, %c0_i32, %arg1 : i32, i32, i32
  }
  func.func @transform_1(%arg0: i32, %arg1: i32) -> (i32, i32) {
    %c0_i32 = arith.constant 0 : i32
    %c0_i32_0 = arith.constant 0 : i32
    %c0_i32_1 = arith.constant 0 : i32
    return %c0_i32, %c0_i32_0 : i32, i32
  }
  func.func @transform_2(%arg0: i32, %arg1: i32) -> (i32, i32) {
    %c0_i32 = arith.constant 0 : i32
    %c0_i32_0 = arith.constant 0 : i32
    %c0_i32_1 = arith.constant 0 : i32
    return %c0_i32, %c0_i32_0 : i32, i32
  }
  func.func @transform_3(%arg0: i32, %arg1: i32) -> (i32, i32, i32) {
    %c0_i32 = arith.constant 0 : i32
    %c0_i32_0 = arith.constant 0 : i32
    return %arg0, %c0_i32, %arg1 : i32, i32, i32
  }
}

module attributes {stable_mosaic.version = 11 : i64} {
  func.func @_px_kernel(%arg0: i32, %arg1: i32, %arg2: memref<1x144x256xbf16, #tpu.memory_space<vmem>>, %arg3: memref<16x144xbf16, #tpu.memory_space<vmem>>, %arg4: memref<16x1xf32, #tpu.memory_space<vmem>>, %arg5: memref<1x16x256xf32, #tpu.memory_space<vmem>>) attributes {dimension_semantics = [#tpu.dimension_semantics<parallel>, #tpu.dimension_semantics<parallel>], iteration_bounds = array<i64: 2, 1>, scalar_prefetch = 0 : i64, scratch_operands = 0 : i64, tpu.core_type = #tpu.core_type<tc>, window_params = [{transform_indices = @transform_0, window_bounds = array<i64: 1, 144, 256>}, {pipeline_mode = #tpu.pipeline_mode<synchronous>, transform_indices = @transform_1, window_bounds = array<i64: 16, 144>}, {pipeline_mode = #tpu.pipeline_mode<synchronous>, transform_indices = @transform_2, window_bounds = array<i64: 16, 1>}, {transform_indices = @transform_3, window_bounds = array<i64: 1, 16, 256>}]} {
    %c0 = arith.constant 0 : index
    %c0_0 = arith.constant 0 : index
    %0 = vector.load %arg3[%c0, %c0_0] : memref<16x144xbf16, #tpu.memory_space<vmem>>, vector<16x144xbf16>
    %c0_1 = arith.constant 0 : index
    %c0_2 = arith.constant 0 : index
    %c0_3 = arith.constant 0 : index
    %1 = vector.load %arg2[%c0_1, %c0_2, %c0_3] : memref<1x144x256xbf16, #tpu.memory_space<vmem>>, vector<1x144x256xbf16>
    %2 = vector.shape_cast %1 : vector<1x144x256xbf16> to vector<144x256xbf16>
    %cst = arith.constant dense<0.000000e+00> : vector<16x256xf32>
    %3 = tpu.matmul %0, %2, %cst {dimension_numbers = #tpu.dot_dimension_numbers<[1], [0], [0], [1], [0, 0, 1, 1], [], []>} : vector<16x144xbf16>, vector<144x256xbf16>, vector<16x256xf32> -> vector<16x256xf32>
    %c0_4 = arith.constant 0 : index
    %c0_5 = arith.constant 0 : index
    %4 = vector.load %arg4[%c0_4, %c0_5] : memref<16x1xf32, #tpu.memory_space<vmem>>, vector<16x1xf32>
    %5 = vector.broadcast %4 : vector<16x1xf32> to vector<16x256xf32>
    %6 = arith.addf %3, %5 : vector<16x256xf32>
    %cst_6 = arith.constant 0.000000e+00 : f32
    %7 = vector.broadcast %cst_6 : f32 to vector<16x256xf32>
    %8 = arith.maximumf %6, %7 : vector<16x256xf32>
    %c0_7 = arith.constant 0 : index
    %c0_8 = arith.constant 0 : index
    %c0_9 = arith.constant 0 : index
    %9 = vector.load %arg5[%c0_7, %c0_8, %c0_9] : memref<1x16x256xf32, #tpu.memory_space<vmem>>, vector<1x16x256xf32>
    %10 = vector.shape_cast %9 : vector<1x16x256xf32> to vector<16x256xf32>
    %11 = vector.shape_cast %8 : vector<16x256xf32> to vector<1x16x256xf32>
    tpu.vector_store %arg5[%c0_7, %c0_8, %c0_9], %11 {strides = array<i32>} : memref<1x16x256xf32, #tpu.memory_space<vmem>>, vector<1x16x256xf32>,
    return
  }
  func.func @transform_0(%arg0: i32, %arg1: i32) -> (i32, i32, i32) {
    %c0_i32 = arith.constant 0 : i32
    %c0_i32_0 = arith.constant 0 : i32
    return %arg0, %c0_i32, %arg1 : i32, i32, i32
  }
  func.func @transform_1(%arg0: i32, %arg1: i32) -> (i32, i32) {
    %c0_i32 = arith.constant 0 : i32
    %c0_i32_0 = arith.constant 0 : i32
    %c0_i32_1 = arith.constant 0 : i32
    return %c0_i32, %c0_i32_0 : i32, i32
  }
  func.func @transform_2(%arg0: i32, %arg1: i32) -> (i32, i32) {
    %c0_i32 = arith.constant 0 : i32
    %c0_i32_0 = arith.constant 0 : i32
    %c0_i32_1 = arith.constant 0 : i32
    return %c0_i32, %c0_i32_0 : i32, i32
  }
  func.func @transform_3(%arg0: i32, %arg1: i32) -> (i32, i32, i32) {
    %c0_i32 = arith.constant 0 : i32
    %c0_i32_0 = arith.constant 0 : i32
    return %arg0, %c0_i32, %arg1 : i32, i32, i32
  }
}

module attributes {stable_mosaic.version = 11 : i64} {
  func.func @_rows_kernel(%arg0: i32, %arg1: memref<128x144xbf16, #tpu.memory_space<vmem>>, %arg2: memref<144x32xbf16, #tpu.memory_space<vmem>>, %arg3: memref<1x32xf32, #tpu.memory_space<vmem>>, %arg4: memref<128x32xf32, #tpu.memory_space<vmem>>) attributes {dimension_semantics = [#tpu.dimension_semantics<parallel>], iteration_bounds = array<i64: 1>, scalar_prefetch = 0 : i64, scratch_operands = 0 : i64, tpu.core_type = #tpu.core_type<tc>, window_params = [{transform_indices = @transform_0, window_bounds = array<i64: 128, 144>}, {pipeline_mode = #tpu.pipeline_mode<synchronous>, transform_indices = @transform_1, window_bounds = array<i64: 144, 32>}, {pipeline_mode = #tpu.pipeline_mode<synchronous>, transform_indices = @transform_2, window_bounds = array<i64: 1, 32>}, {transform_indices = @transform_3, window_bounds = array<i64: 128, 32>}]} {
    %c0 = arith.constant 0 : index
    %c0_0 = arith.constant 0 : index
    %0 = vector.load %arg1[%c0, %c0_0] : memref<128x144xbf16, #tpu.memory_space<vmem>>, vector<128x144xbf16>
    %c0_1 = arith.constant 0 : index
    %c0_2 = arith.constant 0 : index
    %1 = vector.load %arg2[%c0_1, %c0_2] : memref<144x32xbf16, #tpu.memory_space<vmem>>, vector<144x32xbf16>
    %cst = arith.constant dense<0.000000e+00> : vector<128x32xf32>
    %2 = tpu.matmul %0, %1, %cst {dimension_numbers = #tpu.dot_dimension_numbers<[1], [0], [0], [1], [0, 0, 1, 1], [], []>} : vector<128x144xbf16>, vector<144x32xbf16>, vector<128x32xf32> -> vector<128x32xf32>
    %c0_3 = arith.constant 0 : index
    %c0_4 = arith.constant 0 : index
    %3 = vector.load %arg3[%c0_3, %c0_4] : memref<1x32xf32, #tpu.memory_space<vmem>>, vector<1x32xf32>
    %4 = vector.broadcast %3 : vector<1x32xf32> to vector<128x32xf32>
    %5 = arith.addf %2, %4 : vector<128x32xf32>
    %cst_5 = arith.constant 0.000000e+00 : f32
    %6 = vector.broadcast %cst_5 : f32 to vector<128x32xf32>
    %7 = arith.maximumf %5, %6 : vector<128x32xf32>
    %c0_6 = arith.constant 0 : index
    %c0_7 = arith.constant 0 : index
    %8 = vector.load %arg4[%c0_6, %c0_7] : memref<128x32xf32, #tpu.memory_space<vmem>>, vector<128x32xf32>
    tpu.vector_store %arg4[%c0_6, %c0_7], %7 {strides = array<i32>} : memref<128x32xf32, #tpu.memory_space<vmem>>, vector<128x32xf32>,
    return
  }
  func.func @transform_0(%arg0: i32) -> (i32, i32) {
    %c0_i32 = arith.constant 0 : i32
    %c0_i32_0 = arith.constant 0 : i32
    return %arg0, %c0_i32 : i32, i32
  }
  func.func @transform_1(%arg0: i32) -> (i32, i32) {
    %c0_i32 = arith.constant 0 : i32
    %c0_i32_0 = arith.constant 0 : i32
    %c0_i32_1 = arith.constant 0 : i32
    return %c0_i32, %c0_i32_0 : i32, i32
  }
  func.func @transform_2(%arg0: i32) -> (i32, i32) {
    %c0_i32 = arith.constant 0 : i32
    %c0_i32_0 = arith.constant 0 : i32
    %c0_i32_1 = arith.constant 0 : i32
    return %c0_i32, %c0_i32_0 : i32, i32
  }
  func.func @transform_3(%arg0: i32) -> (i32, i32) {
    %c0_i32 = arith.constant 0 : i32
    %c0_i32_0 = arith.constant 0 : i32
    return %arg0, %c0_i32 : i32, i32
  }
}

module attributes {stable_mosaic.version = 11 : i64} {
  func.func @_rows_kernel(%arg0: i32, %arg1: memref<128x288xbf16, #tpu.memory_space<vmem>>, %arg2: memref<288x32xbf16, #tpu.memory_space<vmem>>, %arg3: memref<1x32xf32, #tpu.memory_space<vmem>>, %arg4: memref<128x32xf32, #tpu.memory_space<vmem>>) attributes {dimension_semantics = [#tpu.dimension_semantics<parallel>], iteration_bounds = array<i64: 1>, scalar_prefetch = 0 : i64, scratch_operands = 0 : i64, tpu.core_type = #tpu.core_type<tc>, window_params = [{transform_indices = @transform_0, window_bounds = array<i64: 128, 288>}, {pipeline_mode = #tpu.pipeline_mode<synchronous>, transform_indices = @transform_1, window_bounds = array<i64: 288, 32>}, {pipeline_mode = #tpu.pipeline_mode<synchronous>, transform_indices = @transform_2, window_bounds = array<i64: 1, 32>}, {transform_indices = @transform_3, window_bounds = array<i64: 128, 32>}]} {
    %c0 = arith.constant 0 : index
    %c0_0 = arith.constant 0 : index
    %0 = vector.load %arg1[%c0, %c0_0] : memref<128x288xbf16, #tpu.memory_space<vmem>>, vector<128x288xbf16>
    %c0_1 = arith.constant 0 : index
    %c0_2 = arith.constant 0 : index
    %1 = vector.load %arg2[%c0_1, %c0_2] : memref<288x32xbf16, #tpu.memory_space<vmem>>, vector<288x32xbf16>
    %cst = arith.constant dense<0.000000e+00> : vector<128x32xf32>
    %2 = tpu.matmul %0, %1, %cst {dimension_numbers = #tpu.dot_dimension_numbers<[1], [0], [0], [1], [0, 0, 1, 1], [], []>} : vector<128x288xbf16>, vector<288x32xbf16>, vector<128x32xf32> -> vector<128x32xf32>
    %c0_3 = arith.constant 0 : index
    %c0_4 = arith.constant 0 : index
    %3 = vector.load %arg3[%c0_3, %c0_4] : memref<1x32xf32, #tpu.memory_space<vmem>>, vector<1x32xf32>
    %4 = vector.broadcast %3 : vector<1x32xf32> to vector<128x32xf32>
    %5 = arith.addf %2, %4 : vector<128x32xf32>
    %cst_5 = arith.constant 0.000000e+00 : f32
    %6 = vector.broadcast %cst_5 : f32 to vector<128x32xf32>
    %7 = arith.maximumf %5, %6 : vector<128x32xf32>
    %c0_6 = arith.constant 0 : index
    %c0_7 = arith.constant 0 : index
    %8 = vector.load %arg4[%c0_6, %c0_7] : memref<128x32xf32, #tpu.memory_space<vmem>>, vector<128x32xf32>
    tpu.vector_store %arg4[%c0_6, %c0_7], %7 {strides = array<i32>} : memref<128x32xf32, #tpu.memory_space<vmem>>, vector<128x32xf32>,
    return
  }
  func.func @transform_0(%arg0: i32) -> (i32, i32) {
    %c0_i32 = arith.constant 0 : i32
    %c0_i32_0 = arith.constant 0 : i32
    return %arg0, %c0_i32 : i32, i32
  }
  func.func @transform_1(%arg0: i32) -> (i32, i32) {
    %c0_i32 = arith.constant 0 : i32
    %c0_i32_0 = arith.constant 0 : i32
    %c0_i32_1 = arith.constant 0 : i32
    return %c0_i32, %c0_i32_0 : i32, i32
  }
  func.func @transform_2(%arg0: i32) -> (i32, i32) {
    %c0_i32 = arith.constant 0 : i32
    %c0_i32_0 = arith.constant 0 : i32
    %c0_i32_1 = arith.constant 0 : i32
    return %c0_i32, %c0_i32_0 : i32, i32
  }
  func.func @transform_3(%arg0: i32) -> (i32, i32) {
    %c0_i32 = arith.constant 0 : i32
    %c0_i32_0 = arith.constant 0 : i32
    return %arg0, %c0_i32 : i32, i32
  }
}

module attributes {stable_mosaic.version = 11 : i64} {
  func.func @_rows_kernel(%arg0: i32, %arg1: memref<32x288xbf16, #tpu.memory_space<vmem>>, %arg2: memref<288x64xbf16, #tpu.memory_space<vmem>>, %arg3: memref<1x64xf32, #tpu.memory_space<vmem>>, %arg4: memref<32x64xf32, #tpu.memory_space<vmem>>) attributes {dimension_semantics = [#tpu.dimension_semantics<parallel>], iteration_bounds = array<i64: 1>, scalar_prefetch = 0 : i64, scratch_operands = 0 : i64, tpu.core_type = #tpu.core_type<tc>, window_params = [{transform_indices = @transform_0, window_bounds = array<i64: 32, 288>}, {pipeline_mode = #tpu.pipeline_mode<synchronous>, transform_indices = @transform_1, window_bounds = array<i64: 288, 64>}, {pipeline_mode = #tpu.pipeline_mode<synchronous>, transform_indices = @transform_2, window_bounds = array<i64: 1, 64>}, {transform_indices = @transform_3, window_bounds = array<i64: 32, 64>}]} {
    %c0 = arith.constant 0 : index
    %c0_0 = arith.constant 0 : index
    %0 = vector.load %arg1[%c0, %c0_0] : memref<32x288xbf16, #tpu.memory_space<vmem>>, vector<32x288xbf16>
    %c0_1 = arith.constant 0 : index
    %c0_2 = arith.constant 0 : index
    %1 = vector.load %arg2[%c0_1, %c0_2] : memref<288x64xbf16, #tpu.memory_space<vmem>>, vector<288x64xbf16>
    %cst = arith.constant dense<0.000000e+00> : vector<32x64xf32>
    %2 = tpu.matmul %0, %1, %cst {dimension_numbers = #tpu.dot_dimension_numbers<[1], [0], [0], [1], [0, 0, 1, 1], [], []>} : vector<32x288xbf16>, vector<288x64xbf16>, vector<32x64xf32> -> vector<32x64xf32>
    %c0_3 = arith.constant 0 : index
    %c0_4 = arith.constant 0 : index
    %3 = vector.load %arg3[%c0_3, %c0_4] : memref<1x64xf32, #tpu.memory_space<vmem>>, vector<1x64xf32>
    %4 = vector.broadcast %3 : vector<1x64xf32> to vector<32x64xf32>
    %5 = arith.addf %2, %4 : vector<32x64xf32>
    %cst_5 = arith.constant 0.000000e+00 : f32
    %6 = vector.broadcast %cst_5 : f32 to vector<32x64xf32>
    %7 = arith.maximumf %5, %6 : vector<32x64xf32>
    %c0_6 = arith.constant 0 : index
    %c0_7 = arith.constant 0 : index
    %8 = vector.load %arg4[%c0_6, %c0_7] : memref<32x64xf32, #tpu.memory_space<vmem>>, vector<32x64xf32>
    tpu.vector_store %arg4[%c0_6, %c0_7], %7 {strides = array<i32>} : memref<32x64xf32, #tpu.memory_space<vmem>>, vector<32x64xf32>,
    return
  }
  func.func @transform_0(%arg0: i32) -> (i32, i32) {
    %c0_i32 = arith.constant 0 : i32
    %c0_i32_0 = arith.constant 0 : i32
    return %arg0, %c0_i32 : i32, i32
  }
  func.func @transform_1(%arg0: i32) -> (i32, i32) {
    %c0_i32 = arith.constant 0 : i32
    %c0_i32_0 = arith.constant 0 : i32
    %c0_i32_1 = arith.constant 0 : i32
    return %c0_i32, %c0_i32_0 : i32, i32
  }
  func.func @transform_2(%arg0: i32) -> (i32, i32) {
    %c0_i32 = arith.constant 0 : i32
    %c0_i32_0 = arith.constant 0 : i32
    %c0_i32_1 = arith.constant 0 : i32
    return %c0_i32, %c0_i32_0 : i32, i32
  }
  func.func @transform_3(%arg0: i32) -> (i32, i32) {
    %c0_i32 = arith.constant 0 : i32
    %c0_i32_0 = arith.constant 0 : i32
    return %arg0, %c0_i32 : i32, i32
  }
}

module attributes {stable_mosaic.version = 11 : i64} {
  func.func @_rows_kernel(%arg0: i32, %arg1: memref<32x576xbf16, #tpu.memory_space<vmem>>, %arg2: memref<576x64xbf16, #tpu.memory_space<vmem>>, %arg3: memref<1x64xf32, #tpu.memory_space<vmem>>, %arg4: memref<32x64xf32, #tpu.memory_space<vmem>>) attributes {dimension_semantics = [#tpu.dimension_semantics<parallel>], iteration_bounds = array<i64: 1>, scalar_prefetch = 0 : i64, scratch_operands = 0 : i64, tpu.core_type = #tpu.core_type<tc>, window_params = [{transform_indices = @transform_0, window_bounds = array<i64: 32, 576>}, {pipeline_mode = #tpu.pipeline_mode<synchronous>, transform_indices = @transform_1, window_bounds = array<i64: 576, 64>}, {pipeline_mode = #tpu.pipeline_mode<synchronous>, transform_indices = @transform_2, window_bounds = array<i64: 1, 64>}, {transform_indices = @transform_3, window_bounds = array<i64: 32, 64>}]} {
    %c0 = arith.constant 0 : index
    %c0_0 = arith.constant 0 : index
    %0 = vector.load %arg1[%c0, %c0_0] : memref<32x576xbf16, #tpu.memory_space<vmem>>, vector<32x576xbf16>
    %c0_1 = arith.constant 0 : index
    %c0_2 = arith.constant 0 : index
    %1 = vector.load %arg2[%c0_1, %c0_2] : memref<576x64xbf16, #tpu.memory_space<vmem>>, vector<576x64xbf16>
    %cst = arith.constant dense<0.000000e+00> : vector<32x64xf32>
    %2 = tpu.matmul %0, %1, %cst {dimension_numbers = #tpu.dot_dimension_numbers<[1], [0], [0], [1], [0, 0, 1, 1], [], []>} : vector<32x576xbf16>, vector<576x64xbf16>, vector<32x64xf32> -> vector<32x64xf32>
    %c0_3 = arith.constant 0 : index
    %c0_4 = arith.constant 0 : index
    %3 = vector.load %arg3[%c0_3, %c0_4] : memref<1x64xf32, #tpu.memory_space<vmem>>, vector<1x64xf32>
    %4 = vector.broadcast %3 : vector<1x64xf32> to vector<32x64xf32>
    %5 = arith.addf %2, %4 : vector<32x64xf32>
    %cst_5 = arith.constant 0.000000e+00 : f32
    %6 = vector.broadcast %cst_5 : f32 to vector<32x64xf32>
    %7 = arith.maximumf %5, %6 : vector<32x64xf32>
    %c0_6 = arith.constant 0 : index
    %c0_7 = arith.constant 0 : index
    %8 = vector.load %arg4[%c0_6, %c0_7] : memref<32x64xf32, #tpu.memory_space<vmem>>, vector<32x64xf32>
    tpu.vector_store %arg4[%c0_6, %c0_7], %7 {strides = array<i32>} : memref<32x64xf32, #tpu.memory_space<vmem>>, vector<32x64xf32>,
    return
  }
  func.func @transform_0(%arg0: i32) -> (i32, i32) {
    %c0_i32 = arith.constant 0 : i32
    %c0_i32_0 = arith.constant 0 : i32
    return %arg0, %c0_i32 : i32, i32
  }
  func.func @transform_1(%arg0: i32) -> (i32, i32) {
    %c0_i32 = arith.constant 0 : i32
    %c0_i32_0 = arith.constant 0 : i32
    %c0_i32_1 = arith.constant 0 : i32
    return %c0_i32, %c0_i32_0 : i32, i32
  }
  func.func @transform_2(%arg0: i32) -> (i32, i32) {
    %c0_i32 = arith.constant 0 : i32
    %c0_i32_0 = arith.constant 0 : i32
    %c0_i32_1 = arith.constant 0 : i32
    return %c0_i32, %c0_i32_0 : i32, i32
  }
  func.func @transform_3(%arg0: i32) -> (i32, i32) {
    %c0_i32 = arith.constant 0 : i32
    %c0_i32_0 = arith.constant 0 : i32
    return %arg0, %c0_i32 : i32, i32
  }
}

module attributes {stable_mosaic.version = 11 : i64} {
  func.func @_rows_kernel(%arg0: i32, %arg1: memref<8x576xbf16, #tpu.memory_space<vmem>>, %arg2: memref<576x128xbf16, #tpu.memory_space<vmem>>, %arg3: memref<1x128xf32, #tpu.memory_space<vmem>>, %arg4: memref<8x128xf32, #tpu.memory_space<vmem>>) attributes {dimension_semantics = [#tpu.dimension_semantics<parallel>], iteration_bounds = array<i64: 1>, scalar_prefetch = 0 : i64, scratch_operands = 0 : i64, tpu.core_type = #tpu.core_type<tc>, window_params = [{transform_indices = @transform_0, window_bounds = array<i64: 8, 576>}, {pipeline_mode = #tpu.pipeline_mode<synchronous>, transform_indices = @transform_1, window_bounds = array<i64: 576, 128>}, {pipeline_mode = #tpu.pipeline_mode<synchronous>, transform_indices = @transform_2, window_bounds = array<i64: 1, 128>}, {transform_indices = @transform_3, window_bounds = array<i64: 8, 128>}]} {
    %c0 = arith.constant 0 : index
    %c0_0 = arith.constant 0 : index
    %0 = vector.load %arg1[%c0, %c0_0] : memref<8x576xbf16, #tpu.memory_space<vmem>>, vector<8x576xbf16>
    %c0_1 = arith.constant 0 : index
    %c0_2 = arith.constant 0 : index
    %1 = vector.load %arg2[%c0_1, %c0_2] : memref<576x128xbf16, #tpu.memory_space<vmem>>, vector<576x128xbf16>
    %cst = arith.constant dense<0.000000e+00> : vector<8x128xf32>
    %2 = tpu.matmul %0, %1, %cst {dimension_numbers = #tpu.dot_dimension_numbers<[1], [0], [0], [1], [0, 0, 1, 1], [], []>} : vector<8x576xbf16>, vector<576x128xbf16>, vector<8x128xf32> -> vector<8x128xf32>
    %c0_3 = arith.constant 0 : index
    %c0_4 = arith.constant 0 : index
    %3 = vector.load %arg3[%c0_3, %c0_4] : memref<1x128xf32, #tpu.memory_space<vmem>>, vector<1x128xf32>
    %4 = vector.broadcast %3 : vector<1x128xf32> to vector<8x128xf32>
    %5 = arith.addf %2, %4 : vector<8x128xf32>
    %cst_5 = arith.constant 0.000000e+00 : f32
    %6 = vector.broadcast %cst_5 : f32 to vector<8x128xf32>
    %7 = arith.maximumf %5, %6 : vector<8x128xf32>
    %c0_6 = arith.constant 0 : index
    %c0_7 = arith.constant 0 : index
    %8 = vector.load %arg4[%c0_6, %c0_7] : memref<8x128xf32, #tpu.memory_space<vmem>>, vector<8x128xf32>
    tpu.vector_store %arg4[%c0_6, %c0_7], %7 {strides = array<i32>} : memref<8x128xf32, #tpu.memory_space<vmem>>, vector<8x128xf32>,
    return
  }
  func.func @transform_0(%arg0: i32) -> (i32, i32) {
    %c0_i32 = arith.constant 0 : i32
    %c0_i32_0 = arith.constant 0 : i32
    return %arg0, %c0_i32 : i32, i32
  }
  func.func @transform_1(%arg0: i32) -> (i32, i32) {
    %c0_i32 = arith.constant 0 : i32
    %c0_i32_0 = arith.constant 0 : i32
    %c0_i32_1 = arith.constant 0 : i32
    return %c0_i32, %c0_i32_0 : i32, i32
  }
  func.func @transform_2(%arg0: i32) -> (i32, i32) {
    %c0_i32 = arith.constant 0 : i32
    %c0_i32_0 = arith.constant 0 : i32
    %c0_i32_1 = arith.constant 0 : i32
    return %c0_i32, %c0_i32_0 : i32, i32
  }
  func.func @transform_3(%arg0: i32) -> (i32, i32) {
    %c0_i32 = arith.constant 0 : i32
    %c0_i32_0 = arith.constant 0 : i32
    return %arg0, %c0_i32 : i32, i32
  }
}

module attributes {stable_mosaic.version = 11 : i64} {
  func.func @_rows_kernel(%arg0: i32, %arg1: memref<8x1152xbf16, #tpu.memory_space<vmem>>, %arg2: memref<1152x128xbf16, #tpu.memory_space<vmem>>, %arg3: memref<1x128xf32, #tpu.memory_space<vmem>>, %arg4: memref<8x128xf32, #tpu.memory_space<vmem>>) attributes {dimension_semantics = [#tpu.dimension_semantics<parallel>], iteration_bounds = array<i64: 1>, scalar_prefetch = 0 : i64, scratch_operands = 0 : i64, tpu.core_type = #tpu.core_type<tc>, window_params = [{transform_indices = @transform_0, window_bounds = array<i64: 8, 1152>}, {pipeline_mode = #tpu.pipeline_mode<synchronous>, transform_indices = @transform_1, window_bounds = array<i64: 1152, 128>}, {pipeline_mode = #tpu.pipeline_mode<synchronous>, transform_indices = @transform_2, window_bounds = array<i64: 1, 128>}, {transform_indices = @transform_3, window_bounds = array<i64: 8, 128>}]} {
    %c0 = arith.constant 0 : index
    %c0_0 = arith.constant 0 : index
    %0 = vector.load %arg1[%c0, %c0_0] : memref<8x1152xbf16, #tpu.memory_space<vmem>>, vector<8x1152xbf16>
    %c0_1 = arith.constant 0 : index
    %c0_2 = arith.constant 0 : index
    %1 = vector.load %arg2[%c0_1, %c0_2] : memref<1152x128xbf16, #tpu.memory_space<vmem>>, vector<1152x128xbf16>
    %cst = arith.constant dense<0.000000e+00> : vector<8x128xf32>
    %2 = tpu.matmul %0, %1, %cst {dimension_numbers = #tpu.dot_dimension_numbers<[1], [0], [0], [1], [0, 0, 1, 1], [], []>} : vector<8x1152xbf16>, vector<1152x128xbf16>, vector<8x128xf32> -> vector<8x128xf32>
    %c0_3 = arith.constant 0 : index
    %c0_4 = arith.constant 0 : index
    %3 = vector.load %arg3[%c0_3, %c0_4] : memref<1x128xf32, #tpu.memory_space<vmem>>, vector<1x128xf32>
    %4 = vector.broadcast %3 : vector<1x128xf32> to vector<8x128xf32>
    %5 = arith.addf %2, %4 : vector<8x128xf32>
    %cst_5 = arith.constant 0.000000e+00 : f32
    %6 = vector.broadcast %cst_5 : f32 to vector<8x128xf32>
    %7 = arith.maximumf %5, %6 : vector<8x128xf32>
    %c0_6 = arith.constant 0 : index
    %c0_7 = arith.constant 0 : index
    %8 = vector.load %arg4[%c0_6, %c0_7] : memref<8x128xf32, #tpu.memory_space<vmem>>, vector<8x128xf32>
    tpu.vector_store %arg4[%c0_6, %c0_7], %7 {strides = array<i32>} : memref<8x128xf32, #tpu.memory_space<vmem>>, vector<8x128xf32>,
    return
  }
  func.func @transform_0(%arg0: i32) -> (i32, i32) {
    %c0_i32 = arith.constant 0 : i32
    %c0_i32_0 = arith.constant 0 : i32
    return %arg0, %c0_i32 : i32, i32
  }
  func.func @transform_1(%arg0: i32) -> (i32, i32) {
    %c0_i32 = arith.constant 0 : i32
    %c0_i32_0 = arith.constant 0 : i32
    %c0_i32_1 = arith.constant 0 : i32
    return %c0_i32, %c0_i32_0 : i32, i32
  }
  func.func @transform_2(%arg0: i32) -> (i32, i32) {
    %c0_i32 = arith.constant 0 : i32
    %c0_i32_0 = arith.constant 0 : i32
    %c0_i32_1 = arith.constant 0 : i32
    return %c0_i32, %c0_i32_0 : i32, i32
  }
  func.func @transform_3(%arg0: i32) -> (i32, i32) {
    %c0_i32 = arith.constant 0 : i32
    %c0_i32_0 = arith.constant 0 : i32
    return %arg0, %c0_i32 : i32, i32
  }
}

module attributes {stable_mosaic.version = 11 : i64} {
  func.func @_rows_kernel(%arg0: i32, %arg1: memref<2x1152xbf16, #tpu.memory_space<vmem>>, %arg2: memref<1152x256xbf16, #tpu.memory_space<vmem>>, %arg3: memref<1x256xf32, #tpu.memory_space<vmem>>, %arg4: memref<2x256xf32, #tpu.memory_space<vmem>>) attributes {dimension_semantics = [#tpu.dimension_semantics<parallel>], iteration_bounds = array<i64: 1>, scalar_prefetch = 0 : i64, scratch_operands = 0 : i64, tpu.core_type = #tpu.core_type<tc>, window_params = [{transform_indices = @transform_0, window_bounds = array<i64: 2, 1152>}, {pipeline_mode = #tpu.pipeline_mode<synchronous>, transform_indices = @transform_1, window_bounds = array<i64: 1152, 256>}, {pipeline_mode = #tpu.pipeline_mode<synchronous>, transform_indices = @transform_2, window_bounds = array<i64: 1, 256>}, {transform_indices = @transform_3, window_bounds = array<i64: 2, 256>}]} {
    %c0 = arith.constant 0 : index
    %c0_0 = arith.constant 0 : index
    %0 = vector.load %arg1[%c0, %c0_0] : memref<2x1152xbf16, #tpu.memory_space<vmem>>, vector<2x1152xbf16>
    %c0_1 = arith.constant 0 : index
    %c0_2 = arith.constant 0 : index
    %1 = vector.load %arg2[%c0_1, %c0_2] : memref<1152x256xbf16, #tpu.memory_space<vmem>>, vector<1152x256xbf16>
    %cst = arith.constant dense<0.000000e+00> : vector<2x256xf32>
    %2 = tpu.matmul %0, %1, %cst {dimension_numbers = #tpu.dot_dimension_numbers<[1], [0], [0], [1], [0, 0, 1, 1], [], []>} : vector<2x1152xbf16>, vector<1152x256xbf16>, vector<2x256xf32> -> vector<2x256xf32>
    %c0_3 = arith.constant 0 : index
    %c0_4 = arith.constant 0 : index
    %3 = vector.load %arg3[%c0_3, %c0_4] : memref<1x256xf32, #tpu.memory_space<vmem>>, vector<1x256xf32>
    %4 = vector.broadcast %3 : vector<1x256xf32> to vector<2x256xf32>
    %5 = arith.addf %2, %4 : vector<2x256xf32>
    %cst_5 = arith.constant 0.000000e+00 : f32
    %6 = vector.broadcast %cst_5 : f32 to vector<2x256xf32>
    %7 = arith.maximumf %5, %6 : vector<2x256xf32>
    %c0_6 = arith.constant 0 : index
    %c0_7 = arith.constant 0 : index
    %8 = vector.load %arg4[%c0_6, %c0_7] : memref<2x256xf32, #tpu.memory_space<vmem>>, vector<2x256xf32>
    tpu.vector_store %arg4[%c0_6, %c0_7], %7 {strides = array<i32>} : memref<2x256xf32, #tpu.memory_space<vmem>>, vector<2x256xf32>,
    return
  }
  func.func @transform_0(%arg0: i32) -> (i32, i32) {
    %c0_i32 = arith.constant 0 : i32
    %c0_i32_0 = arith.constant 0 : i32
    return %arg0, %c0_i32 : i32, i32
  }
  func.func @transform_1(%arg0: i32) -> (i32, i32) {
    %c0_i32 = arith.constant 0 : i32
    %c0_i32_0 = arith.constant 0 : i32
    %c0_i32_1 = arith.constant 0 : i32
    return %c0_i32, %c0_i32_0 : i32, i32
  }
  func.func @transform_2(%arg0: i32) -> (i32, i32) {
    %c0_i32 = arith.constant 0 : i32
    %c0_i32_0 = arith.constant 0 : i32
    %c0_i32_1 = arith.constant 0 : i32
    return %c0_i32, %c0_i32_0 : i32, i32
  }
  func.func @transform_3(%arg0: i32) -> (i32, i32) {
    %c0_i32 = arith.constant 0 : i32
    %c0_i32_0 = arith.constant 0 : i32
    return %arg0, %c0_i32 : i32, i32
  }
}

module attributes {stable_mosaic.version = 11 : i64} {
  func.func @_rows_kernel(%arg0: i32, %arg1: memref<2x2304xbf16, #tpu.memory_space<vmem>>, %arg2: memref<2304x256xbf16, #tpu.memory_space<vmem>>, %arg3: memref<1x256xf32, #tpu.memory_space<vmem>>, %arg4: memref<2x256xf32, #tpu.memory_space<vmem>>) attributes {dimension_semantics = [#tpu.dimension_semantics<parallel>], iteration_bounds = array<i64: 1>, scalar_prefetch = 0 : i64, scratch_operands = 0 : i64, tpu.core_type = #tpu.core_type<tc>, window_params = [{transform_indices = @transform_0, window_bounds = array<i64: 2, 2304>}, {pipeline_mode = #tpu.pipeline_mode<synchronous>, transform_indices = @transform_1, window_bounds = array<i64: 2304, 256>}, {pipeline_mode = #tpu.pipeline_mode<synchronous>, transform_indices = @transform_2, window_bounds = array<i64: 1, 256>}, {transform_indices = @transform_3, window_bounds = array<i64: 2, 256>}]} {
    %c0 = arith.constant 0 : index
    %c0_0 = arith.constant 0 : index
    %0 = vector.load %arg1[%c0, %c0_0] : memref<2x2304xbf16, #tpu.memory_space<vmem>>, vector<2x2304xbf16>
    %c0_1 = arith.constant 0 : index
    %c0_2 = arith.constant 0 : index
    %1 = vector.load %arg2[%c0_1, %c0_2] : memref<2304x256xbf16, #tpu.memory_space<vmem>>, vector<2304x256xbf16>
    %cst = arith.constant dense<0.000000e+00> : vector<2x256xf32>
    %2 = tpu.matmul %0, %1, %cst {dimension_numbers = #tpu.dot_dimension_numbers<[1], [0], [0], [1], [0, 0, 1, 1], [], []>} : vector<2x2304xbf16>, vector<2304x256xbf16>, vector<2x256xf32> -> vector<2x256xf32>
    %c0_3 = arith.constant 0 : index
    %c0_4 = arith.constant 0 : index
    %3 = vector.load %arg3[%c0_3, %c0_4] : memref<1x256xf32, #tpu.memory_space<vmem>>, vector<1x256xf32>
    %4 = vector.broadcast %3 : vector<1x256xf32> to vector<2x256xf32>
    %5 = arith.addf %2, %4 : vector<2x256xf32>
    %cst_5 = arith.constant 0.000000e+00 : f32
    %6 = vector.broadcast %cst_5 : f32 to vector<2x256xf32>
    %7 = arith.maximumf %5, %6 : vector<2x256xf32>
    %c0_6 = arith.constant 0 : index
    %c0_7 = arith.constant 0 : index
    %8 = vector.load %arg4[%c0_6, %c0_7] : memref<2x256xf32, #tpu.memory_space<vmem>>, vector<2x256xf32>
    tpu.vector_store %arg4[%c0_6, %c0_7], %7 {strides = array<i32>} : memref<2x256xf32, #tpu.memory_space<vmem>>, vector<2x256xf32>,
    return
  }
  func.func @transform_0(%arg0: i32) -> (i32, i32) {
    %c0_i32 = arith.constant 0 : i32
    %c0_i32_0 = arith.constant 0 : i32
    return %arg0, %c0_i32 : i32, i32
  }
  func.func @transform_1(%arg0: i32) -> (i32, i32) {
    %c0_i32 = arith.constant 0 : i32
    %c0_i32_0 = arith.constant 0 : i32
    %c0_i32_1 = arith.constant 0 : i32
    return %c0_i32, %c0_i32_0 : i32, i32
  }
  func.func @transform_2(%arg0: i32) -> (i32, i32) {
    %c0_i32 = arith.constant 0 : i32
    %c0_i32_0 = arith.constant 0 : i32
    %c0_i32_1 = arith.constant 0 : i32
    return %c0_i32, %c0_i32_0 : i32, i32
  }
  func.func @transform_3(%arg0: i32) -> (i32, i32) {
    %c0_i32 = arith.constant 0 : i32
    %c0_i32_0 = arith.constant 0 : i32
    return %arg0, %c0_i32 : i32, i32
  }
}

module attributes {stable_mosaic.version = 11 : i64} {
  func.func @_rows_kernel(%arg0: i32, %arg1: memref<2x256xbf16, #tpu.memory_space<vmem>>, %arg2: memref<256x512xbf16, #tpu.memory_space<vmem>>, %arg3: memref<1x512xf32, #tpu.memory_space<vmem>>, %arg4: memref<2x512xf32, #tpu.memory_space<vmem>>) attributes {dimension_semantics = [#tpu.dimension_semantics<parallel>], iteration_bounds = array<i64: 1>, scalar_prefetch = 0 : i64, scratch_operands = 0 : i64, tpu.core_type = #tpu.core_type<tc>, window_params = [{transform_indices = @transform_0, window_bounds = array<i64: 2, 256>}, {pipeline_mode = #tpu.pipeline_mode<synchronous>, transform_indices = @transform_1, window_bounds = array<i64: 256, 512>}, {pipeline_mode = #tpu.pipeline_mode<synchronous>, transform_indices = @transform_2, window_bounds = array<i64: 1, 512>}, {transform_indices = @transform_3, window_bounds = array<i64: 2, 512>}]} {
    %c0 = arith.constant 0 : index
    %c0_0 = arith.constant 0 : index
    %0 = vector.load %arg1[%c0, %c0_0] : memref<2x256xbf16, #tpu.memory_space<vmem>>, vector<2x256xbf16>
    %c0_1 = arith.constant 0 : index
    %c0_2 = arith.constant 0 : index
    %1 = vector.load %arg2[%c0_1, %c0_2] : memref<256x512xbf16, #tpu.memory_space<vmem>>, vector<256x512xbf16>
    %cst = arith.constant dense<0.000000e+00> : vector<2x512xf32>
    %2 = tpu.matmul %0, %1, %cst {dimension_numbers = #tpu.dot_dimension_numbers<[1], [0], [0], [1], [0, 0, 1, 1], [], []>} : vector<2x256xbf16>, vector<256x512xbf16>, vector<2x512xf32> -> vector<2x512xf32>
    %c0_3 = arith.constant 0 : index
    %c0_4 = arith.constant 0 : index
    %3 = vector.load %arg3[%c0_3, %c0_4] : memref<1x512xf32, #tpu.memory_space<vmem>>, vector<1x512xf32>
    %4 = vector.broadcast %3 : vector<1x512xf32> to vector<2x512xf32>
    %5 = arith.addf %2, %4 : vector<2x512xf32>
    %c0_5 = arith.constant 0 : index
    %c0_6 = arith.constant 0 : index
    %6 = vector.load %arg4[%c0_5, %c0_6] : memref<2x512xf32, #tpu.memory_space<vmem>>, vector<2x512xf32>
    tpu.vector_store %arg4[%c0_5, %c0_6], %5 {strides = array<i32>} : memref<2x512xf32, #tpu.memory_space<vmem>>, vector<2x512xf32>,
    return
  }
  func.func @transform_0(%arg0: i32) -> (i32, i32) {
    %c0_i32 = arith.constant 0 : i32
    %c0_i32_0 = arith.constant 0 : i32
    return %arg0, %c0_i32 : i32, i32
  }
  func.func @transform_1(%arg0: i32) -> (i32, i32) {
    %c0_i32 = arith.constant 0 : i32
    %c0_i32_0 = arith.constant 0 : i32
    %c0_i32_1 = arith.constant 0 : i32
    return %c0_i32, %c0_i32_0 : i32, i32
  }
  func.func @transform_2(%arg0: i32) -> (i32, i32) {
    %c0_i32 = arith.constant 0 : i32
    %c0_i32_0 = arith.constant 0 : i32
    %c0_i32_1 = arith.constant 0 : i32
    return %c0_i32, %c0_i32_0 : i32, i32
  }
  func.func @transform_3(%arg0: i32) -> (i32, i32) {
    %c0_i32 = arith.constant 0 : i32
    %c0_i32_0 = arith.constant 0 : i32
    return %arg0, %c0_i32 : i32, i32
  }
}

module attributes {stable_mosaic.version = 11 : i64} {
  func.func @_rows_kernel(%arg0: i32, %arg1: memref<8x2304xbf16, #tpu.memory_space<vmem>>, %arg2: memref<2304x128xbf16, #tpu.memory_space<vmem>>, %arg3: memref<1x128xf32, #tpu.memory_space<vmem>>, %arg4: memref<8x128xf32, #tpu.memory_space<vmem>>) attributes {dimension_semantics = [#tpu.dimension_semantics<parallel>], iteration_bounds = array<i64: 1>, scalar_prefetch = 0 : i64, scratch_operands = 0 : i64, tpu.core_type = #tpu.core_type<tc>, window_params = [{transform_indices = @transform_0, window_bounds = array<i64: 8, 2304>}, {pipeline_mode = #tpu.pipeline_mode<synchronous>, transform_indices = @transform_1, window_bounds = array<i64: 2304, 128>}, {pipeline_mode = #tpu.pipeline_mode<synchronous>, transform_indices = @transform_2, window_bounds = array<i64: 1, 128>}, {transform_indices = @transform_3, window_bounds = array<i64: 8, 128>}]} {
    %c0 = arith.constant 0 : index
    %c0_0 = arith.constant 0 : index
    %0 = vector.load %arg1[%c0, %c0_0] : memref<8x2304xbf16, #tpu.memory_space<vmem>>, vector<8x2304xbf16>
    %c0_1 = arith.constant 0 : index
    %c0_2 = arith.constant 0 : index
    %1 = vector.load %arg2[%c0_1, %c0_2] : memref<2304x128xbf16, #tpu.memory_space<vmem>>, vector<2304x128xbf16>
    %cst = arith.constant dense<0.000000e+00> : vector<8x128xf32>
    %2 = tpu.matmul %0, %1, %cst {dimension_numbers = #tpu.dot_dimension_numbers<[1], [0], [0], [1], [0, 0, 1, 1], [], []>} : vector<8x2304xbf16>, vector<2304x128xbf16>, vector<8x128xf32> -> vector<8x128xf32>
    %c0_3 = arith.constant 0 : index
    %c0_4 = arith.constant 0 : index
    %3 = vector.load %arg3[%c0_3, %c0_4] : memref<1x128xf32, #tpu.memory_space<vmem>>, vector<1x128xf32>
    %4 = vector.broadcast %3 : vector<1x128xf32> to vector<8x128xf32>
    %5 = arith.addf %2, %4 : vector<8x128xf32>
    %cst_5 = arith.constant 0.000000e+00 : f32
    %6 = vector.broadcast %cst_5 : f32 to vector<8x128xf32>
    %7 = arith.maximumf %5, %6 : vector<8x128xf32>
    %c0_6 = arith.constant 0 : index
    %c0_7 = arith.constant 0 : index
    %8 = vector.load %arg4[%c0_6, %c0_7] : memref<8x128xf32, #tpu.memory_space<vmem>>, vector<8x128xf32>
    tpu.vector_store %arg4[%c0_6, %c0_7], %7 {strides = array<i32>} : memref<8x128xf32, #tpu.memory_space<vmem>>, vector<8x128xf32>,
    return
  }
  func.func @transform_0(%arg0: i32) -> (i32, i32) {
    %c0_i32 = arith.constant 0 : i32
    %c0_i32_0 = arith.constant 0 : i32
    return %arg0, %c0_i32 : i32, i32
  }
  func.func @transform_1(%arg0: i32) -> (i32, i32) {
    %c0_i32 = arith.constant 0 : i32
    %c0_i32_0 = arith.constant 0 : i32
    %c0_i32_1 = arith.constant 0 : i32
    return %c0_i32, %c0_i32_0 : i32, i32
  }
  func.func @transform_2(%arg0: i32) -> (i32, i32) {
    %c0_i32 = arith.constant 0 : i32
    %c0_i32_0 = arith.constant 0 : i32
    %c0_i32_1 = arith.constant 0 : i32
    return %c0_i32, %c0_i32_0 : i32, i32
  }
  func.func @transform_3(%arg0: i32) -> (i32, i32) {
    %c0_i32 = arith.constant 0 : i32
    %c0_i32_0 = arith.constant 0 : i32
    return %arg0, %c0_i32 : i32, i32
  }
}

module attributes {stable_mosaic.version = 11 : i64} {
  func.func @_rows_kernel(%arg0: i32, %arg1: memref<8x128xbf16, #tpu.memory_space<vmem>>, %arg2: memref<128x256xbf16, #tpu.memory_space<vmem>>, %arg3: memref<1x256xf32, #tpu.memory_space<vmem>>, %arg4: memref<8x256xf32, #tpu.memory_space<vmem>>) attributes {dimension_semantics = [#tpu.dimension_semantics<parallel>], iteration_bounds = array<i64: 1>, scalar_prefetch = 0 : i64, scratch_operands = 0 : i64, tpu.core_type = #tpu.core_type<tc>, window_params = [{transform_indices = @transform_0, window_bounds = array<i64: 8, 128>}, {pipeline_mode = #tpu.pipeline_mode<synchronous>, transform_indices = @transform_1, window_bounds = array<i64: 128, 256>}, {pipeline_mode = #tpu.pipeline_mode<synchronous>, transform_indices = @transform_2, window_bounds = array<i64: 1, 256>}, {transform_indices = @transform_3, window_bounds = array<i64: 8, 256>}]} {
    %c0 = arith.constant 0 : index
    %c0_0 = arith.constant 0 : index
    %0 = vector.load %arg1[%c0, %c0_0] : memref<8x128xbf16, #tpu.memory_space<vmem>>, vector<8x128xbf16>
    %c0_1 = arith.constant 0 : index
    %c0_2 = arith.constant 0 : index
    %1 = vector.load %arg2[%c0_1, %c0_2] : memref<128x256xbf16, #tpu.memory_space<vmem>>, vector<128x256xbf16>
    %cst = arith.constant dense<0.000000e+00> : vector<8x256xf32>
    %2 = tpu.matmul %0, %1, %cst {dimension_numbers = #tpu.dot_dimension_numbers<[1], [0], [0], [1], [0, 0, 1, 1], [], []>} : vector<8x128xbf16>, vector<128x256xbf16>, vector<8x256xf32> -> vector<8x256xf32>
    %c0_3 = arith.constant 0 : index
    %c0_4 = arith.constant 0 : index
    %3 = vector.load %arg3[%c0_3, %c0_4] : memref<1x256xf32, #tpu.memory_space<vmem>>, vector<1x256xf32>
    %4 = vector.broadcast %3 : vector<1x256xf32> to vector<8x256xf32>
    %5 = arith.addf %2, %4 : vector<8x256xf32>
    %c0_5 = arith.constant 0 : index
    %c0_6 = arith.constant 0 : index
    %6 = vector.load %arg4[%c0_5, %c0_6] : memref<8x256xf32, #tpu.memory_space<vmem>>, vector<8x256xf32>
    tpu.vector_store %arg4[%c0_5, %c0_6], %5 {strides = array<i32>} : memref<8x256xf32, #tpu.memory_space<vmem>>, vector<8x256xf32>,
    return
  }
  func.func @transform_0(%arg0: i32) -> (i32, i32) {
    %c0_i32 = arith.constant 0 : i32
    %c0_i32_0 = arith.constant 0 : i32
    return %arg0, %c0_i32 : i32, i32
  }
  func.func @transform_1(%arg0: i32) -> (i32, i32) {
    %c0_i32 = arith.constant 0 : i32
    %c0_i32_0 = arith.constant 0 : i32
    %c0_i32_1 = arith.constant 0 : i32
    return %c0_i32, %c0_i32_0 : i32, i32
  }
  func.func @transform_2(%arg0: i32) -> (i32, i32) {
    %c0_i32 = arith.constant 0 : i32
    %c0_i32_0 = arith.constant 0 : i32
    %c0_i32_1 = arith.constant 0 : i32
    return %c0_i32, %c0_i32_0 : i32, i32
  }
  func.func @transform_3(%arg0: i32) -> (i32, i32) {
    %c0_i32 = arith.constant 0 : i32
    %c0_i32_0 = arith.constant 0 : i32
    return %arg0, %c0_i32 : i32, i32
  }
}

module attributes {stable_mosaic.version = 11 : i64} {
  func.func @_rows_kernel(%arg0: i32, %arg1: memref<32x1152xbf16, #tpu.memory_space<vmem>>, %arg2: memref<1152x64xbf16, #tpu.memory_space<vmem>>, %arg3: memref<1x64xf32, #tpu.memory_space<vmem>>, %arg4: memref<32x64xf32, #tpu.memory_space<vmem>>) attributes {dimension_semantics = [#tpu.dimension_semantics<parallel>], iteration_bounds = array<i64: 1>, scalar_prefetch = 0 : i64, scratch_operands = 0 : i64, tpu.core_type = #tpu.core_type<tc>, window_params = [{transform_indices = @transform_0, window_bounds = array<i64: 32, 1152>}, {pipeline_mode = #tpu.pipeline_mode<synchronous>, transform_indices = @transform_1, window_bounds = array<i64: 1152, 64>}, {pipeline_mode = #tpu.pipeline_mode<synchronous>, transform_indices = @transform_2, window_bounds = array<i64: 1, 64>}, {transform_indices = @transform_3, window_bounds = array<i64: 32, 64>}]} {
    %c0 = arith.constant 0 : index
    %c0_0 = arith.constant 0 : index
    %0 = vector.load %arg1[%c0, %c0_0] : memref<32x1152xbf16, #tpu.memory_space<vmem>>, vector<32x1152xbf16>
    %c0_1 = arith.constant 0 : index
    %c0_2 = arith.constant 0 : index
    %1 = vector.load %arg2[%c0_1, %c0_2] : memref<1152x64xbf16, #tpu.memory_space<vmem>>, vector<1152x64xbf16>
    %cst = arith.constant dense<0.000000e+00> : vector<32x64xf32>
    %2 = tpu.matmul %0, %1, %cst {dimension_numbers = #tpu.dot_dimension_numbers<[1], [0], [0], [1], [0, 0, 1, 1], [], []>} : vector<32x1152xbf16>, vector<1152x64xbf16>, vector<32x64xf32> -> vector<32x64xf32>
    %c0_3 = arith.constant 0 : index
    %c0_4 = arith.constant 0 : index
    %3 = vector.load %arg3[%c0_3, %c0_4] : memref<1x64xf32, #tpu.memory_space<vmem>>, vector<1x64xf32>
    %4 = vector.broadcast %3 : vector<1x64xf32> to vector<32x64xf32>
    %5 = arith.addf %2, %4 : vector<32x64xf32>
    %cst_5 = arith.constant 0.000000e+00 : f32
    %6 = vector.broadcast %cst_5 : f32 to vector<32x64xf32>
    %7 = arith.maximumf %5, %6 : vector<32x64xf32>
    %c0_6 = arith.constant 0 : index
    %c0_7 = arith.constant 0 : index
    %8 = vector.load %arg4[%c0_6, %c0_7] : memref<32x64xf32, #tpu.memory_space<vmem>>, vector<32x64xf32>
    tpu.vector_store %arg4[%c0_6, %c0_7], %7 {strides = array<i32>} : memref<32x64xf32, #tpu.memory_space<vmem>>, vector<32x64xf32>,
    return
  }
  func.func @transform_0(%arg0: i32) -> (i32, i32) {
    %c0_i32 = arith.constant 0 : i32
    %c0_i32_0 = arith.constant 0 : i32
    return %arg0, %c0_i32 : i32, i32
  }
  func.func @transform_1(%arg0: i32) -> (i32, i32) {
    %c0_i32 = arith.constant 0 : i32
    %c0_i32_0 = arith.constant 0 : i32
    %c0_i32_1 = arith.constant 0 : i32
    return %c0_i32, %c0_i32_0 : i32, i32
  }
  func.func @transform_2(%arg0: i32) -> (i32, i32) {
    %c0_i32 = arith.constant 0 : i32
    %c0_i32_0 = arith.constant 0 : i32
    %c0_i32_1 = arith.constant 0 : i32
    return %c0_i32, %c0_i32_0 : i32, i32
  }
  func.func @transform_3(%arg0: i32) -> (i32, i32) {
    %c0_i32 = arith.constant 0 : i32
    %c0_i32_0 = arith.constant 0 : i32
    return %arg0, %c0_i32 : i32, i32
  }
}

module attributes {stable_mosaic.version = 11 : i64} {
  func.func @_rows_kernel(%arg0: i32, %arg1: memref<32x64xbf16, #tpu.memory_space<vmem>>, %arg2: memref<64x128xbf16, #tpu.memory_space<vmem>>, %arg3: memref<1x128xf32, #tpu.memory_space<vmem>>, %arg4: memref<32x128xf32, #tpu.memory_space<vmem>>) attributes {dimension_semantics = [#tpu.dimension_semantics<parallel>], iteration_bounds = array<i64: 1>, scalar_prefetch = 0 : i64, scratch_operands = 0 : i64, tpu.core_type = #tpu.core_type<tc>, window_params = [{transform_indices = @transform_0, window_bounds = array<i64: 32, 64>}, {pipeline_mode = #tpu.pipeline_mode<synchronous>, transform_indices = @transform_1, window_bounds = array<i64: 64, 128>}, {pipeline_mode = #tpu.pipeline_mode<synchronous>, transform_indices = @transform_2, window_bounds = array<i64: 1, 128>}, {transform_indices = @transform_3, window_bounds = array<i64: 32, 128>}]} {
    %c0 = arith.constant 0 : index
    %c0_0 = arith.constant 0 : index
    %0 = vector.load %arg1[%c0, %c0_0] : memref<32x64xbf16, #tpu.memory_space<vmem>>, vector<32x64xbf16>
    %c0_1 = arith.constant 0 : index
    %c0_2 = arith.constant 0 : index
    %1 = vector.load %arg2[%c0_1, %c0_2] : memref<64x128xbf16, #tpu.memory_space<vmem>>, vector<64x128xbf16>
    %cst = arith.constant dense<0.000000e+00> : vector<32x128xf32>
    %2 = tpu.matmul %0, %1, %cst {dimension_numbers = #tpu.dot_dimension_numbers<[1], [0], [0], [1], [0, 0, 1, 1], [], []>} : vector<32x64xbf16>, vector<64x128xbf16>, vector<32x128xf32> -> vector<32x128xf32>
    %c0_3 = arith.constant 0 : index
    %c0_4 = arith.constant 0 : index
    %3 = vector.load %arg3[%c0_3, %c0_4] : memref<1x128xf32, #tpu.memory_space<vmem>>, vector<1x128xf32>
    %4 = vector.broadcast %3 : vector<1x128xf32> to vector<32x128xf32>
    %5 = arith.addf %2, %4 : vector<32x128xf32>
    %c0_5 = arith.constant 0 : index
    %c0_6 = arith.constant 0 : index
    %6 = vector.load %arg4[%c0_5, %c0_6] : memref<32x128xf32, #tpu.memory_space<vmem>>, vector<32x128xf32>
    tpu.vector_store %arg4[%c0_5, %c0_6], %5 {strides = array<i32>} : memref<32x128xf32, #tpu.memory_space<vmem>>, vector<32x128xf32>,
    return
  }
  func.func @transform_0(%arg0: i32) -> (i32, i32) {
    %c0_i32 = arith.constant 0 : i32
    %c0_i32_0 = arith.constant 0 : i32
    return %arg0, %c0_i32 : i32, i32
  }
  func.func @transform_1(%arg0: i32) -> (i32, i32) {
    %c0_i32 = arith.constant 0 : i32
    %c0_i32_0 = arith.constant 0 : i32
    %c0_i32_1 = arith.constant 0 : i32
    return %c0_i32, %c0_i32_0 : i32, i32
  }
  func.func @transform_2(%arg0: i32) -> (i32, i32) {
    %c0_i32 = arith.constant 0 : i32
    %c0_i32_0 = arith.constant 0 : i32
    %c0_i32_1 = arith.constant 0 : i32
    return %c0_i32, %c0_i32_0 : i32, i32
  }
  func.func @transform_3(%arg0: i32) -> (i32, i32) {
    %c0_i32 = arith.constant 0 : i32
    %c0_i32_0 = arith.constant 0 : i32
    return %arg0, %c0_i32 : i32, i32
  }
}

module attributes {stable_mosaic.version = 11 : i64} {
  func.func @_rows_kernel(%arg0: i32, %arg1: memref<128x576xbf16, #tpu.memory_space<vmem>>, %arg2: memref<576x32xbf16, #tpu.memory_space<vmem>>, %arg3: memref<1x32xf32, #tpu.memory_space<vmem>>, %arg4: memref<128x32xf32, #tpu.memory_space<vmem>>) attributes {dimension_semantics = [#tpu.dimension_semantics<parallel>], iteration_bounds = array<i64: 1>, scalar_prefetch = 0 : i64, scratch_operands = 0 : i64, tpu.core_type = #tpu.core_type<tc>, window_params = [{transform_indices = @transform_0, window_bounds = array<i64: 128, 576>}, {pipeline_mode = #tpu.pipeline_mode<synchronous>, transform_indices = @transform_1, window_bounds = array<i64: 576, 32>}, {pipeline_mode = #tpu.pipeline_mode<synchronous>, transform_indices = @transform_2, window_bounds = array<i64: 1, 32>}, {transform_indices = @transform_3, window_bounds = array<i64: 128, 32>}]} {
    %c0 = arith.constant 0 : index
    %c0_0 = arith.constant 0 : index
    %0 = vector.load %arg1[%c0, %c0_0] : memref<128x576xbf16, #tpu.memory_space<vmem>>, vector<128x576xbf16>
    %c0_1 = arith.constant 0 : index
    %c0_2 = arith.constant 0 : index
    %1 = vector.load %arg2[%c0_1, %c0_2] : memref<576x32xbf16, #tpu.memory_space<vmem>>, vector<576x32xbf16>
    %cst = arith.constant dense<0.000000e+00> : vector<128x32xf32>
    %2 = tpu.matmul %0, %1, %cst {dimension_numbers = #tpu.dot_dimension_numbers<[1], [0], [0], [1], [0, 0, 1, 1], [], []>} : vector<128x576xbf16>, vector<576x32xbf16>, vector<128x32xf32> -> vector<128x32xf32>
    %c0_3 = arith.constant 0 : index
    %c0_4 = arith.constant 0 : index
    %3 = vector.load %arg3[%c0_3, %c0_4] : memref<1x32xf32, #tpu.memory_space<vmem>>, vector<1x32xf32>
    %4 = vector.broadcast %3 : vector<1x32xf32> to vector<128x32xf32>
    %5 = arith.addf %2, %4 : vector<128x32xf32>
    %cst_5 = arith.constant 0.000000e+00 : f32
    %6 = vector.broadcast %cst_5 : f32 to vector<128x32xf32>
    %7 = arith.maximumf %5, %6 : vector<128x32xf32>
    %c0_6 = arith.constant 0 : index
    %c0_7 = arith.constant 0 : index
    %8 = vector.load %arg4[%c0_6, %c0_7] : memref<128x32xf32, #tpu.memory_space<vmem>>, vector<128x32xf32>
    tpu.vector_store %arg4[%c0_6, %c0_7], %7 {strides = array<i32>} : memref<128x32xf32, #tpu.memory_space<vmem>>, vector<128x32xf32>,
    return
  }
  func.func @transform_0(%arg0: i32) -> (i32, i32) {
    %c0_i32 = arith.constant 0 : i32
    %c0_i32_0 = arith.constant 0 : i32
    return %arg0, %c0_i32 : i32, i32
  }
  func.func @transform_1(%arg0: i32) -> (i32, i32) {
    %c0_i32 = arith.constant 0 : i32
    %c0_i32_0 = arith.constant 0 : i32
    %c0_i32_1 = arith.constant 0 : i32
    return %c0_i32, %c0_i32_0 : i32, i32
  }
  func.func @transform_2(%arg0: i32) -> (i32, i32) {
    %c0_i32 = arith.constant 0 : i32
    %c0_i32_0 = arith.constant 0 : i32
    %c0_i32_1 = arith.constant 0 : i32
    return %c0_i32, %c0_i32_0 : i32, i32
  }
  func.func @transform_3(%arg0: i32) -> (i32, i32) {
    %c0_i32 = arith.constant 0 : i32
    %c0_i32_0 = arith.constant 0 : i32
    return %arg0, %c0_i32 : i32, i32
  }
}

module attributes {stable_mosaic.version = 11 : i64} {
  func.func @_rows_kernel(%arg0: i32, %arg1: memref<128x32xbf16, #tpu.memory_space<vmem>>, %arg2: memref<32x64xbf16, #tpu.memory_space<vmem>>, %arg3: memref<1x64xf32, #tpu.memory_space<vmem>>, %arg4: memref<128x64xf32, #tpu.memory_space<vmem>>) attributes {dimension_semantics = [#tpu.dimension_semantics<parallel>], iteration_bounds = array<i64: 1>, scalar_prefetch = 0 : i64, scratch_operands = 0 : i64, tpu.core_type = #tpu.core_type<tc>, window_params = [{transform_indices = @transform_0, window_bounds = array<i64: 128, 32>}, {pipeline_mode = #tpu.pipeline_mode<synchronous>, transform_indices = @transform_1, window_bounds = array<i64: 32, 64>}, {pipeline_mode = #tpu.pipeline_mode<synchronous>, transform_indices = @transform_2, window_bounds = array<i64: 1, 64>}, {transform_indices = @transform_3, window_bounds = array<i64: 128, 64>}]} {
    %c0 = arith.constant 0 : index
    %c0_0 = arith.constant 0 : index
    %0 = vector.load %arg1[%c0, %c0_0] : memref<128x32xbf16, #tpu.memory_space<vmem>>, vector<128x32xbf16>
    %c0_1 = arith.constant 0 : index
    %c0_2 = arith.constant 0 : index
    %1 = vector.load %arg2[%c0_1, %c0_2] : memref<32x64xbf16, #tpu.memory_space<vmem>>, vector<32x64xbf16>
    %cst = arith.constant dense<0.000000e+00> : vector<128x64xf32>
    %2 = tpu.matmul %0, %1, %cst {dimension_numbers = #tpu.dot_dimension_numbers<[1], [0], [0], [1], [0, 0, 1, 1], [], []>} : vector<128x32xbf16>, vector<32x64xbf16>, vector<128x64xf32> -> vector<128x64xf32>
    %c0_3 = arith.constant 0 : index
    %c0_4 = arith.constant 0 : index
    %3 = vector.load %arg3[%c0_3, %c0_4] : memref<1x64xf32, #tpu.memory_space<vmem>>, vector<1x64xf32>
    %4 = vector.broadcast %3 : vector<1x64xf32> to vector<128x64xf32>
    %5 = arith.addf %2, %4 : vector<128x64xf32>
    %c0_5 = arith.constant 0 : index
    %c0_6 = arith.constant 0 : index
    %6 = vector.load %arg4[%c0_5, %c0_6] : memref<128x64xf32, #tpu.memory_space<vmem>>, vector<128x64xf32>
    tpu.vector_store %arg4[%c0_5, %c0_6], %5 {strides = array<i32>} : memref<128x64xf32, #tpu.memory_space<vmem>>, vector<128x64xf32>,
    return
  }
  func.func @transform_0(%arg0: i32) -> (i32, i32) {
    %c0_i32 = arith.constant 0 : i32
    %c0_i32_0 = arith.constant 0 : i32
    return %arg0, %c0_i32 : i32, i32
  }
  func.func @transform_1(%arg0: i32) -> (i32, i32) {
    %c0_i32 = arith.constant 0 : i32
    %c0_i32_0 = arith.constant 0 : i32
    %c0_i32_1 = arith.constant 0 : i32
    return %c0_i32, %c0_i32_0 : i32, i32
  }
  func.func @transform_2(%arg0: i32) -> (i32, i32) {
    %c0_i32 = arith.constant 0 : i32
    %c0_i32_0 = arith.constant 0 : i32
    %c0_i32_1 = arith.constant 0 : i32
    return %c0_i32, %c0_i32_0 : i32, i32
  }
  func.func @transform_3(%arg0: i32) -> (i32, i32) {
    %c0_i32 = arith.constant 0 : i32
    %c0_i32_0 = arith.constant 0 : i32
    return %arg0, %c0_i32 : i32, i32
  }
}

module attributes {stable_mosaic.version = 11 : i64} {
  func.func @_px_kernel(%arg0: i32, %arg1: i32, %arg2: memref<1x288x256xbf16, #tpu.memory_space<vmem>>, %arg3: memref<16x288xbf16, #tpu.memory_space<vmem>>, %arg4: memref<16x1xf32, #tpu.memory_space<vmem>>, %arg5: memref<1x16x256xf32, #tpu.memory_space<vmem>>) attributes {dimension_semantics = [#tpu.dimension_semantics<parallel>, #tpu.dimension_semantics<parallel>], iteration_bounds = array<i64: 2, 1>, scalar_prefetch = 0 : i64, scratch_operands = 0 : i64, tpu.core_type = #tpu.core_type<tc>, window_params = [{transform_indices = @transform_0, window_bounds = array<i64: 1, 288, 256>}, {pipeline_mode = #tpu.pipeline_mode<synchronous>, transform_indices = @transform_1, window_bounds = array<i64: 16, 288>}, {pipeline_mode = #tpu.pipeline_mode<synchronous>, transform_indices = @transform_2, window_bounds = array<i64: 16, 1>}, {transform_indices = @transform_3, window_bounds = array<i64: 1, 16, 256>}]} {
    %c0 = arith.constant 0 : index
    %c0_0 = arith.constant 0 : index
    %0 = vector.load %arg3[%c0, %c0_0] : memref<16x288xbf16, #tpu.memory_space<vmem>>, vector<16x288xbf16>
    %c0_1 = arith.constant 0 : index
    %c0_2 = arith.constant 0 : index
    %c0_3 = arith.constant 0 : index
    %1 = vector.load %arg2[%c0_1, %c0_2, %c0_3] : memref<1x288x256xbf16, #tpu.memory_space<vmem>>, vector<1x288x256xbf16>
    %2 = vector.shape_cast %1 : vector<1x288x256xbf16> to vector<288x256xbf16>
    %cst = arith.constant dense<0.000000e+00> : vector<16x256xf32>
    %3 = tpu.matmul %0, %2, %cst {dimension_numbers = #tpu.dot_dimension_numbers<[1], [0], [0], [1], [0, 0, 1, 1], [], []>} : vector<16x288xbf16>, vector<288x256xbf16>, vector<16x256xf32> -> vector<16x256xf32>
    %c0_4 = arith.constant 0 : index
    %c0_5 = arith.constant 0 : index
    %4 = vector.load %arg4[%c0_4, %c0_5] : memref<16x1xf32, #tpu.memory_space<vmem>>, vector<16x1xf32>
    %5 = vector.broadcast %4 : vector<16x1xf32> to vector<16x256xf32>
    %6 = arith.addf %3, %5 : vector<16x256xf32>
    %cst_6 = arith.constant 0.000000e+00 : f32
    %7 = vector.broadcast %cst_6 : f32 to vector<16x256xf32>
    %8 = arith.maximumf %6, %7 : vector<16x256xf32>
    %c0_7 = arith.constant 0 : index
    %c0_8 = arith.constant 0 : index
    %c0_9 = arith.constant 0 : index
    %9 = vector.load %arg5[%c0_7, %c0_8, %c0_9] : memref<1x16x256xf32, #tpu.memory_space<vmem>>, vector<1x16x256xf32>
    %10 = vector.shape_cast %9 : vector<1x16x256xf32> to vector<16x256xf32>
    %11 = vector.shape_cast %8 : vector<16x256xf32> to vector<1x16x256xf32>
    tpu.vector_store %arg5[%c0_7, %c0_8, %c0_9], %11 {strides = array<i32>} : memref<1x16x256xf32, #tpu.memory_space<vmem>>, vector<1x16x256xf32>,
    return
  }
  func.func @transform_0(%arg0: i32, %arg1: i32) -> (i32, i32, i32) {
    %c0_i32 = arith.constant 0 : i32
    %c0_i32_0 = arith.constant 0 : i32
    return %arg0, %c0_i32, %arg1 : i32, i32, i32
  }
  func.func @transform_1(%arg0: i32, %arg1: i32) -> (i32, i32) {
    %c0_i32 = arith.constant 0 : i32
    %c0_i32_0 = arith.constant 0 : i32
    %c0_i32_1 = arith.constant 0 : i32
    return %c0_i32, %c0_i32_0 : i32, i32
  }
  func.func @transform_2(%arg0: i32, %arg1: i32) -> (i32, i32) {
    %c0_i32 = arith.constant 0 : i32
    %c0_i32_0 = arith.constant 0 : i32
    %c0_i32_1 = arith.constant 0 : i32
    return %c0_i32, %c0_i32_0 : i32, i32
  }
  func.func @transform_3(%arg0: i32, %arg1: i32) -> (i32, i32, i32) {
    %c0_i32 = arith.constant 0 : i32
    %c0_i32_0 = arith.constant 0 : i32
    return %arg0, %c0_i32, %arg1 : i32, i32, i32
  }
}

module attributes {stable_mosaic.version = 11 : i64} {
  func.func @_px_kernel(%arg0: i32, %arg1: i32, %arg2: memref<1x16x256xbf16, #tpu.memory_space<vmem>>, %arg3: memref<4x16xbf16, #tpu.memory_space<vmem>>, %arg4: memref<4x1xf32, #tpu.memory_space<vmem>>, %arg5: memref<1x4x256xf32, #tpu.memory_space<vmem>>) attributes {dimension_semantics = [#tpu.dimension_semantics<parallel>, #tpu.dimension_semantics<parallel>], iteration_bounds = array<i64: 2, 1>, scalar_prefetch = 0 : i64, scratch_operands = 0 : i64, tpu.core_type = #tpu.core_type<tc>, window_params = [{transform_indices = @transform_0, window_bounds = array<i64: 1, 16, 256>}, {pipeline_mode = #tpu.pipeline_mode<synchronous>, transform_indices = @transform_1, window_bounds = array<i64: 4, 16>}, {pipeline_mode = #tpu.pipeline_mode<synchronous>, transform_indices = @transform_2, window_bounds = array<i64: 4, 1>}, {transform_indices = @transform_3, window_bounds = array<i64: 1, 4, 256>}]} {
    %c0 = arith.constant 0 : index
    %c0_0 = arith.constant 0 : index
    %0 = vector.load %arg3[%c0, %c0_0] : memref<4x16xbf16, #tpu.memory_space<vmem>>, vector<4x16xbf16>
    %c0_1 = arith.constant 0 : index
    %c0_2 = arith.constant 0 : index
    %c0_3 = arith.constant 0 : index
    %1 = vector.load %arg2[%c0_1, %c0_2, %c0_3] : memref<1x16x256xbf16, #tpu.memory_space<vmem>>, vector<1x16x256xbf16>
    %2 = vector.shape_cast %1 : vector<1x16x256xbf16> to vector<16x256xbf16>
    %cst = arith.constant dense<0.000000e+00> : vector<4x256xf32>
    %3 = tpu.matmul %0, %2, %cst {dimension_numbers = #tpu.dot_dimension_numbers<[1], [0], [0], [1], [0, 0, 1, 1], [], []>} : vector<4x16xbf16>, vector<16x256xbf16>, vector<4x256xf32> -> vector<4x256xf32>
    %c0_4 = arith.constant 0 : index
    %c0_5 = arith.constant 0 : index
    %4 = vector.load %arg4[%c0_4, %c0_5] : memref<4x1xf32, #tpu.memory_space<vmem>>, vector<4x1xf32>
    %5 = vector.broadcast %4 : vector<4x1xf32> to vector<4x256xf32>
    %6 = arith.addf %3, %5 : vector<4x256xf32>
    %cst_6 = arith.constant 5.000000e-01 : f32
    %7 = vector.broadcast %cst_6 : f32 to vector<4x256xf32>
    %8 = arith.mulf %7, %6 : vector<4x256xf32>
    %9 = math.tanh %8 : vector<4x256xf32>
    %cst_7 = arith.constant 1.000000e+00 : f32
    %10 = vector.broadcast %cst_7 : f32 to vector<4x256xf32>
    %11 = arith.addf %9, %10 : vector<4x256xf32>
    %cst_8 = arith.constant 5.000000e-01 : f32
    %12 = vector.broadcast %cst_8 : f32 to vector<4x256xf32>
    %13 = arith.mulf %12, %11 : vector<4x256xf32>
    %c0_9 = arith.constant 0 : index
    %c0_10 = arith.constant 0 : index
    %c0_11 = arith.constant 0 : index
    %14 = vector.load %arg5[%c0_9, %c0_10, %c0_11] : memref<1x4x256xf32, #tpu.memory_space<vmem>>, vector<1x4x256xf32>
    %15 = vector.shape_cast %14 : vector<1x4x256xf32> to vector<4x256xf32>
    %16 = vector.shape_cast %13 : vector<4x256xf32> to vector<1x4x256xf32>
    tpu.vector_store %arg5[%c0_9, %c0_10, %c0_11], %16 {strides = array<i32>} : memref<1x4x256xf32, #tpu.memory_space<vmem>>, vector<1x4x256xf32>,
    return
  }
  func.func @transform_0(%arg0: i32, %arg1: i32) -> (i32, i32, i32) {
    %c0_i32 = arith.constant 0 : i32
    %c0_i32_0 = arith.constant 0 : i32
    return %arg0, %c0_i32, %arg1 : i32, i32, i32
  }
  func.func @transform_1(%arg0: i32, %arg1: i32) -> (i32, i32) {
    %c0_i32 = arith.constant 0 : i32
    %c0_i32_0 = arith.constant 0 : i32
    %c0_i32_1 = arith.constant 0 : i32
    return %c0_i32, %c0_i32_0 : i32, i32
  }
  func.func @transform_2(%arg0: i32, %arg1: i32) -> (i32, i32) {
    %c0_i32 = arith.constant 0 : i32
    %c0_i32_0 = arith.constant 0 : i32
    %c0_i32_1 = arith.constant 0 : i32
    return %c0_i32, %c0_i32_0 : i32, i32
  }
  func.func @transform_3(%arg0: i32, %arg1: i32) -> (i32, i32, i32) {
    %c0_i32 = arith.constant 0 : i32
    %c0_i32_0 = arith.constant 0 : i32
    return %arg0, %c0_i32, %arg1 : i32, i32, i32
  }
}

</mosaic_0001>

<bundles_post_ra>
// kernel: rebuildnet_forward.25
= control target key start
LH: loop header
LB: loop body
LE: loop exit
PB: predicated region body
PF: predicated region fallthrough
CT: control target
= control target key end

     0   :  { %s510_s12 = smov 0   ;;  %s512_s13 = smov 0   ;;  %s556_s0 = inlined_call_operand.vmem [shape: bf16[2,36,256], index: 0, kind: input, shape index: {}]   ;;  %s557_s1 = inlined_call_operand.vmem [shape: bf16[16,36], index: 1, kind: input, shape index: {}]   ;;  %s558_s2 = inlined_call_operand.vmem [shape: f32[16,1], index: 2, kind: input, shape index: {}]   ;;  %s559_s3 = inlined_call_operand.vmem [shape: f32[2,16,256], index: 3, kind: output, shape index: {}]  }
   0x1   :  { %s514_s14 = smov 0  }
   0x2 LB: > { %s25_s15 = sadd.s32 1, %s483_s13  ;;  %p413_p0 = scmp.ge.s32.totalorder %s487_s14, 1  ;;  %s487_s14 = sphi %s514_s14, %s13_s14   ;;  %s483_s13 = sphi %s512_s13, %s561_s13   ;;  %s479_s12 = sphi %s510_s12, %s560_s12  }
   0x3   : > { %p27_p1 = scmp.ge.s32.totalorder %s25_s15, 2  ;;  %p158_p2 = scmp.lt.s32.totalorder %s487_s14, 3 }
   0x5   : > { %s563_s15 = smov (%p27_p1, %s25_s15), 0  ;;  %p159_p3 = pnand %p413_p0, %p158_p2 }
   0x6   : > { %p191_p4 = scmp.lt.s32.totalorder (!%p159_p3), %s479_s12, 1  ;;  %v489_v0 = vmov (!%p159_p3), 0   ;;  %v218_v1 = vld [vmem:[%s558_s2] sm:$0xff] (!%p159_p3)  ;;  %v219_v2 = vld [vmem:[%s558_s2 + $0x8] sm:$0xff] (!%p159_p3)  ;;  %vm264_vm0 = vcmask (!%p159_p3), 1041408   ;;  %vm260_vm1 = vcmask (!%p159_p3), 293888  }
   0x7   : > { %162 = sbr.rel (%p159_p3) target bundleno = 251 (0xfb), region = 32  ;;  %303 = vmatprep.mubr.bf16.mxu0 (!%p159_p3), %v489_v0  ;;  %455 = vset.pattern.permute.xlu0 (!%p159_p3), %v489_v0  ;;  %v464_v11 = vld [vmem:[%s557_s1] sm:$0xff] (!%p159_p3)  }
   0x8   : > { %222 = vperm.xlu0 (!%p159_p3), %455, %v218_v1  }
   0xc   : > { %227 = vperm.xlu0 (!%p159_p3), %455, %v219_v2  }
   0xe   : > { %s565_s12 = smov (!%p191_p4, %s479_s12), 1 }
   0xf   : > { %s429_s20 = smul.u32 40, %s565_s12  ;;  %s428_s26 = sshll.u32 %s565_s12, 5 }
  0x10   : > { %s208_s29 = scalar_lea.vmem %s559_s3, %s428_s26 }
  0x11   : > { %s198_s23 = scalar_lea.vmem %s556_s0, %s429_s20 }
  0x12   : > { %v456_v3 = vld [vmem:[%s198_s23 + $0x4] ss:$8 sps:$4 sm:$0xff]   ;;  %v458_v4 = vld [vmem:[%s198_s23] ss:$8 sps:$4 sm:$0xff]   ;;  %v459_v5 = vld [vmem:[%s198_s23 + $0x14] ss:$8 sps:$4 sm:$0xff]  }
  0x13   : > { %271 = vmatprep.subr.bf16.mxu0 %v456_v3  ;;  %v217_v6 = vld [vmem:[%s198_s23 + $0x20] sm:$0x33]  ;;  %v461_v7 = vld [vmem:[%s198_s23 + $0x10] ss:$8 sps:$4 sm:$0xff]  }
  0x14   : > { %272 = vmatpush1.bf16.msra.mxu0 %v458_v4  ;;  %v423_v8 = vcombine.high %v217_v6, %v217_v6  ;;  %v422_v9 = vcombine.low %v217_v6, %v217_v6 }
  0x15   : > { %273 = vmatprep.subr.bf16.mxu0 %v459_v5 }
  0x16   : > { %v266_v10 = vsel %vm264_vm0, %v422_v9, 0 }
  0x18   : > { %274 = vmatpush1.bf16.msra.mxu0 %v461_v7 }
  0x19   : > { %424 = vmatprep.subr.msk.bf16.mxu0 %vm264_vm0, %v423_v8 }
  0x1c   : > { %276 = vmatpush1.bf16.msra.mxu0 %v266_v10 }
  0x1f   : > { %425 = vmatmul.mubr.msk.bf16.vlgmr.msra.gmra.mrb[0].mxu0 %vm260_vm1, %v464_v11 }
  0x87   : > { %v223_v12 = vpop.permute.xlu0 %222 }
  0x8b   : > { %v228_v16 = vpop.permute.xlu0 %227 }
  0xf2   : > { %v305_v13 = vpop.f32.mrb[0].mxu0 }
  0xf3   : > { %v306_v14 = vadd.f32 %v305_v13, %v223_v12  ;;  %v307_v15 = vpop.f32.mrb[1].mxu0 }
  0xf4   : > { %v308_v17 = vadd.f32 %v307_v15, %v223_v12  ;;  %v309_v18 = vpop.f32.mrb[2].mxu0 }
  0xf5   : > { %v314_v19 = vmax.f32 %v306_v14, 0.0  ;;  %v310_v20 = vadd.f32 %v309_v18, %v228_v16  ;;  %v311_v21 = vpop.f32.mrb[3].mxu0 }
  0xf6   : > { %v315_v22 = vmax.f32 %v308_v17, 0.0  ;;  %v312_v23 = vadd.f32 %v311_v21, %v228_v16 }
  0xf7   : > { %318 = vst [vmem:[%s208_s29] sm:$0xff] %v314_v19  ;;  %v316_v24 = vmax.f32 %v310_v20, 0.0 }
  0xf8   : > { %319 = vst [vmem:[%s208_s29 + $0x8] sm:$0xff] %v315_v22  ;;  %v317_v25 = vmax.f32 %v312_v23, 0.0 }
  0xf9   : > { %320 = vst [vmem:[%s208_s29 + $0x10] sm:$0xff] %v316_v24 }
  0xfa   : > { %321 = vst [vmem:[%s208_s29 + $0x18] sm:$0xff] %v317_v25 }
  0xfb PF: > { %s13_s14 = sadd.s32 1, %s487_s14   ;;  %s560_s12 = smov %s483_s13 }
  0xfc   : > { %p10_p5 = scmp.ge.s32.totalorder %s13_s14, 4   ;;  %s561_s13 = smov %s563_s15 }
  0xfe   :  { %12 = sbr.rel (!%p10_p5) target bundleno = 2 (0x2), region = 62 }

// kernel: rebuildnet_forward.26
= control target key start
LH: loop header
LB: loop body
LE: loop exit
PB: predicated region body
PF: predicated region fallthrough
CT: control target
= control target key end

     0   :  { %s618_s12 = smov 0   ;;  %s620_s13 = smov 0   ;;  %s687_s0 = inlined_call_operand.vmem [shape: bf16[2,144,256], index: 0, kind: input, shape index: {}]   ;;  %s688_s1 = inlined_call_operand.vmem [shape: bf16[16,144], index: 1, kind: input, shape index: {}]   ;;  %s689_s2 = inlined_call_operand.vmem [shape: f32[16,1], index: 2, kind: input, shape index: {}]   ;;  %s690_s3 = inlined_call_operand.vmem [shape: f32[2,16,256], index: 3, kind: output, shape index: {}]  }
   0x1   :  { %s622_s14 = smov 0  }
   0x2 LB: > { %s25_s15 = sadd.s32 1, %s591_s13  ;;  %p488_p0 = scmp.ge.s32.totalorder %s595_s14, 1  ;;  %s595_s14 = sphi %s622_s14, %s13_s14   ;;  %s591_s13 = sphi %s620_s13, %s692_s13   ;;  %s587_s12 = sphi %s618_s12, %s691_s12  }
   0x3   : > { %p27_p1 = scmp.ge.s32.totalorder %s25_s15, 2  ;;  %p158_p2 = scmp.lt.s32.totalorder %s595_s14, 3 }
   0x5   : > { %s694_s15 = smov (%p27_p1, %s25_s15), 0  ;;  %p159_p3 = pnand %p488_p0, %p158_p2 }
   0x6   : > { %p191_p4 = scmp.lt.s32.totalorder (!%p159_p3), %s587_s12, 1  ;;  %vm342_vm0 = vcmask (!%p159_p3), 130048   ;;  %v572_v0 = vld [vmem:[%s688_s1 + $0x4] ss:$8 sps:$4 sm:$0xff] (!%p159_p3)   ;;  %v597_v2 = vmov (!%p159_p3), 0  }
   0x7   : > { %162 = sbr.rel (%p159_p3) target bundleno = 275 (0x113), region = 32  ;;  %v231_v1 = vld [vmem:[%s689_s2] sm:$0xff] (!%p159_p3)  ;;  %542 = vset.pattern.permute.xlu0 (!%p159_p3), %v597_v2  ;;  %512 = vmatprep.mubr.msk.bf16.mxu0 (!%p159_p3), %vm342_vm0, %v572_v0  ;;  %v232_v3 = vld [vmem:[%s689_s2 + $0x8] sm:$0xff] (!%p159_p3) }
   0x8   : > { %235 = vperm.xlu0 (!%p159_p3), %542, %v231_v1   ;;  %v570_v22 = vld [vmem:[%s688_s1] ss:$8 sps:$4 sm:$0xff] (!%p159_p3)  }
   0xc   : > { %240 = vperm.xlu0 (!%p159_p3), %542, %v232_v3  }
   0xe   : > { %s696_s12 = smov (!%p191_p4, %s587_s12), 1 }
   0xf   : > { %s516_s20 = smul.u32 144, %s696_s12  ;;  %s515_s28 = sshll.u32 %s696_s12, 5 }
  0x10   : > { %s208_s4 = scalar_lea.vmem %s690_s3, %s515_s28 }
  0x11   : > { %s651_s25 = scalar_lea.vmem %s687_s0, %s516_s20 }
  0x12   : > { %v543_v4 = vld [vmem:[%s651_s25 + $0x4] ss:$8 sps:$4 sm:$0xff]   ;;  %v545_v5 = vld [vmem:[%s651_s25] ss:$8 sps:$4 sm:$0xff]   ;;  %v546_v6 = vld [vmem:[%s651_s25 + $0x14] ss:$8 sps:$4 sm:$0xff]  }
  0x13   : > { %346 = vmatprep.subr.bf16.mxu0 %v543_v4  ;;  %v548_v7 = vld [vmem:[%s651_s25 + $0x10] ss:$8 sps:$4 sm:$0xff]   ;;  %v549_v8 = vld [vmem:[%s651_s25 + $0x24] ss:$8 sps:$4 sm:$0xff]   ;;  %v551_v9 = vld [vmem:[%s651_s25 + $0x20] ss:$8 sps:$4 sm:$0xff]  }
  0x14   : > { %347 = vmatpush1.bf16.msra.mxu0 %v545_v5  ;;  %v552_v10 = vld [vmem:[%s651_s25 + $0x34] ss:$8 sps:$4 sm:$0xff]   ;;  %v554_v11 = vld [vmem:[%s651_s25 + $0x30] ss:$8 sps:$4 sm:$0xff]   ;;  %v555_v12 = vld [vmem:[%s651_s25 + $0x44] ss:$8 sps:$4 sm:$0xff]  }
  0x15   : > { %348 = vmatprep.subr.bf16.mxu0 %v546_v6  ;;  %v557_v13 = vld [vmem:[%s651_s25 + $0x40] ss:$8 sps:$4 sm:$0xff]   ;;  %v558_v14 = vld [vmem:[%s651_s25 + $0x54] ss:$8 sps:$4 sm:$0xff]   ;;  %v560_v15 = vld [vmem:[%s651_s25 + $0x50] ss:$8 sps:$4 sm:$0xff]  }
  0x16   : > { %v561_v16 = vld [vmem:[%s651_s25 + $0x64] ss:$8 sps:$4 sm:$0xff]   ;;  %v563_v17 = vld [vmem:[%s651_s25 + $0x60] ss:$8 sps:$4 sm:$0xff]   ;;  %v564_v18 = vld [vmem:[%s651_s25 + $0x74] ss:$8 sps:$4 sm:$0xff]  }
  0x17   : > { %v566_v19 = vld [vmem:[%s651_s25 + $0x70] ss:$8 sps:$4 sm:$0xff]   ;;  %v567_v20 = vld [vmem:[%s651_s25 + $0x84] ss:$8 sps:$4 sm:$0xff]   ;;  %v569_v21 = vld [vmem:[%s651_s25 + $0x80] ss:$8 sps:$4 sm:$0xff]  }
  0x18   : > { %349 = vmatpush1.bf16.msra.mxu0 %v548_v7 }
  0x19   : > { %350 = vmatprep.subr.bf16.mxu0 %v549_v8 }
  0x1c   : > { %351 = vmatpush1.bf16.msra.mxu0 %v551_v9 }
  0x1d   : > { %352 = vmatprep.subr.bf16.mxu0 %v552_v10 }
  0x20   : > { %353 = vmatpush1.bf16.msra.mxu0 %v554_v11 }
  0x21   : > { %354 = vmatprep.subr.bf16.mxu0 %v555_v12 }
  0x24   : > { %355 = vmatpush1.bf16.msra.mxu0 %v557_v13 }
  0x25   : > { %356 = vmatprep.subr.bf16.mxu0 %v558_v14 }
  0x28   : > { %357 = vmatpush1.bf16.msra.mxu0 %v560_v15 }
  0x29   : > { %358 = vmatprep.subr.bf16.mxu0 %v561_v16 }
  0x2c   : > { %359 = vmatpush1.bf16.msra.mxu0 %v563_v17 }
  0x2d   : > { %360 = vmatprep.subr.bf16.mxu0 %v564_v18 }
  0x30   : > { %361 = vmatpush1.bf16.msra.mxu0 %v566_v19 }
  0x31   : > { %362 = vmatprep.subr.bf16.mxu0 %v567_v20 }
  0x34   : > { %363 = vmatpush1.bf16.msra.mxu0 %v569_v21 }
  0x37   : > { %379 = vmatmul.mubr.bf16.vlgmr.msra.gmra.mrb[0].mxu0 %v570_v22 }
  0x87   : > { %v236_v23 = vpop.permute.xlu0 %235 }
  0x8b   : > { %v241_v27 = vpop.permute.xlu0 %240 }
 0x10a   : > { %v380_v24 = vpop.f32.mrb[0].mxu0 }
 0x10b   : > { %v381_v25 = vadd.f32 %v380_v24, %v236_v23  ;;  %v382_v26 = vpop.f32.mrb[1].mxu0 }
 0x10c   : > { %v383_v28 = vadd.f32 %v382_v26, %v236_v23  ;;  %v384_v29 = vpop.f32.mrb[2].mxu0 }
 0x10d   : > { %v389_v30 = vmax.f32 %v381_v25, 0.0  ;;  %v385_v31 = vadd.f32 %v384_v29, %v241_v27  ;;  %v386_v32 = vpop.f32.mrb[3].mxu0 }
 0x10e   : > { %v390_v33 = vmax.f32 %v383_v28, 0.0  ;;  %v387_v34 = vadd.f32 %v386_v32, %v241_v27 }
 0x10f   : > { %393 = vst [vmem:[%s208_s4] sm:$0xff] %v389_v30  ;;  %v391_v35 = vmax.f32 %v385_v31, 0.0 }
 0x110   : > { %394 = vst [vmem:[%s208_s4 + $0x8] sm:$0xff] %v390_v33  ;;  %v392_v36 = vmax.f32 %v387_v34, 0.0 }
 0x111   : > { %395 = vst [vmem:[%s208_s4 + $0x10] sm:$0xff] %v391_v35 }
 0x112   : > { %396 = vst [vmem:[%s208_s4 + $0x18] sm:$0xff] %v392_v36 }
 0x113 PF: > { %s13_s14 = sadd.s32 1, %s595_s14   ;;  %s691_s12 = smov %s591_s13 }
 0x114   : > { %p10_p5 = scmp.ge.s32.totalorder %s13_s14, 4   ;;  %s692_s13 = smov %s694_s15 }
 0x116   :  { %12 = sbr.rel (!%p10_p5) target bundleno = 2 (0x2), region = 62 }

// kernel: rebuildnet_forward.27
= control target key start
LH: loop header
LB: loop body
LE: loop exit
PB: predicated region body
PF: predicated region fallthrough
CT: control target
= control target key end

     0   :  { %v427_v0 = vmov 0   ;;  %vm182_vm0 = vcmask 130048   ;;  %vm320_vm1 = vcmask 261120   ;;  %s616_s1 = inlined_call_operand.vmem [shape: bf16[144,32], index: 1, kind: input, shape index: {}]   ;;  %s617_s0 = inlined_call_operand.vmem [shape: bf16[128,144], index: 0, kind: input, shape index: {}]   ;;  %s618_s2 = inlined_call_operand.vmem [shape: f32[1,32], index: 2, kind: input, shape index: {}]   ;;  %s619_s3 = inlined_call_operand.vmem [shape: f32[128,32], index: 3, kind: output, shape index: {}]  }
   0x1   :  { %207 = vmatprep.subr.bf16.mxu0 %v427_v0  ;;  %375 = vmatprep.subr.bf16.mxu1 %v427_v0  ;;  %v394_v1 = vld [vmem:[%s616_s1] sm:$0xff]   ;;  %v395_v2 = vld [vmem:[%s616_s1 + $0x8] sm:$0xff]   ;;  %v396_v3 = vld [vmem:[%s616_s1 + $0x10] sm:$0xff]  }
   0x2   :  { %208 = vmatpush1.bf16.msra.mxu0 %v394_v1  ;;  %384 = vmatpush1.bf16.msra.mxu1 %v394_v1  ;;  %v397_v4 = vld [vmem:[%s616_s1 + $0x18] sm:$0xff]   ;;  %v405_v5 = vld [vmem:[%s617_s0 + $0x4] ss:$8 sps:$4 sm:$0xff]   ;;  %v400_v9 = vld [vmem:[%s616_s1 + $0x30] sm:$0xff]  }
   0x3   :  { %209 = vmatprep.subr.bf16.mxu0 %v427_v0  ;;  %376 = vmatprep.subr.bf16.mxu1 %v427_v0  ;;  %v408_v6 = vld [vmem:[%s617_s0 + $0x44] ss:$8 sps:$4 sm:$0xff]   ;;  %v401_v10 = vld [vmem:[%s616_s1 + $0x38] sm:$0xff]   ;;  %v403_v12 = vld [vmem:[%s617_s0] ss:$8 sps:$4 sm:$0xff]  }
   0x4   :  { %367 = vmatprep.mubr.msk.bf16.mxu0 %vm182_vm0, %v405_v5  ;;  %371 = vmatprep.mubr.msk.bf16.mxu1 %vm182_vm0, %v408_v6  ;;  %v398_v7 = vld [vmem:[%s616_s1 + $0x20] sm:$0xff]   ;;  %v399_v8 = vld [vmem:[%s616_s1 + $0x28] sm:$0xff]   ;;  %v409_v14 = vld [vmem:[%s617_s0 + $0x14] ss:$8 sps:$4 sm:$0xff]  }
   0x5   :  { %v402_v11 = vld [vmem:[%s616_s1 + $0x40] sm:$0xff]   ;;  %v411_v15 = vld [vmem:[%s617_s0 + $0x54] ss:$8 sps:$4 sm:$0xff]   ;;  %v413_v16 = vld [vmem:[%s617_s0 + $0x10] ss:$8 sps:$4 sm:$0xff]  }
   0x6   :  { %210 = vmatpush1.bf16.msra.mxu0 %v395_v2  ;;  %385 = vmatpush1.bf16.msra.mxu1 %v395_v2  ;;  %v406_v13 = vld [vmem:[%s617_s0 + $0x40] ss:$8 sps:$4 sm:$0xff]   ;;  %v414_v17 = vld [vmem:[%s617_s0 + $0x50] ss:$8 sps:$4 sm:$0xff]   ;;  %v415_v18 = vld [vmem:[%s617_s0 + $0x24] ss:$8 sps:$4 sm:$0xff]  }
   0x7   :  { %211 = vmatprep.subr.bf16.mxu0 %v427_v0  ;;  %377 = vmatprep.subr.bf16.mxu1 %v427_v0  ;;  %v417_v19 = vld [vmem:[%s617_s0 + $0x64] ss:$8 sps:$4 sm:$0xff]   ;;  %v419_v20 = vld [vmem:[%s617_s0 + $0x20] ss:$8 sps:$4 sm:$0xff]   ;;  %v421_v22 = vld [vmem:[%s617_s0 + $0x34] ss:$8 sps:$4 sm:$0xff]  }
   0x8   :  { %v420_v21 = vld [vmem:[%s617_s0 + $0x60] ss:$8 sps:$4 sm:$0xff]   ;;  %v423_v23 = vld [vmem:[%s617_s0 + $0x74] ss:$8 sps:$4 sm:$0xff]   ;;  %v425_v24 = vld [vmem:[%s617_s0 + $0x30] ss:$8 sps:$4 sm:$0xff]  }
   0x9   :  { %v426_v25 = vld [vmem:[%s617_s0 + $0x70] ss:$8 sps:$4 sm:$0xff]   ;;  %v534_v26 = vld [vmem:[%s618_s2] ss:$0 sm:$0xff] }
   0xa   :  { %212 = vmatpush1.bf16.msra.mxu0 %v396_v3  ;;  %386 = vmatpush1.bf16.msra.mxu1 %v396_v3 }
   0xb   :  { %213 = vmatprep.subr.bf16.mxu0 %v427_v0  ;;  %378 = vmatprep.subr.bf16.mxu1 %v427_v0 }
   0xe   :  { %214 = vmatpush1.bf16.msra.mxu0 %v397_v4  ;;  %387 = vmatpush1.bf16.msra.mxu1 %v397_v4 }
   0xf   :  { %215 = vmatprep.subr.bf16.mxu0 %v427_v0  ;;  %379 = vmatprep.subr.bf16.mxu1 %v427_v0 }
  0x12   :  { %216 = vmatpush1.bf16.msra.mxu0 %v398_v7  ;;  %388 = vmatpush1.bf16.msra.mxu1 %v398_v7 }
  0x13   :  { %217 = vmatprep.subr.bf16.mxu0 %v427_v0  ;;  %380 = vmatprep.subr.bf16.mxu1 %v427_v0 }
  0x16   :  { %218 = vmatpush1.bf16.msra.mxu0 %v399_v8  ;;  %389 = vmatpush1.bf16.msra.mxu1 %v399_v8 }
  0x17   :  { %219 = vmatprep.subr.bf16.mxu0 %v427_v0  ;;  %381 = vmatprep.subr.bf16.mxu1 %v427_v0 }
  0x1a   :  { %220 = vmatpush1.bf16.msra.mxu0 %v400_v9  ;;  %390 = vmatpush1.bf16.msra.mxu1 %v400_v9 }
  0x1b   :  { %221 = vmatprep.subr.bf16.mxu0 %v427_v0  ;;  %382 = vmatprep.subr.bf16.mxu1 %v427_v0 }
  0x1e   :  { %222 = vmatpush1.bf16.msra.mxu0 %v401_v10  ;;  %391 = vmatpush1.bf16.msra.mxu1 %v401_v10 }
  0x1f   :  { %223 = vmatprep.subr.bf16.mxu0 %v427_v0  ;;  %383 = vmatprep.subr.bf16.mxu1 %v427_v0 }
  0x22   :  { %224 = vmatpush1.bf16.msra.mxu0 %v402_v11  ;;  %392 = vmatpush1.bf16.msra.mxu1 %v402_v11 }
  0x25   :  { %240 = vmatmul.mubr.bf16.vlgmr.msra.gmra.mrb[0].mxu0 %v403_v12  ;;  %272 = vmatmul.mubr.bf16.vlgmr.msra.gmra.mrb[0].mxu1 %v406_v13 }
  0x26   :  { %368 = vmatprep.mubr.msk.bf16.mxu0 %vm182_vm0, %v409_v14  ;;  %372 = vmatprep.mubr.msk.bf16.mxu1 %vm182_vm0, %v411_v15 }
  0x2d   :  { %248 = vmatmul.mubr.bf16.gmra.mrb[4].mxu0 %v413_v16  ;;  %280 = vmatmul.mubr.bf16.gmra.mrb[4].mxu1 %v414_v17 }
  0x2e   :  { %369 = vmatprep.mubr.msk.bf16.mxu0 %vm182_vm0, %v415_v18  ;;  %373 = vmatprep.mubr.msk.bf16.mxu1 %vm182_vm0, %v417_v19 }
  0x35   :  { %256 = vmatmul.mubr.bf16.gmra.mrb[8].mxu0 %v419_v20  ;;  %288 = vmatmul.mubr.bf16.gmra.mrb[8].mxu1 %v420_v21 }
  0x36   :  { %370 = vmatprep.mubr.msk.bf16.mxu0 %vm182_vm0, %v421_v22  ;;  %374 = vmatprep.mubr.msk.bf16.mxu1 %vm182_vm0, %v423_v23 }
  0x3d   :  { %264 = vmatmul.mubr.bf16.gmra.mrb[12].mxu0 %v425_v24  ;;  %296 = vmatmul.mubr.bf16.gmra.mrb[12].mxu1 %v426_v25 }
  0xf8   :  { %v241_v27 = vpop.f32.mrb[0].mxu0  ;;  %v273_v28 = vpop.f32.mrb[0].mxu1 }
  0xf9   :  { %v242_v29 = vadd.f32 %v534_v26, %v241_v27  ;;  %v274_v30 = vadd.f32 %v534_v26, %v273_v28  ;;  %v243_v31 = vpop.f32.mrb[1].mxu0  ;;  %v275_v32 = vpop.f32.mrb[1].mxu1 }
  0xfa   :  { %v244_v33 = vpop.f32.mrb[2].mxu0  ;;  %v276_v34 = vpop.f32.mrb[2].mxu1 }
  0xfb   :  { %v304_v35 = vmax.f32 %v242_v29, 0.0  ;;  %v312_v36 = vmax.f32 %v274_v30, 0.0  ;;  %v245_v37 = vadd.f32 %v534_v26, %v244_v33  ;;  %v277_v38 = vadd.f32 %v534_v26, %v276_v34  ;;  %v246_v39 = vpop.f32.mrb[3].mxu0  ;;  %v278_v40 = vpop.f32.mrb[3].mxu1 }
  0xfd   :  { %321 = vst.msk [vmem:[%s619_s3] sm:$0xff] %vm320_vm1, %v304_v35  ;;  %329 = vst.msk [vmem:[%s619_s3 + $0x40] sm:$0xff] %vm320_vm1, %v312_v36  ;;  %v305_v41 = vmax.f32 %v245_v37, 0.0  ;;  %v313_v42 = vmax.f32 %v277_v38, 0.0 }
  0xff   :  { %322 = vst.msk [vmem:[%s619_s3 + $0x8] sm:$0xff] %vm320_vm1, %v305_v41  ;;  %330 = vst.msk [vmem:[%s619_s3 + $0x48] sm:$0xff] %vm320_vm1, %v313_v42 }
 0x100   :  { %v249_v43 = vpop.f32.mrb[4].mxu0  ;;  %v281_v44 = vpop.f32.mrb[4].mxu1 }
 0x101   :  { %v250_v45 = vadd.f32 %v534_v26, %v249_v43  ;;  %v282_v46 = vadd.f32 %v534_v26, %v281_v44  ;;  %v251_v47 = vpop.f32.mrb[5].mxu0  ;;  %v283_v48 = vpop.f32.mrb[5].mxu1 }
 0x102   :  { %v252_v49 = vpop.f32.mrb[6].mxu0  ;;  %v284_v50 = vpop.f32.mrb[6].mxu1 }
 0x103   :  { %v306_v51 = vmax.f32 %v250_v45, 0.0  ;;  %v314_v52 = vmax.f32 %v282_v46, 0.0  ;;  %v253_v53 = vadd.f32 %v534_v26, %v252_v49  ;;  %v285_v54 = vadd.f32 %v534_v26, %v284_v50  ;;  %v254_v55 = vpop.f32.mrb[7].mxu0  ;;  %v286_v56 = vpop.f32.mrb[7].mxu1 }
 0x105   :  { %323 = vst.msk [vmem:[%s619_s3 + $0x10] sm:$0xff] %vm320_vm1, %v306_v51  ;;  %331 = vst.msk [vmem:[%s619_s3 + $0x50] sm:$0xff] %vm320_vm1, %v314_v52  ;;  %v307_v57 = vmax.f32 %v253_v53, 0.0  ;;  %v315_v58 = vmax.f32 %v285_v54, 0.0 }
 0x107   :  { %324 = vst.msk [vmem:[%s619_s3 + $0x18] sm:$0xff] %vm320_vm1, %v307_v57  ;;  %332 = vst.msk [vmem:[%s619_s3 + $0x58] sm:$0xff] %vm320_vm1, %v315_v58 }
 0x108   :  { %v257_v59 = vpop.f32.mrb[8].mxu0  ;;  %v289_v60 = vpop.f32.mrb[8].mxu1 }
 0x109   :  { %v258_v61 = vadd.f32 %v534_v26, %v257_v59  ;;  %v290_v62 = vadd.f32 %v534_v26, %v289_v60  ;;  %v259_v63 = vpop.f32.mrb[9].mxu0  ;;  %v291_v0 = vpop.f32.mrb[9].mxu1 }
 0x10a   :  { %v260_v1 = vpop.f32.mrb[10].mxu0  ;;  %v292_v2 = vpop.f32.mrb[10].mxu1 }
 0x10b   :  { %v308_v3 = vmax.f32 %v258_v61, 0.0  ;;  %v316_v4 = vmax.f32 %v290_v62, 0.0  ;;  %v261_v5 = vadd.f32 %v534_v26, %v260_v1  ;;  %v293_v6 = vadd.f32 %v534_v26, %v292_v2  ;;  %v262_v7 = vpop.f32.mrb[11].mxu0  ;;  %v294_v8 = vpop.f32.mrb[11].mxu1 }
 0x10d   :  { %325 = vst.msk [vmem:[%s619_s3 + $0x20] sm:$0xff] %vm320_vm1, %v308_v3  ;;  %333 = vst.msk [vmem:[%s619_s3 + $0x60] sm:$0xff] %vm320_vm1, %v316_v4  ;;  %v309_v9 = vmax.f32 %v261_v5, 0.0  ;;  %v317_v10 = vmax.f32 %v293_v6, 0.0 }
 0x10f   :  { %326 = vst.msk [vmem:[%s619_s3 + $0x28] sm:$0xff] %vm320_vm1, %v309_v9  ;;  %334 = vst.msk [vmem:[%s619_s3 + $0x68] sm:$0xff] %vm320_vm1, %v317_v10 }
 0x110   :  { %v265_v11 = vpop.f32.mrb[12].mxu0  ;;  %v297_v12 = vpop.f32.mrb[12].mxu1 }
 0x111   :  { %v266_v13 = vadd.f32 %v534_v26, %v265_v11  ;;  %v298_v14 = vadd.f32 %v534_v26, %v297_v12  ;;  %v267_v15 = vpop.f32.mrb[13].mxu0  ;;  %v299_v16 = vpop.f32.mrb[13].mxu1 }
 0x112   :  { %v268_v17 = vpop.f32.mrb[14].mxu0  ;;  %v300_v18 = vpop.f32.mrb[14].mxu1 }
 0x113   :  { %v310_v19 = vmax.f32 %v266_v13, 0.0  ;;  %v318_v20 = vmax.f32 %v298_v14, 0.0  ;;  %v269_v21 = vadd.f32 %v534_v26, %v268_v17  ;;  %v301_v22 = vadd.f32 %v534_v26, %v300_v18  ;;  %v270_v23 = vpop.f32.mrb[15].mxu0  ;;  %v302_v24 = vpop.f32.mrb[15].mxu1 }
 0x115   :  { %327 = vst.msk [vmem:[%s619_s3 + $0x30] sm:$0xff] %vm320_vm1, %v310_v19  ;;  %335 = vst.msk [vmem:[%s619_s3 + $0x70] sm:$0xff] %vm320_vm1, %v318_v20  ;;  %v311_v25 = vmax.f32 %v269_v21, 0.0  ;;  %v319_v27 = vmax.f32 %v301_v22, 0.0 }
 0x117   :  { %328 = vst.msk [vmem:[%s619_s3 + $0x38] sm:$0xff] %vm320_vm1, %v311_v25  ;;  %336 = vst.msk [vmem:[%s619_s3 + $0x78] sm:$0xff] %vm320_vm1, %v319_v27 }

// kernel: rebuildnet_forward.28
= control target key start
LH: loop header
LB: loop body
LE: loop exit
PB: predicated region body
PF: predicated region fallthrough
CT: control target
= control target key end

     0   :  { %vm318_vm0 = vcmask 261120   ;;  %s1035_s1 = inlined_call_operand.vmem [shape: bf16[288,32], index: 1, kind: input, shape index: {}]   ;;  %s1036_s0 = inlined_call_operand.vmem [shape: bf16[128,288], index: 0, kind: input, shape index: {}]   ;;  %s1037_s2 = inlined_call_operand.vmem [shape: f32[1,32], index: 2, kind: input, shape index: {}]   ;;  %s1038_s3 = inlined_call_operand.vmem [shape: f32[128,32], index: 3, kind: output, shape index: {}]  }
   0x1   :  { %v734_v0 = vld [vmem:[%s1035_s1 + $0x40] sm:$0xff]   ;;  %v736_v2 = vld [vmem:[%s1035_s1 + $0x48] sm:$0xff]   ;;  %v738_v4 = vld [vmem:[%s1035_s1 + $0x50] sm:$0xff]  }
   0x2   :  { %v735_v1 = vld [vmem:[%s1035_s1] sm:$0xff]   ;;  %624 = vmatprep.subr.bf16.mxu0 %v734_v0  ;;  %718 = vmatprep.subr.bf16.mxu1 %v734_v0  ;;  %v737_v3 = vld [vmem:[%s1035_s1 + $0x8] sm:$0xff]   ;;  %v739_v5 = vld [vmem:[%s1035_s1 + $0x10] sm:$0xff]  }
   0x3   :  { %625 = vmatpush3.bf16.msra.mxu0 %v735_v1  ;;  %726 = vmatpush3.bf16.msra.mxu1 %v735_v1  ;;  %v740_v6 = vld [vmem:[%s1035_s1 + $0x58] sm:$0xff]   ;;  %v742_v8 = vld [vmem:[%s1035_s1 + $0x60] sm:$0xff]   ;;  %v744_v10 = vld [vmem:[%s1035_s1 + $0x68] sm:$0xff]  }
   0x4   :  { %626 = vmatprep.subr.bf16.mxu0 %v736_v2  ;;  %719 = vmatprep.subr.bf16.mxu1 %v736_v2  ;;  %v741_v7 = vld [vmem:[%s1035_s1 + $0x18] sm:$0xff]   ;;  %v743_v9 = vld [vmem:[%s1035_s1 + $0x20] sm:$0xff]   ;;  %v745_v13 = vld [vmem:[%s1035_s1 + $0x28] sm:$0xff]  }
   0x5   :  { %v752_v11 = vld [vmem:[%s1036_s0 + $0x4] ss:$12 sps:$4 sm:$0xff]   ;;  %v755_v12 = vld [vmem:[%s1036_s0 + $0x94] ss:$12 sps:$4 sm:$0xff]   ;;  %v748_v16 = vld [vmem:[%s1035_s1 + $0x78] sm:$0xff]  }
   0x6   :  { %v746_v14 = vld [vmem:[%s1035_s1 + $0x70] sm:$0xff]   ;;  %375 = vmatprep.mubr.bf16.mxu0 %v752_v11  ;;  %423 = vmatprep.mubr.bf16.mxu1 %v755_v12  ;;  %v749_v17 = vld [vmem:[%s1035_s1 + $0x38] sm:$0xff]   ;;  %v750_v18 = vld [vmem:[%s1036_s0] ss:$12 sps:$4 sm:$0xff]  }
   0x7   :  { %627 = vmatpush3.bf16.msra.mxu0 %v737_v3  ;;  %727 = vmatpush3.bf16.msra.mxu1 %v737_v3  ;;  %v747_v15 = vld [vmem:[%s1035_s1 + $0x30] sm:$0xff]   ;;  %v756_v19 = vld [vmem:[%s1035_s1 + $0x80] sm:$0xff]   ;;  %v757_v21 = vld [vmem:[%s1036_s0 + $0x1c] ss:$12 sps:$4 sm:$0xff]  }
   0x8   :  { %628 = vmatprep.subr.bf16.mxu0 %v738_v4  ;;  %720 = vmatprep.subr.bf16.mxu1 %v738_v4  ;;  %v753_v20 = vld [vmem:[%s1036_s0 + $0x90] ss:$12 sps:$4 sm:$0xff]   ;;  %v759_v22 = vld [vmem:[%s1036_s0 + $0xac] ss:$12 sps:$4 sm:$0xff]   ;;  %v762_v25 = vld [vmem:[%s1036_s0 + $0xa8] ss:$12 sps:$4 sm:$0xff]  }
   0x9   :  { %v763_v23 = vld [vmem:[%s1035_s1 + $0x88] sm:$0xff]   ;;  %v761_v24 = vld [vmem:[%s1036_s0 + $0x18] ss:$12 sps:$4 sm:$0xff]   ;;  %v764_v26 = vld [vmem:[%s1036_s0 + $0x34] ss:$12 sps:$4 sm:$0xff]  }
   0xa   :  { %v766_v27 = vld [vmem:[%s1036_s0 + $0x8] ss:$12 sps:$4 sm:$0xff]   ;;  %v767_v28 = vld [vmem:[%s1036_s0 + $0x30] ss:$12 sps:$4 sm:$0xff]   ;;  %v768_v29 = vld [vmem:[%s1036_s0 + $0x20] ss:$12 sps:$4 sm:$0xff]  }
   0xb   :  { %629 = vmatpush3.bf16.msra.mxu0 %v739_v5  ;;  %728 = vmatpush3.bf16.msra.mxu1 %v739_v5  ;;  %v769_v30 = vld [vmem:[%s1036_s0 + $0x4c] ss:$12 sps:$4 sm:$0xff]   ;;  %v772_v32 = vld [vmem:[%s1036_s0 + $0x48] ss:$12 sps:$4 sm:$0xff]   ;;  %v773_v33 = vld [vmem:[%s1036_s0 + $0x50] ss:$12 sps:$4 sm:$0xff]  }
   0xc   :  { %630 = vmatprep.subr.bf16.mxu0 %v740_v6  ;;  %721 = vmatprep.subr.bf16.mxu1 %v740_v6  ;;  %v771_v31 = vld [vmem:[%s1036_s0 + $0x38] ss:$12 sps:$4 sm:$0xff]   ;;  %v776_v35 = vld [vmem:[%s1036_s0 + $0x68] ss:$12 sps:$4 sm:$0xff]   ;;  %v777_v36 = vld [vmem:[%s1036_s0 + $0x60] ss:$12 sps:$4 sm:$0xff]  }
   0xd   :  { %v774_v34 = vld [vmem:[%s1036_s0 + $0x64] ss:$12 sps:$4 sm:$0xff]   ;;  %v778_v37 = vld [vmem:[%s1036_s0 + $0x80] ss:$12 sps:$4 sm:$0xff]   ;;  %v779_v38 = vld [vmem:[%s1036_s0 + $0x7c] ss:$12 sps:$4 sm:$0xff]  }
   0xe   :  { %v781_v39 = vld [vmem:[%s1036_s0 + $0x98] ss:$12 sps:$4 sm:$0xff]   ;;  %v783_v41 = vld [vmem:[%s1036_s0 + $0xb0] ss:$12 sps:$4 sm:$0xff]   ;;  %v949_v2 = vld [vmem:[%s1037_s2] ss:$0 sm:$0xff] }
   0xf   :  { %631 = vmatpush3.bf16.msra.mxu0 %v741_v7  ;;  %729 = vmatpush3.bf16.msra.mxu1 %v741_v7  ;;  %v782_v40 = vld [vmem:[%s1036_s0 + $0x78] ss:$12 sps:$4 sm:$0xff]  }
  0x10   :  { %632 = vmatprep.subr.bf16.mxu0 %v742_v8  ;;  %722 = vmatprep.subr.bf16.mxu1 %v742_v8 }
  0x13   :  { %633 = vmatpush3.bf16.msra.mxu0 %v743_v9  ;;  %730 = vmatpush3.bf16.msra.mxu1 %v743_v9 }
  0x14   :  { %634 = vmatprep.subr.bf16.mxu0 %v744_v10  ;;  %723 = vmatprep.subr.bf16.mxu1 %v744_v10 }
  0x17   :  { %635 = vmatpush3.bf16.msra.mxu0 %v745_v13  ;;  %731 = vmatpush3.bf16.msra.mxu1 %v745_v13 }
  0x18   :  { %636 = vmatprep.subr.bf16.mxu0 %v746_v14  ;;  %724 = vmatprep.subr.bf16.mxu1 %v746_v14 }
  0x1b   :  { %637 = vmatpush3.bf16.msra.mxu0 %v747_v15  ;;  %732 = vmatpush3.bf16.msra.mxu1 %v747_v15 }
  0x1c   :  { %638 = vmatprep.subr.bf16.mxu0 %v748_v16  ;;  %725 = vmatprep.subr.bf16.mxu1 %v748_v16 }
  0x1f   :  { %639 = vmatpush3.bf16.msra.mxu0 %v749_v17  ;;  %733 = vmatpush3.bf16.msra.mxu1 %v749_v17 }
  0x20   :  { %698 = vmatprep.subr.bf16.mxu1 %v756_v19 }
  0x22   :  { %376 = vmatmul.mubr.bf16.vlgmr.msra.gmra.mrb[0].mxu0 %v750_v18  ;;  %424 = vmatmul.mubr.bf16.vlgmr.msra.gmra.mrb[0].mxu1 %v753_v20 }
  0x23   :  { %699 = vmatpush3.bf16.msra.mxu1 %v756_v19  ;;  %383 = vmatprep.mubr.bf16.mxu0 %v757_v21 }
  0x24   :  { %431 = vmatprep.mubr.bf16.mxu1 %v759_v22  ;;  %700 = vmatprep.subr.bf16.mxu1 %v763_v23 }
  0x27   :  { %701 = vmatpush3.bf16.msra.mxu1 %v763_v23 }
  0x2a   :  { %384 = vmatmul.mubr.bf16.gmra.mrb[4].mxu0 %v761_v24  ;;  %432 = vmatmul.mubr.bf16.gmra.mrb[4].mxu1 %v762_v25 }
  0x2b   :  { %391 = vmatprep.mubr.bf16.mxu0 %v764_v26  ;;  %702 = vmatprep.mubr.msk.bf16.mxu1 %vm318_vm0, %v766_v27 }
  0x32   :  { %392 = vmatmul.mubr.bf16.gmra.mrb[8].mxu0 %v767_v28  ;;  %703 = vmatmul.mubr.msk.bf16.vlgmr.msra.gmra.mrb[8].mxu1 %vm318_vm0, %v768_v29 }
  0x33   :  { %399 = vmatprep.mubr.bf16.mxu0 %v769_v30  ;;  %706 = vmatprep.mubr.msk.bf16.mxu1 %vm318_vm0, %v771_v31 }
  0x3a   :  { %400 = vmatmul.mubr.bf16.gmra.mrb[12].mxu0 %v772_v32  ;;  %707 = vmatmul.mubr.msk.bf16.gmra.mrb[12].mxu1 %vm318_vm0, %v773_v33 }
  0x3b   :  { %407 = vmatprep.mubr.bf16.mxu0 %v774_v34  ;;  %710 = vmatprep.mubr.msk.bf16.mxu1 %vm318_vm0, %v776_v35 }
  0x42   :  { %408 = vmatmul.mubr.bf16.gmra.mrb[16].mxu0 %v777_v36  ;;  %711 = vmatmul.mubr.msk.bf16.gmra.mrb[16].mxu1 %vm318_vm0, %v778_v37 }
  0x43   :  { %415 = vmatprep.mubr.bf16.mxu0 %v779_v38  ;;  %714 = vmatprep.mubr.msk.bf16.mxu1 %vm318_vm0, %v781_v39 }
  0x4a   :  { %416 = vmatmul.mubr.bf16.gmra.mrb[20].mxu0 %v782_v40  ;;  %715 = vmatmul.mubr.msk.bf16.gmra.mrb[20].mxu1 %vm318_vm0, %v783_v41 }
  0xf5   :  { %v640_v42 = vpop.f32.mrb[0].mxu0  ;;  %v676_v43 = vpop.f32.mrb[0].mxu1 }
  0xf6   :  { %v641_v44 = vpop.f32.mrb[1].mxu0  ;;  %v677_v45 = vpop.f32.mrb[1].mxu1 }
  0xf7   :  { %v642_v46 = vadd.f32 %v641_v44, %v640_v42  ;;  %v643_v47 = vpop.f32.mrb[2].mxu0  ;;  %v938_v48 = vadd.f32 %v677_v45, %v676_v43  ;;  %v679_v49 = vpop.f32.mrb[2].mxu1 }
  0xf8   :  { %v644_v50 = vpop.f32.mrb[3].mxu0  ;;  %v680_v51 = vpop.f32.mrb[3].mxu1 }
  0xf9   :  { %v645_v52 = vadd.f32 %v644_v50, %v643_v47  ;;  %v940_v53 = vadd.f32 %v680_v51, %v679_v49  ;;  %v378_v6 = vadd.f32 %v642_v46, %v949_v2 }
  0xfb   :  { %v381_v15 = vadd.f32 %v645_v52, %v949_v2 }
  0xfd   :  { %v646_v54 = vpop.f32.mrb[4].mxu0  ;;  %v682_v55 = vpop.f32.mrb[4].mxu1 }
  0xfe   :  { %v647_v56 = vpop.f32.mrb[5].mxu0  ;;  %v683_v57 = vpop.f32.mrb[5].mxu1 }
  0xff   :  { %v648_v58 = vadd.f32 %v647_v56, %v646_v54  ;;  %v649_v59 = vpop.f32.mrb[6].mxu0  ;;  %v942_v60 = vadd.f32 %v683_v57, %v682_v55  ;;  %v685_v61 = vpop.f32.mrb[6].mxu1 }
 0x100   :  { %v650_v62 = vpop.f32.mrb[7].mxu0  ;;  %v686_v63 = vpop.f32.mrb[7].mxu1 }
 0x101   :  { %v651_v0 = vadd.f32 %v650_v62, %v649_v59  ;;  %v944_v1 = vadd.f32 %v686_v63, %v685_v61  ;;  %v386_v3 = vadd.f32 %v648_v58, %v949_v2  ;;  %v434_v63 = vadd.f32 %v942_v60, %v949_v2 }
 0x103   :  { %v389_v10 = vadd.f32 %v651_v0, %v949_v2 }
 0x105   :  { %v652_v4 = vpop.f32.mrb[8].mxu0  ;;  %v704_v5 = vpop.f32.mrb[8].mxu1 }
 0x106   :  { %v483_v7 = vadd.f32 %v704_v5, %v386_v3  ;;  %v653_v8 = vpop.f32.mrb[9].mxu0  ;;  %v474_v9 = vpop.f32.mrb[9].mxu1 }
 0x107   :  { %v654_v11 = vadd.f32 %v653_v8, %v652_v4  ;;  %v475_v12 = vadd.f32 %v474_v9, %v378_v6  ;;  %v655_v13 = vpop.f32.mrb[10].mxu0  ;;  %v705_v14 = vpop.f32.mrb[10].mxu1  ;;  %v426_v6 = vadd.f32 %v938_v48, %v949_v2 }
 0x108   :  { %v539_v16 = vmax.f32 %v483_v7, 0.0  ;;  %v486_v17 = vadd.f32 %v705_v14, %v389_v10  ;;  %v656_v18 = vpop.f32.mrb[11].mxu0  ;;  %v477_v19 = vpop.f32.mrb[11].mxu1  ;;  %v437_v10 = vadd.f32 %v944_v1, %v949_v2 }
 0x109   :  { %v537_v20 = vmax.f32 %v475_v12, 0.0  ;;  %v657_v21 = vadd.f32 %v656_v18, %v655_v13  ;;  %v478_v22 = vadd.f32 %v477_v19, %v381_v15  ;;  %v394_v27 = vadd.f32 %v654_v11, %v949_v2 }
 0x10a   :  { %555 = vst.msk [vmem:[%s1038_s3 + $0x10] sm:$0xff] %vm318_vm0, %v539_v16  ;;  %v540_v23 = vmax.f32 %v486_v17, 0.0  ;;  %v429_v15 = vadd.f32 %v940_v53, %v949_v2 }
 0x10b   :  { %553 = vst.msk [vmem:[%s1038_s3] sm:$0xff] %vm318_vm0, %v537_v20  ;;  %v538_v24 = vmax.f32 %v478_v22, 0.0  ;;  %v397_v34 = vadd.f32 %v657_v21, %v949_v2 }
 0x10c   :  { %556 = vst.msk [vmem:[%s1038_s3 + $0x18] sm:$0xff] %vm318_vm0, %v540_v23 }
 0x10d   :  { %554 = vst.msk [vmem:[%s1038_s3 + $0x8] sm:$0xff] %vm318_vm0, %v538_v24  ;;  %v658_v25 = vpop.f32.mrb[12].mxu0  ;;  %v708_v26 = vpop.f32.mrb[12].mxu1 }
 0x10e   :  { %v659_v28 = vpop.f32.mrb[13].mxu0  ;;  %v490_v29 = vpop.f32.mrb[13].mxu1 }
 0x10f   :  { %v660_v30 = vadd.f32 %v659_v28, %v658_v25  ;;  %v491_v31 = vadd.f32 %v490_v29, %v394_v27  ;;  %v661_v32 = vpop.f32.mrb[14].mxu0  ;;  %v709_v33 = vpop.f32.mrb[14].mxu1 }
 0x110   :  { %v662_v35 = vpop.f32.mrb[15].mxu0  ;;  %v493_v36 = vpop.f32.mrb[15].mxu1 }
 0x111   :  { %v402_v37 = vadd.f32 %v660_v30, %v949_v2  ;;  %v541_v38 = vmax.f32 %v491_v31, 0.0  ;;  %v663_v39 = vadd.f32 %v662_v35, %v661_v32  ;;  %v494_v40 = vadd.f32 %v493_v36, %v397_v34 }
 0x113   :  { %v499_v41 = vadd.f32 %v708_v26, %v402_v37  ;;  %557 = vst.msk [vmem:[%s1038_s3 + $0x20] sm:$0xff] %vm318_vm0, %v541_v38  ;;  %v405_v42 = vadd.f32 %v663_v39, %v949_v2  ;;  %v542_v43 = vmax.f32 %v494_v40, 0.0 }
 0x115   :  { %v543_v44 = vmax.f32 %v499_v41, 0.0  ;;  %v502_v45 = vadd.f32 %v709_v33, %v405_v42  ;;  %558 = vst.msk [vmem:[%s1038_s3 + $0x28] sm:$0xff] %vm318_vm0, %v542_v43  ;;  %v664_v46 = vpop.f32.mrb[16].mxu0  ;;  %v712_v47 = vpop.f32.mrb[16].mxu1 }
 0x116   :  { %v665_v49 = vpop.f32.mrb[17].mxu0  ;;  %v506_v50 = vpop.f32.mrb[17].mxu1 }
 0x117   :  { %559 = vst.msk [vmem:[%s1038_s3 + $0x30] sm:$0xff] %vm318_vm0, %v543_v44  ;;  %v544_v51 = vmax.f32 %v502_v45, 0.0  ;;  %v666_v52 = vadd.f32 %v665_v49, %v664_v46  ;;  %v667_v54 = vpop.f32.mrb[18].mxu0  ;;  %v713_v55 = vpop.f32.mrb[18].mxu1 }
 0x118   :  { %v668_v56 = vpop.f32.mrb[19].mxu0  ;;  %v509_v57 = vpop.f32.mrb[19].mxu1 }
 0x119   :  { %560 = vst.msk [vmem:[%s1038_s3 + $0x38] sm:$0xff] %vm318_vm0, %v544_v51  ;;  %v410_v58 = vadd.f32 %v666_v52, %v949_v2  ;;  %v669_v59 = vadd.f32 %v668_v56, %v667_v54 }
 0x11b   :  { %v507_v61 = vadd.f32 %v506_v50, %v410_v58  ;;  %v413_v62 = vadd.f32 %v669_v59, %v949_v2 }
 0x11d   :  { %v545_v0 = vmax.f32 %v507_v61, 0.0  ;;  %v510_v3 = vadd.f32 %v509_v57, %v413_v62  ;;  %v670_v4 = vpop.f32.mrb[20].mxu0  ;;  %v716_v5 = vpop.f32.mrb[20].mxu1 }
 0x11e   :  { %v531_v7 = vadd.f32 %v716_v5, %v434_v63  ;;  %v671_v8 = vpop.f32.mrb[21].mxu0  ;;  %v522_v9 = vpop.f32.mrb[21].mxu1 }
 0x11f   :  { %561 = vst.msk [vmem:[%s1038_s3 + $0x40] sm:$0xff] %vm318_vm0, %v545_v0  ;;  %v546_v11 = vmax.f32 %v510_v3, 0.0  ;;  %v672_v60 = vadd.f32 %v671_v8, %v670_v4  ;;  %v523_v12 = vadd.f32 %v522_v9, %v426_v6  ;;  %v673_v13 = vpop.f32.mrb[22].mxu0  ;;  %v717_v14 = vpop.f32.mrb[22].mxu1 }
 0x120   :  { %v551_v48 = vmax.f32 %v531_v7, 0.0  ;;  %v534_v16 = vadd.f32 %v717_v14, %v437_v10  ;;  %v674_v17 = vpop.f32.mrb[23].mxu0  ;;  %v525_v18 = vpop.f32.mrb[23].mxu1 }
 0x121   :  { %562 = vst.msk [vmem:[%s1038_s3 + $0x48] sm:$0xff] %vm318_vm0, %v546_v11  ;;  %v418_v1 = vadd.f32 %v672_v60, %v949_v2  ;;  %v549_v19 = vmax.f32 %v523_v12, 0.0  ;;  %v675_v20 = vadd.f32 %v674_v17, %v673_v13  ;;  %v526_v21 = vadd.f32 %v525_v18, %v429_v15 }
 0x122   :  { %567 = vst.msk [vmem:[%s1038_s3 + $0x70] sm:$0xff] %vm318_vm0, %v551_v48  ;;  %v552_v53 = vmax.f32 %v534_v16, 0.0 }
 0x123   :  { %v515_v22 = vadd.f32 %v712_v47, %v418_v1  ;;  %565 = vst.msk [vmem:[%s1038_s3 + $0x60] sm:$0xff] %vm318_vm0, %v549_v19  ;;  %v421_v23 = vadd.f32 %v675_v20, %v949_v2  ;;  %v550_v24 = vmax.f32 %v526_v21, 0.0 }
 0x124   :  { %568 = vst.msk [vmem:[%s1038_s3 + $0x78] sm:$0xff] %vm318_vm0, %v552_v53 }
 0x125   :  { %v547_v25 = vmax.f32 %v515_v22, 0.0  ;;  %v518_v26 = vadd.f32 %v713_v55, %v421_v23  ;;  %566 = vst.msk [vmem:[%s1038_s3 + $0x68] sm:$0xff] %vm318_vm0, %v550_v24 }
 0x127   :  { %563 = vst.msk [vmem:[%s1038_s3 + $0x50] sm:$0xff] %vm318_vm0, %v547_v25  ;;  %v548_v27 = vmax.f32 %v518_v26, 0.0 }
 0x129   :  { %564 = vst.msk [vmem:[%s1038_s3 + $0x58] sm:$0xff] %vm318_vm0, %v548_v27 }

// kernel: rebuildnet_forward.29
= control target key start
LH: loop header
LB: loop body
LE: loop exit
PB: predicated region body
PF: predicated region fallthrough
CT: control target
= control target key end

     0   :  { %vm204_vm0 = vcmask 261120   ;;  %vm313_vm1 = vcmask 523264   ;;  %s526_s1 = inlined_call_operand.vmem [shape: bf16[288,64], index: 1, kind: input, shape index: {}]   ;;  %s527_s0 = inlined_call_operand.vmem [shape: bf16[32,288], index: 0, kind: input, shape index: {}]   ;;  %s528_s2 = inlined_call_operand.vmem [shape: f32[1,64], index: 2, kind: input, shape index: {}]   ;;  %s529_s3 = inlined_call_operand.vmem [shape: f32[32,64], index: 3, kind: output, shape index: {}]  }
   0x1   :  { %v389_v0 = vld [vmem:[%s526_s1 + $0x40] sm:$0xff]   ;;  %v391_v2 = vld [vmem:[%s526_s1 + $0x48] sm:$0xff]   ;;  %v393_v4 = vld [vmem:[%s526_s1 + $0x50] sm:$0xff]  }
   0x2   :  { %v390_v1 = vld [vmem:[%s526_s1] sm:$0xff]   ;;  %349 = vmatprep.subr.bf16.mxu0 %v389_v0  ;;  %v392_v3 = vld [vmem:[%s526_s1 + $0x8] sm:$0xff]   ;;  %v394_v5 = vld [vmem:[%s526_s1 + $0x10] sm:$0xff]  }
   0x3   :  { %350 = vmatpush3.bf16.msra.mxu0 %v390_v1  ;;  %v395_v6 = vld [vmem:[%s526_s1 + $0x58] sm:$0xff]   ;;  %v397_v8 = vld [vmem:[%s526_s1 + $0x60] sm:$0xff]   ;;  %v399_v11 = vld [vmem:[%s526_s1 + $0x68] sm:$0xff]  }
   0x4   :  { %351 = vmatprep.subr.bf16.mxu0 %v391_v2  ;;  %v396_v7 = vld [vmem:[%s526_s1 + $0x18] sm:$0xff]   ;;  %v398_v9 = vld [vmem:[%s526_s1 + $0x20] sm:$0xff]   ;;  %v400_v12 = vld [vmem:[%s526_s1 + $0x28] sm:$0xff]  }
   0x5   :  { %v404_v10 = vld [vmem:[%s526_s1 + $0x80] sm:$0xff]   ;;  %v401_v13 = vld [vmem:[%s526_s1 + $0x70] sm:$0xff]   ;;  %v409_v15 = vld [vmem:[%s526_s1 + $0x88] sm:$0xff]  }
   0x6   :  { %381 = vmatprep.subr.bf16.mxu1 %v404_v10  ;;  %v408_v14 = vld [vmem:[%s527_s0 + $0x4] ss:$12 sps:$4 sm:$0xff]   ;;  %v410_v16 = vld [vmem:[%s527_s0 + $0x8] ss:$12 sps:$4 sm:$0xff]   ;;  %v411_v17 = vld [vmem:[%s527_s0 + $0x20] ss:$12 sps:$4 sm:$0xff]  }
   0x7   :  { %352 = vmatpush3.bf16.msra.mxu0 %v392_v3  ;;  %382 = vmatpush3.bf16.msra.mxu1 %v404_v10  ;;  %v402_v18 = vld [vmem:[%s526_s1 + $0x30] sm:$0xff]   ;;  %v403_v19 = vld [vmem:[%s526_s1 + $0x78] sm:$0xff]   ;;  %v406_v21 = vld [vmem:[%s527_s0] ss:$12 sps:$4 sm:$0xff]  }
   0x8   :  { %353 = vmatprep.subr.bf16.mxu0 %v393_v4  ;;  %243 = vmatprep.mubr.bf16.mxu0 %v408_v14  ;;  %v405_v20 = vld [vmem:[%s526_s1 + $0x38] sm:$0xff]   ;;  %v322_v30 = vld [vmem:[%s528_s2] ss:$0 sm:$0xff] }
   0x9   :  { %383 = vmatprep.subr.bf16.mxu1 %v409_v15  ;;  %385 = vmatprep.mubr.msk.bf16.mxu1 %vm204_vm0, %v410_v16  ;;  %v412_v22 = vld [vmem:[%s527_s0 + $0x1c] ss:$12 sps:$4 sm:$0xff]   ;;  %v414_v23 = vld [vmem:[%s527_s0 + $0x18] ss:$12 sps:$4 sm:$0xff]  }
   0xb   :  { %354 = vmatpush3.bf16.msra.mxu0 %v394_v5  ;;  %384 = vmatpush3.bf16.msra.mxu1 %v409_v15 }
   0xc   :  { %355 = vmatprep.subr.bf16.mxu0 %v395_v6 }
   0xe   :  { %386 = vmatmul.mubr.msk.bf16.vlgmr.msra.gmra.mrb[0].mxu1 %vm204_vm0, %v411_v17 }
   0xf   :  { %356 = vmatpush3.bf16.msra.mxu0 %v396_v7 }
  0x10   :  { %357 = vmatprep.subr.bf16.mxu0 %v397_v8 }
  0x13   :  { %358 = vmatpush3.bf16.msra.mxu0 %v398_v9 }
  0x14   :  { %359 = vmatprep.subr.bf16.mxu0 %v399_v11 }
  0x17   :  { %360 = vmatpush3.bf16.msra.mxu0 %v400_v12 }
  0x18   :  { %361 = vmatprep.subr.bf16.mxu0 %v401_v13 }
  0x1b   :  { %362 = vmatpush3.bf16.msra.mxu0 %v402_v18 }
  0x1c   :  { %363 = vmatprep.subr.bf16.mxu0 %v403_v19 }
  0x1f   :  { %364 = vmatpush3.bf16.msra.mxu0 %v405_v20 }
  0x22   :  { %244 = vmatmul.mubr.bf16.vlgmr.msra.gmra.mrb[0].mxu0 %v406_v21 }
  0x23   :  { %251 = vmatprep.mubr.bf16.mxu0 %v412_v22 }
  0x2a   :  { %252 = vmatmul.mubr.bf16.gmra.mrb[4].mxu0 %v414_v23 }
  0xe1   :  { %v387_v24 = vpop.f32.mrb[0].mxu1 }
  0xe2   :  { %v294_v25 = vpop.f32.mrb[1].mxu1 }
  0xe3   :  { %v388_v26 = vpop.f32.mrb[2].mxu1 }
  0xe4   :  { %v297_v27 = vpop.f32.mrb[3].mxu1 }
  0xf5   :  { %v365_v28 = vpop.f32.mrb[0].mxu0 }
  0xf6   :  { %v366_v29 = vpop.f32.mrb[1].mxu0 }
  0xf7   :  { %v367_v31 = vadd.f32 %v366_v29, %v365_v28  ;;  %v368_v32 = vpop.f32.mrb[2].mxu0 }
  0xf8   :  { %v369_v33 = vpop.f32.mrb[3].mxu0 }
  0xf9   :  { %v370_v34 = vadd.f32 %v369_v33, %v368_v32  ;;  %v246_v35 = vadd.f32 %v367_v31, %v322_v30 }
  0xfb   :  { %v295_v36 = vadd.f32 %v294_v25, %v246_v35  ;;  %v249_v37 = vadd.f32 %v370_v34, %v322_v30 }
  0xfd   :  { %v309_v38 = vmax.f32 %v295_v36, 0.0  ;;  %v298_v39 = vadd.f32 %v297_v27, %v249_v37  ;;  %v371_v40 = vpop.f32.mrb[4].mxu0 }
  0xfe   :  { %v372_v41 = vpop.f32.mrb[5].mxu0 }
  0xff   :  { %314 = vst.msk [vmem:[%s529_s3] sm:$0xff] %vm313_vm1, %v309_v38  ;;  %v310_v42 = vmax.f32 %v298_v39, 0.0  ;;  %v373_v43 = vadd.f32 %v372_v41, %v371_v40  ;;  %v374_v44 = vpop.f32.mrb[6].mxu0 }
 0x100   :  { %v375_v45 = vpop.f32.mrb[7].mxu0 }
 0x101   :  { %315 = vst.msk [vmem:[%s529_s3 + $0x8] sm:$0xff] %vm313_vm1, %v310_v42  ;;  %v254_v46 = vadd.f32 %v373_v43, %v322_v30  ;;  %v376_v47 = vadd.f32 %v375_v45, %v374_v44 }
 0x103   :  { %v303_v48 = vadd.f32 %v387_v24, %v254_v46  ;;  %v257_v49 = vadd.f32 %v376_v47, %v322_v30 }
 0x105   :  { %v311_v50 = vmax.f32 %v303_v48, 0.0  ;;  %v306_v51 = vadd.f32 %v388_v26, %v257_v49 }
 0x107   :  { %316 = vst.msk [vmem:[%s529_s3 + $0x10] sm:$0xff] %vm313_vm1, %v311_v50  ;;  %v312_v52 = vmax.f32 %v306_v51, 0.0 }
 0x109   :  { %317 = vst.msk [vmem:[%s529_s3 + $0x18] sm:$0xff] %vm313_vm1, %v312_v52 }

// kernel: rebuildnet_forward.30
= control target key start
LH: loop header
LB: loop body
LE: loop exit
PB: predicated region body
PF: predicated region fallthrough
CT: control target
= control target key end

     0   :  { %vm372_vm0 = vcmask 523264   ;;  %s890_s1 = inlined_call_operand.vmem [shape: bf16[576,64], index: 1, kind: input, shape index: {}]   ;;  %s891_s0 = inlined_call_operand.vmem [shape: bf16[32,576], index: 0, kind: input, shape index: {}]   ;;  %s892_s2 = inlined_call_operand.vmem [shape: f32[1,64], index: 2, kind: input, shape index: {}]   ;;  %s893_s3 = inlined_call_operand.vmem [shape: f32[32,64], index: 3, kind: output, shape index: {}]  }
   0x1   :  { %v661_v0 = vld [vmem:[%s890_s1 + $0x40] sm:$0xff]   ;;  %v665_v4 = vld [vmem:[%s890_s1 + $0x48] sm:$0xff]   ;;  %v669_v8 = vld [vmem:[%s890_s1 + $0x50] sm:$0xff]  }
   0x2   :  { %v662_v1 = vld [vmem:[%s890_s1] sm:$0xff]   ;;  %587 = vmatprep.subr.bf16.mxu0 %v661_v0  ;;  %v666_v5 = vld [vmem:[%s890_s1 + $0x8] sm:$0xff]   ;;  %v670_v9 = vld [vmem:[%s890_s1 + $0x10] sm:$0xff]  }
   0x3   :  { %v663_v2 = vld [vmem:[%s890_s1 + $0xc0] sm:$0xff]   ;;  %588 = vmatpush3.bf16.msra.mxu0 %v662_v1  ;;  %v667_v6 = vld [vmem:[%s890_s1 + $0xc8] sm:$0xff]   ;;  %v671_v10 = vld [vmem:[%s890_s1 + $0xd0] sm:$0xff]  }
   0x4   :  { %v664_v3 = vld [vmem:[%s890_s1 + $0x80] sm:$0xff]   ;;  %615 = vmatprep.subr.bf16.mxu1 %v663_v2  ;;  %589 = vmatprep.subr.bf16.mxu0 %v665_v4  ;;  %v668_v7 = vld [vmem:[%s890_s1 + $0x88] sm:$0xff]   ;;  %v672_v11 = vld [vmem:[%s890_s1 + $0x90] sm:$0xff]  }
   0x5   :  { %616 = vmatpush3.bf16.msra.mxu1 %v664_v3  ;;  %v673_v12 = vld [vmem:[%s890_s1 + $0x58] sm:$0xff]   ;;  %v677_v16 = vld [vmem:[%s890_s1 + $0x60] sm:$0xff]   ;;  %v681_v20 = vld [vmem:[%s890_s1 + $0x68] sm:$0xff]  }
   0x6   :  { %617 = vmatprep.subr.bf16.mxu1 %v667_v6  ;;  %v674_v13 = vld [vmem:[%s890_s1 + $0x18] sm:$0xff]   ;;  %v678_v17 = vld [vmem:[%s890_s1 + $0x20] sm:$0xff]   ;;  %v682_v21 = vld [vmem:[%s890_s1 + $0x28] sm:$0xff]  }
   0x7   :  { %590 = vmatpush3.bf16.msra.mxu0 %v666_v5  ;;  %v675_v14 = vld [vmem:[%s890_s1 + $0xd8] sm:$0xff]   ;;  %v679_v18 = vld [vmem:[%s890_s1 + $0xe0] sm:$0xff]   ;;  %v683_v22 = vld [vmem:[%s890_s1 + $0xe8] sm:$0xff]  }
   0x8   :  { %591 = vmatprep.subr.bf16.mxu0 %v669_v8  ;;  %v676_v15 = vld [vmem:[%s890_s1 + $0x98] sm:$0xff]   ;;  %v680_v19 = vld [vmem:[%s890_s1 + $0xa0] sm:$0xff]   ;;  %v684_v23 = vld [vmem:[%s890_s1 + $0xa8] sm:$0xff]  }
   0x9   :  { %618 = vmatpush3.bf16.msra.mxu1 %v668_v7  ;;  %v685_v24 = vld [vmem:[%s890_s1 + $0x70] sm:$0xff]   ;;  %v689_v28 = vld [vmem:[%s890_s1 + $0x78] sm:$0xff]   ;;  %v696_v34 = vld [vmem:[%s890_s1 + $0x100] sm:$0xff]  }
   0xa   :  { %619 = vmatprep.subr.bf16.mxu1 %v671_v10  ;;  %v686_v25 = vld [vmem:[%s890_s1 + $0x30] sm:$0xff]   ;;  %v690_v29 = vld [vmem:[%s890_s1 + $0x38] sm:$0xff]   ;;  %v699_v36 = vld [vmem:[%s891_s0 + $0xc] ss:$20 sps:$4 sm:$0xff]  }
   0xb   :  { %592 = vmatpush3.bf16.msra.mxu0 %v670_v9  ;;  %v687_v26 = vld [vmem:[%s890_s1 + $0xf0] sm:$0xff]   ;;  %v691_v30 = vld [vmem:[%s890_s1 + $0xf8] sm:$0xff]   ;;  %v700_v37 = vld [vmem:[%s890_s1 + $0x108] sm:$0xff]   ;;  %460 = vmatprep.mubr.bf16.mxu1 %v699_v36 }
   0xc   :  { %593 = vmatprep.subr.bf16.mxu0 %v673_v12  ;;  %v688_v27 = vld [vmem:[%s890_s1 + $0xb0] sm:$0xff]   ;;  %v694_v32 = vld [vmem:[%s891_s0 + $0x4] ss:$20 sps:$4 sm:$0xff]   ;;  %v697_v35 = vld [vmem:[%s891_s0 + $0x8] ss:$20 sps:$4 sm:$0xff]  }
   0xd   :  { %620 = vmatpush3.bf16.msra.mxu1 %v672_v11  ;;  %v692_v31 = vld [vmem:[%s891_s0] ss:$20 sps:$4 sm:$0xff]   ;;  %v695_v33 = vld [vmem:[%s890_s1 + $0xb8] sm:$0xff]   ;;  %411 = vmatprep.mubr.bf16.mxu0 %v694_v32  ;;  %v707_v42 = vld [vmem:[%s891_s0 + $0x30] ss:$20 sps:$4 sm:$0xff]  }
   0xe   :  { %621 = vmatprep.subr.bf16.mxu1 %v675_v14  ;;  %v701_v38 = vld [vmem:[%s891_s0 + $0x2c] ss:$20 sps:$4 sm:$0xff]   ;;  %v703_v39 = vld [vmem:[%s891_s0 + $0x28] ss:$20 sps:$4 sm:$0xff]   ;;  %v704_v40 = vld [vmem:[%s890_s1 + $0x110] sm:$0xff]  }
   0xf   :  { %594 = vmatpush3.bf16.msra.mxu0 %v674_v13  ;;  %v705_v41 = vld [vmem:[%s891_s0 + $0x34] ss:$20 sps:$4 sm:$0xff]   ;;  %v708_v43 = vld [vmem:[%s890_s1 + $0x118] sm:$0xff]   ;;  %v709_v44 = vld [vmem:[%s891_s0 + $0x10] ss:$20 sps:$4 sm:$0xff]  }
  0x10   :  { %595 = vmatprep.subr.bf16.mxu0 %v677_v16  ;;  %v710_v45 = vld [vmem:[%s891_s0 + $0x38] ss:$20 sps:$4 sm:$0xff]   ;;  %v538_v47 = vld [vmem:[%s892_s2] ss:$0 sm:$0xff] }
  0x11   :  { %622 = vmatpush3.bf16.msra.mxu1 %v676_v15 }
  0x12   :  { %623 = vmatprep.subr.bf16.mxu1 %v679_v18 }
  0x13   :  { %596 = vmatpush3.bf16.msra.mxu0 %v678_v17 }
  0x14   :  { %597 = vmatprep.subr.bf16.mxu0 %v681_v20 }
  0x15   :  { %624 = vmatpush3.bf16.msra.mxu1 %v680_v19 }
  0x16   :  { %625 = vmatprep.subr.bf16.mxu1 %v683_v22 }
  0x17   :  { %598 = vmatpush3.bf16.msra.mxu0 %v682_v21 }
  0x18   :  { %599 = vmatprep.subr.bf16.mxu0 %v685_v24 }
  0x19   :  { %626 = vmatpush3.bf16.msra.mxu1 %v684_v23 }
  0x1a   :  { %627 = vmatprep.subr.bf16.mxu1 %v687_v26 }
  0x1b   :  { %600 = vmatpush3.bf16.msra.mxu0 %v686_v25 }
  0x1c   :  { %601 = vmatprep.subr.bf16.mxu0 %v689_v28 }
  0x1d   :  { %628 = vmatpush3.bf16.msra.mxu1 %v688_v27 }
  0x1e   :  { %629 = vmatprep.subr.bf16.mxu1 %v691_v30 }
  0x1f   :  { %602 = vmatpush3.bf16.msra.mxu0 %v690_v29 }
  0x20   :  { %649 = vmatprep.subr.bf16.mxu0 %v696_v34 }
  0x21   :  { %630 = vmatpush3.bf16.msra.mxu1 %v695_v33 }
  0x22   :  { %412 = vmatmul.mubr.bf16.vlgmr.msra.gmra.mrb[0].mxu0 %v692_v31 }
  0x23   :  { %650 = vmatpush3.bf16.msra.mxu0 %v696_v34  ;;  %419 = vmatprep.mubr.bf16.mxu0 %v701_v38 }
  0x24   :  { %461 = vmatmul.mubr.bf16.vlgmr.msra.gmra.mrb[0].mxu1 %v697_v35  ;;  %651 = vmatprep.subr.bf16.mxu0 %v700_v37 }
  0x25   :  { %468 = vmatprep.mubr.bf16.mxu1 %v705_v41 }
  0x27   :  { %652 = vmatpush3.bf16.msra.mxu0 %v700_v37 }
  0x28   :  { %653 = vmatprep.subr.bf16.mxu0 %v704_v40 }
  0x2a   :  { %420 = vmatmul.mubr.bf16.gmra.mrb[4].mxu0 %v703_v39 }
  0x2b   :  { %657 = vmatprep.mubr.msk.bf16.mxu0 %vm372_vm0, %v709_v44  ;;  %654 = vmatpush3.bf16.msra.mxu0 %v704_v40 }
  0x2c   :  { %469 = vmatmul.mubr.bf16.gmra.mrb[4].mxu1 %v707_v42  ;;  %655 = vmatprep.subr.bf16.mxu0 %v708_v43 }
  0x2f   :  { %656 = vmatpush3.bf16.msra.mxu0 %v708_v43 }
  0x32   :  { %658 = vmatmul.mubr.msk.bf16.vlgmr.msra.gmra.mrb[8].mxu0 %vm372_vm0, %v710_v45 }
  0xf5   :  { %v603_v46 = vpop.f32.mrb[0].mxu0 }
  0xf6   :  { %v604_v48 = vpop.f32.mrb[1].mxu0 }
  0xf7   :  { %v605_v49 = vadd.f32 %v604_v48, %v603_v46  ;;  %v606_v50 = vpop.f32.mrb[2].mxu0  ;;  %v631_v51 = vpop.f32.mrb[0].mxu1 }
  0xf8   :  { %v607_v52 = vpop.f32.mrb[3].mxu0  ;;  %v632_v55 = vpop.f32.mrb[1].mxu1 }
  0xf9   :  { %v414_v53 = vadd.f32 %v605_v49, %v538_v47  ;;  %v608_v54 = vadd.f32 %v607_v52, %v606_v50  ;;  %v633_v56 = vadd.f32 %v632_v55, %v631_v51  ;;  %v634_v57 = vpop.f32.mrb[2].mxu1 }
  0xfa   :  { %v635_v59 = vpop.f32.mrb[3].mxu1 }
  0xfb   :  { %v417_v58 = vadd.f32 %v608_v54, %v538_v47  ;;  %v636_v60 = vadd.f32 %v635_v59, %v634_v57  ;;  %v463_v61 = vadd.f32 %v633_v56, %v414_v53 }
  0xfd   :  { %v609_v62 = vpop.f32.mrb[4].mxu0  ;;  %v466_v0 = vadd.f32 %v636_v60, %v417_v58 }
  0xfe   :  { %v610_v63 = vpop.f32.mrb[5].mxu0 }
  0xff   :  { %v611_v1 = vadd.f32 %v610_v63, %v609_v62  ;;  %v612_v2 = vpop.f32.mrb[6].mxu0  ;;  %v637_v3 = vpop.f32.mrb[4].mxu1 }
 0x100   :  { %v613_v4 = vpop.f32.mrb[7].mxu0  ;;  %v638_v7 = vpop.f32.mrb[5].mxu1 }
 0x101   :  { %v422_v5 = vadd.f32 %v611_v1, %v538_v47  ;;  %v614_v6 = vadd.f32 %v613_v4, %v612_v2  ;;  %v639_v8 = vadd.f32 %v638_v7, %v637_v3  ;;  %v640_v9 = vpop.f32.mrb[6].mxu1 }
 0x102   :  { %v641_v11 = vpop.f32.mrb[7].mxu1 }
 0x103   :  { %v425_v10 = vadd.f32 %v614_v6, %v538_v47  ;;  %v642_v12 = vadd.f32 %v641_v11, %v640_v9  ;;  %v471_v13 = vadd.f32 %v639_v8, %v422_v5 }
 0x105   :  { %v659_v14 = vpop.f32.mrb[8].mxu0  ;;  %v474_v15 = vadd.f32 %v642_v12, %v425_v10 }
 0x106   :  { %v520_v16 = vadd.f32 %v659_v14, %v471_v13  ;;  %v511_v17 = vpop.f32.mrb[9].mxu0 }
 0x107   :  { %v512_v18 = vadd.f32 %v511_v17, %v463_v61  ;;  %v660_v19 = vpop.f32.mrb[10].mxu0 }
 0x108   :  { %v528_v20 = vmax.f32 %v520_v16, 0.0  ;;  %v523_v21 = vadd.f32 %v660_v19, %v474_v15  ;;  %v514_v22 = vpop.f32.mrb[11].mxu0 }
 0x109   :  { %v526_v23 = vmax.f32 %v512_v18, 0.0  ;;  %v515_v24 = vadd.f32 %v514_v22, %v466_v0 }
 0x10a   :  { %532 = vst.msk [vmem:[%s893_s3 + $0x10] sm:$0xff] %vm372_vm0, %v528_v20  ;;  %v529_v25 = vmax.f32 %v523_v21, 0.0 }
 0x10b   :  { %530 = vst.msk [vmem:[%s893_s3] sm:$0xff] %vm372_vm0, %v526_v23  ;;  %v527_v26 = vmax.f32 %v515_v24, 0.0 }
 0x10c   :  { %533 = vst.msk [vmem:[%s893_s3 + $0x18] sm:$0xff] %vm372_vm0, %v529_v25 }
 0x10d   :  { %531 = vst.msk [vmem:[%s893_s3 + $0x8] sm:$0xff] %vm372_vm0, %v527_v26 }

// kernel: rebuildnet_forward.31
= control target key start
LH: loop header
LB: loop body
LE: loop exit
PB: predicated region body
PF: predicated region fallthrough
CT: control target
= control target key end

     0   :  { %v607_v35 = vmov 0.0   ;;  %vm608_vm0 = vmmov 0   ;;  %vm330_vm1 = vcmask 523264   ;;  %s752_s1 = inlined_call_operand.vmem [shape: bf16[576,128], index: 1, kind: input, shape index: {}]   ;;  %s753_s0 = inlined_call_operand.vmem [shape: bf16[8,576], index: 0, kind: input, shape index: {}]   ;;  %s754_s2 = inlined_call_operand.vmem [shape: f32[1,128], index: 2, kind: input, shape index: {}]   ;;  %s755_s3 = inlined_call_operand.vmem [shape: f32[8,128], index: 3, kind: output, shape index: {}]  }
   0x1   :  { %v566_v0 = vld [vmem:[%s752_s1 + $0x40] sm:$0xff]   ;;  %v570_v4 = vld [vmem:[%s752_s1 + $0x48] sm:$0xff]   ;;  %v574_v8 = vld [vmem:[%s752_s1 + $0x50] sm:$0xff]  }
   0x2   :  { %v567_v1 = vld [vmem:[%s752_s1] sm:$0xff]   ;;  %503 = vmatprep.subr.bf16.mxu0 %v566_v0  ;;  %v571_v5 = vld [vmem:[%s752_s1 + $0x8] sm:$0xff]   ;;  %v575_v9 = vld [vmem:[%s752_s1 + $0x10] sm:$0xff]  }
   0x3   :  { %v568_v2 = vld [vmem:[%s752_s1 + $0xc0] sm:$0xff]   ;;  %504 = vmatpush3.bf16.msra.mxu0 %v567_v1  ;;  %v572_v6 = vld [vmem:[%s752_s1 + $0xc8] sm:$0xff]   ;;  %v576_v10 = vld [vmem:[%s752_s1 + $0xd0] sm:$0xff]  }
   0x4   :  { %v569_v3 = vld [vmem:[%s752_s1 + $0x80] sm:$0xff]   ;;  %525 = vmatprep.subr.bf16.mxu1 %v568_v2  ;;  %505 = vmatprep.subr.bf16.mxu0 %v570_v4  ;;  %v573_v7 = vld [vmem:[%s752_s1 + $0x88] sm:$0xff]   ;;  %v577_v11 = vld [vmem:[%s752_s1 + $0x90] sm:$0xff]  }
   0x5   :  { %526 = vmatpush3.bf16.msra.mxu1 %v569_v3  ;;  %v578_v12 = vld [vmem:[%s752_s1 + $0x58] sm:$0xff]   ;;  %v582_v16 = vld [vmem:[%s752_s1 + $0x60] sm:$0xff]   ;;  %v586_v20 = vld [vmem:[%s752_s1 + $0x68] sm:$0xff]  }
   0x6   :  { %527 = vmatprep.subr.bf16.mxu1 %v572_v6  ;;  %v579_v13 = vld [vmem:[%s752_s1 + $0x18] sm:$0xff]   ;;  %v583_v17 = vld [vmem:[%s752_s1 + $0x20] sm:$0xff]   ;;  %v587_v21 = vld [vmem:[%s752_s1 + $0x28] sm:$0xff]  }
   0x7   :  { %506 = vmatpush3.bf16.msra.mxu0 %v571_v5  ;;  %v580_v14 = vld [vmem:[%s752_s1 + $0xd8] sm:$0xff]   ;;  %v584_v18 = vld [vmem:[%s752_s1 + $0xe0] sm:$0xff]   ;;  %v588_v22 = vld [vmem:[%s752_s1 + $0xe8] sm:$0xff]  }
   0x8   :  { %507 = vmatprep.subr.bf16.mxu0 %v574_v8  ;;  %v581_v15 = vld [vmem:[%s752_s1 + $0x98] sm:$0xff]   ;;  %v585_v19 = vld [vmem:[%s752_s1 + $0xa0] sm:$0xff]   ;;  %v589_v23 = vld [vmem:[%s752_s1 + $0xa8] sm:$0xff]  }
   0x9   :  { %528 = vmatpush3.bf16.msra.mxu1 %v573_v7  ;;  %v590_v24 = vld [vmem:[%s752_s1 + $0x70] sm:$0xff]   ;;  %v594_v28 = vld [vmem:[%s752_s1 + $0x78] sm:$0xff]   ;;  %v15_v31 = vld [vmem:[%s753_s0] sm:$0xff] }
   0xa   :  { %529 = vmatprep.subr.bf16.mxu1 %v576_v10  ;;  %v591_v25 = vld [vmem:[%s752_s1 + $0x30] sm:$0xff]   ;;  %v595_v29 = vld [vmem:[%s752_s1 + $0x38] sm:$0xff]   ;;  %v461_v32 = vcombine.low %v15_v31, %v15_v31  ;;  %v462_v33 = vcombine.high %v15_v31, %v15_v31  ;;  %v16_v36 = vld [vmem:[%s753_s0 + $0x8] sm:$0xff] }
   0xb   :  { %508 = vmatpush3.bf16.msra.mxu0 %v575_v9  ;;  %v592_v26 = vld [vmem:[%s752_s1 + $0xf0] sm:$0xff]   ;;  %v596_v30 = vld [vmem:[%s752_s1 + $0xf8] sm:$0xff]   ;;  %v463_v37 = vcombine.low %v16_v36, %v16_v36  ;;  %v464_v38 = vcombine.high %v16_v36, %v16_v36  ;;  %v603_v39 = vld [vmem:[%s752_s1 + $0x100] sm:$0xff]  }
   0xc   :  { %509 = vmatprep.subr.bf16.mxu0 %v578_v12  ;;  %v593_v27 = vld [vmem:[%s752_s1 + $0xb0] sm:$0xff]   ;;  %v600_v34 = vld [vmem:[%s752_s1 + $0xb8] sm:$0xff]   ;;  %366 = vmatprep.mubr.bf16.mxu0 %v462_v33  ;;  %v604_v40 = vld [vmem:[%s752_s1 + $0x108] sm:$0xff]  }
   0xd   :  { %530 = vmatpush3.bf16.msra.mxu1 %v577_v11  ;;  %406 = vmatprep.mubr.bf16.mxu1 %v464_v38  ;;  %v605_v41 = vld [vmem:[%s752_s1 + $0x110] sm:$0xff]   ;;  %v606_v42 = vld [vmem:[%s752_s1 + $0x118] sm:$0xff]   ;;  %v460_v45 = vld [vmem:[%s754_s2] ss:$0 sm:$0xff] }
   0xe   :  { %531 = vmatprep.subr.bf16.mxu1 %v580_v14  ;;  %v599_v43 = vld [vmem:[%s753_s0 + $0x10] ss:$0 sps:$4 sm:$0xff]  }
   0xf   :  { %510 = vmatpush3.bf16.msra.mxu0 %v579_v13 }
  0x10   :  { %511 = vmatprep.subr.bf16.mxu0 %v582_v16 }
  0x11   :  { %532 = vmatpush3.bf16.msra.mxu1 %v581_v15 }
  0x12   :  { %533 = vmatprep.subr.bf16.mxu1 %v584_v18 }
  0x13   :  { %512 = vmatpush3.bf16.msra.mxu0 %v583_v17 }
  0x14   :  { %513 = vmatprep.subr.bf16.mxu0 %v586_v20 }
  0x15   :  { %534 = vmatpush3.bf16.msra.mxu1 %v585_v19 }
  0x16   :  { %535 = vmatprep.subr.bf16.mxu1 %v588_v22 }
  0x17   :  { %514 = vmatpush3.bf16.msra.mxu0 %v587_v21 }
  0x18   :  { %515 = vmatprep.subr.bf16.mxu0 %v590_v24 }
  0x19   :  { %536 = vmatpush3.bf16.msra.mxu1 %v589_v23 }
  0x1a   :  { %537 = vmatprep.subr.bf16.mxu1 %v592_v26 }
  0x1b   :  { %516 = vmatpush3.bf16.msra.mxu0 %v591_v25 }
  0x1c   :  { %517 = vmatprep.subr.bf16.mxu0 %v594_v28 }
  0x1d   :  { %538 = vmatpush3.bf16.msra.mxu1 %v593_v27 }
  0x1e   :  { %539 = vmatprep.subr.bf16.mxu1 %v596_v30 }
  0x1f   :  { %518 = vmatpush3.bf16.msra.mxu0 %v595_v29 }
  0x20   :  { %552 = vmatprep.subr.bf16.mxu0 %v607_v35 }
  0x21   :  { %540 = vmatpush3.bf16.msra.mxu1 %v600_v34 }
  0x22   :  { %367 = vmatmul.mubr.bf16.vlgmr.msra.gmra.mrb[0].mxu0 %v461_v32 }
  0x23   :  { %553 = vmatpush3.bf16.msra.mxu0 %v603_v39  ;;  %560 = vmatprep.mubr.msk.bf16.mxu0 %vm608_vm0, %v607_v35 }
  0x24   :  { %407 = vmatmul.mubr.bf16.vlgmr.msra.gmra.mrb[0].mxu1 %v463_v37  ;;  %554 = vmatprep.subr.bf16.mxu0 %v607_v35 }
  0x27   :  { %555 = vmatpush3.bf16.msra.mxu0 %v604_v40 }
  0x28   :  { %556 = vmatprep.subr.bf16.mxu0 %v607_v35 }
  0x2b   :  { %557 = vmatpush3.bf16.msra.mxu0 %v605_v41 }
  0x2c   :  { %558 = vmatprep.subr.bf16.mxu0 %v607_v35 }
  0x2f   :  { %559 = vmatpush3.bf16.msra.mxu0 %v606_v42 }
  0x32   :  { %561 = vmatmul.mubr.msk.bf16.vlgmr.msra.gmra.mrb[4].mxu0 %vm330_vm1, %v599_v43 }
  0xf5   :  { %v519_v44 = vpop.f32.mrb[0].mxu0 }
  0xf6   :  { %v520_v46 = vpop.f32.mrb[1].mxu0 }
  0xf7   :  { %v521_v47 = vadd.f32 %v520_v46, %v519_v44  ;;  %v522_v48 = vpop.f32.mrb[2].mxu0  ;;  %v541_v49 = vpop.f32.mrb[0].mxu1 }
  0xf8   :  { %v523_v50 = vpop.f32.mrb[3].mxu0  ;;  %v542_v51 = vpop.f32.mrb[1].mxu1 }
  0xf9   :  { %v369_v52 = vadd.f32 %v521_v47, %v460_v45  ;;  %v543_v53 = vadd.f32 %v542_v51, %v541_v49  ;;  %v544_v54 = vpop.f32.mrb[2].mxu1 }
  0xfa   :  { %v545_v55 = vpop.f32.mrb[3].mxu1 }
  0xfb   :  { %v409_v56 = vadd.f32 %v543_v53, %v369_v52 }
 0x105   :  { %v448_v57 = vpop.f32.mrb[4].mxu0 }
 0x106   :  { %v449_v58 = vadd.f32 %v448_v57, %v409_v56  ;;  %v562_v59 = vpop.f32.mrb[5].mxu0 }
 0x107   :  { %v451_v60 = vpop.f32.mrb[6].mxu0 }
 0x108   :  { %v454_v61 = vmax.f32 %v449_v58, 0.0  ;;  %v563_v62 = vpop.f32.mrb[7].mxu0 }
 0x10a   :  { %455 = vst [vmem:[%s755_s3] sm:$0xff] %v454_v61 }

// kernel: rebuildnet_forward.32
= control target key start
LH: loop header
LB: loop body
LE: loop exit
PB: predicated region body
PF: predicated region fallthrough
CT: control target
= control target key end

     0   :  { %vm1124_vm0 = vmmov 0   ;;  %s1382_s1 = inlined_call_operand.vmem [shape: bf16[1152,128], index: 1, kind: input, shape index: {}]   ;;  %s1383_s0 = inlined_call_operand.vmem [shape: bf16[8,1152], index: 0, kind: input, shape index: {}]   ;;  %s1384_s2 = inlined_call_operand.vmem [shape: f32[1,128], index: 2, kind: input, shape index: {}]   ;;  %s1385_s3 = inlined_call_operand.vmem [shape: f32[8,128], index: 3, kind: output, shape index: {}]  }
   0x1   :  { %v1042_v0 = vld [vmem:[%s1382_s1 + $0x40] sm:$0xff]   ;;  %v1046_v4 = vld [vmem:[%s1382_s1 + $0x48] sm:$0xff]   ;;  %v1050_v8 = vld [vmem:[%s1382_s1 + $0x50] sm:$0xff]  }
   0x2   :  { %v1043_v1 = vld [vmem:[%s1382_s1] sm:$0xff]   ;;  %923 = vmatprep.subr.bf16.mxu0 %v1042_v0  ;;  %v1047_v5 = vld [vmem:[%s1382_s1 + $0x8] sm:$0xff]   ;;  %v1051_v9 = vld [vmem:[%s1382_s1 + $0x10] sm:$0xff]  }
   0x3   :  { %v1044_v2 = vld [vmem:[%s1382_s1 + $0xc0] sm:$0xff]   ;;  %924 = vmatpush3.bf16.msra.mxu0 %v1043_v1  ;;  %v1048_v6 = vld [vmem:[%s1382_s1 + $0xc8] sm:$0xff]   ;;  %v1052_v10 = vld [vmem:[%s1382_s1 + $0xd0] sm:$0xff]  }
   0x4   :  { %v1045_v3 = vld [vmem:[%s1382_s1 + $0x80] sm:$0xff]   ;;  %945 = vmatprep.subr.bf16.mxu1 %v1044_v2  ;;  %925 = vmatprep.subr.bf16.mxu0 %v1046_v4  ;;  %v1049_v7 = vld [vmem:[%s1382_s1 + $0x88] sm:$0xff]   ;;  %v1053_v11 = vld [vmem:[%s1382_s1 + $0x90] sm:$0xff]  }
   0x5   :  { %946 = vmatpush3.bf16.msra.mxu1 %v1045_v3  ;;  %v1054_v12 = vld [vmem:[%s1382_s1 + $0x58] sm:$0xff]   ;;  %v1058_v16 = vld [vmem:[%s1382_s1 + $0x60] sm:$0xff]   ;;  %v1062_v20 = vld [vmem:[%s1382_s1 + $0x68] sm:$0xff]  }
   0x6   :  { %947 = vmatprep.subr.bf16.mxu1 %v1048_v6  ;;  %v1055_v13 = vld [vmem:[%s1382_s1 + $0x18] sm:$0xff]   ;;  %v1059_v17 = vld [vmem:[%s1382_s1 + $0x20] sm:$0xff]   ;;  %v1063_v21 = vld [vmem:[%s1382_s1 + $0x28] sm:$0xff]  }
   0x7   :  { %926 = vmatpush3.bf16.msra.mxu0 %v1047_v5  ;;  %v1056_v14 = vld [vmem:[%s1382_s1 + $0xd8] sm:$0xff]   ;;  %v1060_v18 = vld [vmem:[%s1382_s1 + $0xe0] sm:$0xff]   ;;  %v1064_v22 = vld [vmem:[%s1382_s1 + $0xe8] sm:$0xff]  }
   0x8   :  { %927 = vmatprep.subr.bf16.mxu0 %v1050_v8  ;;  %v1057_v15 = vld [vmem:[%s1382_s1 + $0x98] sm:$0xff]   ;;  %v1061_v19 = vld [vmem:[%s1382_s1 + $0xa0] sm:$0xff]   ;;  %v1065_v23 = vld [vmem:[%s1382_s1 + $0xa8] sm:$0xff]  }
   0x9   :  { %948 = vmatpush3.bf16.msra.mxu1 %v1049_v7  ;;  %v1066_v24 = vld [vmem:[%s1382_s1 + $0x70] sm:$0xff]   ;;  %v1070_v28 = vld [vmem:[%s1382_s1 + $0x78] sm:$0xff]   ;;  %v15_v31 = vld [vmem:[%s1383_s0] sm:$0xff] }
   0xa   :  { %949 = vmatprep.subr.bf16.mxu1 %v1052_v10  ;;  %v1067_v25 = vld [vmem:[%s1382_s1 + $0x30] sm:$0xff]   ;;  %v1071_v29 = vld [vmem:[%s1382_s1 + $0x38] sm:$0xff]   ;;  %v842_v32 = vcombine.low %v15_v31, %v15_v31  ;;  %v843_v33 = vcombine.high %v15_v31, %v15_v31  ;;  %v1076_v35 = vld [vmem:[%s1382_s1 + $0x140] sm:$0xff]  }
   0xb   :  { %928 = vmatpush3.bf16.msra.mxu0 %v1051_v9  ;;  %v1068_v26 = vld [vmem:[%s1382_s1 + $0xf0] sm:$0xff]   ;;  %v1072_v30 = vld [vmem:[%s1382_s1 + $0xf8] sm:$0xff]   ;;  %v16_v36 = vld [vmem:[%s1383_s0 + $0x8] sm:$0xff]  ;;  %v1123_v9 = vmov 0.0  }
   0xc   :  { %929 = vmatprep.subr.bf16.mxu0 %v1054_v12  ;;  %v1069_v27 = vld [vmem:[%s1382_s1 + $0xb0] sm:$0xff]   ;;  %v1075_v34 = vld [vmem:[%s1382_s1 + $0xb8] sm:$0xff]   ;;  %667 = vmatprep.mubr.bf16.mxu0 %v843_v33  ;;  %v844_v37 = vcombine.low %v16_v36, %v16_v36  ;;  %v845_v38 = vcombine.high %v16_v36, %v16_v36  ;;  %v1079_v39 = vld [vmem:[%s1382_s1 + $0x100] sm:$0xff]  }
   0xd   :  { %950 = vmatpush3.bf16.msra.mxu1 %v1053_v11  ;;  %v1080_v40 = vld [vmem:[%s1382_s1 + $0x1c0] sm:$0xff]   ;;  %v1082_v42 = vld [vmem:[%s1382_s1 + $0x148] sm:$0xff]   ;;  %v1086_v46 = vld [vmem:[%s1382_s1 + $0x150] sm:$0xff]  }
   0xe   :  { %951 = vmatprep.subr.bf16.mxu1 %v1056_v14  ;;  %707 = vmatprep.mubr.bf16.mxu1 %v845_v38  ;;  %v1081_v41 = vld [vmem:[%s1382_s1 + $0x180] sm:$0xff]   ;;  %v1083_v43 = vld [vmem:[%s1382_s1 + $0x108] sm:$0xff]   ;;  %v1087_v47 = vld [vmem:[%s1382_s1 + $0x110] sm:$0xff]  }
   0xf   :  { %930 = vmatpush3.bf16.msra.mxu0 %v1055_v13  ;;  %v1084_v44 = vld [vmem:[%s1382_s1 + $0x1c8] sm:$0xff]   ;;  %v1088_v48 = vld [vmem:[%s1382_s1 + $0x1d0] sm:$0xff]   ;;  %v1090_v50 = vld [vmem:[%s1382_s1 + $0x158] sm:$0xff]  }
  0x10   :  { %931 = vmatprep.subr.bf16.mxu0 %v1058_v16  ;;  %v1085_v45 = vld [vmem:[%s1382_s1 + $0x188] sm:$0xff]   ;;  %v1089_v49 = vld [vmem:[%s1382_s1 + $0x190] sm:$0xff]   ;;  %v1091_v51 = vld [vmem:[%s1382_s1 + $0x118] sm:$0xff]  }
  0x11   :  { %952 = vmatpush3.bf16.msra.mxu1 %v1057_v15  ;;  %v1092_v52 = vld [vmem:[%s1382_s1 + $0x1d8] sm:$0xff]   ;;  %v1094_v54 = vld [vmem:[%s1382_s1 + $0x160] sm:$0xff]   ;;  %v1098_v58 = vld [vmem:[%s1382_s1 + $0x168] sm:$0xff]  }
  0x12   :  { %953 = vmatprep.subr.bf16.mxu1 %v1060_v18  ;;  %v1093_v53 = vld [vmem:[%s1382_s1 + $0x198] sm:$0xff]   ;;  %v1095_v55 = vld [vmem:[%s1382_s1 + $0x120] sm:$0xff]   ;;  %v1099_v59 = vld [vmem:[%s1382_s1 + $0x128] sm:$0xff]  }
  0x13   :  { %932 = vmatpush3.bf16.msra.mxu0 %v1059_v17  ;;  %v1096_v56 = vld [vmem:[%s1382_s1 + $0x1e0] sm:$0xff]   ;;  %v1100_v60 = vld [vmem:[%s1382_s1 + $0x1e8] sm:$0xff]   ;;  %v1102_v62 = vld [vmem:[%s1382_s1 + $0x170] sm:$0xff]  }
  0x14   :  { %933 = vmatprep.subr.bf16.mxu0 %v1062_v20  ;;  %v1097_v57 = vld [vmem:[%s1382_s1 + $0x1a0] sm:$0xff]   ;;  %v1101_v61 = vld [vmem:[%s1382_s1 + $0x1a8] sm:$0xff]   ;;  %v1103_v63 = vld [vmem:[%s1382_s1 + $0x130] sm:$0xff]  }
  0x15   :  { %954 = vmatpush3.bf16.msra.mxu1 %v1061_v19  ;;  %v1104_v0 = vld [vmem:[%s1382_s1 + $0x1f0] sm:$0xff]   ;;  %v1106_v2 = vld [vmem:[%s1382_s1 + $0x178] sm:$0xff]   ;;  %v1114_v13 = vld [vmem:[%s1382_s1 + $0x200] sm:$0xff]  }
  0x16   :  { %955 = vmatprep.subr.bf16.mxu1 %v1064_v22  ;;  %v1105_v1 = vld [vmem:[%s1382_s1 + $0x1b0] sm:$0xff]   ;;  %v1107_v3 = vld [vmem:[%s1382_s1 + $0x138] sm:$0xff]   ;;  %v1115_v14 = vld [vmem:[%s1382_s1 + $0x208] sm:$0xff]  }
  0x17   :  { %934 = vmatpush3.bf16.msra.mxu0 %v1063_v21  ;;  %v1108_v4 = vld [vmem:[%s1382_s1 + $0x1f8] sm:$0xff]   ;;  %v17_v5 = vld [vmem:[%s1383_s0 + $0x10] sm:$0xff]  ;;  %v1118_v17 = vld [vmem:[%s1382_s1 + $0x220] sm:$0xff]  }
  0x18   :  { %935 = vmatprep.subr.bf16.mxu0 %v1066_v24  ;;  %v846_v6 = vcombine.low %v17_v5, %v17_v5  ;;  %v847_v7 = vcombine.high %v17_v5, %v17_v5  ;;  %v1111_v8 = vld [vmem:[%s1382_s1 + $0x1b8] sm:$0xff]   ;;  %v1116_v15 = vld [vmem:[%s1382_s1 + $0x210] sm:$0xff]   ;;  %v1119_v18 = vld [vmem:[%s1382_s1 + $0x228] sm:$0xff]  }
  0x19   :  { %956 = vmatpush3.bf16.msra.mxu1 %v1065_v23  ;;  %v18_v10 = vld [vmem:[%s1383_s0 + $0x18] sm:$0xff]  ;;  %v1120_v19 = vld [vmem:[%s1382_s1 + $0x230] sm:$0xff]   ;;  %v1122_v21 = vld [vmem:[%s1383_s0 + $0x20] ss:$0 sps:$4 sm:$0xff]  }
  0x1a   :  { %957 = vmatprep.subr.bf16.mxu1 %v1068_v26  ;;  %v848_v11 = vcombine.low %v18_v10, %v18_v10  ;;  %v849_v12 = vcombine.high %v18_v10, %v18_v10  ;;  %v1117_v16 = vld [vmem:[%s1382_s1 + $0x218] sm:$0xff]   ;;  %v841_v23 = vld [vmem:[%s1384_s2] ss:$0 sm:$0xff] }
  0x1b   :  { %936 = vmatpush3.bf16.msra.mxu0 %v1067_v25  ;;  %v1121_v20 = vld [vmem:[%s1382_s1 + $0x238] sm:$0xff]  }
  0x1c   :  { %937 = vmatprep.subr.bf16.mxu0 %v1070_v28 }
  0x1d   :  { %958 = vmatpush3.bf16.msra.mxu1 %v1069_v27 }
  0x1e   :  { %959 = vmatprep.subr.bf16.mxu1 %v1072_v30 }
  0x1f   :  { %938 = vmatpush3.bf16.msra.mxu0 %v1071_v29 }
  0x20   :  { %967 = vmatprep.subr.bf16.mxu0 %v1076_v35 }
  0x21   :  { %960 = vmatpush3.bf16.msra.mxu1 %v1075_v34 }
  0x22   :  { %668 = vmatmul.mubr.bf16.vlgmr.msra.gmra.mrb[0].mxu0 %v842_v32  ;;  %989 = vmatprep.subr.bf16.mxu1 %v1080_v40 }
  0x23   :  { %968 = vmatpush3.bf16.msra.mxu0 %v1079_v39  ;;  %747 = vmatprep.mubr.bf16.mxu0 %v847_v7 }
  0x24   :  { %708 = vmatmul.mubr.bf16.vlgmr.msra.gmra.mrb[0].mxu1 %v844_v37  ;;  %969 = vmatprep.subr.bf16.mxu0 %v1082_v42 }
  0x25   :  { %990 = vmatpush3.bf16.msra.mxu1 %v1081_v41  ;;  %787 = vmatprep.mubr.bf16.mxu1 %v849_v12 }
  0x26   :  { %991 = vmatprep.subr.bf16.mxu1 %v1084_v44 }
  0x27   :  { %970 = vmatpush3.bf16.msra.mxu0 %v1083_v43 }
  0x28   :  { %971 = vmatprep.subr.bf16.mxu0 %v1086_v46 }
  0x29   :  { %992 = vmatpush3.bf16.msra.mxu1 %v1085_v45 }
  0x2a   :  { %993 = vmatprep.subr.bf16.mxu1 %v1088_v48 }
  0x2b   :  { %972 = vmatpush3.bf16.msra.mxu0 %v1087_v47 }
  0x2c   :  { %973 = vmatprep.subr.bf16.mxu0 %v1090_v50 }
  0x2d   :  { %994 = vmatpush3.bf16.msra.mxu1 %v1089_v49 }
  0x2e   :  { %995 = vmatprep.subr.bf16.mxu1 %v1092_v52 }
  0x2f   :  { %974 = vmatpush3.bf16.msra.mxu0 %v1091_v51 }
  0x30   :  { %975 = vmatprep.subr.bf16.mxu0 %v1094_v54 }
  0x31   :  { %996 = vmatpush3.bf16.msra.mxu1 %v1093_v53 }
  0x32   :  { %997 = vmatprep.subr.bf16.mxu1 %v1096_v56 }
  0x33   :  { %976 = vmatpush3.bf16.msra.mxu0 %v1095_v55 }
  0x34   :  { %977 = vmatprep.subr.bf16.mxu0 %v1098_v58 }
  0x35   :  { %998 = vmatpush3.bf16.msra.mxu1 %v1097_v57 }
  0x36   :  { %999 = vmatprep.subr.bf16.mxu1 %v1100_v60 }
  0x37   :  { %978 = vmatpush3.bf16.msra.mxu0 %v1099_v59 }
  0x38   :  { %979 = vmatprep.subr.bf16.mxu0 %v1102_v62 }
  0x39   :  { %1000 = vmatpush3.bf16.msra.mxu1 %v1101_v61 }
  0x3a   :  { %1001 = vmatprep.subr.bf16.mxu1 %v1104_v0 }
  0x3b   :  { %980 = vmatpush3.bf16.msra.mxu0 %v1103_v63 }
  0x3c   :  { %981 = vmatprep.subr.bf16.mxu0 %v1106_v2 }
  0x3d   :  { %1002 = vmatpush3.bf16.msra.mxu1 %v1105_v1 }
  0x3e   :  { %1003 = vmatprep.subr.bf16.mxu1 %v1108_v4 }
  0x3f   :  { %982 = vmatpush3.bf16.msra.mxu0 %v1107_v3 }
  0x40   :  { %1020 = vmatprep.subr.bf16.mxu0 %v1123_v9 }
  0x41   :  { %1004 = vmatpush3.bf16.msra.mxu1 %v1111_v8 }
  0x42   :  { %748 = vmatmul.mubr.bf16.vlgmr.msra.gmra.mrb[4].mxu0 %v846_v6 }
  0x43   :  { %1021 = vmatpush3.bf16.msra.mxu0 %v1114_v13  ;;  %1036 = vmatprep.mubr.msk.bf16.mxu0 %vm1124_vm0, %v1123_v9 }
  0x44   :  { %788 = vmatmul.mubr.bf16.vlgmr.msra.gmra.mrb[4].mxu1 %v848_v11  ;;  %1022 = vmatprep.subr.bf16.mxu0 %v1123_v9 }
  0x47   :  { %1023 = vmatpush3.bf16.msra.mxu0 %v1115_v14 }
  0x48   :  { %1024 = vmatprep.subr.bf16.mxu0 %v1123_v9 }
  0x4b   :  { %1025 = vmatpush3.bf16.msra.mxu0 %v1116_v15 }
  0x4c   :  { %1026 = vmatprep.subr.bf16.mxu0 %v1123_v9 }
  0x4f   :  { %1027 = vmatpush3.bf16.msra.mxu0 %v1117_v16 }
  0x50   :  { %1028 = vmatprep.subr.bf16.mxu0 %v1123_v9 }
  0x53   :  { %1029 = vmatpush3.bf16.msra.mxu0 %v1118_v17 }
  0x54   :  { %1030 = vmatprep.subr.bf16.mxu0 %v1123_v9 }
  0x57   :  { %1031 = vmatpush3.bf16.msra.mxu0 %v1119_v18 }
  0x58   :  { %1032 = vmatprep.subr.bf16.mxu0 %v1123_v9 }
  0x5b   :  { %1033 = vmatpush3.bf16.msra.mxu0 %v1120_v19 }
  0x5c   :  { %1034 = vmatprep.subr.bf16.mxu0 %v1123_v9 }
  0x5f   :  { %1035 = vmatpush3.bf16.msra.mxu0 %v1121_v20 }
  0x62   :  { %1037 = vmatmul.mubr.bf16.vlgmr.msra.gmra.mrb[8].mxu0 %v1122_v21 }
  0xf5   :  { %v939_v22 = vpop.f32.mrb[0].mxu0 }
  0xf6   :  { %v940_v24 = vpop.f32.mrb[1].mxu0 }
  0xf7   :  { %v941_v25 = vadd.f32 %v940_v24, %v939_v22  ;;  %v942_v26 = vpop.f32.mrb[2].mxu0  ;;  %v961_v27 = vpop.f32.mrb[0].mxu1 }
  0xf8   :  { %v943_v28 = vpop.f32.mrb[3].mxu0  ;;  %v962_v29 = vpop.f32.mrb[1].mxu1 }
  0xf9   :  { %v670_v30 = vadd.f32 %v941_v25, %v841_v23  ;;  %v963_v31 = vadd.f32 %v962_v29, %v961_v27  ;;  %v964_v32 = vpop.f32.mrb[2].mxu1 }
  0xfa   :  { %v965_v33 = vpop.f32.mrb[3].mxu1 }
  0xfb   :  { %v710_v34 = vadd.f32 %v963_v31, %v670_v30 }
 0x115   :  { %v983_v35 = vpop.f32.mrb[4].mxu0 }
 0x116   :  { %v984_v36 = vpop.f32.mrb[5].mxu0 }
 0x117   :  { %v985_v37 = vadd.f32 %v984_v36, %v983_v35  ;;  %v986_v38 = vpop.f32.mrb[6].mxu0  ;;  %v1005_v39 = vpop.f32.mrb[4].mxu1 }
 0x118   :  { %v987_v40 = vpop.f32.mrb[7].mxu0  ;;  %v1006_v41 = vpop.f32.mrb[5].mxu1 }
 0x119   :  { %v750_v42 = vadd.f32 %v985_v37, %v710_v34  ;;  %v1007_v43 = vadd.f32 %v1006_v41, %v1005_v39  ;;  %v1008_v44 = vpop.f32.mrb[6].mxu1 }
 0x11a   :  { %v1009_v45 = vpop.f32.mrb[7].mxu1 }
 0x11b   :  { %v790_v46 = vadd.f32 %v1007_v43, %v750_v42 }
 0x135   :  { %v829_v47 = vpop.f32.mrb[8].mxu0 }
 0x136   :  { %v830_v48 = vadd.f32 %v829_v47, %v790_v46  ;;  %v1038_v49 = vpop.f32.mrb[9].mxu0 }
 0x137   :  { %v832_v50 = vpop.f32.mrb[10].mxu0 }
 0x138   :  { %v835_v51 = vmax.f32 %v830_v48, 0.0  ;;  %v1039_v52 = vpop.f32.mrb[11].mxu0 }
 0x13a   :  { %836 = vst [vmem:[%s1385_s3] sm:$0xff] %v835_v51 }

// kernel: rebuildnet_forward.33
= control target key start
LH: loop header
LB: loop body
LE: loop exit
PB: predicated region body
PF: predicated region fallthrough
CT: control target
= control target key end

     0   :  { %v163_v36 = vlaneseq  ;;  %v1571_v37 = vmov 1966171168   ;;  %s2067_s1 = inlined_call_operand.vmem [shape: bf16[1152,256], index: 1, kind: input, shape index: {}]   ;;  %s2068_s0 = inlined_call_operand.vmem [shape: bf16[2,1152], index: 0, kind: input, shape index: {}]   ;;  %s2069_s2 = inlined_call_operand.vmem [shape: f32[1,256], index: 2, kind: input, shape index: {}]   ;;  %s2070_s3 = inlined_call_operand.vmem [shape: f32[2,256], index: 3, kind: output, shape index: {}]  }
   0x1   :  { %v1354_v0 = vld [vmem:[%s2067_s1 + $0x4] ss:$8 sps:$4 sm:$0xff]   ;;  %v1358_v2 = vld [vmem:[%s2067_s1] ss:$8 sps:$4 sm:$0xff]   ;;  %v1360_v4 = vld [vmem:[%s2067_s1 + $0x14] ss:$8 sps:$4 sm:$0xff]   ;;  %v177_v38 = vunpack.c.l.s4 %v1571_v37 }
   0x2   :  { %v1356_v1 = vld [vmem:[%s2067_s1 + $0x204] ss:$8 sps:$4 sm:$0xff]   ;;  %967 = vmatprep.subr.bf16.mxu1 %v1354_v0  ;;  %v1359_v3 = vld [vmem:[%s2067_s1 + $0x200] ss:$8 sps:$4 sm:$0xff]   ;;  %v1362_v5 = vld [vmem:[%s2067_s1 + $0x214] ss:$8 sps:$4 sm:$0xff]  }
   0x3   :  { %1049 = vmatprep.subr.bf16.mxu0 %v1356_v1  ;;  %968 = vmatpush1.bf16.msra.mxu1 %v1358_v2  ;;  %v1364_v6 = vld [vmem:[%s2067_s1 + $0x10] ss:$8 sps:$4 sm:$0xff]   ;;  %v1366_v8 = vld [vmem:[%s2067_s1 + $0x24] ss:$8 sps:$4 sm:$0xff]   ;;  %v1370_v10 = vld [vmem:[%s2067_s1 + $0x20] ss:$8 sps:$4 sm:$0xff]   ;;  %v178_v43 = vunpack.c.0.s8 %v177_v38 }
   0x4   :  { %1050 = vmatpush1.bf16.msra.mxu0 %v1359_v3  ;;  %969 = vmatprep.subr.bf16.mxu1 %v1360_v4  ;;  %v1365_v7 = vld [vmem:[%s2067_s1 + $0x210] ss:$8 sps:$4 sm:$0xff]   ;;  %v1368_v9 = vld [vmem:[%s2067_s1 + $0x224] ss:$8 sps:$4 sm:$0xff]   ;;  %v1371_v11 = vld [vmem:[%s2067_s1 + $0x220] ss:$8 sps:$4 sm:$0xff]  }
   0x5   :  { %1051 = vmatprep.subr.bf16.mxu0 %v1362_v5  ;;  %v1372_v12 = vld [vmem:[%s2067_s1 + $0x34] ss:$8 sps:$4 sm:$0xff]   ;;  %v1376_v14 = vld [vmem:[%s2067_s1 + $0x30] ss:$8 sps:$4 sm:$0xff]   ;;  %v1378_v16 = vld [vmem:[%s2067_s1 + $0x44] ss:$8 sps:$4 sm:$0xff]  }
   0x6   :  { %v1374_v13 = vld [vmem:[%s2067_s1 + $0x234] ss:$8 sps:$4 sm:$0xff]   ;;  %v1377_v15 = vld [vmem:[%s2067_s1 + $0x230] ss:$8 sps:$4 sm:$0xff]   ;;  %v1380_v17 = vld [vmem:[%s2067_s1 + $0x244] ss:$8 sps:$4 sm:$0xff]  }
   0x7   :  { %970 = vmatpush1.bf16.msra.mxu1 %v1364_v6  ;;  %v1382_v18 = vld [vmem:[%s2067_s1 + $0x40] ss:$8 sps:$4 sm:$0xff]   ;;  %v1384_v20 = vld [vmem:[%s2067_s1 + $0x54] ss:$8 sps:$4 sm:$0xff]   ;;  %v1388_v22 = vld [vmem:[%s2067_s1 + $0x50] ss:$8 sps:$4 sm:$0xff]  }
   0x8   :  { %1052 = vmatpush1.bf16.msra.mxu0 %v1365_v7  ;;  %971 = vmatprep.subr.bf16.mxu1 %v1366_v8  ;;  %v1383_v19 = vld [vmem:[%s2067_s1 + $0x240] ss:$8 sps:$4 sm:$0xff]   ;;  %v1386_v21 = vld [vmem:[%s2067_s1 + $0x254] ss:$8 sps:$4 sm:$0xff]   ;;  %v1389_v23 = vld [vmem:[%s2067_s1 + $0x250] ss:$8 sps:$4 sm:$0xff]  }
   0x9   :  { %1053 = vmatprep.subr.bf16.mxu0 %v1368_v9  ;;  %v1390_v24 = vld [vmem:[%s2067_s1 + $0x64] ss:$8 sps:$4 sm:$0xff]   ;;  %v1394_v26 = vld [vmem:[%s2067_s1 + $0x60] ss:$8 sps:$4 sm:$0xff]   ;;  %v1396_v28 = vld [vmem:[%s2067_s1 + $0x74] ss:$8 sps:$4 sm:$0xff]  }
   0xa   :  { %v1392_v25 = vld [vmem:[%s2067_s1 + $0x264] ss:$8 sps:$4 sm:$0xff]   ;;  %v1395_v27 = vld [vmem:[%s2067_s1 + $0x260] ss:$8 sps:$4 sm:$0xff]   ;;  %v1398_v29 = vld [vmem:[%s2067_s1 + $0x274] ss:$8 sps:$4 sm:$0xff]  }
   0xb   :  { %972 = vmatpush1.bf16.msra.mxu1 %v1370_v10  ;;  %v1400_v30 = vld [vmem:[%s2067_s1 + $0x70] ss:$8 sps:$4 sm:$0xff]   ;;  %v1402_v32 = vld [vmem:[%s2067_s1 + $0x84] ss:$8 sps:$4 sm:$0xff]   ;;  %v1406_v34 = vld [vmem:[%s2067_s1 + $0x80] ss:$8 sps:$4 sm:$0xff]  }
   0xc   :  { %1054 = vmatpush1.bf16.msra.mxu0 %v1371_v11  ;;  %973 = vmatprep.subr.bf16.mxu1 %v1372_v12  ;;  %v1401_v31 = vld [vmem:[%s2067_s1 + $0x270] ss:$8 sps:$4 sm:$0xff]   ;;  %v1404_v33 = vld [vmem:[%s2067_s1 + $0x284] ss:$8 sps:$4 sm:$0xff]   ;;  %v1407_v35 = vld [vmem:[%s2067_s1 + $0x280] ss:$8 sps:$4 sm:$0xff]  }
   0xd   :  { %1055 = vmatprep.subr.bf16.mxu0 %v1374_v13  ;;  %v1408_v39 = vld [vmem:[%s2067_s1 + $0x94] ss:$8 sps:$4 sm:$0xff]   ;;  %v1412_v41 = vld [vmem:[%s2067_s1 + $0x90] ss:$8 sps:$4 sm:$0xff]   ;;  %v1710_v42 = vshrl.u32 %v163_v36, 7  ;;  %v15_v52 = vld [vmem:[%s2068_s0] sm:$0xff] }
   0xe   :  { %v1410_v40 = vld [vmem:[%s2067_s1 + $0x294] ss:$8 sps:$4 sm:$0xff]   ;;  %v1413_v44 = vld [vmem:[%s2067_s1 + $0x290] ss:$8 sps:$4 sm:$0xff]   ;;  %v1414_v45 = vld [vmem:[%s2067_s1 + $0xa4] ss:$8 sps:$4 sm:$0xff]   ;;  %v175_v55 = vcombine.high %v15_v52, %v15_v52 }
   0xf   :  { %974 = vmatpush1.bf16.msra.mxu1 %v1376_v14  ;;  %v1416_v46 = vld [vmem:[%s2067_s1 + $0x2a4] ss:$8 sps:$4 sm:$0xff]   ;;  %v1418_v47 = vld [vmem:[%s2067_s1 + $0xa0] ss:$8 sps:$4 sm:$0xff]   ;;  %v1728_v49 = vsub.s32 %v178_v43, %v1710_v42  ;;  %v1420_v50 = vld [vmem:[%s2067_s1 + $0xb4] ss:$8 sps:$4 sm:$0xff]  }
  0x10   :  { %1056 = vmatpush1.bf16.msra.mxu0 %v1377_v15  ;;  %975 = vmatprep.subr.bf16.mxu1 %v1378_v16  ;;  %v1419_v48 = vld [vmem:[%s2067_s1 + $0x2a0] ss:$8 sps:$4 sm:$0xff]   ;;  %v1422_v51 = vld [vmem:[%s2067_s1 + $0x2b4] ss:$8 sps:$4 sm:$0xff]   ;;  %v1424_v53 = vld [vmem:[%s2067_s1 + $0xb0] ss:$8 sps:$4 sm:$0xff]  }
  0x11   :  { %1057 = vmatprep.subr.bf16.mxu0 %v1380_v17  ;;  %v182_v54 = vrot.slane %v15_v52, %v1728_v49  ;;  %v1425_v56 = vld [vmem:[%s2067_s1 + $0x2b0] ss:$8 sps:$4 sm:$0xff]   ;;  %v1426_v57 = vld [vmem:[%s2067_s1 + $0xc4] ss:$8 sps:$4 sm:$0xff]   ;;  %v189_v60 = vrot.slane %v175_v55, %v1728_v49  ;;  %v1430_v61 = vld [vmem:[%s2067_s1 + $0xc0] ss:$8 sps:$4 sm:$0xff]  }
  0x12   :  { %v1428_v58 = vld [vmem:[%s2067_s1 + $0x2c4] ss:$8 sps:$4 sm:$0xff]   ;;  %v1431_v0 = vld [vmem:[%s2067_s1 + $0x2c0] ss:$8 sps:$4 sm:$0xff]   ;;  %v1432_v1 = vld [vmem:[%s2067_s1 + $0xd4] ss:$8 sps:$4 sm:$0xff]  }
  0x13   :  { %976 = vmatpush1.bf16.msra.mxu1 %v1382_v18  ;;  %v190_v59 = vcombine.high %v182_v54, %v182_v54  ;;  %v191_v63 = vcombine.high %v189_v60, %v189_v60  ;;  %v1434_v2 = vld [vmem:[%s2067_s1 + $0x2d4] ss:$8 sps:$4 sm:$0xff]   ;;  %v1436_v4 = vld [vmem:[%s2067_s1 + $0xd0] ss:$8 sps:$4 sm:$0xff]   ;;  %v1438_v6 = vld [vmem:[%s2067_s1 + $0xe4] ss:$8 sps:$4 sm:$0xff]   ;;  %v1807_v17 = vrot.slane %v182_v54, %v1728_v49  ;;  %v1810_v18 = vrot.slane %v189_v60, %v1728_v49 }
  0x14   :  { %1058 = vmatpush1.bf16.msra.mxu0 %v1383_v19  ;;  %977 = vmatprep.subr.bf16.mxu1 %v1384_v20  ;;  %v1437_v5 = vld [vmem:[%s2067_s1 + $0x2d0] ss:$8 sps:$4 sm:$0xff]   ;;  %v1440_v7 = vld [vmem:[%s2067_s1 + $0x2e4] ss:$8 sps:$4 sm:$0xff]   ;;  %v1442_v8 = vld [vmem:[%s2067_s1 + $0xe0] ss:$8 sps:$4 sm:$0xff]  }
  0x15   :  { %1059 = vmatprep.subr.bf16.mxu0 %v1386_v21  ;;  %v212_v62 = vrot.slane %v190_v59, %v1728_v49  ;;  %v219_v3 = vrot.slane %v191_v63, %v1728_v49  ;;  %v1443_v9 = vld [vmem:[%s2067_s1 + $0x2e0] ss:$8 sps:$4 sm:$0xff]   ;;  %v1444_v10 = vld [vmem:[%s2067_s1 + $0xf4] ss:$8 sps:$4 sm:$0xff]   ;;  %v1448_v12 = vld [vmem:[%s2067_s1 + $0xf0] ss:$8 sps:$4 sm:$0xff]  }
  0x16   :  { %v1446_v11 = vld [vmem:[%s2067_s1 + $0x2f4] ss:$8 sps:$4 sm:$0xff]   ;;  %v1449_v13 = vld [vmem:[%s2067_s1 + $0x2f0] ss:$8 sps:$4 sm:$0xff]   ;;  %v1452_v14 = vld [vmem:[%s2067_s1 + $0x104] ss:$8 sps:$4 sm:$0xff]  }
  0x17   :  { %978 = vmatpush1.bf16.msra.mxu1 %v1388_v22  ;;  %999 = vmatprep.mubr.bf16.mxu1 %v212_v62  ;;  %v1456_v15 = vld [vmem:[%s2067_s1 + $0x304] ss:$8 sps:$4 sm:$0xff]   ;;  %v1450_v16 = vld [vmem:[%s2067_s1 + $0x100] ss:$8 sps:$4 sm:$0xff]   ;;  %v1459_v20 = vld [vmem:[%s2067_s1 + $0x114] ss:$8 sps:$4 sm:$0xff]   ;;  %v222_v22 = vcombine.high %v212_v62, %v212_v62 }
  0x18   :  { %1060 = vmatpush1.bf16.msra.mxu0 %v1389_v23  ;;  %979 = vmatprep.subr.bf16.mxu1 %v1390_v24  ;;  %v1454_v19 = vld [vmem:[%s2067_s1 + $0x300] ss:$8 sps:$4 sm:$0xff]   ;;  %v1462_v21 = vld [vmem:[%s2067_s1 + $0x314] ss:$8 sps:$4 sm:$0xff]   ;;  %v223_v23 = vcombine.high %v219_v3, %v219_v3  ;;  %v1457_v24 = vld [vmem:[%s2067_s1 + $0x110] ss:$8 sps:$4 sm:$0xff]  }
  0x19   :  { %1061 = vmatprep.subr.bf16.mxu0 %v1392_v25  ;;  %1081 = vmatprep.mubr.bf16.mxu0 %v219_v3  ;;  %v1460_v25 = vld [vmem:[%s2067_s1 + $0x310] ss:$8 sps:$4 sm:$0xff]   ;;  %v1475_v36 = vld [vmem:[%s2067_s1 + $0x140] ss:$8 sps:$4 sm:$0xff]   ;;  %v1483_v38 = vld [vmem:[%s2067_s1 + $0x154] ss:$8 sps:$4 sm:$0xff]  }
  0x1a   :  { %v1478_v37 = vld [vmem:[%s2067_s1 + $0x340] ss:$8 sps:$4 sm:$0xff]   ;;  %v1489_v43 = vld [vmem:[%s2067_s1 + $0x164] ss:$8 sps:$4 sm:$0xff]   ;;  %v1505_v60 = vld [vmem:[%s2067_s1 + $0x190] ss:$8 sps:$4 sm:$0xff]  }
  0x1b   :  { %980 = vmatpush1.bf16.msra.mxu1 %v1394_v26  ;;  %v1465_v26 = vld [vmem:[%s2067_s1 + $0x124] ss:$8 sps:$4 sm:$0xff]   ;;  %v1499_v54 = vld [vmem:[%s2067_s1 + $0x180] ss:$8 sps:$4 sm:$0xff]   ;;  %v1522_v3 = vld [vmem:[%s2067_s1 + $0x3b4] ss:$8 sps:$4 sm:$0xff]  }
  0x1c   :  { %1062 = vmatpush1.bf16.msra.mxu0 %v1395_v27  ;;  %981 = vmatprep.subr.bf16.mxu1 %v1396_v28  ;;  %v1468_v27 = vld [vmem:[%s2067_s1 + $0x324] ss:$8 sps:$4 sm:$0xff]   ;;  %v1463_v28 = vld [vmem:[%s2067_s1 + $0x120] ss:$8 sps:$4 sm:$0xff]  }
  0x1d   :  { %1063 = vmatprep.subr.bf16.mxu0 %v1398_v29  ;;  %v1466_v29 = vld [vmem:[%s2067_s1 + $0x320] ss:$8 sps:$4 sm:$0xff]   ;;  %v1501_v52 = vld [vmem:[%s2067_s1 + $0x184] ss:$8 sps:$4 sm:$0xff]  }
  0x1e   :  { %v1502_v55 = vld [vmem:[%s2067_s1 + $0x380] ss:$8 sps:$4 sm:$0xff]   ;;  %v1513_v62 = vld [vmem:[%s2067_s1 + $0x1a4] ss:$8 sps:$4 sm:$0xff]  }
  0x1f   :  { %982 = vmatpush1.bf16.msra.mxu1 %v1400_v30  ;;  %v1471_v30 = vld [vmem:[%s2067_s1 + $0x134] ss:$8 sps:$4 sm:$0xff]   ;;  %v1516_v63 = vld [vmem:[%s2067_s1 + $0x3a4] ss:$8 sps:$4 sm:$0xff]  }
  0x20   :  { %1064 = vmatpush1.bf16.msra.mxu0 %v1401_v31  ;;  %983 = vmatprep.subr.bf16.mxu1 %v1402_v32  ;;  %v1474_v31 = vld [vmem:[%s2067_s1 + $0x334] ss:$8 sps:$4 sm:$0xff]   ;;  %v1469_v32 = vld [vmem:[%s2067_s1 + $0x130] ss:$8 sps:$4 sm:$0xff]  }
  0x21   :  { %1065 = vmatprep.subr.bf16.mxu0 %v1404_v33  ;;  %v1472_v33 = vld [vmem:[%s2067_s1 + $0x330] ss:$8 sps:$4 sm:$0xff]  }
  0x23   :  { %984 = vmatpush1.bf16.msra.mxu1 %v1406_v34  ;;  %v1477_v34 = vld [vmem:[%s2067_s1 + $0x144] ss:$8 sps:$4 sm:$0xff]  }
  0x24   :  { %1066 = vmatpush1.bf16.msra.mxu0 %v1407_v35  ;;  %985 = vmatprep.subr.bf16.mxu1 %v1408_v39  ;;  %v1480_v35 = vld [vmem:[%s2067_s1 + $0x344] ss:$8 sps:$4 sm:$0xff]   ;;  %v1486_v39 = vld [vmem:[%s2067_s1 + $0x354] ss:$8 sps:$4 sm:$0xff]  }
  0x25   :  { %1067 = vmatprep.subr.bf16.mxu0 %v1410_v40  ;;  %v1481_v40 = vld [vmem:[%s2067_s1 + $0x150] ss:$8 sps:$4 sm:$0xff]  }
  0x27   :  { %986 = vmatpush1.bf16.msra.mxu1 %v1412_v41  ;;  %v1484_v41 = vld [vmem:[%s2067_s1 + $0x350] ss:$8 sps:$4 sm:$0xff]  }
  0x28   :  { %1068 = vmatpush1.bf16.msra.mxu0 %v1413_v44  ;;  %987 = vmatprep.subr.bf16.mxu1 %v1414_v45  ;;  %v1492_v44 = vld [vmem:[%s2067_s1 + $0x364] ss:$8 sps:$4 sm:$0xff]   ;;  %v1487_v45 = vld [vmem:[%s2067_s1 + $0x160] ss:$8 sps:$4 sm:$0xff]  }
  0x29   :  { %1069 = vmatprep.subr.bf16.mxu0 %v1416_v46  ;;  %v1490_v46 = vld [vmem:[%s2067_s1 + $0x360] ss:$8 sps:$4 sm:$0xff]  }
  0x2b   :  { %988 = vmatpush1.bf16.msra.mxu1 %v1418_v47  ;;  %v1495_v47 = vld [vmem:[%s2067_s1 + $0x174] ss:$8 sps:$4 sm:$0xff]  }
  0x2c   :  { %1070 = vmatpush1.bf16.msra.mxu0 %v1419_v48  ;;  %989 = vmatprep.subr.bf16.mxu1 %v1420_v50  ;;  %v1498_v48 = vld [vmem:[%s2067_s1 + $0x374] ss:$8 sps:$4 sm:$0xff]   ;;  %v1493_v50 = vld [vmem:[%s2067_s1 + $0x170] ss:$8 sps:$4 sm:$0xff]  }
  0x2d   :  { %1071 = vmatprep.subr.bf16.mxu0 %v1422_v51  ;;  %v1496_v51 = vld [vmem:[%s2067_s1 + $0x370] ss:$8 sps:$4 sm:$0xff]  }
  0x2f   :  { %990 = vmatpush1.bf16.msra.mxu1 %v1424_v53  ;;  %v1504_v53 = vld [vmem:[%s2067_s1 + $0x384] ss:$8 sps:$4 sm:$0xff]  }
  0x30   :  { %1072 = vmatpush1.bf16.msra.mxu0 %v1425_v56  ;;  %991 = vmatprep.subr.bf16.mxu1 %v1426_v57  ;;  %v1916_v56 = vld.sshfl [vmem:[%s2068_s0 + $0x8] sm:$0x1 pattern:$0x75316420]  ;;  %v1507_v57 = vld [vmem:[%s2067_s1 + $0x194] ss:$8 sps:$4 sm:$0xff]  }
  0x31   :  { %1073 = vmatprep.subr.bf16.mxu0 %v1428_v58  ;;  %v1510_v58 = vld [vmem:[%s2067_s1 + $0x394] ss:$8 sps:$4 sm:$0xff]   ;;  %v237_v59 = vrot.slane %v1916_v56, %v1728_v49 }
  0x33   :  { %992 = vmatpush1.bf16.msra.mxu1 %v1430_v61  ;;  %v1508_v61 = vld [vmem:[%s2067_s1 + $0x390] ss:$8 sps:$4 sm:$0xff]  }
  0x34   :  { %1074 = vmatpush1.bf16.msra.mxu0 %v1431_v0  ;;  %993 = vmatprep.subr.bf16.mxu1 %v1432_v1  ;;  %v1511_v0 = vld [vmem:[%s2067_s1 + $0x1a0] ss:$8 sps:$4 sm:$0xff]  }
  0x35   :  { %1075 = vmatprep.subr.bf16.mxu0 %v1434_v2  ;;  %v1514_v1 = vld [vmem:[%s2067_s1 + $0x3a0] ss:$8 sps:$4 sm:$0xff]   ;;  %v1519_v2 = vld [vmem:[%s2067_s1 + $0x1b4] ss:$8 sps:$4 sm:$0xff]  }
  0x37   :  { %994 = vmatpush1.bf16.msra.mxu1 %v1436_v4  ;;  %v1517_v4 = vld [vmem:[%s2067_s1 + $0x1b0] ss:$8 sps:$4 sm:$0xff]  }
  0x38   :  { %1076 = vmatpush1.bf16.msra.mxu0 %v1437_v5  ;;  %995 = vmatprep.subr.bf16.mxu1 %v1438_v6  ;;  %v1520_v5 = vld [vmem:[%s2067_s1 + $0x3b0] ss:$8 sps:$4 sm:$0xff]   ;;  %v1525_v6 = vld [vmem:[%s2067_s1 + $0x1c4] ss:$8 sps:$4 sm:$0xff]  }
  0x39   :  { %1077 = vmatprep.subr.bf16.mxu0 %v1440_v7  ;;  %v1528_v7 = vld [vmem:[%s2067_s1 + $0x3c4] ss:$8 sps:$4 sm:$0xff]  }
  0x3b   :  { %996 = vmatpush1.bf16.msra.mxu1 %v1442_v8  ;;  %v1523_v8 = vld [vmem:[%s2067_s1 + $0x1c0] ss:$8 sps:$4 sm:$0xff]  }
  0x3c   :  { %1078 = vmatpush1.bf16.msra.mxu0 %v1443_v9  ;;  %997 = vmatprep.subr.bf16.mxu1 %v1444_v10  ;;  %v1526_v9 = vld [vmem:[%s2067_s1 + $0x3c0] ss:$8 sps:$4 sm:$0xff]   ;;  %v1531_v10 = vld [vmem:[%s2067_s1 + $0x1d4] ss:$8 sps:$4 sm:$0xff]  }
  0x3d   :  { %1079 = vmatprep.subr.bf16.mxu0 %v1446_v11  ;;  %v1534_v11 = vld [vmem:[%s2067_s1 + $0x3d4] ss:$8 sps:$4 sm:$0xff]  }
  0x3f   :  { %998 = vmatpush1.bf16.msra.mxu1 %v1448_v12  ;;  %v1529_v12 = vld [vmem:[%s2067_s1 + $0x1d0] ss:$8 sps:$4 sm:$0xff]  }
  0x40   :  { %1080 = vmatpush1.bf16.msra.mxu0 %v1449_v13  ;;  %1008 = vmatprep.subr.bf16.mxu1 %v1452_v14  ;;  %v1532_v13 = vld [vmem:[%s2067_s1 + $0x3d0] ss:$8 sps:$4 sm:$0xff]   ;;  %v1537_v14 = vld [vmem:[%s2067_s1 + $0x1e4] ss:$8 sps:$4 sm:$0xff]  }
  0x41   :  { %1090 = vmatprep.subr.bf16.mxu0 %v1456_v15  ;;  %v1540_v15 = vld [vmem:[%s2067_s1 + $0x3e4] ss:$8 sps:$4 sm:$0xff]  }
  0x42   :  { %1000 = vmatmul.mubr.bf16.vlgmr.msra.gmra.mrb[0].mxu1 %v1807_v17 }
  0x43   :  { %1082 = vmatmul.mubr.bf16.vlgmr.msra.gmra.mrb[0].mxu0 %v1810_v18  ;;  %1009 = vmatpush1.bf16.msra.mxu1 %v1450_v16  ;;  %v1535_v16 = vld [vmem:[%s2067_s1 + $0x1e0] ss:$8 sps:$4 sm:$0xff]  }
  0x44   :  { %1091 = vmatpush1.bf16.msra.mxu0 %v1454_v19  ;;  %1010 = vmatprep.subr.bf16.mxu1 %v1459_v20  ;;  %v1538_v19 = vld [vmem:[%s2067_s1 + $0x3e0] ss:$8 sps:$4 sm:$0xff]   ;;  %v1543_v20 = vld [vmem:[%s2067_s1 + $0x1f4] ss:$8 sps:$4 sm:$0xff]  }
  0x45   :  { %1092 = vmatprep.subr.bf16.mxu0 %v1462_v21  ;;  %1040 = vmatprep.mubr.bf16.mxu1 %v222_v22  ;;  %v1546_v21 = vld [vmem:[%s2067_s1 + $0x3f4] ss:$8 sps:$4 sm:$0xff]   ;;  %v1541_v22 = vld [vmem:[%s2067_s1 + $0x1f0] ss:$8 sps:$4 sm:$0xff]  }
  0x46   :  { %1122 = vmatprep.mubr.bf16.mxu0 %v223_v23  ;;  %v1544_v23 = vld [vmem:[%s2067_s1 + $0x3f0] ss:$8 sps:$4 sm:$0xff]  }
  0x47   :  { %1011 = vmatpush1.bf16.msra.mxu1 %v1457_v24  ;;  %v1549_v24 = vld [vmem:[%s2067_s1 + $0x404] ss:$8 sps:$4 sm:$0xff]  }
  0x48   :  { %1093 = vmatpush1.bf16.msra.mxu0 %v1460_v25  ;;  %1012 = vmatprep.subr.bf16.mxu1 %v1465_v26  ;;  %v220_v25 = vcombine.high %v1807_v17, %v1807_v17  ;;  %v221_v26 = vcombine.high %v1810_v18, %v1810_v18  ;;  %v1550_v17 = vld [vmem:[%s2067_s1 + $0x410] ss:$8 sps:$4 sm:$0xff]   ;;  %v1555_v18 = vld [vmem:[%s2067_s1 + $0x424] ss:$8 sps:$4 sm:$0xff]  }
  0x49   :  { %1094 = vmatprep.subr.bf16.mxu0 %v1468_v27  ;;  %v1547_v27 = vld [vmem:[%s2067_s1 + $0x400] ss:$8 sps:$4 sm:$0xff]  }
  0x4b   :  { %1013 = vmatpush1.bf16.msra.mxu1 %v1463_v28  ;;  %v1552_v28 = vld [vmem:[%s2067_s1 + $0x414] ss:$8 sps:$4 sm:$0xff]  }
  0x4c   :  { %1095 = vmatpush1.bf16.msra.mxu0 %v1466_v29  ;;  %1014 = vmatprep.subr.bf16.mxu1 %v1471_v30  ;;  %v1572_v29 = vmov 0   ;;  %v1553_v30 = vld [vmem:[%s2067_s1 + $0x420] ss:$8 sps:$4 sm:$0xff]  }
  0x4d   :  { %1096 = vmatprep.subr.bf16.mxu0 %v1474_v31  ;;  %v1558_v31 = vld [vmem:[%s2067_s1 + $0x434] ss:$8 sps:$4 sm:$0xff]  }
  0x4f   :  { %1015 = vmatpush1.bf16.msra.mxu1 %v1469_v32  ;;  %v1556_v32 = vld [vmem:[%s2067_s1 + $0x430] ss:$8 sps:$4 sm:$0xff]  }
  0x50   :  { %1097 = vmatpush1.bf16.msra.mxu0 %v1472_v33  ;;  %1016 = vmatprep.subr.bf16.mxu1 %v1477_v34  ;;  %v1561_v33 = vld [vmem:[%s2067_s1 + $0x444] ss:$8 sps:$4 sm:$0xff]   ;;  %v1559_v34 = vld [vmem:[%s2067_s1 + $0x440] ss:$8 sps:$4 sm:$0xff]  }
  0x51   :  { %1098 = vmatprep.subr.bf16.mxu0 %v1480_v35  ;;  %v1564_v35 = vld [vmem:[%s2067_s1 + $0x454] ss:$8 sps:$4 sm:$0xff]  }
  0x53   :  { %1017 = vmatpush1.bf16.msra.mxu1 %v1475_v36  ;;  %v1562_v36 = vld [vmem:[%s2067_s1 + $0x450] ss:$8 sps:$4 sm:$0xff]  }
  0x54   :  { %1099 = vmatpush1.bf16.msra.mxu0 %v1478_v37  ;;  %1018 = vmatprep.subr.bf16.mxu1 %v1483_v38  ;;  %v1567_v37 = vld [vmem:[%s2067_s1 + $0x464] ss:$8 sps:$4 sm:$0xff]   ;;  %v1565_v38 = vld [vmem:[%s2067_s1 + $0x460] ss:$8 sps:$4 sm:$0xff]  }
  0x55   :  { %1100 = vmatprep.subr.bf16.mxu0 %v1486_v39  ;;  %v1570_v39 = vld [vmem:[%s2067_s1 + $0x474] ss:$8 sps:$4 sm:$0xff]  }
  0x57   :  { %1019 = vmatpush1.bf16.msra.mxu1 %v1481_v40  ;;  %v1568_v40 = vld [vmem:[%s2067_s1 + $0x470] ss:$8 sps:$4 sm:$0xff]  }
  0x58   :  { %1101 = vmatpush1.bf16.msra.mxu0 %v1484_v41  ;;  %1020 = vmatprep.subr.bf16.mxu1 %v1489_v43 }
  0x59   :  { %1102 = vmatprep.subr.bf16.mxu0 %v1492_v44 }
  0x5b   :  { %1021 = vmatpush1.bf16.msra.mxu1 %v1487_v45 }
  0x5c   :  { %1103 = vmatpush1.bf16.msra.mxu0 %v1490_v46  ;;  %1022 = vmatprep.subr.bf16.mxu1 %v1495_v47  ;;  %v165_v46 = vsub.s32 0, %v1710_v42  ;;  %v161_v47 = vld [vmem:[%s2069_s2] sm:$0x3] }
  0x5d   :  { %1104 = vmatprep.subr.bf16.mxu0 %v1498_v48  ;;  %v169_v48 = vsub.s32 1, %v1710_v42 }
  0x5f   :  { %1023 = vmatpush1.bf16.msra.mxu1 %v1493_v50  ;;  %v166_v50 = vrot.slane %v161_v47, %v165_v46 }
  0x60   :  { %1105 = vmatpush1.bf16.msra.mxu0 %v1496_v51  ;;  %1024 = vmatprep.subr.bf16.mxu1 %v1501_v52  ;;  %v170_v51 = vrot.slane %v161_v47, %v169_v48 }
  0x61   :  { %1106 = vmatprep.subr.bf16.mxu0 %v1504_v53 }
  0x63   :  { %1025 = vmatpush1.bf16.msra.mxu1 %v1499_v54 }
  0x64   :  { %1107 = vmatpush1.bf16.msra.mxu0 %v1502_v55  ;;  %1026 = vmatprep.subr.bf16.mxu1 %v1507_v57 }
  0x65   :  { %1108 = vmatprep.subr.bf16.mxu0 %v1510_v58 }
  0x67   :  { %1027 = vmatpush1.bf16.msra.mxu1 %v1505_v60 }
  0x68   :  { %1109 = vmatpush1.bf16.msra.mxu0 %v1508_v61  ;;  %1028 = vmatprep.subr.bf16.mxu1 %v1513_v62 }
  0x69   :  { %1110 = vmatprep.subr.bf16.mxu0 %v1516_v63 }
  0x6b   :  { %1029 = vmatpush1.bf16.msra.mxu1 %v1511_v0 }
  0x6c   :  { %1111 = vmatpush1.bf16.msra.mxu0 %v1514_v1  ;;  %1030 = vmatprep.subr.bf16.mxu1 %v1519_v2 }
  0x6d   :  { %1112 = vmatprep.subr.bf16.mxu0 %v1522_v3 }
  0x6f   :  { %1031 = vmatpush1.bf16.msra.mxu1 %v1517_v4 }
  0x70   :  { %1113 = vmatpush1.bf16.msra.mxu0 %v1520_v5  ;;  %1032 = vmatprep.subr.bf16.mxu1 %v1525_v6 }
  0x71   :  { %1114 = vmatprep.subr.bf16.mxu0 %v1528_v7 }
  0x73   :  { %1033 = vmatpush1.bf16.msra.mxu1 %v1523_v8 }
  0x74   :  { %1115 = vmatpush1.bf16.msra.mxu0 %v1526_v9  ;;  %1034 = vmatprep.subr.bf16.mxu1 %v1531_v10 }
  0x75   :  { %1116 = vmatprep.subr.bf16.mxu0 %v1534_v11 }
  0x77   :  { %1035 = vmatpush1.bf16.msra.mxu1 %v1529_v12 }
  0x78   :  { %1117 = vmatpush1.bf16.msra.mxu0 %v1532_v13  ;;  %1036 = vmatprep.subr.bf16.mxu1 %v1537_v14 }
  0x79   :  { %1118 = vmatprep.subr.bf16.mxu0 %v1540_v15 }
  0x7b   :  { %1037 = vmatpush1.bf16.msra.mxu1 %v1535_v16 }
  0x7c   :  { %1119 = vmatpush1.bf16.msra.mxu0 %v1538_v19  ;;  %1038 = vmatprep.subr.bf16.mxu1 %v1543_v20 }
  0x7d   :  { %1120 = vmatprep.subr.bf16.mxu0 %v1546_v21 }
  0x7f   :  { %1039 = vmatpush1.bf16.msra.mxu1 %v1541_v22 }
  0x80   :  { %1121 = vmatpush1.bf16.msra.mxu0 %v1544_v23 }
  0x81   :  { %1131 = vmatprep.subr.bf16.mxu0 %v1549_v24 }
  0x82   :  { %1041 = vmatmul.mubr.bf16.vlgmr.msra.gmra.mrb[0].mxu1 %v220_v25 }
  0x83   :  { %1123 = vmatmul.mubr.bf16.vlgmr.msra.gmra.mrb[0].mxu0 %v221_v26 }
  0x84   :  { %1132 = vmatpush1.bf16.msra.mxu0 %v1547_v27  ;;  %1163 = vmatprep.mubr.bf16.mxu0 %v1572_v29 }
  0x85   :  { %1133 = vmatprep.subr.bf16.mxu0 %v1552_v28 }
  0x88   :  { %1134 = vmatpush1.bf16.msra.mxu0 %v1550_v17 }
  0x89   :  { %1135 = vmatprep.subr.bf16.mxu0 %v1555_v18 }
  0x8c   :  { %1136 = vmatpush1.bf16.msra.mxu0 %v1553_v30 }
  0x8d   :  { %1137 = vmatprep.subr.bf16.mxu0 %v1558_v31 }
  0x90   :  { %1138 = vmatpush1.bf16.msra.mxu0 %v1556_v32 }
  0x91   :  { %1139 = vmatprep.subr.bf16.mxu0 %v1561_v33 }
  0x94   :  { %1140 = vmatpush1.bf16.msra.mxu0 %v1559_v34 }
  0x95   :  { %1141 = vmatprep.subr.bf16.mxu0 %v1564_v35 }
  0x98   :  { %1142 = vmatpush1.bf16.msra.mxu0 %v1562_v36 }
  0x99   :  { %1143 = vmatprep.subr.bf16.mxu0 %v1567_v37 }
  0x9c   :  { %1144 = vmatpush1.bf16.msra.mxu0 %v1565_v38 }
  0x9d   :  { %1145 = vmatprep.subr.bf16.mxu0 %v1570_v39 }
  0xa0   :  { %1146 = vmatpush1.bf16.msra.mxu0 %v1568_v40 }
  0xa3   :  { %1164 = vmatmul.mubr.bf16.vlgmr.msra.gmra.mrb[0].mxu0 %v237_v59 }
 0x155   :  { %v1042_v41 = vpop.f32.mrb[0].mxu1 }
 0x156   :  { %v1044_v43 = vpop.f32.mrb[1].mxu1  ;;  %v1336_v52 = vadd.f32 %v1042_v41, %v166_v50 }
 0x157   :  { %v1046_v44 = vpop.f32.mrb[2].mxu1  ;;  %v1338_v53 = vadd.f32 %v1044_v43, %v170_v51 }
 0x158   :  { %v1047_v45 = vpop.f32.mrb[3].mxu1 }
 0x176   :  { %v1165_v54 = vpop.f32.mrb[0].mxu0 }
 0x177   :  { %v1337_v55 = vadd.f32 %v1336_v52, %v1165_v54  ;;  %v1167_v49 = vpop.f32.mrb[1].mxu0 }
 0x178   :  { %v1339_v56 = vadd.f32 %v1338_v53, %v1167_v49  ;;  %v1169_v57 = vpop.f32.mrb[2].mxu0 }
 0x179   :  { %v1172_v58 = vmax.f32 %v1337_v55, 0.0  ;;  %v1170_v59 = vpop.f32.mrb[3].mxu0 }
 0x17a   :  { %v1173_v60 = vmax.f32 %v1339_v56, 0.0 }
 0x17c   :  { %v1176_v61 = vcombine.low %v1172_v58, %v1173_v60 }
 0x17e   :  { %1335 = vst.sshfl [vmem:[%s2070_s3] sm:$0x33 pattern:$0x76325410] %v1176_v61 }

// kernel: rebuildnet_forward.34
= control target key start
LH: loop header
LB: loop body
LE: loop exit
PB: predicated region body
PF: predicated region fallthrough
CT: control target
= control target key end

     0   :  { %v307_v36 = vlaneseq  ;;  %v3042_v37 = vmov 1966171168   ;;  %s4018_s1 = inlined_call_operand.vmem [shape: bf16[2304,256], index: 1, kind: input, shape index: {}]   ;;  %s4019_s0 = inlined_call_operand.vmem [shape: bf16[2,2304], index: 0, kind: input, shape index: {}]   ;;  %s4020_s2 = inlined_call_operand.vmem [shape: f32[1,256], index: 2, kind: input, shape index: {}]   ;;  %s4021_s3 = inlined_call_operand.vmem [shape: f32[2,256], index: 3, kind: output, shape index: {}]  }
   0x1   :  { %v2608_v0 = vld [vmem:[%s4018_s1 + $0x4] ss:$8 sps:$4 sm:$0xff]   ;;  %v2612_v2 = vld [vmem:[%s4018_s1] ss:$8 sps:$4 sm:$0xff]   ;;  %v2614_v4 = vld [vmem:[%s4018_s1 + $0x14] ss:$8 sps:$4 sm:$0xff]   ;;  %v322_v38 = vunpack.c.l.s4 %v3042_v37 }
   0x2   :  { %v2610_v1 = vld [vmem:[%s4018_s1 + $0x404] ss:$8 sps:$4 sm:$0xff]   ;;  %1898 = vmatprep.subr.bf16.mxu1 %v2608_v0  ;;  %v2613_v3 = vld [vmem:[%s4018_s1 + $0x400] ss:$8 sps:$4 sm:$0xff]   ;;  %v2616_v5 = vld [vmem:[%s4018_s1 + $0x414] ss:$8 sps:$4 sm:$0xff]  }
   0x3   :  { %2062 = vmatprep.subr.bf16.mxu0 %v2610_v1  ;;  %1899 = vmatpush1.bf16.msra.mxu1 %v2612_v2  ;;  %v2618_v6 = vld [vmem:[%s4018_s1 + $0x10] ss:$8 sps:$4 sm:$0xff]   ;;  %v2620_v8 = vld [vmem:[%s4018_s1 + $0x24] ss:$8 sps:$4 sm:$0xff]   ;;  %v2624_v10 = vld [vmem:[%s4018_s1 + $0x20] ss:$8 sps:$4 sm:$0xff]   ;;  %v323_v43 = vunpack.c.0.s8 %v322_v38 }
   0x4   :  { %2063 = vmatpush1.bf16.msra.mxu0 %v2613_v3  ;;  %1900 = vmatprep.subr.bf16.mxu1 %v2614_v4  ;;  %v2619_v7 = vld [vmem:[%s4018_s1 + $0x410] ss:$8 sps:$4 sm:$0xff]   ;;  %v2622_v9 = vld [vmem:[%s4018_s1 + $0x424] ss:$8 sps:$4 sm:$0xff]   ;;  %v2625_v11 = vld [vmem:[%s4018_s1 + $0x420] ss:$8 sps:$4 sm:$0xff]  }
   0x5   :  { %2064 = vmatprep.subr.bf16.mxu0 %v2616_v5  ;;  %v2626_v12 = vld [vmem:[%s4018_s1 + $0x34] ss:$8 sps:$4 sm:$0xff]   ;;  %v2630_v14 = vld [vmem:[%s4018_s1 + $0x30] ss:$8 sps:$4 sm:$0xff]   ;;  %v2632_v16 = vld [vmem:[%s4018_s1 + $0x44] ss:$8 sps:$4 sm:$0xff]  }
   0x6   :  { %v2628_v13 = vld [vmem:[%s4018_s1 + $0x434] ss:$8 sps:$4 sm:$0xff]   ;;  %v2631_v15 = vld [vmem:[%s4018_s1 + $0x430] ss:$8 sps:$4 sm:$0xff]   ;;  %v2634_v17 = vld [vmem:[%s4018_s1 + $0x444] ss:$8 sps:$4 sm:$0xff]  }
   0x7   :  { %1901 = vmatpush1.bf16.msra.mxu1 %v2618_v6  ;;  %v2636_v18 = vld [vmem:[%s4018_s1 + $0x40] ss:$8 sps:$4 sm:$0xff]   ;;  %v2638_v20 = vld [vmem:[%s4018_s1 + $0x54] ss:$8 sps:$4 sm:$0xff]   ;;  %v2642_v22 = vld [vmem:[%s4018_s1 + $0x50] ss:$8 sps:$4 sm:$0xff]  }
   0x8   :  { %2065 = vmatpush1.bf16.msra.mxu0 %v2619_v7  ;;  %1902 = vmatprep.subr.bf16.mxu1 %v2620_v8  ;;  %v2637_v19 = vld [vmem:[%s4018_s1 + $0x440] ss:$8 sps:$4 sm:$0xff]   ;;  %v2640_v21 = vld [vmem:[%s4018_s1 + $0x454] ss:$8 sps:$4 sm:$0xff]   ;;  %v2643_v23 = vld [vmem:[%s4018_s1 + $0x450] ss:$8 sps:$4 sm:$0xff]  }
   0x9   :  { %2066 = vmatprep.subr.bf16.mxu0 %v2622_v9  ;;  %v2644_v24 = vld [vmem:[%s4018_s1 + $0x64] ss:$8 sps:$4 sm:$0xff]   ;;  %v2648_v26 = vld [vmem:[%s4018_s1 + $0x60] ss:$8 sps:$4 sm:$0xff]   ;;  %v2650_v28 = vld [vmem:[%s4018_s1 + $0x74] ss:$8 sps:$4 sm:$0xff]  }
   0xa   :  { %v2646_v25 = vld [vmem:[%s4018_s1 + $0x464] ss:$8 sps:$4 sm:$0xff]   ;;  %v2649_v27 = vld [vmem:[%s4018_s1 + $0x460] ss:$8 sps:$4 sm:$0xff]   ;;  %v2652_v29 = vld [vmem:[%s4018_s1 + $0x474] ss:$8 sps:$4 sm:$0xff]  }
   0xb   :  { %1903 = vmatpush1.bf16.msra.mxu1 %v2624_v10  ;;  %v2654_v30 = vld [vmem:[%s4018_s1 + $0x70] ss:$8 sps:$4 sm:$0xff]   ;;  %v2656_v32 = vld [vmem:[%s4018_s1 + $0x84] ss:$8 sps:$4 sm:$0xff]   ;;  %v2660_v34 = vld [vmem:[%s4018_s1 + $0x80] ss:$8 sps:$4 sm:$0xff]  }
   0xc   :  { %2067 = vmatpush1.bf16.msra.mxu0 %v2625_v11  ;;  %1904 = vmatprep.subr.bf16.mxu1 %v2626_v12  ;;  %v2655_v31 = vld [vmem:[%s4018_s1 + $0x470] ss:$8 sps:$4 sm:$0xff]   ;;  %v2658_v33 = vld [vmem:[%s4018_s1 + $0x484] ss:$8 sps:$4 sm:$0xff]   ;;  %v2661_v35 = vld [vmem:[%s4018_s1 + $0x480] ss:$8 sps:$4 sm:$0xff]  }
   0xd   :  { %2068 = vmatprep.subr.bf16.mxu0 %v2628_v13  ;;  %v2662_v39 = vld [vmem:[%s4018_s1 + $0x94] ss:$8 sps:$4 sm:$0xff]   ;;  %v2666_v41 = vld [vmem:[%s4018_s1 + $0x90] ss:$8 sps:$4 sm:$0xff]   ;;  %v3180_v42 = vshrl.u32 %v307_v36, 7  ;;  %v3209_v52 = vld [vmem:[%s4019_s0] sm:$0xff] }
   0xe   :  { %v2664_v40 = vld [vmem:[%s4018_s1 + $0x494] ss:$8 sps:$4 sm:$0xff]   ;;  %v2667_v44 = vld [vmem:[%s4018_s1 + $0x490] ss:$8 sps:$4 sm:$0xff]   ;;  %v2668_v45 = vld [vmem:[%s4018_s1 + $0xa4] ss:$8 sps:$4 sm:$0xff]  }
   0xf   :  { %1905 = vmatpush1.bf16.msra.mxu1 %v2630_v14  ;;  %v2670_v46 = vld [vmem:[%s4018_s1 + $0x4a4] ss:$8 sps:$4 sm:$0xff]   ;;  %v2672_v47 = vld [vmem:[%s4018_s1 + $0xa0] ss:$8 sps:$4 sm:$0xff]   ;;  %v3198_v49 = vsub.s32 %v323_v43, %v3180_v42  ;;  %v2674_v50 = vld [vmem:[%s4018_s1 + $0xb4] ss:$8 sps:$4 sm:$0xff]  }
  0x10   :  { %2069 = vmatpush1.bf16.msra.mxu0 %v2631_v15  ;;  %1906 = vmatprep.subr.bf16.mxu1 %v2632_v16  ;;  %v2673_v48 = vld [vmem:[%s4018_s1 + $0x4a0] ss:$8 sps:$4 sm:$0xff]   ;;  %v2676_v51 = vld [vmem:[%s4018_s1 + $0x4b4] ss:$8 sps:$4 sm:$0xff]   ;;  %v2678_v53 = vld [vmem:[%s4018_s1 + $0xb0] ss:$8 sps:$4 sm:$0xff]  }
  0x11   :  { %2070 = vmatprep.subr.bf16.mxu0 %v2634_v17  ;;  %v327_v54 = vrot.slane %v3209_v52, %v3198_v49  ;;  %v2679_v55 = vld [vmem:[%s4018_s1 + $0x4b0] ss:$8 sps:$4 sm:$0xff]   ;;  %v3222_v56 = vld [vmem:[%s4019_s0 + $0x8] sm:$0xff]  ;;  %v2686_v1 = vld [vmem:[%s4018_s1 + $0xd4] ss:$8 sps:$4 sm:$0xff]  }
  0x12   :  { %v2680_v57 = vld [vmem:[%s4018_s1 + $0xc4] ss:$8 sps:$4 sm:$0xff]   ;;  %v376_v60 = vrot.slane %v3222_v56, %v3198_v49  ;;  %v2684_v63 = vld [vmem:[%s4018_s1 + $0xc0] ss:$8 sps:$4 sm:$0xff]   ;;  %v2688_v2 = vld [vmem:[%s4018_s1 + $0x4d4] ss:$8 sps:$4 sm:$0xff]  }
  0x13   :  { %1907 = vmatpush1.bf16.msra.mxu1 %v2636_v18  ;;  %v2682_v58 = vld [vmem:[%s4018_s1 + $0x4c4] ss:$8 sps:$4 sm:$0xff]   ;;  %v335_v59 = vcombine.high %v327_v54, %v327_v54  ;;  %v2685_v0 = vld [vmem:[%s4018_s1 + $0x4c0] ss:$8 sps:$4 sm:$0xff]   ;;  %v2690_v4 = vld [vmem:[%s4018_s1 + $0xd0] ss:$8 sps:$4 sm:$0xff]   ;;  %v3283_v16 = vrot.slane %v327_v54, %v3198_v49 }
  0x14   :  { %2071 = vmatpush1.bf16.msra.mxu0 %v2637_v19  ;;  %1908 = vmatprep.subr.bf16.mxu1 %v2638_v20  ;;  %v384_v62 = vcombine.high %v376_v60, %v376_v60  ;;  %v2691_v5 = vld [vmem:[%s4018_s1 + $0x4d0] ss:$8 sps:$4 sm:$0xff]   ;;  %v2692_v6 = vld [vmem:[%s4018_s1 + $0xe4] ss:$8 sps:$4 sm:$0xff]   ;;  %v2696_v8 = vld [vmem:[%s4018_s1 + $0xe0] ss:$8 sps:$4 sm:$0xff]   ;;  %v3286_v17 = vrot.slane %v376_v60, %v3198_v49 }
  0x15   :  { %2072 = vmatprep.subr.bf16.mxu0 %v2640_v21  ;;  %v357_v61 = vrot.slane %v335_v59, %v3198_v49  ;;  %v2694_v7 = vld [vmem:[%s4018_s1 + $0x4e4] ss:$8 sps:$4 sm:$0xff]   ;;  %v2697_v9 = vld [vmem:[%s4018_s1 + $0x4e0] ss:$8 sps:$4 sm:$0xff]   ;;  %v2698_v10 = vld [vmem:[%s4018_s1 + $0xf4] ss:$8 sps:$4 sm:$0xff]  }
  0x16   :  { %v406_v3 = vrot.slane %v384_v62, %v3198_v49  ;;  %v2700_v11 = vld [vmem:[%s4018_s1 + $0x4f4] ss:$8 sps:$4 sm:$0xff]   ;;  %v2702_v12 = vld [vmem:[%s4018_s1 + $0xf0] ss:$8 sps:$4 sm:$0xff]   ;;  %v2707_v14 = vld [vmem:[%s4018_s1 + $0x104] ss:$8 sps:$4 sm:$0xff]  }
  0x17   :  { %1909 = vmatpush1.bf16.msra.mxu1 %v2642_v22  ;;  %1930 = vmatprep.mubr.bf16.mxu1 %v357_v61  ;;  %v2703_v13 = vld [vmem:[%s4018_s1 + $0x4f0] ss:$8 sps:$4 sm:$0xff]   ;;  %v2711_v15 = vld [vmem:[%s4018_s1 + $0x504] ss:$8 sps:$4 sm:$0xff]   ;;  %v2705_v18 = vld [vmem:[%s4018_s1 + $0x100] ss:$8 sps:$4 sm:$0xff]   ;;  %v367_v22 = vcombine.high %v357_v61, %v357_v61 }
  0x18   :  { %2073 = vmatpush1.bf16.msra.mxu0 %v2643_v23  ;;  %1910 = vmatprep.subr.bf16.mxu1 %v2644_v24  ;;  %v2709_v19 = vld [vmem:[%s4018_s1 + $0x500] ss:$8 sps:$4 sm:$0xff]   ;;  %v2714_v20 = vld [vmem:[%s4018_s1 + $0x114] ss:$8 sps:$4 sm:$0xff]   ;;  %v416_v23 = vcombine.high %v406_v3, %v406_v3  ;;  %v2712_v24 = vld [vmem:[%s4018_s1 + $0x110] ss:$8 sps:$4 sm:$0xff]  }
  0x19   :  { %2074 = vmatprep.subr.bf16.mxu0 %v2646_v25  ;;  %2094 = vmatprep.mubr.bf16.mxu0 %v406_v3  ;;  %v2717_v21 = vld [vmem:[%s4018_s1 + $0x514] ss:$8 sps:$4 sm:$0xff]   ;;  %v2715_v25 = vld [vmem:[%s4018_s1 + $0x510] ss:$8 sps:$4 sm:$0xff]   ;;  %v2730_v36 = vld [vmem:[%s4018_s1 + $0x140] ss:$8 sps:$4 sm:$0xff]  }
  0x1a   :  { %v2733_v37 = vld [vmem:[%s4018_s1 + $0x540] ss:$8 sps:$4 sm:$0xff]   ;;  %v2738_v38 = vld [vmem:[%s4018_s1 + $0x154] ss:$8 sps:$4 sm:$0xff]   ;;  %v2744_v43 = vld [vmem:[%s4018_s1 + $0x164] ss:$8 sps:$4 sm:$0xff]  }
  0x1b   :  { %1911 = vmatpush1.bf16.msra.mxu1 %v2648_v26  ;;  %v2720_v26 = vld [vmem:[%s4018_s1 + $0x124] ss:$8 sps:$4 sm:$0xff]   ;;  %v2765_v59 = vld [vmem:[%s4018_s1 + $0x594] ss:$8 sps:$4 sm:$0xff]   ;;  %v2760_v60 = vld [vmem:[%s4018_s1 + $0x190] ss:$8 sps:$4 sm:$0xff]  }
  0x1c   :  { %2075 = vmatpush1.bf16.msra.mxu0 %v2649_v27  ;;  %1912 = vmatprep.subr.bf16.mxu1 %v2650_v28  ;;  %v2723_v27 = vld [vmem:[%s4018_s1 + $0x524] ss:$8 sps:$4 sm:$0xff]   ;;  %v2718_v28 = vld [vmem:[%s4018_s1 + $0x120] ss:$8 sps:$4 sm:$0xff]   ;;  %v2763_v61 = vld [vmem:[%s4018_s1 + $0x590] ss:$8 sps:$4 sm:$0xff]  }
  0x1d   :  { %2076 = vmatprep.subr.bf16.mxu0 %v2652_v29  ;;  %v2721_v29 = vld [vmem:[%s4018_s1 + $0x520] ss:$8 sps:$4 sm:$0xff]   ;;  %v2759_v54 = vld [vmem:[%s4018_s1 + $0x584] ss:$8 sps:$4 sm:$0xff]   ;;  %v2777_v3 = vld [vmem:[%s4018_s1 + $0x5b4] ss:$8 sps:$4 sm:$0xff]  }
  0x1e   :  { %v2768_v62 = vld [vmem:[%s4018_s1 + $0x1a4] ss:$8 sps:$4 sm:$0xff]  }
  0x1f   :  { %1913 = vmatpush1.bf16.msra.mxu1 %v2654_v30  ;;  %v2726_v30 = vld [vmem:[%s4018_s1 + $0x134] ss:$8 sps:$4 sm:$0xff]  }
  0x20   :  { %2077 = vmatpush1.bf16.msra.mxu0 %v2655_v31  ;;  %1914 = vmatprep.subr.bf16.mxu1 %v2656_v32  ;;  %v2729_v31 = vld [vmem:[%s4018_s1 + $0x534] ss:$8 sps:$4 sm:$0xff]   ;;  %v2724_v32 = vld [vmem:[%s4018_s1 + $0x130] ss:$8 sps:$4 sm:$0xff]  }
  0x21   :  { %2078 = vmatprep.subr.bf16.mxu0 %v2658_v33  ;;  %v2727_v33 = vld [vmem:[%s4018_s1 + $0x530] ss:$8 sps:$4 sm:$0xff]  }
  0x23   :  { %1915 = vmatpush1.bf16.msra.mxu1 %v2660_v34  ;;  %v2732_v34 = vld [vmem:[%s4018_s1 + $0x144] ss:$8 sps:$4 sm:$0xff]  }
  0x24   :  { %2079 = vmatpush1.bf16.msra.mxu0 %v2661_v35  ;;  %1916 = vmatprep.subr.bf16.mxu1 %v2662_v39  ;;  %v2735_v35 = vld [vmem:[%s4018_s1 + $0x544] ss:$8 sps:$4 sm:$0xff]   ;;  %v2741_v39 = vld [vmem:[%s4018_s1 + $0x554] ss:$8 sps:$4 sm:$0xff]  }
  0x25   :  { %2080 = vmatprep.subr.bf16.mxu0 %v2664_v40  ;;  %v2736_v40 = vld [vmem:[%s4018_s1 + $0x150] ss:$8 sps:$4 sm:$0xff]  }
  0x27   :  { %1917 = vmatpush1.bf16.msra.mxu1 %v2666_v41  ;;  %v2739_v41 = vld [vmem:[%s4018_s1 + $0x550] ss:$8 sps:$4 sm:$0xff]  }
  0x28   :  { %2081 = vmatpush1.bf16.msra.mxu0 %v2667_v44  ;;  %1918 = vmatprep.subr.bf16.mxu1 %v2668_v45  ;;  %v2747_v44 = vld [vmem:[%s4018_s1 + $0x564] ss:$8 sps:$4 sm:$0xff]   ;;  %v2742_v45 = vld [vmem:[%s4018_s1 + $0x160] ss:$8 sps:$4 sm:$0xff]  }
  0x29   :  { %2082 = vmatprep.subr.bf16.mxu0 %v2670_v46  ;;  %v2745_v46 = vld [vmem:[%s4018_s1 + $0x560] ss:$8 sps:$4 sm:$0xff]  }
  0x2b   :  { %1919 = vmatpush1.bf16.msra.mxu1 %v2672_v47  ;;  %v2750_v47 = vld [vmem:[%s4018_s1 + $0x174] ss:$8 sps:$4 sm:$0xff]  }
  0x2c   :  { %2083 = vmatpush1.bf16.msra.mxu0 %v2673_v48  ;;  %1920 = vmatprep.subr.bf16.mxu1 %v2674_v50  ;;  %v2753_v48 = vld [vmem:[%s4018_s1 + $0x574] ss:$8 sps:$4 sm:$0xff]   ;;  %v2748_v50 = vld [vmem:[%s4018_s1 + $0x170] ss:$8 sps:$4 sm:$0xff]  }
  0x2d   :  { %2084 = vmatprep.subr.bf16.mxu0 %v2676_v51  ;;  %v2751_v51 = vld [vmem:[%s4018_s1 + $0x570] ss:$8 sps:$4 sm:$0xff]  }
  0x2f   :  { %1921 = vmatpush1.bf16.msra.mxu1 %v2678_v53  ;;  %v2756_v53 = vld [vmem:[%s4018_s1 + $0x184] ss:$8 sps:$4 sm:$0xff]  }
  0x30   :  { %2085 = vmatpush1.bf16.msra.mxu0 %v2679_v55  ;;  %1922 = vmatprep.subr.bf16.mxu1 %v2680_v57  ;;  %v2754_v55 = vld [vmem:[%s4018_s1 + $0x180] ss:$8 sps:$4 sm:$0xff]  }
  0x31   :  { %2086 = vmatprep.subr.bf16.mxu0 %v2682_v58  ;;  %v2757_v57 = vld [vmem:[%s4018_s1 + $0x580] ss:$8 sps:$4 sm:$0xff]   ;;  %v2762_v58 = vld [vmem:[%s4018_s1 + $0x194] ss:$8 sps:$4 sm:$0xff]  }
  0x33   :  { %1923 = vmatpush1.bf16.msra.mxu1 %v2684_v63  ;;  %v2771_v63 = vld [vmem:[%s4018_s1 + $0x5a4] ss:$8 sps:$4 sm:$0xff]  }
  0x34   :  { %2087 = vmatpush1.bf16.msra.mxu0 %v2685_v0  ;;  %1924 = vmatprep.subr.bf16.mxu1 %v2686_v1  ;;  %v2766_v0 = vld [vmem:[%s4018_s1 + $0x1a0] ss:$8 sps:$4 sm:$0xff]  }
  0x35   :  { %2088 = vmatprep.subr.bf16.mxu0 %v2688_v2  ;;  %v2769_v1 = vld [vmem:[%s4018_s1 + $0x5a0] ss:$8 sps:$4 sm:$0xff]   ;;  %v2774_v2 = vld [vmem:[%s4018_s1 + $0x1b4] ss:$8 sps:$4 sm:$0xff]  }
  0x37   :  { %1925 = vmatpush1.bf16.msra.mxu1 %v2690_v4  ;;  %v2772_v4 = vld [vmem:[%s4018_s1 + $0x1b0] ss:$8 sps:$4 sm:$0xff]  }
  0x38   :  { %2089 = vmatpush1.bf16.msra.mxu0 %v2691_v5  ;;  %1926 = vmatprep.subr.bf16.mxu1 %v2692_v6  ;;  %v2775_v5 = vld [vmem:[%s4018_s1 + $0x5b0] ss:$8 sps:$4 sm:$0xff]   ;;  %v2780_v6 = vld [vmem:[%s4018_s1 + $0x1c4] ss:$8 sps:$4 sm:$0xff]  }
  0x39   :  { %2090 = vmatprep.subr.bf16.mxu0 %v2694_v7  ;;  %v2783_v7 = vld [vmem:[%s4018_s1 + $0x5c4] ss:$8 sps:$4 sm:$0xff]  }
  0x3b   :  { %1927 = vmatpush1.bf16.msra.mxu1 %v2696_v8  ;;  %v2778_v8 = vld [vmem:[%s4018_s1 + $0x1c0] ss:$8 sps:$4 sm:$0xff]  }
  0x3c   :  { %2091 = vmatpush1.bf16.msra.mxu0 %v2697_v9  ;;  %1928 = vmatprep.subr.bf16.mxu1 %v2698_v10  ;;  %v2781_v9 = vld [vmem:[%s4018_s1 + $0x5c0] ss:$8 sps:$4 sm:$0xff]   ;;  %v2786_v10 = vld [vmem:[%s4018_s1 + $0x1d4] ss:$8 sps:$4 sm:$0xff]  }
  0x3d   :  { %2092 = vmatprep.subr.bf16.mxu0 %v2700_v11  ;;  %v2789_v11 = vld [vmem:[%s4018_s1 + $0x5d4] ss:$8 sps:$4 sm:$0xff]  }
  0x3f   :  { %1929 = vmatpush1.bf16.msra.mxu1 %v2702_v12  ;;  %v2784_v12 = vld [vmem:[%s4018_s1 + $0x1d0] ss:$8 sps:$4 sm:$0xff]  }
  0x40   :  { %2093 = vmatpush1.bf16.msra.mxu0 %v2703_v13  ;;  %1939 = vmatprep.subr.bf16.mxu1 %v2707_v14  ;;  %v2787_v13 = vld [vmem:[%s4018_s1 + $0x5d0] ss:$8 sps:$4 sm:$0xff]   ;;  %v2792_v14 = vld [vmem:[%s4018_s1 + $0x1e4] ss:$8 sps:$4 sm:$0xff]  }
  0x41   :  { %2103 = vmatprep.subr.bf16.mxu0 %v2711_v15  ;;  %v2795_v15 = vld [vmem:[%s4018_s1 + $0x5e4] ss:$8 sps:$4 sm:$0xff]  }
  0x42   :  { %1931 = vmatmul.mubr.bf16.vlgmr.msra.gmra.mrb[0].mxu1 %v3283_v16 }
  0x43   :  { %2095 = vmatmul.mubr.bf16.vlgmr.msra.gmra.mrb[0].mxu0 %v3286_v17  ;;  %1940 = vmatpush1.bf16.msra.mxu1 %v2705_v18  ;;  %v320_v18 = vcombine.high %v3209_v52, %v3209_v52  ;;  %v2801_v52 = vld [vmem:[%s4018_s1 + $0x5f4] ss:$8 sps:$4 sm:$0xff]  }
  0x44   :  { %2104 = vmatpush1.bf16.msra.mxu0 %v2709_v19  ;;  %1941 = vmatprep.subr.bf16.mxu1 %v2714_v20  ;;  %v369_v19 = vcombine.high %v3222_v56, %v3222_v56  ;;  %v2790_v20 = vld [vmem:[%s4018_s1 + $0x1e0] ss:$8 sps:$4 sm:$0xff]  }
  0x45   :  { %2105 = vmatprep.subr.bf16.mxu0 %v2717_v21  ;;  %1971 = vmatprep.mubr.bf16.mxu1 %v367_v22  ;;  %v2793_v21 = vld [vmem:[%s4018_s1 + $0x5e0] ss:$8 sps:$4 sm:$0xff]   ;;  %v2798_v22 = vld [vmem:[%s4018_s1 + $0x1f4] ss:$8 sps:$4 sm:$0xff]   ;;  %v3475_v56 = vrot.slane %v320_v18, %v3198_v49  ;;  %v2868_v18 = vld [vmem:[%s4018_s1 + $0x2b0] ss:$8 sps:$4 sm:$0xff]  }
  0x46   :  { %2135 = vmatprep.mubr.bf16.mxu0 %v416_v23  ;;  %v3478_v23 = vrot.slane %v369_v19, %v3198_v49  ;;  %v2871_v19 = vld [vmem:[%s4018_s1 + $0x6b0] ss:$8 sps:$4 sm:$0xff]  }
  0x47   :  { %1942 = vmatpush1.bf16.msra.mxu1 %v2712_v24  ;;  %v2796_v24 = vld [vmem:[%s4018_s1 + $0x1f0] ss:$8 sps:$4 sm:$0xff]  }
  0x48   :  { %2106 = vmatpush1.bf16.msra.mxu0 %v2715_v25  ;;  %1943 = vmatprep.subr.bf16.mxu1 %v2720_v26  ;;  %v2799_v25 = vld [vmem:[%s4018_s1 + $0x5f0] ss:$8 sps:$4 sm:$0xff]   ;;  %v2804_v26 = vld [vmem:[%s4018_s1 + $0x204] ss:$8 sps:$4 sm:$0xff]  }
  0x49   :  { %2107 = vmatprep.subr.bf16.mxu0 %v2723_v27  ;;  %v2807_v27 = vld [vmem:[%s4018_s1 + $0x604] ss:$8 sps:$4 sm:$0xff]  }
  0x4b   :  { %1944 = vmatpush1.bf16.msra.mxu1 %v2718_v28  ;;  %v336_v28 = vcombine.high %v3475_v56, %v3475_v56 }
  0x4c   :  { %2108 = vmatpush1.bf16.msra.mxu0 %v2721_v29  ;;  %1945 = vmatprep.subr.bf16.mxu1 %v2726_v30  ;;  %v385_v29 = vcombine.high %v3478_v23, %v3478_v23  ;;  %v365_v30 = vcombine.high %v3283_v16, %v3283_v16  ;;  %v2813_v16 = vld [vmem:[%s4018_s1 + $0x614] ss:$8 sps:$4 sm:$0xff]  }
  0x4d   :  { %2109 = vmatprep.subr.bf16.mxu0 %v2729_v31  ;;  %v414_v31 = vcombine.high %v3286_v17, %v3286_v17  ;;  %v3513_v17 = vrot.slane %v336_v28, %v3198_v49  ;;  %v2888_v28 = vld [vmem:[%s4018_s1 + $0x2e4] ss:$8 sps:$4 sm:$0xff]  }
  0x4f   :  { %1946 = vmatpush1.bf16.msra.mxu1 %v2724_v32  ;;  %v2802_v32 = vld [vmem:[%s4018_s1 + $0x200] ss:$8 sps:$4 sm:$0xff]  }
  0x50   :  { %2110 = vmatpush1.bf16.msra.mxu0 %v2727_v33  ;;  %1947 = vmatprep.subr.bf16.mxu1 %v2732_v34  ;;  %v2805_v33 = vld [vmem:[%s4018_s1 + $0x600] ss:$8 sps:$4 sm:$0xff]   ;;  %v2810_v34 = vld [vmem:[%s4018_s1 + $0x214] ss:$8 sps:$4 sm:$0xff]  }
  0x51   :  { %2111 = vmatprep.subr.bf16.mxu0 %v2735_v35  ;;  %v3516_v35 = vrot.slane %v385_v29, %v3198_v49  ;;  %v2891_v29 = vld [vmem:[%s4018_s1 + $0x6e4] ss:$8 sps:$4 sm:$0xff]  }
  0x53   :  { %1948 = vmatpush1.bf16.msra.mxu1 %v2730_v36  ;;  %v2808_v36 = vld [vmem:[%s4018_s1 + $0x210] ss:$8 sps:$4 sm:$0xff]  }
  0x54   :  { %2112 = vmatpush1.bf16.msra.mxu0 %v2733_v37  ;;  %1949 = vmatprep.subr.bf16.mxu1 %v2738_v38  ;;  %v2811_v37 = vld [vmem:[%s4018_s1 + $0x610] ss:$8 sps:$4 sm:$0xff]   ;;  %v2816_v38 = vld [vmem:[%s4018_s1 + $0x224] ss:$8 sps:$4 sm:$0xff]  }
  0x55   :  { %2113 = vmatprep.subr.bf16.mxu0 %v2741_v39  ;;  %v2819_v39 = vld [vmem:[%s4018_s1 + $0x624] ss:$8 sps:$4 sm:$0xff]  }
  0x57   :  { %1950 = vmatpush1.bf16.msra.mxu1 %v2736_v40  ;;  %v2814_v40 = vld [vmem:[%s4018_s1 + $0x220] ss:$8 sps:$4 sm:$0xff]  }
  0x58   :  { %2114 = vmatpush1.bf16.msra.mxu0 %v2739_v41  ;;  %1951 = vmatprep.subr.bf16.mxu1 %v2744_v43  ;;  %v2817_v41 = vld [vmem:[%s4018_s1 + $0x620] ss:$8 sps:$4 sm:$0xff]   ;;  %v2822_v43 = vld [vmem:[%s4018_s1 + $0x234] ss:$8 sps:$4 sm:$0xff]  }
  0x59   :  { %2115 = vmatprep.subr.bf16.mxu0 %v2747_v44  ;;  %v2825_v44 = vld [vmem:[%s4018_s1 + $0x634] ss:$8 sps:$4 sm:$0xff]  }
  0x5b   :  { %1952 = vmatpush1.bf16.msra.mxu1 %v2742_v45  ;;  %v2820_v45 = vld [vmem:[%s4018_s1 + $0x230] ss:$8 sps:$4 sm:$0xff]  }
  0x5c   :  { %2116 = vmatpush1.bf16.msra.mxu0 %v2745_v46  ;;  %1953 = vmatprep.subr.bf16.mxu1 %v2750_v47  ;;  %v2823_v46 = vld [vmem:[%s4018_s1 + $0x630] ss:$8 sps:$4 sm:$0xff]   ;;  %v2828_v47 = vld [vmem:[%s4018_s1 + $0x244] ss:$8 sps:$4 sm:$0xff]  }
  0x5d   :  { %2117 = vmatprep.subr.bf16.mxu0 %v2753_v48  ;;  %v2831_v48 = vld [vmem:[%s4018_s1 + $0x644] ss:$8 sps:$4 sm:$0xff]  }
  0x5f   :  { %1954 = vmatpush1.bf16.msra.mxu1 %v2748_v50  ;;  %v2826_v50 = vld [vmem:[%s4018_s1 + $0x240] ss:$8 sps:$4 sm:$0xff]  }
  0x60   :  { %2118 = vmatpush1.bf16.msra.mxu0 %v2751_v51  ;;  %1955 = vmatprep.subr.bf16.mxu1 %v2756_v53  ;;  %v2829_v51 = vld [vmem:[%s4018_s1 + $0x640] ss:$8 sps:$4 sm:$0xff]   ;;  %v2834_v53 = vld [vmem:[%s4018_s1 + $0x254] ss:$8 sps:$4 sm:$0xff]  }
  0x61   :  { %2119 = vmatprep.subr.bf16.mxu0 %v2759_v54  ;;  %v2837_v54 = vld [vmem:[%s4018_s1 + $0x654] ss:$8 sps:$4 sm:$0xff]  }
  0x63   :  { %1956 = vmatpush1.bf16.msra.mxu1 %v2754_v55  ;;  %v2832_v55 = vld [vmem:[%s4018_s1 + $0x250] ss:$8 sps:$4 sm:$0xff]  }
  0x64   :  { %2120 = vmatpush1.bf16.msra.mxu0 %v2757_v57  ;;  %1957 = vmatprep.subr.bf16.mxu1 %v2762_v58  ;;  %v2835_v57 = vld [vmem:[%s4018_s1 + $0x650] ss:$8 sps:$4 sm:$0xff]   ;;  %v2840_v58 = vld [vmem:[%s4018_s1 + $0x264] ss:$8 sps:$4 sm:$0xff]  }
  0x65   :  { %2121 = vmatprep.subr.bf16.mxu0 %v2765_v59  ;;  %v2843_v59 = vld [vmem:[%s4018_s1 + $0x664] ss:$8 sps:$4 sm:$0xff]  }
  0x67   :  { %1958 = vmatpush1.bf16.msra.mxu1 %v2760_v60  ;;  %v2838_v60 = vld [vmem:[%s4018_s1 + $0x260] ss:$8 sps:$4 sm:$0xff]  }
  0x68   :  { %2122 = vmatpush1.bf16.msra.mxu0 %v2763_v61  ;;  %1959 = vmatprep.subr.bf16.mxu1 %v2768_v62  ;;  %v2841_v61 = vld [vmem:[%s4018_s1 + $0x660] ss:$8 sps:$4 sm:$0xff]   ;;  %v2846_v62 = vld [vmem:[%s4018_s1 + $0x274] ss:$8 sps:$4 sm:$0xff]  }
  0x69   :  { %2123 = vmatprep.subr.bf16.mxu0 %v2771_v63  ;;  %v2849_v63 = vld [vmem:[%s4018_s1 + $0x674] ss:$8 sps:$4 sm:$0xff]  }
  0x6b   :  { %1960 = vmatpush1.bf16.msra.mxu1 %v2766_v0  ;;  %v2844_v0 = vld [vmem:[%s4018_s1 + $0x270] ss:$8 sps:$4 sm:$0xff]  }
  0x6c   :  { %2124 = vmatpush1.bf16.msra.mxu0 %v2769_v1  ;;  %1961 = vmatprep.subr.bf16.mxu1 %v2774_v2  ;;  %v2847_v1 = vld [vmem:[%s4018_s1 + $0x670] ss:$8 sps:$4 sm:$0xff]   ;;  %v2852_v2 = vld [vmem:[%s4018_s1 + $0x284] ss:$8 sps:$4 sm:$0xff]  }
  0x6d   :  { %2125 = vmatprep.subr.bf16.mxu0 %v2777_v3  ;;  %v2855_v3 = vld [vmem:[%s4018_s1 + $0x684] ss:$8 sps:$4 sm:$0xff]  }
  0x6f   :  { %1962 = vmatpush1.bf16.msra.mxu1 %v2772_v4  ;;  %v2850_v4 = vld [vmem:[%s4018_s1 + $0x280] ss:$8 sps:$4 sm:$0xff]  }
  0x70   :  { %2126 = vmatpush1.bf16.msra.mxu0 %v2775_v5  ;;  %1963 = vmatprep.subr.bf16.mxu1 %v2780_v6  ;;  %v2853_v5 = vld [vmem:[%s4018_s1 + $0x680] ss:$8 sps:$4 sm:$0xff]   ;;  %v2858_v6 = vld [vmem:[%s4018_s1 + $0x294] ss:$8 sps:$4 sm:$0xff]  }
  0x71   :  { %2127 = vmatprep.subr.bf16.mxu0 %v2783_v7  ;;  %v2861_v7 = vld [vmem:[%s4018_s1 + $0x694] ss:$8 sps:$4 sm:$0xff]  }
  0x73   :  { %1964 = vmatpush1.bf16.msra.mxu1 %v2778_v8  ;;  %v2856_v8 = vld [vmem:[%s4018_s1 + $0x290] ss:$8 sps:$4 sm:$0xff]  }
  0x74   :  { %2128 = vmatpush1.bf16.msra.mxu0 %v2781_v9  ;;  %1965 = vmatprep.subr.bf16.mxu1 %v2786_v10  ;;  %v2859_v9 = vld [vmem:[%s4018_s1 + $0x690] ss:$8 sps:$4 sm:$0xff]   ;;  %v2864_v10 = vld [vmem:[%s4018_s1 + $0x2a4] ss:$8 sps:$4 sm:$0xff]  }
  0x75   :  { %2129 = vmatprep.subr.bf16.mxu0 %v2789_v11  ;;  %v2867_v11 = vld [vmem:[%s4018_s1 + $0x6a4] ss:$8 sps:$4 sm:$0xff]  }
  0x77   :  { %1966 = vmatpush1.bf16.msra.mxu1 %v2784_v12  ;;  %v2862_v12 = vld [vmem:[%s4018_s1 + $0x2a0] ss:$8 sps:$4 sm:$0xff]  }
  0x78   :  { %2130 = vmatpush1.bf16.msra.mxu0 %v2787_v13  ;;  %1967 = vmatprep.subr.bf16.mxu1 %v2792_v14  ;;  %v2865_v13 = vld [vmem:[%s4018_s1 + $0x6a0] ss:$8 sps:$4 sm:$0xff]   ;;  %v2870_v14 = vld [vmem:[%s4018_s1 + $0x2b4] ss:$8 sps:$4 sm:$0xff]  }
  0x79   :  { %2131 = vmatprep.subr.bf16.mxu0 %v2795_v15  ;;  %v2873_v15 = vld [vmem:[%s4018_s1 + $0x6b4] ss:$8 sps:$4 sm:$0xff]  }
  0x7b   :  { %1968 = vmatpush1.bf16.msra.mxu1 %v2790_v20  ;;  %v2876_v20 = vld [vmem:[%s4018_s1 + $0x2c4] ss:$8 sps:$4 sm:$0xff]  }
  0x7c   :  { %2132 = vmatpush1.bf16.msra.mxu0 %v2793_v21  ;;  %1969 = vmatprep.subr.bf16.mxu1 %v2798_v22  ;;  %v2879_v21 = vld [vmem:[%s4018_s1 + $0x6c4] ss:$8 sps:$4 sm:$0xff]   ;;  %v2874_v22 = vld [vmem:[%s4018_s1 + $0x2c0] ss:$8 sps:$4 sm:$0xff]  }
  0x7d   :  { %2133 = vmatprep.subr.bf16.mxu0 %v2801_v52  ;;  %v2877_v52 = vld [vmem:[%s4018_s1 + $0x6c0] ss:$8 sps:$4 sm:$0xff]  }
  0x7f   :  { %1970 = vmatpush1.bf16.msra.mxu1 %v2796_v24  ;;  %v2882_v24 = vld [vmem:[%s4018_s1 + $0x2d4] ss:$8 sps:$4 sm:$0xff]  }
  0x80   :  { %2134 = vmatpush1.bf16.msra.mxu0 %v2799_v25  ;;  %1980 = vmatprep.subr.bf16.mxu1 %v2804_v26  ;;  %v2885_v25 = vld [vmem:[%s4018_s1 + $0x6d4] ss:$8 sps:$4 sm:$0xff]   ;;  %v2880_v26 = vld [vmem:[%s4018_s1 + $0x2d0] ss:$8 sps:$4 sm:$0xff]  }
  0x81   :  { %2144 = vmatprep.subr.bf16.mxu0 %v2807_v27  ;;  %v2883_v27 = vld [vmem:[%s4018_s1 + $0x6d0] ss:$8 sps:$4 sm:$0xff]  }
  0x82   :  { %1972 = vmatmul.mubr.bf16.vlgmr.msra.gmra.mrb[0].mxu1 %v365_v30  ;;  %v2886_v30 = vld [vmem:[%s4018_s1 + $0x2e0] ss:$8 sps:$4 sm:$0xff]  }
  0x83   :  { %2136 = vmatmul.mubr.bf16.vlgmr.msra.gmra.mrb[0].mxu0 %v414_v31  ;;  %1981 = vmatpush1.bf16.msra.mxu1 %v2802_v32  ;;  %v2889_v31 = vld [vmem:[%s4018_s1 + $0x6e0] ss:$8 sps:$4 sm:$0xff]   ;;  %v2894_v32 = vld [vmem:[%s4018_s1 + $0x2f4] ss:$8 sps:$4 sm:$0xff]  }
  0x84   :  { %2145 = vmatpush1.bf16.msra.mxu0 %v2805_v33  ;;  %1982 = vmatprep.subr.bf16.mxu1 %v2810_v34  ;;  %v2897_v33 = vld [vmem:[%s4018_s1 + $0x6f4] ss:$8 sps:$4 sm:$0xff]   ;;  %v2892_v34 = vld [vmem:[%s4018_s1 + $0x2f0] ss:$8 sps:$4 sm:$0xff]  }
  0x85   :  { %2146 = vmatprep.subr.bf16.mxu0 %v2813_v16  ;;  %2012 = vmatprep.mubr.bf16.mxu1 %v3513_v17  ;;  %v2895_v16 = vld [vmem:[%s4018_s1 + $0x6f0] ss:$8 sps:$4 sm:$0xff]  }
  0x86   :  { %2176 = vmatprep.mubr.bf16.mxu0 %v3516_v35 }
  0x87   :  { %1983 = vmatpush1.bf16.msra.mxu1 %v2808_v36  ;;  %v2900_v36 = vld [vmem:[%s4018_s1 + $0x304] ss:$8 sps:$4 sm:$0xff]  }
  0x88   :  { %2147 = vmatpush1.bf16.msra.mxu0 %v2811_v37  ;;  %1984 = vmatprep.subr.bf16.mxu1 %v2816_v38  ;;  %v2903_v37 = vld [vmem:[%s4018_s1 + $0x704] ss:$8 sps:$4 sm:$0xff]   ;;  %v3702_v38 = vrot.slane %v3475_v56, %v3198_v49  ;;  %v2906_v56 = vld [vmem:[%s4018_s1 + $0x314] ss:$8 sps:$4 sm:$0xff]  }
  0x89   :  { %2148 = vmatprep.subr.bf16.mxu0 %v2819_v39  ;;  %v3706_v39 = vrot.slane %v3478_v23, %v3198_v49  ;;  %v2909_v23 = vld [vmem:[%s4018_s1 + $0x714] ss:$8 sps:$4 sm:$0xff]  }
  0x8b   :  { %1985 = vmatpush1.bf16.msra.mxu1 %v2814_v40  ;;  %v2898_v40 = vld [vmem:[%s4018_s1 + $0x300] ss:$8 sps:$4 sm:$0xff]  }
  0x8c   :  { %2149 = vmatpush1.bf16.msra.mxu0 %v2817_v41  ;;  %1986 = vmatprep.subr.bf16.mxu1 %v2822_v43  ;;  %v2901_v41 = vld [vmem:[%s4018_s1 + $0x700] ss:$8 sps:$4 sm:$0xff]   ;;  %v368_v43 = vcombine.high %v3513_v17, %v3513_v17  ;;  %v2912_v17 = vld [vmem:[%s4018_s1 + $0x324] ss:$8 sps:$4 sm:$0xff]  }
  0x8d   :  { %2150 = vmatprep.subr.bf16.mxu0 %v2825_v44  ;;  %v417_v44 = vcombine.high %v3516_v35, %v3516_v35  ;;  %v2915_v35 = vld [vmem:[%s4018_s1 + $0x724] ss:$8 sps:$4 sm:$0xff]  }
  0x8f   :  { %1987 = vmatpush1.bf16.msra.mxu1 %v2820_v45  ;;  %v2904_v45 = vld [vmem:[%s4018_s1 + $0x310] ss:$8 sps:$4 sm:$0xff]  }
  0x90   :  { %2151 = vmatpush1.bf16.msra.mxu0 %v2823_v46  ;;  %1988 = vmatprep.subr.bf16.mxu1 %v2828_v47  ;;  %v2907_v46 = vld [vmem:[%s4018_s1 + $0x710] ss:$8 sps:$4 sm:$0xff]   ;;  %v2910_v47 = vld [vmem:[%s4018_s1 + $0x320] ss:$8 sps:$4 sm:$0xff]  }
  0x91   :  { %2152 = vmatprep.subr.bf16.mxu0 %v2831_v48  ;;  %v2913_v48 = vld [vmem:[%s4018_s1 + $0x720] ss:$8 sps:$4 sm:$0xff]  }
  0x93   :  { %1989 = vmatpush1.bf16.msra.mxu1 %v2826_v50  ;;  %v2918_v50 = vld [vmem:[%s4018_s1 + $0x334] ss:$8 sps:$4 sm:$0xff]  }
  0x94   :  { %2153 = vmatpush1.bf16.msra.mxu0 %v2829_v51  ;;  %1990 = vmatprep.subr.bf16.mxu1 %v2834_v53  ;;  %v2921_v51 = vld [vmem:[%s4018_s1 + $0x734] ss:$8 sps:$4 sm:$0xff]   ;;  %v2916_v53 = vld [vmem:[%s4018_s1 + $0x330] ss:$8 sps:$4 sm:$0xff]  }
  0x95   :  { %2154 = vmatprep.subr.bf16.mxu0 %v2837_v54  ;;  %v2919_v54 = vld [vmem:[%s4018_s1 + $0x730] ss:$8 sps:$4 sm:$0xff]  }
  0x97   :  { %1991 = vmatpush1.bf16.msra.mxu1 %v2832_v55  ;;  %v2924_v55 = vld [vmem:[%s4018_s1 + $0x344] ss:$8 sps:$4 sm:$0xff]  }
  0x98   :  { %2155 = vmatpush1.bf16.msra.mxu0 %v2835_v57  ;;  %1992 = vmatprep.subr.bf16.mxu1 %v2840_v58  ;;  %v2927_v57 = vld [vmem:[%s4018_s1 + $0x744] ss:$8 sps:$4 sm:$0xff]   ;;  %v2922_v58 = vld [vmem:[%s4018_s1 + $0x340] ss:$8 sps:$4 sm:$0xff]  }
  0x99   :  { %2156 = vmatprep.subr.bf16.mxu0 %v2843_v59  ;;  %v2925_v59 = vld [vmem:[%s4018_s1 + $0x740] ss:$8 sps:$4 sm:$0xff]  }
  0x9b   :  { %1993 = vmatpush1.bf16.msra.mxu1 %v2838_v60  ;;  %v2930_v60 = vld [vmem:[%s4018_s1 + $0x354] ss:$8 sps:$4 sm:$0xff]  }
  0x9c   :  { %2157 = vmatpush1.bf16.msra.mxu0 %v2841_v61  ;;  %1994 = vmatprep.subr.bf16.mxu1 %v2846_v62  ;;  %v2933_v61 = vld [vmem:[%s4018_s1 + $0x754] ss:$8 sps:$4 sm:$0xff]   ;;  %v2928_v62 = vld [vmem:[%s4018_s1 + $0x350] ss:$8 sps:$4 sm:$0xff]  }
  0x9d   :  { %2158 = vmatprep.subr.bf16.mxu0 %v2849_v63  ;;  %v2931_v63 = vld [vmem:[%s4018_s1 + $0x750] ss:$8 sps:$4 sm:$0xff]  }
  0x9f   :  { %1995 = vmatpush1.bf16.msra.mxu1 %v2844_v0  ;;  %v2936_v0 = vld [vmem:[%s4018_s1 + $0x364] ss:$8 sps:$4 sm:$0xff]  }
  0xa0   :  { %2159 = vmatpush1.bf16.msra.mxu0 %v2847_v1  ;;  %1996 = vmatprep.subr.bf16.mxu1 %v2852_v2  ;;  %v2939_v1 = vld [vmem:[%s4018_s1 + $0x764] ss:$8 sps:$4 sm:$0xff]   ;;  %v2934_v2 = vld [vmem:[%s4018_s1 + $0x360] ss:$8 sps:$4 sm:$0xff]  }
  0xa1   :  { %2160 = vmatprep.subr.bf16.mxu0 %v2855_v3  ;;  %v2937_v3 = vld [vmem:[%s4018_s1 + $0x760] ss:$8 sps:$4 sm:$0xff]  }
  0xa3   :  { %1997 = vmatpush1.bf16.msra.mxu1 %v2850_v4  ;;  %v2942_v4 = vld [vmem:[%s4018_s1 + $0x374] ss:$8 sps:$4 sm:$0xff]  }
  0xa4   :  { %2161 = vmatpush1.bf16.msra.mxu0 %v2853_v5  ;;  %1998 = vmatprep.subr.bf16.mxu1 %v2858_v6  ;;  %v2945_v5 = vld [vmem:[%s4018_s1 + $0x774] ss:$8 sps:$4 sm:$0xff]   ;;  %v2940_v6 = vld [vmem:[%s4018_s1 + $0x370] ss:$8 sps:$4 sm:$0xff]  }
  0xa5   :  { %2162 = vmatprep.subr.bf16.mxu0 %v2861_v7  ;;  %v2943_v7 = vld [vmem:[%s4018_s1 + $0x770] ss:$8 sps:$4 sm:$0xff]  }
  0xa7   :  { %1999 = vmatpush1.bf16.msra.mxu1 %v2856_v8  ;;  %v2948_v8 = vld [vmem:[%s4018_s1 + $0x384] ss:$8 sps:$4 sm:$0xff]  }
  0xa8   :  { %2163 = vmatpush1.bf16.msra.mxu0 %v2859_v9  ;;  %2000 = vmatprep.subr.bf16.mxu1 %v2864_v10  ;;  %v2951_v9 = vld [vmem:[%s4018_s1 + $0x784] ss:$8 sps:$4 sm:$0xff]   ;;  %v2946_v10 = vld [vmem:[%s4018_s1 + $0x380] ss:$8 sps:$4 sm:$0xff]  }
  0xa9   :  { %2164 = vmatprep.subr.bf16.mxu0 %v2867_v11  ;;  %v2949_v11 = vld [vmem:[%s4018_s1 + $0x780] ss:$8 sps:$4 sm:$0xff]  }
  0xab   :  { %2001 = vmatpush1.bf16.msra.mxu1 %v2862_v12  ;;  %v2954_v12 = vld [vmem:[%s4018_s1 + $0x394] ss:$8 sps:$4 sm:$0xff]  }
  0xac   :  { %2165 = vmatpush1.bf16.msra.mxu0 %v2865_v13  ;;  %2002 = vmatprep.subr.bf16.mxu1 %v2870_v14  ;;  %v2957_v13 = vld [vmem:[%s4018_s1 + $0x794] ss:$8 sps:$4 sm:$0xff]   ;;  %v2952_v14 = vld [vmem:[%s4018_s1 + $0x390] ss:$8 sps:$4 sm:$0xff]  }
  0xad   :  { %2166 = vmatprep.subr.bf16.mxu0 %v2873_v15  ;;  %v2955_v15 = vld [vmem:[%s4018_s1 + $0x790] ss:$8 sps:$4 sm:$0xff]  }
  0xaf   :  { %2003 = vmatpush1.bf16.msra.mxu1 %v2868_v18  ;;  %v2960_v18 = vld [vmem:[%s4018_s1 + $0x3a4] ss:$8 sps:$4 sm:$0xff]  }
  0xb0   :  { %2167 = vmatpush1.bf16.msra.mxu0 %v2871_v19  ;;  %2004 = vmatprep.subr.bf16.mxu1 %v2876_v20  ;;  %v2963_v19 = vld [vmem:[%s4018_s1 + $0x7a4] ss:$8 sps:$4 sm:$0xff]   ;;  %v2958_v20 = vld [vmem:[%s4018_s1 + $0x3a0] ss:$8 sps:$4 sm:$0xff]  }
  0xb1   :  { %2168 = vmatprep.subr.bf16.mxu0 %v2879_v21  ;;  %v2961_v21 = vld [vmem:[%s4018_s1 + $0x7a0] ss:$8 sps:$4 sm:$0xff]  }
  0xb3   :  { %2005 = vmatpush1.bf16.msra.mxu1 %v2874_v22  ;;  %v2966_v22 = vld [vmem:[%s4018_s1 + $0x3b4] ss:$8 sps:$4 sm:$0xff]  }
  0xb4   :  { %2169 = vmatpush1.bf16.msra.mxu0 %v2877_v52  ;;  %2006 = vmatprep.subr.bf16.mxu1 %v2882_v24  ;;  %v2969_v52 = vld [vmem:[%s4018_s1 + $0x7b4] ss:$8 sps:$4 sm:$0xff]   ;;  %v2964_v24 = vld [vmem:[%s4018_s1 + $0x3b0] ss:$8 sps:$4 sm:$0xff]  }
  0xb5   :  { %2170 = vmatprep.subr.bf16.mxu0 %v2885_v25  ;;  %v2967_v25 = vld [vmem:[%s4018_s1 + $0x7b0] ss:$8 sps:$4 sm:$0xff]  }
  0xb7   :  { %2007 = vmatpush1.bf16.msra.mxu1 %v2880_v26  ;;  %v2972_v26 = vld [vmem:[%s4018_s1 + $0x3c4] ss:$8 sps:$4 sm:$0xff]  }
  0xb8   :  { %2171 = vmatpush1.bf16.msra.mxu0 %v2883_v27  ;;  %2008 = vmatprep.subr.bf16.mxu1 %v2888_v28  ;;  %v2975_v27 = vld [vmem:[%s4018_s1 + $0x7c4] ss:$8 sps:$4 sm:$0xff]   ;;  %v2970_v28 = vld [vmem:[%s4018_s1 + $0x3c0] ss:$8 sps:$4 sm:$0xff]  }
  0xb9   :  { %2172 = vmatprep.subr.bf16.mxu0 %v2891_v29  ;;  %v2973_v29 = vld [vmem:[%s4018_s1 + $0x7c0] ss:$8 sps:$4 sm:$0xff]  }
  0xbb   :  { %2009 = vmatpush1.bf16.msra.mxu1 %v2886_v30  ;;  %v2978_v30 = vld [vmem:[%s4018_s1 + $0x3d4] ss:$8 sps:$4 sm:$0xff]  }
  0xbc   :  { %2173 = vmatpush1.bf16.msra.mxu0 %v2889_v31  ;;  %2010 = vmatprep.subr.bf16.mxu1 %v2894_v32  ;;  %v2981_v31 = vld [vmem:[%s4018_s1 + $0x7d4] ss:$8 sps:$4 sm:$0xff]   ;;  %v2976_v32 = vld [vmem:[%s4018_s1 + $0x3d0] ss:$8 sps:$4 sm:$0xff]  }
  0xbd   :  { %2174 = vmatprep.subr.bf16.mxu0 %v2897_v33  ;;  %v2979_v33 = vld [vmem:[%s4018_s1 + $0x7d0] ss:$8 sps:$4 sm:$0xff]  }
  0xbf   :  { %2011 = vmatpush1.bf16.msra.mxu1 %v2892_v34  ;;  %v2984_v34 = vld [vmem:[%s4018_s1 + $0x3e4] ss:$8 sps:$4 sm:$0xff]  }
  0xc0   :  { %2175 = vmatpush1.bf16.msra.mxu0 %v2895_v16  ;;  %2021 = vmatprep.subr.bf16.mxu1 %v2900_v36  ;;  %v2987_v16 = vld [vmem:[%s4018_s1 + $0x7e4] ss:$8 sps:$4 sm:$0xff]   ;;  %v2982_v36 = vld [vmem:[%s4018_s1 + $0x3e0] ss:$8 sps:$4 sm:$0xff]  }
  0xc1   :  { %2185 = vmatprep.subr.bf16.mxu0 %v2903_v37  ;;  %v2985_v37 = vld [vmem:[%s4018_s1 + $0x7e0] ss:$8 sps:$4 sm:$0xff]  }
  0xc2   :  { %2013 = vmatmul.mubr.bf16.vlgmr.msra.gmra.mrb[0].mxu1 %v3702_v38 }
  0xc3   :  { %2177 = vmatmul.mubr.bf16.vlgmr.msra.gmra.mrb[0].mxu0 %v3706_v39  ;;  %2022 = vmatpush1.bf16.msra.mxu1 %v2898_v40  ;;  %v2990_v40 = vld [vmem:[%s4018_s1 + $0x3f4] ss:$8 sps:$4 sm:$0xff]  }
  0xc4   :  { %2186 = vmatpush1.bf16.msra.mxu0 %v2901_v41  ;;  %2023 = vmatprep.subr.bf16.mxu1 %v2906_v56  ;;  %v2993_v41 = vld [vmem:[%s4018_s1 + $0x7f4] ss:$8 sps:$4 sm:$0xff]   ;;  %v3897_v56 = vld.sshfl [vmem:[%s4019_s0 + $0x10] sm:$0x11 pattern:$0x75316420] }
  0xc5   :  { %2187 = vmatprep.subr.bf16.mxu0 %v2909_v23  ;;  %2053 = vmatprep.mubr.bf16.mxu1 %v368_v43  ;;  %v2988_v23 = vld [vmem:[%s4018_s1 + $0x3f0] ss:$8 sps:$4 sm:$0xff]  }
  0xc6   :  { %2217 = vmatprep.mubr.bf16.mxu0 %v417_v44  ;;  %v2991_v43 = vld [vmem:[%s4018_s1 + $0x7f0] ss:$8 sps:$4 sm:$0xff]   ;;  %v425_v44 = vcombine.high %v3897_v56, %v3897_v56 }
  0xc7   :  { %2024 = vmatpush1.bf16.msra.mxu1 %v2904_v45  ;;  %v2996_v45 = vld [vmem:[%s4018_s1 + $0x804] ss:$8 sps:$4 sm:$0xff]  }
  0xc8   :  { %2188 = vmatpush1.bf16.msra.mxu0 %v2907_v46  ;;  %2025 = vmatprep.subr.bf16.mxu1 %v2912_v17  ;;  %v366_v46 = vcombine.high %v3702_v38, %v3702_v38  ;;  %v415_v17 = vcombine.high %v3706_v39, %v3706_v39  ;;  %v2997_v38 = vld [vmem:[%s4018_s1 + $0x810] ss:$8 sps:$4 sm:$0xff]   ;;  %v3002_v39 = vld [vmem:[%s4018_s1 + $0x824] ss:$8 sps:$4 sm:$0xff]  }
  0xc9   :  { %2189 = vmatprep.subr.bf16.mxu0 %v2915_v35  ;;  %v2994_v35 = vld [vmem:[%s4018_s1 + $0x800] ss:$8 sps:$4 sm:$0xff]  }
  0xcb   :  { %2026 = vmatpush1.bf16.msra.mxu1 %v2910_v47  ;;  %v439_v47 = vrot.slane %v425_v44, %v3198_v49 }
  0xcc   :  { %2190 = vmatpush1.bf16.msra.mxu0 %v2913_v48  ;;  %2027 = vmatprep.subr.bf16.mxu1 %v2918_v50  ;;  %v2999_v48 = vld [vmem:[%s4018_s1 + $0x814] ss:$8 sps:$4 sm:$0xff]   ;;  %v3000_v50 = vld [vmem:[%s4018_s1 + $0x820] ss:$8 sps:$4 sm:$0xff]  }
  0xcd   :  { %2191 = vmatprep.subr.bf16.mxu0 %v2921_v51  ;;  %v3005_v51 = vld [vmem:[%s4018_s1 + $0x834] ss:$8 sps:$4 sm:$0xff]  }
  0xcf   :  { %2028 = vmatpush1.bf16.msra.mxu1 %v2916_v53  ;;  %v3003_v53 = vld [vmem:[%s4018_s1 + $0x830] ss:$8 sps:$4 sm:$0xff]  }
  0xd0   :  { %2192 = vmatpush1.bf16.msra.mxu0 %v2919_v54  ;;  %2029 = vmatprep.subr.bf16.mxu1 %v2924_v55  ;;  %v3008_v54 = vld [vmem:[%s4018_s1 + $0x844] ss:$8 sps:$4 sm:$0xff]   ;;  %v3006_v55 = vld [vmem:[%s4018_s1 + $0x840] ss:$8 sps:$4 sm:$0xff]  }
  0xd1   :  { %2193 = vmatprep.subr.bf16.mxu0 %v2927_v57  ;;  %v3011_v57 = vld [vmem:[%s4018_s1 + $0x854] ss:$8 sps:$4 sm:$0xff]  }
  0xd3   :  { %2030 = vmatpush1.bf16.msra.mxu1 %v2922_v58  ;;  %v3009_v58 = vld [vmem:[%s4018_s1 + $0x850] ss:$8 sps:$4 sm:$0xff]  }
  0xd4   :  { %2194 = vmatpush1.bf16.msra.mxu0 %v2925_v59  ;;  %2031 = vmatprep.subr.bf16.mxu1 %v2930_v60  ;;  %v3014_v59 = vld [vmem:[%s4018_s1 + $0x864] ss:$8 sps:$4 sm:$0xff]   ;;  %v3012_v60 = vld [vmem:[%s4018_s1 + $0x860] ss:$8 sps:$4 sm:$0xff]  }
  0xd5   :  { %2195 = vmatprep.subr.bf16.mxu0 %v2933_v61  ;;  %v3017_v61 = vld [vmem:[%s4018_s1 + $0x874] ss:$8 sps:$4 sm:$0xff]  }
  0xd7   :  { %2032 = vmatpush1.bf16.msra.mxu1 %v2928_v62  ;;  %v3015_v62 = vld [vmem:[%s4018_s1 + $0x870] ss:$8 sps:$4 sm:$0xff]  }
  0xd8   :  { %2196 = vmatpush1.bf16.msra.mxu0 %v2931_v63  ;;  %2033 = vmatprep.subr.bf16.mxu1 %v2936_v0  ;;  %v3020_v63 = vld [vmem:[%s4018_s1 + $0x884] ss:$8 sps:$4 sm:$0xff]   ;;  %v3018_v0 = vld [vmem:[%s4018_s1 + $0x880] ss:$8 sps:$4 sm:$0xff]  }
  0xd9   :  { %2197 = vmatprep.subr.bf16.mxu0 %v2939_v1  ;;  %v3023_v1 = vld [vmem:[%s4018_s1 + $0x894] ss:$8 sps:$4 sm:$0xff]  }
  0xdb   :  { %2034 = vmatpush1.bf16.msra.mxu1 %v2934_v2  ;;  %v3021_v2 = vld [vmem:[%s4018_s1 + $0x890] ss:$8 sps:$4 sm:$0xff]  }
  0xdc   :  { %2198 = vmatpush1.bf16.msra.mxu0 %v2937_v3  ;;  %2035 = vmatprep.subr.bf16.mxu1 %v2942_v4  ;;  %v3026_v3 = vld [vmem:[%s4018_s1 + $0x8a4] ss:$8 sps:$4 sm:$0xff]   ;;  %v3024_v4 = vld [vmem:[%s4018_s1 + $0x8a0] ss:$8 sps:$4 sm:$0xff]  }
  0xdd   :  { %2199 = vmatprep.subr.bf16.mxu0 %v2945_v5  ;;  %v3029_v5 = vld [vmem:[%s4018_s1 + $0x8b4] ss:$8 sps:$4 sm:$0xff]  }
  0xdf   :  { %2036 = vmatpush1.bf16.msra.mxu1 %v2940_v6  ;;  %v3027_v6 = vld [vmem:[%s4018_s1 + $0x8b0] ss:$8 sps:$4 sm:$0xff]  }
  0xe0   :  { %2200 = vmatpush1.bf16.msra.mxu0 %v2943_v7  ;;  %2037 = vmatprep.subr.bf16.mxu1 %v2948_v8  ;;  %v3032_v7 = vld [vmem:[%s4018_s1 + $0x8c4] ss:$8 sps:$4 sm:$0xff]   ;;  %v3030_v8 = vld [vmem:[%s4018_s1 + $0x8c0] ss:$8 sps:$4 sm:$0xff]  }
  0xe1   :  { %2201 = vmatprep.subr.bf16.mxu0 %v2951_v9  ;;  %v3035_v9 = vld [vmem:[%s4018_s1 + $0x8d4] ss:$8 sps:$4 sm:$0xff]  }
  0xe3   :  { %2038 = vmatpush1.bf16.msra.mxu1 %v2946_v10  ;;  %v3033_v10 = vld [vmem:[%s4018_s1 + $0x8d0] ss:$8 sps:$4 sm:$0xff]  }
  0xe4   :  { %2202 = vmatpush1.bf16.msra.mxu0 %v2949_v11  ;;  %2039 = vmatprep.subr.bf16.mxu1 %v2954_v12  ;;  %v3038_v11 = vld [vmem:[%s4018_s1 + $0x8e4] ss:$8 sps:$4 sm:$0xff]   ;;  %v3036_v12 = vld [vmem:[%s4018_s1 + $0x8e0] ss:$8 sps:$4 sm:$0xff]  }
  0xe5   :  { %2203 = vmatprep.subr.bf16.mxu0 %v2957_v13  ;;  %v3041_v13 = vld [vmem:[%s4018_s1 + $0x8f4] ss:$8 sps:$4 sm:$0xff]  }
  0xe7   :  { %2040 = vmatpush1.bf16.msra.mxu1 %v2952_v14  ;;  %v3039_v14 = vld [vmem:[%s4018_s1 + $0x8f0] ss:$8 sps:$4 sm:$0xff]  }
  0xe8   :  { %2204 = vmatpush1.bf16.msra.mxu0 %v2955_v15  ;;  %2041 = vmatprep.subr.bf16.mxu1 %v2960_v18  ;;  %v432_v15 = vrot.slane %v3897_v56, %v3198_v49 }
  0xe9   :  { %2205 = vmatprep.subr.bf16.mxu0 %v2963_v19 }
  0xeb   :  { %2042 = vmatpush1.bf16.msra.mxu1 %v2958_v20 }
  0xec   :  { %2206 = vmatpush1.bf16.msra.mxu0 %v2961_v21  ;;  %2043 = vmatprep.subr.bf16.mxu1 %v2966_v22  ;;  %v309_v22 = vsub.s32 0, %v3180_v42 }
  0xed   :  { %2207 = vmatprep.subr.bf16.mxu0 %v2969_v52  ;;  %v305_v52 = vld [vmem:[%s4020_s2] sm:$0x3] }
  0xef   :  { %2044 = vmatpush1.bf16.msra.mxu1 %v2964_v24  ;;  %v313_v24 = vsub.s32 1, %v3180_v42 }
  0xf0   :  { %2208 = vmatpush1.bf16.msra.mxu0 %v2967_v25  ;;  %2045 = vmatprep.subr.bf16.mxu1 %v2972_v26  ;;  %v310_v25 = vrot.slane %v305_v52, %v309_v22 }
  0xf1   :  { %2209 = vmatprep.subr.bf16.mxu0 %v2975_v27  ;;  %v314_v26 = vrot.slane %v305_v52, %v313_v24 }
  0xf3   :  { %2046 = vmatpush1.bf16.msra.mxu1 %v2970_v28 }
  0xf4   :  { %2210 = vmatpush1.bf16.msra.mxu0 %v2973_v29  ;;  %2047 = vmatprep.subr.bf16.mxu1 %v2978_v30 }
  0xf5   :  { %2211 = vmatprep.subr.bf16.mxu0 %v2981_v31 }
  0xf7   :  { %2048 = vmatpush1.bf16.msra.mxu1 %v2976_v32 }
  0xf8   :  { %2212 = vmatpush1.bf16.msra.mxu0 %v2979_v33  ;;  %2049 = vmatprep.subr.bf16.mxu1 %v2984_v34 }
  0xf9   :  { %2213 = vmatprep.subr.bf16.mxu0 %v2987_v16 }
  0xfb   :  { %2050 = vmatpush1.bf16.msra.mxu1 %v2982_v36 }
  0xfc   :  { %2214 = vmatpush1.bf16.msra.mxu0 %v2985_v37  ;;  %2051 = vmatprep.subr.bf16.mxu1 %v2990_v40 }
  0xfd   :  { %2215 = vmatprep.subr.bf16.mxu0 %v2993_v41 }
  0xff   :  { %2052 = vmatpush1.bf16.msra.mxu1 %v2988_v23 }
 0x100   :  { %2216 = vmatpush1.bf16.msra.mxu0 %v2991_v43 }
 0x101   :  { %2226 = vmatprep.subr.bf16.mxu0 %v2996_v45 }
 0x102   :  { %2054 = vmatmul.mubr.bf16.vlgmr.msra.gmra.mrb[0].mxu1 %v366_v46 }
 0x103   :  { %2218 = vmatmul.mubr.bf16.vlgmr.msra.gmra.mrb[0].mxu0 %v415_v17 }
 0x104   :  { %2227 = vmatpush1.bf16.msra.mxu0 %v2994_v35  ;;  %2258 = vmatprep.mubr.bf16.mxu0 %v439_v47 }
 0x105   :  { %2228 = vmatprep.subr.bf16.mxu0 %v2999_v48 }
 0x108   :  { %2229 = vmatpush1.bf16.msra.mxu0 %v2997_v38 }
 0x109   :  { %2230 = vmatprep.subr.bf16.mxu0 %v3002_v39 }
 0x10c   :  { %2231 = vmatpush1.bf16.msra.mxu0 %v3000_v50 }
 0x10d   :  { %2232 = vmatprep.subr.bf16.mxu0 %v3005_v51 }
 0x110   :  { %2233 = vmatpush1.bf16.msra.mxu0 %v3003_v53 }
 0x111   :  { %2234 = vmatprep.subr.bf16.mxu0 %v3008_v54 }
 0x114   :  { %2235 = vmatpush1.bf16.msra.mxu0 %v3006_v55 }
 0x115   :  { %2236 = vmatprep.subr.bf16.mxu0 %v3011_v57 }
 0x118   :  { %2237 = vmatpush1.bf16.msra.mxu0 %v3009_v58 }
 0x119   :  { %2238 = vmatprep.subr.bf16.mxu0 %v3014_v59 }
 0x11c   :  { %2239 = vmatpush1.bf16.msra.mxu0 %v3012_v60 }
 0x11d   :  { %2240 = vmatprep.subr.bf16.mxu0 %v3017_v61 }
 0x120   :  { %2241 = vmatpush1.bf16.msra.mxu0 %v3015_v62 }
 0x121   :  { %2242 = vmatprep.subr.bf16.mxu0 %v3020_v63 }
 0x124   :  { %2243 = vmatpush1.bf16.msra.mxu0 %v3018_v0 }
 0x125   :  { %2244 = vmatprep.subr.bf16.mxu0 %v3023_v1 }
 0x128   :  { %2245 = vmatpush1.bf16.msra.mxu0 %v3021_v2 }
 0x129   :  { %2246 = vmatprep.subr.bf16.mxu0 %v3026_v3 }
 0x12c   :  { %2247 = vmatpush1.bf16.msra.mxu0 %v3024_v4 }
 0x12d   :  { %2248 = vmatprep.subr.bf16.mxu0 %v3029_v5 }
 0x130   :  { %2249 = vmatpush1.bf16.msra.mxu0 %v3027_v6 }
 0x131   :  { %2250 = vmatprep.subr.bf16.mxu0 %v3032_v7 }
 0x134   :  { %2251 = vmatpush1.bf16.msra.mxu0 %v3030_v8 }
 0x135   :  { %2252 = vmatprep.subr.bf16.mxu0 %v3035_v9 }
 0x138   :  { %2253 = vmatpush1.bf16.msra.mxu0 %v3033_v10 }
 0x139   :  { %2254 = vmatprep.subr.bf16.mxu0 %v3038_v11 }
 0x13c   :  { %2255 = vmatpush1.bf16.msra.mxu0 %v3036_v12 }
 0x13d   :  { %2256 = vmatprep.subr.bf16.mxu0 %v3041_v13 }
 0x140   :  { %2257 = vmatpush1.bf16.msra.mxu0 %v3039_v14 }
 0x143   :  { %2259 = vmatmul.mubr.bf16.vlgmr.msra.gmra.mrb[0].mxu0 %v432_v15 }
 0x1d5   :  { %v2055_v18 = vpop.f32.mrb[0].mxu1 }
 0x1d6   :  { %v2057_v19 = vpop.f32.mrb[1].mxu1  ;;  %v2575_v27 = vadd.f32 %v2055_v18, %v310_v25 }
 0x1d7   :  { %v2059_v20 = vpop.f32.mrb[2].mxu1  ;;  %v2577_v28 = vadd.f32 %v2057_v19, %v314_v26 }
 0x1d8   :  { %v2060_v21 = vpop.f32.mrb[3].mxu1 }
 0x216   :  { %v2260_v29 = vpop.f32.mrb[0].mxu0 }
 0x217   :  { %v2576_v49 = vadd.f32 %v2575_v27, %v2260_v29  ;;  %v2262_v30 = vpop.f32.mrb[1].mxu0 }
 0x218   :  { %v2578_v31 = vadd.f32 %v2577_v28, %v2262_v30  ;;  %v2264_v32 = vpop.f32.mrb[2].mxu0 }
 0x219   :  { %v2267_v33 = vmax.f32 %v2576_v49, 0.0  ;;  %v2265_v34 = vpop.f32.mrb[3].mxu0 }
 0x21a   :  { %v2268_v16 = vmax.f32 %v2578_v31, 0.0 }
 0x21c   :  { %v2271_v36 = vcombine.low %v2267_v33, %v2268_v16 }
 0x21e   :  { %2574 = vst.sshfl [vmem:[%s4021_s3] sm:$0x33 pattern:$0x76325410] %v2271_v36 }

// kernel: rebuildnet_forward.37
= control target key start
LH: loop header
LB: loop body
LE: loop exit
PB: predicated region body
PF: predicated region fallthrough
CT: control target
= control target key end

     0   :  { %v81_v38 = vlaneseq  ;;  %v718_v39 = vmov 1966171168   ;;  %s949_s1 = inlined_call_operand.vmem [shape: bf16[256,512], index: 1, kind: input, shape index: {}]   ;;  %s950_s0 = inlined_call_operand.vmem [shape: bf16[2,256], index: 0, kind: input, shape index: {}]   ;;  %s951_s2 = inlined_call_operand.vmem [shape: f32[1,512], index: 2, kind: input, shape index: {}]   ;;  %s952_s3 = inlined_call_operand.vmem [shape: f32[2,512], index: 3, kind: output, shape index: {}]  }
   0x1   :  { %v622_v0 = vld [vmem:[%s949_s1 + $0x4] ss:$16 sps:$4 sm:$0xff]   ;;  %v624_v1 = vld [vmem:[%s949_s1 + $0xc] ss:$16 sps:$4 sm:$0xff]   ;;  %v626_v2 = vld [vmem:[%s949_s1] ss:$16 sps:$4 sm:$0xff]   ;;  %v111_v40 = vunpack.c.l.s4 %v718_v39 }
   0x2   :  { %446 = vmatprep.subr.bf16.mxu0 %v622_v0  ;;  %v627_v3 = vld [vmem:[%s949_s1 + $0x8] ss:$16 sps:$4 sm:$0xff]   ;;  %487 = vmatprep.subr.bf16.mxu1 %v624_v1  ;;  %v628_v4 = vld [vmem:[%s949_s1 + $0x24] ss:$16 sps:$4 sm:$0xff]   ;;  %v630_v5 = vld [vmem:[%s949_s1 + $0x2c] ss:$16 sps:$4 sm:$0xff]  }
   0x3   :  { %447 = vmatpush1.bf16.msra.mxu0 %v626_v2  ;;  %488 = vmatpush1.bf16.msra.mxu1 %v627_v3  ;;  %v632_v6 = vld [vmem:[%s949_s1 + $0x20] ss:$16 sps:$4 sm:$0xff]   ;;  %v633_v7 = vld [vmem:[%s949_s1 + $0x28] ss:$16 sps:$4 sm:$0xff]   ;;  %v634_v8 = vld [vmem:[%s949_s1 + $0x44] ss:$16 sps:$4 sm:$0xff]   ;;  %v112_v46 = vunpack.c.0.s8 %v111_v40 }
   0x4   :  { %448 = vmatprep.subr.bf16.mxu0 %v628_v4  ;;  %489 = vmatprep.subr.bf16.mxu1 %v630_v5  ;;  %v636_v9 = vld [vmem:[%s949_s1 + $0x4c] ss:$16 sps:$4 sm:$0xff]   ;;  %v638_v10 = vld [vmem:[%s949_s1 + $0x40] ss:$16 sps:$4 sm:$0xff]   ;;  %v639_v11 = vld [vmem:[%s949_s1 + $0x48] ss:$16 sps:$4 sm:$0xff]  }
   0x5   :  { %v640_v12 = vld [vmem:[%s949_s1 + $0x64] ss:$16 sps:$4 sm:$0xff]   ;;  %v642_v13 = vld [vmem:[%s949_s1 + $0x6c] ss:$16 sps:$4 sm:$0xff]   ;;  %v644_v14 = vld [vmem:[%s949_s1 + $0x60] ss:$16 sps:$4 sm:$0xff]  }
   0x6   :  { %v645_v15 = vld [vmem:[%s949_s1 + $0x68] ss:$16 sps:$4 sm:$0xff]   ;;  %v646_v16 = vld [vmem:[%s949_s1 + $0x84] ss:$16 sps:$4 sm:$0xff]   ;;  %v648_v17 = vld [vmem:[%s949_s1 + $0x8c] ss:$16 sps:$4 sm:$0xff]  }
   0x7   :  { %449 = vmatpush1.bf16.msra.mxu0 %v632_v6  ;;  %490 = vmatpush1.bf16.msra.mxu1 %v633_v7  ;;  %v650_v18 = vld [vmem:[%s949_s1 + $0x80] ss:$16 sps:$4 sm:$0xff]   ;;  %v651_v19 = vld [vmem:[%s949_s1 + $0x88] ss:$16 sps:$4 sm:$0xff]   ;;  %v652_v20 = vld [vmem:[%s949_s1 + $0xa4] ss:$16 sps:$4 sm:$0xff]  }
   0x8   :  { %450 = vmatprep.subr.bf16.mxu0 %v634_v8  ;;  %491 = vmatprep.subr.bf16.mxu1 %v636_v9  ;;  %v654_v21 = vld [vmem:[%s949_s1 + $0xac] ss:$16 sps:$4 sm:$0xff]   ;;  %v656_v22 = vld [vmem:[%s949_s1 + $0xa0] ss:$16 sps:$4 sm:$0xff]   ;;  %v657_v23 = vld [vmem:[%s949_s1 + $0xa8] ss:$16 sps:$4 sm:$0xff]  }
   0x9   :  { %v658_v24 = vld [vmem:[%s949_s1 + $0xc4] ss:$16 sps:$4 sm:$0xff]   ;;  %v660_v25 = vld [vmem:[%s949_s1 + $0xcc] ss:$16 sps:$4 sm:$0xff]   ;;  %v662_v26 = vld [vmem:[%s949_s1 + $0xc0] ss:$16 sps:$4 sm:$0xff]  }
   0xa   :  { %v663_v27 = vld [vmem:[%s949_s1 + $0xc8] ss:$16 sps:$4 sm:$0xff]   ;;  %v664_v28 = vld [vmem:[%s949_s1 + $0xe4] ss:$16 sps:$4 sm:$0xff]   ;;  %v666_v29 = vld [vmem:[%s949_s1 + $0xec] ss:$16 sps:$4 sm:$0xff]  }
   0xb   :  { %451 = vmatpush1.bf16.msra.mxu0 %v638_v10  ;;  %492 = vmatpush1.bf16.msra.mxu1 %v639_v11  ;;  %v668_v30 = vld [vmem:[%s949_s1 + $0xe0] ss:$16 sps:$4 sm:$0xff]   ;;  %v669_v31 = vld [vmem:[%s949_s1 + $0xe8] ss:$16 sps:$4 sm:$0xff]   ;;  %v670_v32 = vld [vmem:[%s949_s1 + $0x104] ss:$16 sps:$4 sm:$0xff]  }
   0xc   :  { %452 = vmatprep.subr.bf16.mxu0 %v640_v12  ;;  %493 = vmatprep.subr.bf16.mxu1 %v642_v13  ;;  %v672_v33 = vld [vmem:[%s949_s1 + $0x10c] ss:$16 sps:$4 sm:$0xff]   ;;  %v674_v34 = vld [vmem:[%s949_s1 + $0x100] ss:$16 sps:$4 sm:$0xff]   ;;  %v675_v35 = vld [vmem:[%s949_s1 + $0x108] ss:$16 sps:$4 sm:$0xff]  }
   0xd   :  { %v676_v36 = vld [vmem:[%s949_s1 + $0x124] ss:$16 sps:$4 sm:$0xff]   ;;  %v678_v37 = vld [vmem:[%s949_s1 + $0x12c] ss:$16 sps:$4 sm:$0xff]   ;;  %v680_v41 = vld [vmem:[%s949_s1 + $0x120] ss:$16 sps:$4 sm:$0xff]  }
   0xe   :  { %v681_v42 = vld [vmem:[%s949_s1 + $0x128] ss:$16 sps:$4 sm:$0xff]   ;;  %v682_v43 = vld [vmem:[%s949_s1 + $0x144] ss:$16 sps:$4 sm:$0xff]   ;;  %v684_v44 = vld [vmem:[%s949_s1 + $0x14c] ss:$16 sps:$4 sm:$0xff]  }
   0xf   :  { %453 = vmatpush1.bf16.msra.mxu0 %v644_v14  ;;  %494 = vmatpush1.bf16.msra.mxu1 %v645_v15  ;;  %v866_v45 = vshrl.u32 %v81_v38, 7  ;;  %v686_v47 = vld [vmem:[%s949_s1 + $0x140] ss:$16 sps:$4 sm:$0xff]   ;;  %v687_v48 = vld [vmem:[%s949_s1 + $0x148] ss:$16 sps:$4 sm:$0xff]  }
  0x10   :  { %454 = vmatprep.subr.bf16.mxu0 %v646_v16  ;;  %495 = vmatprep.subr.bf16.mxu1 %v648_v17  ;;  %v688_v49 = vld [vmem:[%s949_s1 + $0x164] ss:$16 sps:$4 sm:$0xff]   ;;  %v690_v50 = vld [vmem:[%s949_s1 + $0x16c] ss:$16 sps:$4 sm:$0xff]   ;;  %v692_v53 = vld [vmem:[%s949_s1 + $0x160] ss:$16 sps:$4 sm:$0xff]  }
  0x11   :  { %v115_v51 = vsub.s32 %v112_v46, %v866_v45  ;;  %v555_v52 = vld.sshfl [vmem:[%s950_s0] sm:$0x11 pattern:$0x75316420]  ;;  %v693_v54 = vld [vmem:[%s949_s1 + $0x168] ss:$16 sps:$4 sm:$0xff]  }
  0x12   :  { %v109_v55 = vcombine.high %v555_v52, %v555_v52  ;;  %v694_v56 = vld [vmem:[%s949_s1 + $0x184] ss:$16 sps:$4 sm:$0xff]   ;;  %v696_v57 = vld [vmem:[%s949_s1 + $0x18c] ss:$16 sps:$4 sm:$0xff]   ;;  %v698_v59 = vld [vmem:[%s949_s1 + $0x180] ss:$16 sps:$4 sm:$0xff]  }
  0x13   :  { %455 = vmatpush1.bf16.msra.mxu0 %v650_v18  ;;  %496 = vmatpush1.bf16.msra.mxu1 %v651_v19  ;;  %v699_v60 = vld [vmem:[%s949_s1 + $0x188] ss:$16 sps:$4 sm:$0xff]   ;;  %v700_v61 = vld [vmem:[%s949_s1 + $0x1a4] ss:$16 sps:$4 sm:$0xff]   ;;  %v702_v62 = vld [vmem:[%s949_s1 + $0x1ac] ss:$16 sps:$4 sm:$0xff]   ;;  %v116_v9 = vrot.slane %v555_v52, %v115_v51 }
  0x14   :  { %456 = vmatprep.subr.bf16.mxu0 %v652_v20  ;;  %497 = vmatprep.subr.bf16.mxu1 %v654_v21  ;;  %v123_v58 = vrot.slane %v109_v55, %v115_v51  ;;  %v704_v63 = vld [vmem:[%s949_s1 + $0x1a0] ss:$16 sps:$4 sm:$0xff]   ;;  %v705_v0 = vld [vmem:[%s949_s1 + $0x1a8] ss:$16 sps:$4 sm:$0xff]   ;;  %v706_v1 = vld [vmem:[%s949_s1 + $0x1c4] ss:$16 sps:$4 sm:$0xff]  }
  0x15   :  { %v708_v2 = vld [vmem:[%s949_s1 + $0x1cc] ss:$16 sps:$4 sm:$0xff]   ;;  %v710_v3 = vld [vmem:[%s949_s1 + $0x1c0] ss:$16 sps:$4 sm:$0xff]   ;;  %v711_v4 = vld [vmem:[%s949_s1 + $0x1c8] ss:$16 sps:$4 sm:$0xff]  }
  0x16   :  { %478 = vmatprep.mubr.bf16.mxu0 %v123_v58  ;;  %519 = vmatprep.mubr.bf16.mxu1 %v123_v58  ;;  %v712_v5 = vld [vmem:[%s949_s1 + $0x1e4] ss:$16 sps:$4 sm:$0xff]   ;;  %v714_v6 = vld [vmem:[%s949_s1 + $0x1ec] ss:$16 sps:$4 sm:$0xff]   ;;  %v716_v7 = vld [vmem:[%s949_s1 + $0x1e0] ss:$16 sps:$4 sm:$0xff]  }
  0x17   :  { %457 = vmatpush1.bf16.msra.mxu0 %v656_v22  ;;  %498 = vmatpush1.bf16.msra.mxu1 %v657_v23  ;;  %v717_v8 = vld [vmem:[%s949_s1 + $0x1e8] ss:$16 sps:$4 sm:$0xff]   ;;  %v83_v10 = vsub.s32 0, %v866_v45  ;;  %v91_v11 = vsub.s32 2, %v866_v45  ;;  %v79_v12 = vld [vmem:[%s951_s2] sm:$0xf] }
  0x18   :  { %458 = vmatprep.subr.bf16.mxu0 %v658_v24  ;;  %499 = vmatprep.subr.bf16.mxu1 %v660_v25  ;;  %v87_v13 = vsub.s32 1, %v866_v45  ;;  %v719_v14 = vmov 1983009808   ;;  %v95_v16 = vsub.s32 3, %v866_v45 }
  0x19   :  { %v535_v15 = vunpack.c.l.s4 %v719_v14  ;;  %v84_v17 = vrot.slane %v79_v12, %v83_v10  ;;  %v92_v18 = vrot.slane %v79_v12, %v91_v11 }
  0x1a   :  { %v88_v19 = vrot.slane %v79_v12, %v87_v13  ;;  %v96_v21 = vrot.slane %v79_v12, %v95_v16 }
  0x1b   :  { %459 = vmatpush1.bf16.msra.mxu0 %v662_v26  ;;  %500 = vmatpush1.bf16.msra.mxu1 %v663_v27  ;;  %v536_v20 = vunpack.c.0.s8 %v535_v15 }
  0x1c   :  { %460 = vmatprep.subr.bf16.mxu0 %v664_v28  ;;  %501 = vmatprep.subr.bf16.mxu1 %v666_v29 }
  0x1d   :  { %v539_v29 = vsub.s32 %v536_v20, %v866_v45 }
  0x1f   :  { %461 = vmatpush1.bf16.msra.mxu0 %v668_v30  ;;  %502 = vmatpush1.bf16.msra.mxu1 %v669_v31 }
  0x20   :  { %462 = vmatprep.subr.bf16.mxu0 %v670_v32  ;;  %503 = vmatprep.subr.bf16.mxu1 %v672_v33 }
  0x23   :  { %463 = vmatpush1.bf16.msra.mxu0 %v674_v34  ;;  %504 = vmatpush1.bf16.msra.mxu1 %v675_v35 }
  0x24   :  { %464 = vmatprep.subr.bf16.mxu0 %v676_v36  ;;  %505 = vmatprep.subr.bf16.mxu1 %v678_v37 }
  0x27   :  { %465 = vmatpush1.bf16.msra.mxu0 %v680_v41  ;;  %506 = vmatpush1.bf16.msra.mxu1 %v681_v42 }
  0x28   :  { %466 = vmatprep.subr.bf16.mxu0 %v682_v43  ;;  %507 = vmatprep.subr.bf16.mxu1 %v684_v44 }
  0x2b   :  { %467 = vmatpush1.bf16.msra.mxu0 %v686_v47  ;;  %508 = vmatpush1.bf16.msra.mxu1 %v687_v48 }
  0x2c   :  { %468 = vmatprep.subr.bf16.mxu0 %v688_v49  ;;  %509 = vmatprep.subr.bf16.mxu1 %v690_v50 }
  0x2f   :  { %469 = vmatpush1.bf16.msra.mxu0 %v692_v53  ;;  %510 = vmatpush1.bf16.msra.mxu1 %v693_v54 }
  0x30   :  { %470 = vmatprep.subr.bf16.mxu0 %v694_v56  ;;  %511 = vmatprep.subr.bf16.mxu1 %v696_v57 }
  0x33   :  { %471 = vmatpush1.bf16.msra.mxu0 %v698_v59  ;;  %512 = vmatpush1.bf16.msra.mxu1 %v699_v60 }
  0x34   :  { %472 = vmatprep.subr.bf16.mxu0 %v700_v61  ;;  %513 = vmatprep.subr.bf16.mxu1 %v702_v62 }
  0x37   :  { %473 = vmatpush1.bf16.msra.mxu0 %v704_v63  ;;  %514 = vmatpush1.bf16.msra.mxu1 %v705_v0 }
  0x38   :  { %474 = vmatprep.subr.bf16.mxu0 %v706_v1  ;;  %515 = vmatprep.subr.bf16.mxu1 %v708_v2 }
  0x3b   :  { %475 = vmatpush1.bf16.msra.mxu0 %v710_v3  ;;  %516 = vmatpush1.bf16.msra.mxu1 %v711_v4 }
  0x3c   :  { %476 = vmatprep.subr.bf16.mxu0 %v712_v5  ;;  %517 = vmatprep.subr.bf16.mxu1 %v714_v6 }
  0x3f   :  { %477 = vmatpush1.bf16.msra.mxu0 %v716_v7  ;;  %518 = vmatpush1.bf16.msra.mxu1 %v717_v8 }
  0x42   :  { %479 = vmatmul.mubr.bf16.vlgmr.msra.gmra.mrb[0].mxu0 %v116_v9  ;;  %520 = vmatmul.mubr.bf16.vlgmr.msra.gmra.mrb[0].mxu1 %v116_v9 }
 0x115   :  { %v480_v22 = vpop.f32.mrb[0].mxu0  ;;  %v521_v23 = vpop.f32.mrb[0].mxu1 }
 0x116   :  { %v481_v24 = vadd.f32 %v480_v22, %v84_v17  ;;  %v522_v25 = vadd.f32 %v521_v23, %v92_v18  ;;  %v482_v26 = vpop.f32.mrb[1].mxu0  ;;  %v523_v27 = vpop.f32.mrb[1].mxu1 }
 0x117   :  { %v483_v28 = vadd.f32 %v482_v26, %v88_v19  ;;  %v524_v30 = vadd.f32 %v523_v27, %v96_v21  ;;  %v484_v31 = vpop.f32.mrb[2].mxu0  ;;  %v525_v32 = vpop.f32.mrb[2].mxu1 }
 0x118   :  { %v485_v33 = vpop.f32.mrb[3].mxu0  ;;  %v526_v34 = vpop.f32.mrb[3].mxu1 }
 0x119   :  { %v532_v35 = vcombine.low %v481_v24, %v483_v28  ;;  %v533_v36 = vcombine.low %v522_v25, %v524_v30 }
 0x11b   :  { %v540_v37 = vrot.slane %v532_v35, %v539_v29  ;;  %v547_v38 = vrot.slane %v533_v36, %v539_v29 }
 0x11d   :  { %v548_v39 = vcombine.low %v540_v37, %v547_v38 }
 0x11f   :  { %550 = vst [vmem:[%s952_s3] sm:$0xff] %v548_v39 }

// kernel: rebuildnet_forward.40
= control target key start
LH: loop header
LB: loop body
LE: loop exit
PB: predicated region body
PF: predicated region fallthrough
CT: control target
= control target key end

     0   :  { %v212_v1 = vmov 0   ;;  %v34_v18 = vlaneseq  ;;  %s293_s1 = inlined_call_operand.vmem [shape: bf16[128,256], index: 1, kind: input, shape index: {}]   ;;  %s294_s0 = inlined_call_operand.vmem [shape: bf16[8,128], index: 0, kind: input, shape index: {}]   ;;  %s295_s2 = inlined_call_operand.vmem [shape: f32[1,256], index: 2, kind: input, shape index: {}]   ;;  %s296_s3 = inlined_call_operand.vmem [shape: f32[8,256], index: 3, kind: output, shape index: {}]  }
   0x1   :  { %v188_v0 = vld [vmem:[%s293_s1 + $0x4] ss:$8 sps:$4 sm:$0xff]   ;;  %156 = vmatprep.mubr.bf16.mxu0 %v212_v1  ;;  %v190_v2 = vld [vmem:[%s293_s1] ss:$8 sps:$4 sm:$0xff]   ;;  %v191_v3 = vld [vmem:[%s293_s1 + $0x14] ss:$8 sps:$4 sm:$0xff]  }
   0x2   :  { %124 = vmatprep.subr.bf16.mxu0 %v188_v0  ;;  %v193_v4 = vld [vmem:[%s293_s1 + $0x10] ss:$8 sps:$4 sm:$0xff]   ;;  %v194_v5 = vld [vmem:[%s293_s1 + $0x24] ss:$8 sps:$4 sm:$0xff]   ;;  %v196_v6 = vld [vmem:[%s293_s1 + $0x20] ss:$8 sps:$4 sm:$0xff]  }
   0x3   :  { %125 = vmatpush1.bf16.msra.mxu0 %v190_v2  ;;  %v197_v7 = vld [vmem:[%s293_s1 + $0x34] ss:$8 sps:$4 sm:$0xff]   ;;  %v199_v8 = vld [vmem:[%s293_s1 + $0x30] ss:$8 sps:$4 sm:$0xff]   ;;  %v200_v9 = vld [vmem:[%s293_s1 + $0x44] ss:$8 sps:$4 sm:$0xff]  }
   0x4   :  { %126 = vmatprep.subr.bf16.mxu0 %v191_v3  ;;  %v202_v10 = vld [vmem:[%s293_s1 + $0x40] ss:$8 sps:$4 sm:$0xff]   ;;  %v203_v11 = vld [vmem:[%s293_s1 + $0x54] ss:$8 sps:$4 sm:$0xff]   ;;  %v205_v12 = vld [vmem:[%s293_s1 + $0x50] ss:$8 sps:$4 sm:$0xff]  }
   0x5   :  { %v206_v13 = vld [vmem:[%s293_s1 + $0x64] ss:$8 sps:$4 sm:$0xff]   ;;  %v208_v14 = vld [vmem:[%s293_s1 + $0x60] ss:$8 sps:$4 sm:$0xff]   ;;  %v209_v15 = vld [vmem:[%s293_s1 + $0x74] ss:$8 sps:$4 sm:$0xff]  }
   0x6   :  { %v211_v16 = vld [vmem:[%s293_s1 + $0x70] ss:$8 sps:$4 sm:$0xff]   ;;  %v15_v17 = vld [vmem:[%s294_s0] sm:$0xf]  ;;  %v35_v19 = vshrl.u32 %v34_v18, 7 }
   0x7   :  { %127 = vmatpush1.bf16.msra.mxu0 %v193_v4  ;;  %v32_v21 = vld [vmem:[%s295_s2] sm:$0x3] }
   0x8   :  { %128 = vmatprep.subr.bf16.mxu0 %v194_v5  ;;  %v36_v20 = vsub.s32 0, %v35_v19  ;;  %v40_v22 = vsub.s32 1, %v35_v19 }
   0xa   :  { %v37_v23 = vrot.slane %v32_v21, %v36_v20  ;;  %v41_v24 = vrot.slane %v32_v21, %v40_v22 }
   0xb   :  { %129 = vmatpush1.bf16.msra.mxu0 %v196_v6 }
   0xc   :  { %130 = vmatprep.subr.bf16.mxu0 %v197_v7 }
   0xf   :  { %131 = vmatpush1.bf16.msra.mxu0 %v199_v8 }
  0x10   :  { %132 = vmatprep.subr.bf16.mxu0 %v200_v9 }
  0x13   :  { %133 = vmatpush1.bf16.msra.mxu0 %v202_v10 }
  0x14   :  { %134 = vmatprep.subr.bf16.mxu0 %v203_v11 }
  0x17   :  { %135 = vmatpush1.bf16.msra.mxu0 %v205_v12 }
  0x18   :  { %136 = vmatprep.subr.bf16.mxu0 %v206_v13 }
  0x1b   :  { %137 = vmatpush1.bf16.msra.mxu0 %v208_v14 }
  0x1c   :  { %138 = vmatprep.subr.bf16.mxu0 %v209_v15 }
  0x1f   :  { %139 = vmatpush1.bf16.msra.mxu0 %v211_v16 }
  0x22   :  { %157 = vmatmul.mubr.bf16.vlgmr.msra.gmra.mrb[0].mxu0 %v15_v17 }
  0xf5   :  { %v158_v25 = vpop.f32.mrb[0].mxu0 }
  0xf6   :  { %v159_v26 = vadd.f32 %v158_v25, %v37_v23  ;;  %v160_v27 = vpop.f32.mrb[1].mxu0 }
  0xf7   :  { %v161_v28 = vadd.f32 %v160_v27, %v41_v24  ;;  %v162_v29 = vpop.f32.mrb[2].mxu0 }
  0xf8   :  { %165 = vst [vmem:[%s296_s3] sm:$0xff] %v159_v26  ;;  %v163_v30 = vpop.f32.mrb[3].mxu0 }
  0xf9   :  { %166 = vst [vmem:[%s296_s3 + $0x8] sm:$0xff] %v161_v28 }

// kernel: rebuildnet_forward.38
= control target key start
LH: loop header
LB: loop body
LE: loop exit
PB: predicated region body
PF: predicated region fallthrough
CT: control target
= control target key end

     0   :  { %s2620_s1 = inlined_call_operand.vmem [shape: bf16[2304,128], index: 1, kind: input, shape index: {}]   ;;  %s2621_s0 = inlined_call_operand.vmem [shape: bf16[8,2304], index: 0, kind: input, shape index: {}]   ;;  %s2622_s2 = inlined_call_operand.vmem [shape: f32[1,128], index: 2, kind: input, shape index: {}]   ;;  %s2623_s3 = inlined_call_operand.vmem [shape: f32[8,128], index: 3, kind: output, shape index: {}]  }
   0x1   :  { %v1973_v0 = vld [vmem:[%s2620_s1 + $0x40] sm:$0xff]   ;;  %v1977_v4 = vld [vmem:[%s2620_s1 + $0x48] sm:$0xff]   ;;  %v1981_v8 = vld [vmem:[%s2620_s1 + $0x50] sm:$0xff]  }
   0x2   :  { %v1974_v1 = vld [vmem:[%s2620_s1] sm:$0xff]   ;;  %1775 = vmatprep.subr.bf16.mxu0 %v1973_v0  ;;  %v1978_v5 = vld [vmem:[%s2620_s1 + $0x8] sm:$0xff]   ;;  %v1982_v9 = vld [vmem:[%s2620_s1 + $0x10] sm:$0xff]  }
   0x3   :  { %v1975_v2 = vld [vmem:[%s2620_s1 + $0xc0] sm:$0xff]   ;;  %1776 = vmatpush3.bf16.msra.mxu0 %v1974_v1  ;;  %v1979_v6 = vld [vmem:[%s2620_s1 + $0xc8] sm:$0xff]   ;;  %v1983_v10 = vld [vmem:[%s2620_s1 + $0xd0] sm:$0xff]  }
   0x4   :  { %v1976_v3 = vld [vmem:[%s2620_s1 + $0x80] sm:$0xff]   ;;  %1797 = vmatprep.subr.bf16.mxu1 %v1975_v2  ;;  %1777 = vmatprep.subr.bf16.mxu0 %v1977_v4  ;;  %v1980_v7 = vld [vmem:[%s2620_s1 + $0x88] sm:$0xff]   ;;  %v1984_v11 = vld [vmem:[%s2620_s1 + $0x90] sm:$0xff]  }
   0x5   :  { %1798 = vmatpush3.bf16.msra.mxu1 %v1976_v3  ;;  %v1985_v12 = vld [vmem:[%s2620_s1 + $0x58] sm:$0xff]   ;;  %v1989_v16 = vld [vmem:[%s2620_s1 + $0x60] sm:$0xff]   ;;  %v1993_v20 = vld [vmem:[%s2620_s1 + $0x68] sm:$0xff]  }
   0x6   :  { %1799 = vmatprep.subr.bf16.mxu1 %v1979_v6  ;;  %v1986_v13 = vld [vmem:[%s2620_s1 + $0x18] sm:$0xff]   ;;  %v1990_v17 = vld [vmem:[%s2620_s1 + $0x20] sm:$0xff]   ;;  %v1994_v21 = vld [vmem:[%s2620_s1 + $0x28] sm:$0xff]  }
   0x7   :  { %1778 = vmatpush3.bf16.msra.mxu0 %v1978_v5  ;;  %v1987_v14 = vld [vmem:[%s2620_s1 + $0xd8] sm:$0xff]   ;;  %v1991_v18 = vld [vmem:[%s2620_s1 + $0xe0] sm:$0xff]   ;;  %v1995_v22 = vld [vmem:[%s2620_s1 + $0xe8] sm:$0xff]  }
   0x8   :  { %1779 = vmatprep.subr.bf16.mxu0 %v1981_v8  ;;  %v1988_v15 = vld [vmem:[%s2620_s1 + $0x98] sm:$0xff]   ;;  %v1992_v19 = vld [vmem:[%s2620_s1 + $0xa0] sm:$0xff]   ;;  %v1996_v23 = vld [vmem:[%s2620_s1 + $0xa8] sm:$0xff]  }
   0x9   :  { %1800 = vmatpush3.bf16.msra.mxu1 %v1980_v7  ;;  %v1997_v24 = vld [vmem:[%s2620_s1 + $0x70] sm:$0xff]   ;;  %v2001_v28 = vld [vmem:[%s2620_s1 + $0x78] sm:$0xff]   ;;  %v15_v31 = vld [vmem:[%s2621_s0] sm:$0xff] }
   0xa   :  { %1801 = vmatprep.subr.bf16.mxu1 %v1983_v10  ;;  %v1998_v25 = vld [vmem:[%s2620_s1 + $0x30] sm:$0xff]   ;;  %v2002_v29 = vld [vmem:[%s2620_s1 + $0x38] sm:$0xff]   ;;  %v1613_v32 = vcombine.low %v15_v31, %v15_v31  ;;  %v1614_v33 = vcombine.high %v15_v31, %v15_v31  ;;  %v2007_v35 = vld [vmem:[%s2620_s1 + $0x140] sm:$0xff]  }
   0xb   :  { %1780 = vmatpush3.bf16.msra.mxu0 %v1982_v9  ;;  %v1999_v26 = vld [vmem:[%s2620_s1 + $0xf0] sm:$0xff]   ;;  %v2003_v30 = vld [vmem:[%s2620_s1 + $0xf8] sm:$0xff]   ;;  %v16_v36 = vld [vmem:[%s2621_s0 + $0x8] sm:$0xff] }
   0xc   :  { %1781 = vmatprep.subr.bf16.mxu0 %v1985_v12  ;;  %v2000_v27 = vld [vmem:[%s2620_s1 + $0xb0] sm:$0xff]   ;;  %v2006_v34 = vld [vmem:[%s2620_s1 + $0xb8] sm:$0xff]   ;;  %1278 = vmatprep.mubr.bf16.mxu0 %v1614_v33  ;;  %v1615_v37 = vcombine.low %v16_v36, %v16_v36  ;;  %v1616_v38 = vcombine.high %v16_v36, %v16_v36  ;;  %v2010_v39 = vld [vmem:[%s2620_s1 + $0x100] sm:$0xff]  }
   0xd   :  { %1802 = vmatpush3.bf16.msra.mxu1 %v1984_v11  ;;  %v2011_v40 = vld [vmem:[%s2620_s1 + $0x1c0] sm:$0xff]   ;;  %v2013_v42 = vld [vmem:[%s2620_s1 + $0x148] sm:$0xff]   ;;  %v2017_v46 = vld [vmem:[%s2620_s1 + $0x150] sm:$0xff]  }
   0xe   :  { %1803 = vmatprep.subr.bf16.mxu1 %v1987_v14  ;;  %1318 = vmatprep.mubr.bf16.mxu1 %v1616_v38  ;;  %v2012_v41 = vld [vmem:[%s2620_s1 + $0x180] sm:$0xff]   ;;  %v2014_v43 = vld [vmem:[%s2620_s1 + $0x108] sm:$0xff]   ;;  %v2018_v47 = vld [vmem:[%s2620_s1 + $0x110] sm:$0xff]  }
   0xf   :  { %1782 = vmatpush3.bf16.msra.mxu0 %v1986_v13  ;;  %v2015_v44 = vld [vmem:[%s2620_s1 + $0x1c8] sm:$0xff]   ;;  %v2019_v48 = vld [vmem:[%s2620_s1 + $0x1d0] sm:$0xff]   ;;  %v2021_v50 = vld [vmem:[%s2620_s1 + $0x158] sm:$0xff]  }
  0x10   :  { %1783 = vmatprep.subr.bf16.mxu0 %v1989_v16  ;;  %v2016_v45 = vld [vmem:[%s2620_s1 + $0x188] sm:$0xff]   ;;  %v2020_v49 = vld [vmem:[%s2620_s1 + $0x190] sm:$0xff]   ;;  %v2022_v51 = vld [vmem:[%s2620_s1 + $0x118] sm:$0xff]  }
  0x11   :  { %1804 = vmatpush3.bf16.msra.mxu1 %v1988_v15  ;;  %v2023_v52 = vld [vmem:[%s2620_s1 + $0x1d8] sm:$0xff]   ;;  %v2025_v54 = vld [vmem:[%s2620_s1 + $0x160] sm:$0xff]   ;;  %v2029_v58 = vld [vmem:[%s2620_s1 + $0x168] sm:$0xff]  }
  0x12   :  { %1805 = vmatprep.subr.bf16.mxu1 %v1991_v18  ;;  %v2024_v53 = vld [vmem:[%s2620_s1 + $0x198] sm:$0xff]   ;;  %v2026_v55 = vld [vmem:[%s2620_s1 + $0x120] sm:$0xff]   ;;  %v2030_v59 = vld [vmem:[%s2620_s1 + $0x128] sm:$0xff]  }
  0x13   :  { %1784 = vmatpush3.bf16.msra.mxu0 %v1990_v17  ;;  %v2027_v56 = vld [vmem:[%s2620_s1 + $0x1e0] sm:$0xff]   ;;  %v2031_v60 = vld [vmem:[%s2620_s1 + $0x1e8] sm:$0xff]   ;;  %v2033_v62 = vld [vmem:[%s2620_s1 + $0x170] sm:$0xff]  }
  0x14   :  { %1785 = vmatprep.subr.bf16.mxu0 %v1993_v20  ;;  %v2028_v57 = vld [vmem:[%s2620_s1 + $0x1a0] sm:$0xff]   ;;  %v2032_v61 = vld [vmem:[%s2620_s1 + $0x1a8] sm:$0xff]   ;;  %v2034_v63 = vld [vmem:[%s2620_s1 + $0x130] sm:$0xff]  }
  0x15   :  { %1806 = vmatpush3.bf16.msra.mxu1 %v1992_v19  ;;  %v2035_v0 = vld [vmem:[%s2620_s1 + $0x1f0] sm:$0xff]   ;;  %v2037_v2 = vld [vmem:[%s2620_s1 + $0x178] sm:$0xff]   ;;  %v2043_v9 = vld [vmem:[%s2620_s1 + $0x240] sm:$0xff]  }
  0x16   :  { %1807 = vmatprep.subr.bf16.mxu1 %v1995_v22  ;;  %v2036_v1 = vld [vmem:[%s2620_s1 + $0x1b0] sm:$0xff]   ;;  %v2038_v3 = vld [vmem:[%s2620_s1 + $0x138] sm:$0xff]   ;;  %v2046_v13 = vld [vmem:[%s2620_s1 + $0x200] sm:$0xff]  }
  0x17   :  { %1786 = vmatpush3.bf16.msra.mxu0 %v1994_v21  ;;  %v2039_v4 = vld [vmem:[%s2620_s1 + $0x1f8] sm:$0xff]   ;;  %v17_v5 = vld [vmem:[%s2621_s0 + $0x10] sm:$0xff]  ;;  %v2047_v14 = vld [vmem:[%s2620_s1 + $0x2c0] sm:$0xff]  }
  0x18   :  { %1787 = vmatprep.subr.bf16.mxu0 %v1997_v24  ;;  %v1617_v6 = vcombine.low %v17_v5, %v17_v5  ;;  %v1618_v7 = vcombine.high %v17_v5, %v17_v5  ;;  %v2042_v8 = vld [vmem:[%s2620_s1 + $0x1b8] sm:$0xff]   ;;  %v2048_v15 = vld [vmem:[%s2620_s1 + $0x280] sm:$0xff]   ;;  %v2049_v16 = vld [vmem:[%s2620_s1 + $0x248] sm:$0xff]  }
  0x19   :  { %1808 = vmatpush3.bf16.msra.mxu1 %v1996_v23  ;;  %v18_v10 = vld [vmem:[%s2621_s0 + $0x18] sm:$0xff]  ;;  %v2050_v17 = vld [vmem:[%s2620_s1 + $0x208] sm:$0xff]   ;;  %v2053_v20 = vld [vmem:[%s2620_s1 + $0x250] sm:$0xff]  }
  0x1a   :  { %1809 = vmatprep.subr.bf16.mxu1 %v1999_v26  ;;  %v1619_v11 = vcombine.low %v18_v10, %v18_v10  ;;  %v1620_v12 = vcombine.high %v18_v10, %v18_v10  ;;  %v2051_v18 = vld [vmem:[%s2620_s1 + $0x2c8] sm:$0xff]   ;;  %v2054_v21 = vld [vmem:[%s2620_s1 + $0x210] sm:$0xff]   ;;  %v2057_v24 = vld [vmem:[%s2620_s1 + $0x258] sm:$0xff]  }
  0x1b   :  { %1788 = vmatpush3.bf16.msra.mxu0 %v1998_v25  ;;  %v2052_v19 = vld [vmem:[%s2620_s1 + $0x288] sm:$0xff]   ;;  %v2055_v22 = vld [vmem:[%s2620_s1 + $0x2d0] sm:$0xff]   ;;  %v2058_v25 = vld [vmem:[%s2620_s1 + $0x218] sm:$0xff]  }
  0x1c   :  { %1789 = vmatprep.subr.bf16.mxu0 %v2001_v28  ;;  %v2056_v23 = vld [vmem:[%s2620_s1 + $0x290] sm:$0xff]   ;;  %v2059_v26 = vld [vmem:[%s2620_s1 + $0x2d8] sm:$0xff]   ;;  %v2061_v28 = vld [vmem:[%s2620_s1 + $0x260] sm:$0xff]  }
  0x1d   :  { %1810 = vmatpush3.bf16.msra.mxu1 %v2000_v27  ;;  %v2060_v27 = vld [vmem:[%s2620_s1 + $0x298] sm:$0xff]   ;;  %v2064_v31 = vld [vmem:[%s2620_s1 + $0x2a0] sm:$0xff]   ;;  %v2066_v33 = vld [vmem:[%s2620_s1 + $0x228] sm:$0xff]  }
  0x1e   :  { %1811 = vmatprep.subr.bf16.mxu1 %v2003_v30  ;;  %v2063_v30 = vld [vmem:[%s2620_s1 + $0x2e0] sm:$0xff]   ;;  %v2069_v36 = vld [vmem:[%s2620_s1 + $0x270] sm:$0xff]  }
  0x1f   :  { %1790 = vmatpush3.bf16.msra.mxu0 %v2002_v29  ;;  %v2062_v29 = vld [vmem:[%s2620_s1 + $0x220] sm:$0xff]   ;;  %v2071_v38 = vld [vmem:[%s2620_s1 + $0x2f0] sm:$0xff]  }
  0x20   :  { %1819 = vmatprep.subr.bf16.mxu0 %v2007_v35  ;;  %v2068_v35 = vld [vmem:[%s2620_s1 + $0x2a8] sm:$0xff]   ;;  %v2100_v5 = vld [vmem:[%s2620_s1 + $0x3a0] sm:$0xff]   ;;  %v2105_v10 = vld [vmem:[%s2620_s1 + $0x370] sm:$0xff]  }
  0x21   :  { %1812 = vmatpush3.bf16.msra.mxu1 %v2006_v34  ;;  %v2067_v34 = vld [vmem:[%s2620_s1 + $0x2e8] sm:$0xff]  }
  0x22   :  { %1279 = vmatmul.mubr.bf16.vlgmr.msra.gmra.mrb[0].mxu0 %v1613_v32  ;;  %1841 = vmatprep.subr.bf16.mxu1 %v2011_v40  ;;  %v2065_v32 = vld [vmem:[%s2620_s1 + $0x268] sm:$0xff]   ;;  %v2073_v40 = vld [vmem:[%s2620_s1 + $0x278] sm:$0xff]  }
  0x23   :  { %1820 = vmatpush3.bf16.msra.mxu0 %v2010_v39  ;;  %1358 = vmatprep.mubr.bf16.mxu0 %v1618_v7  ;;  %v2072_v39 = vld [vmem:[%s2620_s1 + $0x2b0] sm:$0xff]   ;;  %v2102_v7 = vld [vmem:[%s2620_s1 + $0x328] sm:$0xff]  }
  0x24   :  { %1319 = vmatmul.mubr.bf16.vlgmr.msra.gmra.mrb[0].mxu1 %v1615_v37  ;;  %1821 = vmatprep.subr.bf16.mxu0 %v2013_v42  ;;  %v2070_v37 = vld [vmem:[%s2620_s1 + $0x230] sm:$0xff]   ;;  %v2075_v42 = vld [vmem:[%s2620_s1 + $0x2f8] sm:$0xff]  }
  0x25   :  { %1842 = vmatpush3.bf16.msra.mxu1 %v2012_v41  ;;  %1398 = vmatprep.mubr.bf16.mxu1 %v1620_v12  ;;  %v2074_v41 = vld [vmem:[%s2620_s1 + $0x238] sm:$0xff]   ;;  %v2107_v12 = vld [vmem:[%s2620_s1 + $0x3f0] sm:$0xff]  }
  0x26   :  { %1843 = vmatprep.subr.bf16.mxu1 %v2015_v44 }
  0x27   :  { %1822 = vmatpush3.bf16.msra.mxu0 %v2014_v43  ;;  %v19_v43 = vld [vmem:[%s2621_s0 + $0x20] sm:$0xff] }
  0x28   :  { %1823 = vmatprep.subr.bf16.mxu0 %v2017_v46  ;;  %v1621_v44 = vcombine.low %v19_v43, %v19_v43  ;;  %v2078_v46 = vld [vmem:[%s2620_s1 + $0x2b8] sm:$0xff]  }
  0x29   :  { %1844 = vmatpush3.bf16.msra.mxu1 %v2016_v45  ;;  %v1622_v45 = vcombine.high %v19_v43, %v19_v43 }
  0x2a   :  { %1845 = vmatprep.subr.bf16.mxu1 %v2019_v48  ;;  %v20_v48 = vld [vmem:[%s2621_s0 + $0x28] sm:$0xff] }
  0x2b   :  { %1824 = vmatpush3.bf16.msra.mxu0 %v2018_v47  ;;  %v2079_v47 = vld [vmem:[%s2620_s1 + $0x340] sm:$0xff]  }
  0x2c   :  { %1825 = vmatprep.subr.bf16.mxu0 %v2021_v50  ;;  %v1624_v50 = vcombine.high %v20_v48, %v20_v48 }
  0x2d   :  { %1846 = vmatpush3.bf16.msra.mxu1 %v2020_v49  ;;  %v1623_v49 = vcombine.low %v20_v48, %v20_v48 }
  0x2e   :  { %1847 = vmatprep.subr.bf16.mxu1 %v2023_v52  ;;  %v2083_v52 = vld [vmem:[%s2620_s1 + $0x3c0] sm:$0xff]  }
  0x2f   :  { %1826 = vmatpush3.bf16.msra.mxu0 %v2022_v51  ;;  %v2082_v51 = vld [vmem:[%s2620_s1 + $0x300] sm:$0xff]  }
  0x30   :  { %1827 = vmatprep.subr.bf16.mxu0 %v2025_v54  ;;  %v2085_v54 = vld [vmem:[%s2620_s1 + $0x348] sm:$0xff]  }
  0x31   :  { %1848 = vmatpush3.bf16.msra.mxu1 %v2024_v53  ;;  %v2084_v53 = vld [vmem:[%s2620_s1 + $0x380] sm:$0xff]  }
  0x32   :  { %1849 = vmatprep.subr.bf16.mxu1 %v2027_v56  ;;  %v2087_v56 = vld [vmem:[%s2620_s1 + $0x3c8] sm:$0xff]  }
  0x33   :  { %1828 = vmatpush3.bf16.msra.mxu0 %v2026_v55  ;;  %v2086_v55 = vld [vmem:[%s2620_s1 + $0x308] sm:$0xff]  }
  0x34   :  { %1829 = vmatprep.subr.bf16.mxu0 %v2029_v58  ;;  %v2089_v58 = vld [vmem:[%s2620_s1 + $0x350] sm:$0xff]  }
  0x35   :  { %1850 = vmatpush3.bf16.msra.mxu1 %v2028_v57  ;;  %v2088_v57 = vld [vmem:[%s2620_s1 + $0x388] sm:$0xff]  }
  0x36   :  { %1851 = vmatprep.subr.bf16.mxu1 %v2031_v60  ;;  %v2091_v60 = vld [vmem:[%s2620_s1 + $0x3d0] sm:$0xff]  }
  0x37   :  { %1830 = vmatpush3.bf16.msra.mxu0 %v2030_v59  ;;  %v2090_v59 = vld [vmem:[%s2620_s1 + $0x310] sm:$0xff]  }
  0x38   :  { %1831 = vmatprep.subr.bf16.mxu0 %v2033_v62  ;;  %v2093_v62 = vld [vmem:[%s2620_s1 + $0x358] sm:$0xff]  }
  0x39   :  { %1852 = vmatpush3.bf16.msra.mxu1 %v2032_v61  ;;  %v2092_v61 = vld [vmem:[%s2620_s1 + $0x390] sm:$0xff]  }
  0x3a   :  { %1853 = vmatprep.subr.bf16.mxu1 %v2035_v0  ;;  %v2095_v0 = vld [vmem:[%s2620_s1 + $0x3d8] sm:$0xff]  }
  0x3b   :  { %1832 = vmatpush3.bf16.msra.mxu0 %v2034_v63  ;;  %v2094_v63 = vld [vmem:[%s2620_s1 + $0x318] sm:$0xff]  }
  0x3c   :  { %1833 = vmatprep.subr.bf16.mxu0 %v2037_v2  ;;  %v2097_v2 = vld [vmem:[%s2620_s1 + $0x360] sm:$0xff]  }
  0x3d   :  { %1854 = vmatpush3.bf16.msra.mxu1 %v2036_v1  ;;  %v2096_v1 = vld [vmem:[%s2620_s1 + $0x398] sm:$0xff]  }
  0x3e   :  { %1855 = vmatprep.subr.bf16.mxu1 %v2039_v4  ;;  %v2099_v4 = vld [vmem:[%s2620_s1 + $0x3e0] sm:$0xff]  }
  0x3f   :  { %1834 = vmatpush3.bf16.msra.mxu0 %v2038_v3  ;;  %v2098_v3 = vld [vmem:[%s2620_s1 + $0x320] sm:$0xff]  }
  0x40   :  { %1863 = vmatprep.subr.bf16.mxu0 %v2043_v9  ;;  %v2104_v9 = vld [vmem:[%s2620_s1 + $0x3a8] sm:$0xff]  }
  0x41   :  { %1856 = vmatpush3.bf16.msra.mxu1 %v2042_v8  ;;  %v2103_v8 = vld [vmem:[%s2620_s1 + $0x3e8] sm:$0xff]  }
  0x42   :  { %1359 = vmatmul.mubr.bf16.vlgmr.msra.gmra.mrb[4].mxu0 %v1617_v6  ;;  %1885 = vmatprep.subr.bf16.mxu1 %v2047_v14  ;;  %v2101_v6 = vld [vmem:[%s2620_s1 + $0x368] sm:$0xff]   ;;  %v2109_v14 = vld [vmem:[%s2620_s1 + $0x378] sm:$0xff]  }
  0x43   :  { %1864 = vmatpush3.bf16.msra.mxu0 %v2046_v13  ;;  %1438 = vmatprep.mubr.bf16.mxu0 %v1622_v45  ;;  %v2108_v13 = vld [vmem:[%s2620_s1 + $0x3b0] sm:$0xff]  }
  0x44   :  { %1399 = vmatmul.mubr.bf16.vlgmr.msra.gmra.mrb[4].mxu1 %v1619_v11  ;;  %1865 = vmatprep.subr.bf16.mxu0 %v2049_v16  ;;  %v2106_v11 = vld [vmem:[%s2620_s1 + $0x330] sm:$0xff]   ;;  %v2111_v16 = vld [vmem:[%s2620_s1 + $0x3f8] sm:$0xff]  }
  0x45   :  { %1886 = vmatpush3.bf16.msra.mxu1 %v2048_v15  ;;  %1478 = vmatprep.mubr.bf16.mxu1 %v1624_v50  ;;  %v2110_v15 = vld [vmem:[%s2620_s1 + $0x338] sm:$0xff]  }
  0x46   :  { %1887 = vmatprep.subr.bf16.mxu1 %v2051_v18 }
  0x47   :  { %1866 = vmatpush3.bf16.msra.mxu0 %v2050_v17  ;;  %v21_v17 = vld [vmem:[%s2621_s0 + $0x30] sm:$0xff] }
  0x48   :  { %1867 = vmatprep.subr.bf16.mxu0 %v2053_v20  ;;  %v1625_v18 = vcombine.low %v21_v17, %v21_v17  ;;  %v2114_v20 = vld [vmem:[%s2620_s1 + $0x3b8] sm:$0xff]  }
  0x49   :  { %1888 = vmatpush3.bf16.msra.mxu1 %v2052_v19  ;;  %v1626_v19 = vcombine.high %v21_v17, %v21_v17 }
  0x4a   :  { %1889 = vmatprep.subr.bf16.mxu1 %v2055_v22  ;;  %v22_v22 = vld [vmem:[%s2621_s0 + $0x38] sm:$0xff] }
  0x4b   :  { %1868 = vmatpush3.bf16.msra.mxu0 %v2054_v21  ;;  %v2115_v21 = vld [vmem:[%s2620_s1 + $0x440] sm:$0xff]  }
  0x4c   :  { %1869 = vmatprep.subr.bf16.mxu0 %v2057_v24  ;;  %v1628_v24 = vcombine.high %v22_v22, %v22_v22 }
  0x4d   :  { %1890 = vmatpush3.bf16.msra.mxu1 %v2056_v23  ;;  %v1627_v23 = vcombine.low %v22_v22, %v22_v22 }
  0x4e   :  { %1891 = vmatprep.subr.bf16.mxu1 %v2059_v26  ;;  %v2119_v26 = vld [vmem:[%s2620_s1 + $0x448] sm:$0xff]  }
  0x4f   :  { %1870 = vmatpush3.bf16.msra.mxu0 %v2058_v25  ;;  %v2118_v25 = vld [vmem:[%s2620_s1 + $0x400] sm:$0xff]  }
  0x50   :  { %1871 = vmatprep.subr.bf16.mxu0 %v2061_v28  ;;  %v2121_v28 = vld [vmem:[%s2620_s1 + $0x450] sm:$0xff]  }
  0x51   :  { %1892 = vmatpush3.bf16.msra.mxu1 %v2060_v27  ;;  %v2120_v27 = vld [vmem:[%s2620_s1 + $0x408] sm:$0xff]  }
  0x52   :  { %1893 = vmatprep.subr.bf16.mxu1 %v2063_v30  ;;  %v2123_v30 = vld [vmem:[%s2620_s1 + $0x458] sm:$0xff]  }
  0x53   :  { %1872 = vmatpush3.bf16.msra.mxu0 %v2062_v29  ;;  %v2122_v29 = vld [vmem:[%s2620_s1 + $0x410] sm:$0xff]  }
  0x54   :  { %1873 = vmatprep.subr.bf16.mxu0 %v2065_v32  ;;  %v2125_v32 = vld [vmem:[%s2620_s1 + $0x460] sm:$0xff]  }
  0x55   :  { %1894 = vmatpush3.bf16.msra.mxu1 %v2064_v31  ;;  %v2124_v31 = vld [vmem:[%s2620_s1 + $0x418] sm:$0xff]  }
  0x56   :  { %1895 = vmatprep.subr.bf16.mxu1 %v2067_v34  ;;  %v23_v34 = vld [vmem:[%s2621_s0 + $0x40] sm:$0xff] }
  0x57   :  { %1874 = vmatpush3.bf16.msra.mxu0 %v2066_v33  ;;  %v2126_v33 = vld [vmem:[%s2620_s1 + $0x420] sm:$0xff]  }
  0x58   :  { %1875 = vmatprep.subr.bf16.mxu0 %v2069_v36  ;;  %v1630_v36 = vcombine.high %v23_v34, %v23_v34 }
  0x59   :  { %1896 = vmatpush3.bf16.msra.mxu1 %v2068_v35  ;;  %v2127_v35 = vld [vmem:[%s2620_s1 + $0x468] sm:$0xff]  }
  0x5a   :  { %1897 = vmatprep.subr.bf16.mxu1 %v2071_v38  ;;  %v2129_v38 = vld [vmem:[%s2620_s1 + $0x470] sm:$0xff]  }
  0x5b   :  { %1876 = vmatpush3.bf16.msra.mxu0 %v2070_v37  ;;  %v2128_v37 = vld [vmem:[%s2620_s1 + $0x428] sm:$0xff]  }
  0x5c   :  { %1877 = vmatprep.subr.bf16.mxu0 %v2073_v40  ;;  %v2131_v40 = vld [vmem:[%s2620_s1 + $0x478] sm:$0xff]  }
  0x5d   :  { %1898 = vmatpush3.bf16.msra.mxu1 %v2072_v39  ;;  %v2130_v39 = vld [vmem:[%s2620_s1 + $0x430] sm:$0xff]  }
  0x5e   :  { %1899 = vmatprep.subr.bf16.mxu1 %v2075_v42  ;;  %v1629_v42 = vcombine.low %v23_v34, %v23_v34 }
  0x5f   :  { %1878 = vmatpush3.bf16.msra.mxu0 %v2074_v41  ;;  %v2132_v41 = vld [vmem:[%s2620_s1 + $0x438] sm:$0xff]  }
  0x60   :  { %1907 = vmatprep.subr.bf16.mxu0 %v2079_v47 }
  0x61   :  { %1900 = vmatpush3.bf16.msra.mxu1 %v2078_v46 }
  0x62   :  { %1439 = vmatmul.mubr.bf16.vlgmr.msra.gmra.mrb[8].mxu0 %v1621_v44  ;;  %1929 = vmatprep.subr.bf16.mxu1 %v2083_v52  ;;  %v1612_v44 = vld [vmem:[%s2622_s2] ss:$0 sm:$0xff] }
  0x63   :  { %1908 = vmatpush3.bf16.msra.mxu0 %v2082_v51  ;;  %1518 = vmatprep.mubr.bf16.mxu0 %v1626_v19 }
  0x64   :  { %1479 = vmatmul.mubr.bf16.vlgmr.msra.gmra.mrb[8].mxu1 %v1623_v49  ;;  %1909 = vmatprep.subr.bf16.mxu0 %v2085_v54 }
  0x65   :  { %1930 = vmatpush3.bf16.msra.mxu1 %v2084_v53  ;;  %1558 = vmatprep.mubr.bf16.mxu1 %v1628_v24 }
  0x66   :  { %1931 = vmatprep.subr.bf16.mxu1 %v2087_v56 }
  0x67   :  { %1910 = vmatpush3.bf16.msra.mxu0 %v2086_v55 }
  0x68   :  { %1911 = vmatprep.subr.bf16.mxu0 %v2089_v58 }
  0x69   :  { %1932 = vmatpush3.bf16.msra.mxu1 %v2088_v57 }
  0x6a   :  { %1933 = vmatprep.subr.bf16.mxu1 %v2091_v60 }
  0x6b   :  { %1912 = vmatpush3.bf16.msra.mxu0 %v2090_v59 }
  0x6c   :  { %1913 = vmatprep.subr.bf16.mxu0 %v2093_v62 }
  0x6d   :  { %1934 = vmatpush3.bf16.msra.mxu1 %v2092_v61 }
  0x6e   :  { %1935 = vmatprep.subr.bf16.mxu1 %v2095_v0 }
  0x6f   :  { %1914 = vmatpush3.bf16.msra.mxu0 %v2094_v63 }
  0x70   :  { %1915 = vmatprep.subr.bf16.mxu0 %v2097_v2 }
  0x71   :  { %1936 = vmatpush3.bf16.msra.mxu1 %v2096_v1 }
  0x72   :  { %1937 = vmatprep.subr.bf16.mxu1 %v2099_v4 }
  0x73   :  { %1916 = vmatpush3.bf16.msra.mxu0 %v2098_v3 }
  0x74   :  { %1917 = vmatprep.subr.bf16.mxu0 %v2101_v6 }
  0x75   :  { %1938 = vmatpush3.bf16.msra.mxu1 %v2100_v5 }
  0x76   :  { %1939 = vmatprep.subr.bf16.mxu1 %v2103_v8 }
  0x77   :  { %1918 = vmatpush3.bf16.msra.mxu0 %v2102_v7 }
  0x78   :  { %1919 = vmatprep.subr.bf16.mxu0 %v2105_v10 }
  0x79   :  { %1940 = vmatpush3.bf16.msra.mxu1 %v2104_v9 }
  0x7a   :  { %1941 = vmatprep.subr.bf16.mxu1 %v2107_v12 }
  0x7b   :  { %1920 = vmatpush3.bf16.msra.mxu0 %v2106_v11 }
  0x7c   :  { %1921 = vmatprep.subr.bf16.mxu0 %v2109_v14 }
  0x7d   :  { %1942 = vmatpush3.bf16.msra.mxu1 %v2108_v13 }
  0x7e   :  { %1943 = vmatprep.subr.bf16.mxu1 %v2111_v16 }
  0x7f   :  { %1922 = vmatpush3.bf16.msra.mxu0 %v2110_v15 }
  0x80   :  { %1951 = vmatprep.subr.bf16.mxu0 %v2115_v21 }
  0x81   :  { %1944 = vmatpush3.bf16.msra.mxu1 %v2114_v20 }
  0x82   :  { %1519 = vmatmul.mubr.bf16.vlgmr.msra.gmra.mrb[12].mxu0 %v1625_v18 }
  0x83   :  { %1952 = vmatpush3.bf16.msra.mxu0 %v2118_v25  ;;  %1598 = vmatprep.mubr.bf16.mxu0 %v1630_v36 }
  0x84   :  { %1559 = vmatmul.mubr.bf16.vlgmr.msra.gmra.mrb[12].mxu1 %v1627_v23  ;;  %1953 = vmatprep.subr.bf16.mxu0 %v2119_v26 }
  0x87   :  { %1954 = vmatpush3.bf16.msra.mxu0 %v2120_v27 }
  0x88   :  { %1955 = vmatprep.subr.bf16.mxu0 %v2121_v28 }
  0x8b   :  { %1956 = vmatpush3.bf16.msra.mxu0 %v2122_v29 }
  0x8c   :  { %1957 = vmatprep.subr.bf16.mxu0 %v2123_v30 }
  0x8f   :  { %1958 = vmatpush3.bf16.msra.mxu0 %v2124_v31 }
  0x90   :  { %1959 = vmatprep.subr.bf16.mxu0 %v2125_v32 }
  0x93   :  { %1960 = vmatpush3.bf16.msra.mxu0 %v2126_v33 }
  0x94   :  { %1961 = vmatprep.subr.bf16.mxu0 %v2127_v35 }
  0x97   :  { %1962 = vmatpush3.bf16.msra.mxu0 %v2128_v37 }
  0x98   :  { %1963 = vmatprep.subr.bf16.mxu0 %v2129_v38 }
  0x9b   :  { %1964 = vmatpush3.bf16.msra.mxu0 %v2130_v39 }
  0x9c   :  { %1965 = vmatprep.subr.bf16.mxu0 %v2131_v40 }
  0x9f   :  { %1966 = vmatpush3.bf16.msra.mxu0 %v2132_v41 }
  0xa2   :  { %1599 = vmatmul.mubr.bf16.vlgmr.msra.gmra.mrb[16].mxu0 %v1629_v42 }
  0xf5   :  { %v1791_v43 = vpop.f32.mrb[0].mxu0 }
  0xf6   :  { %v1792_v45 = vpop.f32.mrb[1].mxu0 }
  0xf7   :  { %v1793_v46 = vadd.f32 %v1792_v45, %v1791_v43  ;;  %v1794_v47 = vpop.f32.mrb[2].mxu0  ;;  %v1813_v48 = vpop.f32.mrb[0].mxu1 }
  0xf8   :  { %v1795_v49 = vpop.f32.mrb[3].mxu0  ;;  %v1814_v50 = vpop.f32.mrb[1].mxu1 }
  0xf9   :  { %v1281_v51 = vadd.f32 %v1793_v46, %v1612_v44  ;;  %v1815_v52 = vadd.f32 %v1814_v50, %v1813_v48  ;;  %v1816_v53 = vpop.f32.mrb[2].mxu1 }
  0xfa   :  { %v1817_v54 = vpop.f32.mrb[3].mxu1 }
  0xfb   :  { %v1321_v55 = vadd.f32 %v1815_v52, %v1281_v51 }
 0x115   :  { %v1835_v56 = vpop.f32.mrb[4].mxu0 }
 0x116   :  { %v1836_v57 = vpop.f32.mrb[5].mxu0 }
 0x117   :  { %v1837_v58 = vadd.f32 %v1836_v57, %v1835_v56  ;;  %v1838_v59 = vpop.f32.mrb[6].mxu0  ;;  %v1857_v60 = vpop.f32.mrb[4].mxu1 }
 0x118   :  { %v1839_v61 = vpop.f32.mrb[7].mxu0  ;;  %v1858_v63 = vpop.f32.mrb[5].mxu1 }
 0x119   :  { %v1361_v62 = vadd.f32 %v1837_v58, %v1321_v55  ;;  %v1859_v0 = vadd.f32 %v1858_v63, %v1857_v60  ;;  %v1860_v1 = vpop.f32.mrb[6].mxu1 }
 0x11a   :  { %v1861_v2 = vpop.f32.mrb[7].mxu1 }
 0x11b   :  { %v1401_v3 = vadd.f32 %v1859_v0, %v1361_v62 }
 0x135   :  { %v1879_v4 = vpop.f32.mrb[8].mxu0 }
 0x136   :  { %v1880_v5 = vpop.f32.mrb[9].mxu0 }
 0x137   :  { %v1881_v6 = vadd.f32 %v1880_v5, %v1879_v4  ;;  %v1882_v7 = vpop.f32.mrb[10].mxu0  ;;  %v1901_v8 = vpop.f32.mrb[8].mxu1 }
 0x138   :  { %v1883_v9 = vpop.f32.mrb[11].mxu0  ;;  %v1902_v10 = vpop.f32.mrb[9].mxu1 }
 0x139   :  { %v1441_v11 = vadd.f32 %v1881_v6, %v1401_v3  ;;  %v1903_v12 = vadd.f32 %v1902_v10, %v1901_v8  ;;  %v1904_v13 = vpop.f32.mrb[10].mxu1 }
 0x13a   :  { %v1905_v14 = vpop.f32.mrb[11].mxu1 }
 0x13b   :  { %v1481_v15 = vadd.f32 %v1903_v12, %v1441_v11 }
 0x155   :  { %v1923_v16 = vpop.f32.mrb[12].mxu0 }
 0x156   :  { %v1924_v17 = vpop.f32.mrb[13].mxu0 }
 0x157   :  { %v1925_v18 = vadd.f32 %v1924_v17, %v1923_v16  ;;  %v1926_v19 = vpop.f32.mrb[14].mxu0  ;;  %v1945_v20 = vpop.f32.mrb[12].mxu1 }
 0x158   :  { %v1927_v21 = vpop.f32.mrb[15].mxu0  ;;  %v1946_v22 = vpop.f32.mrb[13].mxu1 }
 0x159   :  { %v1521_v23 = vadd.f32 %v1925_v18, %v1481_v15  ;;  %v1947_v24 = vadd.f32 %v1946_v22, %v1945_v20  ;;  %v1948_v25 = vpop.f32.mrb[14].mxu1 }
 0x15a   :  { %v1949_v26 = vpop.f32.mrb[15].mxu1 }
 0x15b   :  { %v1561_v27 = vadd.f32 %v1947_v24, %v1521_v23 }
 0x175   :  { %v1967_v28 = vpop.f32.mrb[16].mxu0 }
 0x176   :  { %v1968_v29 = vpop.f32.mrb[17].mxu0 }
 0x177   :  { %v1969_v30 = vadd.f32 %v1968_v29, %v1967_v28  ;;  %v1970_v31 = vpop.f32.mrb[18].mxu0 }
 0x178   :  { %v1971_v32 = vpop.f32.mrb[19].mxu0 }
 0x179   :  { %v1601_v33 = vadd.f32 %v1969_v30, %v1561_v27 }
 0x17b   :  { %v1606_v34 = vmax.f32 %v1601_v33, 0.0 }
 0x17d   :  { %1607 = vst [vmem:[%s2623_s3] sm:$0xff] %v1606_v34 }

// kernel: rebuildnet_forward.43
= control target key start
LH: loop header
LB: loop body
LE: loop exit
PB: predicated region body
PF: predicated region fallthrough
CT: control target
= control target key end

     0   :  { %vm68_vm0 = vcmask 523264   ;;  %s218_s1 = inlined_call_operand.vmem [shape: bf16[64,128], index: 1, kind: input, shape index: {}]   ;;  %s219_s0 = inlined_call_operand.vmem [shape: bf16[32,64], index: 0, kind: input, shape index: {}]   ;;  %s220_s2 = inlined_call_operand.vmem [shape: f32[1,128], index: 2, kind: input, shape index: {}]   ;;  %s221_s3 = inlined_call_operand.vmem [shape: f32[32,128], index: 3, kind: output, shape index: {}]  }
   0x1   :  { %v159_v0 = vld [vmem:[%s218_s1] sm:$0xff]   ;;  %v160_v1 = vld [vmem:[%s218_s1 + $0x8] sm:$0xff]   ;;  %v161_v2 = vld [vmem:[%s218_s1 + $0x10] sm:$0xff]  }
   0x2   :  { %147 = vmatprep.subr.bf16.mxu0 %v159_v0  ;;  %v163_v3 = vld [vmem:[%s219_s0] sm:$0xff]   ;;  %v162_v4 = vld [vmem:[%s218_s1 + $0x18] sm:$0xff]   ;;  %v164_v5 = vld [vmem:[%s219_s0 + $0x8] sm:$0xff]  }
   0x3   :  { %148 = vmatpush3.bf16.msra.mxu0 %v159_v0  ;;  %155 = vmatprep.mubr.msk.bf16.mxu0 %vm68_vm0, %v163_v3  ;;  %v132_v6 = vld [vmem:[%s220_s2] ss:$0 sm:$0xff] }
   0x4   :  { %149 = vmatprep.subr.bf16.mxu0 %v160_v1 }
   0x7   :  { %150 = vmatpush3.bf16.msra.mxu0 %v160_v1 }
   0x8   :  { %151 = vmatprep.subr.bf16.mxu0 %v161_v2 }
   0xb   :  { %152 = vmatpush3.bf16.msra.mxu0 %v161_v2 }
   0xc   :  { %153 = vmatprep.subr.bf16.mxu0 %v162_v4 }
   0xf   :  { %154 = vmatpush3.bf16.msra.mxu0 %v162_v4 }
  0x12   :  { %156 = vmatmul.mubr.msk.bf16.vlgmr.msra.gmra.mrb[0].mxu0 %vm68_vm0, %v164_v5 }
  0xe5   :  { %v157_v7 = vpop.f32.mrb[0].mxu0 }
  0xe6   :  { %v118_v8 = vadd.f32 %v157_v7, %v132_v6  ;;  %v109_v9 = vpop.f32.mrb[1].mxu0 }
  0xe7   :  { %v110_v10 = vadd.f32 %v132_v6, %v109_v9  ;;  %v158_v11 = vpop.f32.mrb[2].mxu0 }
  0xe8   :  { %126 = vst [vmem:[%s221_s3 + $0x10] sm:$0xff] %v118_v8  ;;  %v121_v12 = vadd.f32 %v158_v11, %v132_v6  ;;  %v112_v13 = vpop.f32.mrb[3].mxu0 }
  0xe9   :  { %124 = vst [vmem:[%s221_s3] sm:$0xff] %v110_v10  ;;  %v113_v14 = vadd.f32 %v132_v6, %v112_v13 }
  0xea   :  { %127 = vst [vmem:[%s221_s3 + $0x18] sm:$0xff] %v121_v12 }
  0xeb   :  { %125 = vst [vmem:[%s221_s3 + $0x8] sm:$0xff] %v113_v14 }

// kernel: rebuildnet_forward.41
= control target key start
LH: loop header
LB: loop body
LE: loop exit
PB: predicated region body
PF: predicated region fallthrough
CT: control target
= control target key end

     0   :  { %vm959_vm0 = vcmask 523264   ;;  %s1604_s1 = inlined_call_operand.vmem [shape: bf16[1152,64], index: 1, kind: input, shape index: {}]   ;;  %s1605_s0 = inlined_call_operand.vmem [shape: bf16[32,1152], index: 0, kind: input, shape index: {}]   ;;  %s1606_s2 = inlined_call_operand.vmem [shape: f32[1,64], index: 2, kind: input, shape index: {}]   ;;  %s1607_s3 = inlined_call_operand.vmem [shape: f32[32,64], index: 3, kind: output, shape index: {}]  }
   0x1   :  { %v1201_v0 = vld [vmem:[%s1604_s1 + $0x40] sm:$0xff]   ;;  %v1205_v4 = vld [vmem:[%s1604_s1 + $0x48] sm:$0xff]   ;;  %v1209_v8 = vld [vmem:[%s1604_s1 + $0x50] sm:$0xff]  }
   0x2   :  { %v1202_v1 = vld [vmem:[%s1604_s1] sm:$0xff]   ;;  %1059 = vmatprep.subr.bf16.mxu0 %v1201_v0  ;;  %v1206_v5 = vld [vmem:[%s1604_s1 + $0x8] sm:$0xff]   ;;  %v1210_v9 = vld [vmem:[%s1604_s1 + $0x10] sm:$0xff]  }
   0x3   :  { %v1203_v2 = vld [vmem:[%s1604_s1 + $0xc0] sm:$0xff]   ;;  %1060 = vmatpush3.bf16.msra.mxu0 %v1202_v1  ;;  %v1207_v6 = vld [vmem:[%s1604_s1 + $0xc8] sm:$0xff]   ;;  %v1211_v10 = vld [vmem:[%s1604_s1 + $0xd0] sm:$0xff]  }
   0x4   :  { %v1204_v3 = vld [vmem:[%s1604_s1 + $0x80] sm:$0xff]   ;;  %1087 = vmatprep.subr.bf16.mxu1 %v1203_v2  ;;  %1061 = vmatprep.subr.bf16.mxu0 %v1205_v4  ;;  %v1208_v7 = vld [vmem:[%s1604_s1 + $0x88] sm:$0xff]   ;;  %v1212_v11 = vld [vmem:[%s1604_s1 + $0x90] sm:$0xff]  }
   0x5   :  { %1088 = vmatpush3.bf16.msra.mxu1 %v1204_v3  ;;  %v1213_v12 = vld [vmem:[%s1604_s1 + $0x58] sm:$0xff]   ;;  %v1217_v16 = vld [vmem:[%s1604_s1 + $0x60] sm:$0xff]   ;;  %v1221_v20 = vld [vmem:[%s1604_s1 + $0x68] sm:$0xff]  }
   0x6   :  { %1089 = vmatprep.subr.bf16.mxu1 %v1207_v6  ;;  %v1214_v13 = vld [vmem:[%s1604_s1 + $0x18] sm:$0xff]   ;;  %v1218_v17 = vld [vmem:[%s1604_s1 + $0x20] sm:$0xff]   ;;  %v1222_v21 = vld [vmem:[%s1604_s1 + $0x28] sm:$0xff]  }
   0x7   :  { %1062 = vmatpush3.bf16.msra.mxu0 %v1206_v5  ;;  %v1215_v14 = vld [vmem:[%s1604_s1 + $0xd8] sm:$0xff]   ;;  %v1219_v18 = vld [vmem:[%s1604_s1 + $0xe0] sm:$0xff]   ;;  %v1223_v22 = vld [vmem:[%s1604_s1 + $0xe8] sm:$0xff]  }
   0x8   :  { %1063 = vmatprep.subr.bf16.mxu0 %v1209_v8  ;;  %v1216_v15 = vld [vmem:[%s1604_s1 + $0x98] sm:$0xff]   ;;  %v1220_v19 = vld [vmem:[%s1604_s1 + $0xa0] sm:$0xff]   ;;  %v1224_v23 = vld [vmem:[%s1604_s1 + $0xa8] sm:$0xff]  }
   0x9   :  { %1090 = vmatpush3.bf16.msra.mxu1 %v1208_v7  ;;  %v1225_v24 = vld [vmem:[%s1604_s1 + $0x70] sm:$0xff]   ;;  %v1229_v28 = vld [vmem:[%s1604_s1 + $0x78] sm:$0xff]   ;;  %v1232_v31 = vld [vmem:[%s1605_s0] ss:$36 sps:$4 sm:$0xff]  }
   0xa   :  { %1091 = vmatprep.subr.bf16.mxu1 %v1211_v10  ;;  %v1226_v25 = vld [vmem:[%s1604_s1 + $0x30] sm:$0xff]   ;;  %v1230_v29 = vld [vmem:[%s1604_s1 + $0x38] sm:$0xff]   ;;  %v1234_v32 = vld [vmem:[%s1605_s0 + $0x4] ss:$36 sps:$4 sm:$0xff]  }
   0xb   :  { %1064 = vmatpush3.bf16.msra.mxu0 %v1210_v9  ;;  %v1227_v26 = vld [vmem:[%s1604_s1 + $0xf0] sm:$0xff]   ;;  %v1231_v30 = vld [vmem:[%s1604_s1 + $0xf8] sm:$0xff]   ;;  %742 = vmatprep.mubr.bf16.mxu0 %v1234_v32  ;;  %v1236_v34 = vld [vmem:[%s1604_s1 + $0x140] sm:$0xff]  }
   0xc   :  { %1065 = vmatprep.subr.bf16.mxu0 %v1213_v12  ;;  %v1228_v27 = vld [vmem:[%s1604_s1 + $0xb0] sm:$0xff]   ;;  %v1235_v33 = vld [vmem:[%s1604_s1 + $0xb8] sm:$0xff]   ;;  %v1237_v35 = vld [vmem:[%s1605_s0 + $0x8] ss:$36 sps:$4 sm:$0xff]  }
   0xd   :  { %1092 = vmatpush3.bf16.msra.mxu1 %v1212_v11  ;;  %v1239_v36 = vld [vmem:[%s1605_s0 + $0xc] ss:$36 sps:$4 sm:$0xff]   ;;  %v1240_v37 = vld [vmem:[%s1604_s1 + $0x100] sm:$0xff]   ;;  %v1251_v48 = vld [vmem:[%s1604_s1 + $0x158] sm:$0xff]  }
   0xe   :  { %1093 = vmatprep.subr.bf16.mxu1 %v1215_v14  ;;  %791 = vmatprep.mubr.bf16.mxu1 %v1239_v36  ;;  %v1241_v38 = vld [vmem:[%s1604_s1 + $0x1c0] sm:$0xff]   ;;  %v1243_v40 = vld [vmem:[%s1604_s1 + $0x148] sm:$0xff]   ;;  %v1247_v44 = vld [vmem:[%s1604_s1 + $0x150] sm:$0xff]  }
   0xf   :  { %1066 = vmatpush3.bf16.msra.mxu0 %v1214_v13  ;;  %v1242_v39 = vld [vmem:[%s1604_s1 + $0x180] sm:$0xff]   ;;  %v1244_v41 = vld [vmem:[%s1604_s1 + $0x108] sm:$0xff]   ;;  %v1248_v45 = vld [vmem:[%s1604_s1 + $0x110] sm:$0xff]  }
  0x10   :  { %1067 = vmatprep.subr.bf16.mxu0 %v1217_v16  ;;  %v1245_v42 = vld [vmem:[%s1604_s1 + $0x1c8] sm:$0xff]   ;;  %v1249_v46 = vld [vmem:[%s1604_s1 + $0x1d0] sm:$0xff]   ;;  %v1252_v49 = vld [vmem:[%s1604_s1 + $0x118] sm:$0xff]  }
  0x11   :  { %1094 = vmatpush3.bf16.msra.mxu1 %v1216_v15  ;;  %v1246_v43 = vld [vmem:[%s1604_s1 + $0x188] sm:$0xff]   ;;  %v1250_v47 = vld [vmem:[%s1604_s1 + $0x190] sm:$0xff]   ;;  %v1253_v50 = vld [vmem:[%s1604_s1 + $0x1d8] sm:$0xff]  }
  0x12   :  { %1095 = vmatprep.subr.bf16.mxu1 %v1219_v18  ;;  %v1254_v51 = vld [vmem:[%s1604_s1 + $0x198] sm:$0xff]   ;;  %v1255_v52 = vld [vmem:[%s1604_s1 + $0x160] sm:$0xff]   ;;  %v1259_v56 = vld [vmem:[%s1604_s1 + $0x168] sm:$0xff]  }
  0x13   :  { %1068 = vmatpush3.bf16.msra.mxu0 %v1218_v17  ;;  %v1256_v53 = vld [vmem:[%s1604_s1 + $0x120] sm:$0xff]   ;;  %v1260_v57 = vld [vmem:[%s1605_s0 + $0x4c] ss:$36 sps:$4 sm:$0xff]   ;;  %v1265_v61 = vld [vmem:[%s1605_s0 + $0x54] ss:$36 sps:$4 sm:$0xff]  }
  0x14   :  { %1069 = vmatprep.subr.bf16.mxu0 %v1221_v20  ;;  %v1257_v54 = vld [vmem:[%s1604_s1 + $0x1e0] sm:$0xff]   ;;  %v1262_v58 = vld [vmem:[%s1604_s1 + $0x128] sm:$0xff]   ;;  %v1268_v63 = vld [vmem:[%s1605_s0 + $0x50] ss:$36 sps:$4 sm:$0xff]  }
  0x15   :  { %1096 = vmatpush3.bf16.msra.mxu1 %v1220_v19  ;;  %v1258_v55 = vld [vmem:[%s1604_s1 + $0x1a0] sm:$0xff]   ;;  %v1263_v59 = vld [vmem:[%s1605_s0 + $0x48] ss:$36 sps:$4 sm:$0xff]   ;;  %v1269_v0 = vld [vmem:[%s1604_s1 + $0x170] sm:$0xff]  }
  0x16   :  { %1097 = vmatprep.subr.bf16.mxu1 %v1223_v22  ;;  %v1264_v60 = vld [vmem:[%s1604_s1 + $0x1e8] sm:$0xff]   ;;  %v1270_v1 = vld [vmem:[%s1604_s1 + $0x130] sm:$0xff]   ;;  %v1273_v4 = vld [vmem:[%s1604_s1 + $0x178] sm:$0xff]  }
  0x17   :  { %1070 = vmatpush3.bf16.msra.mxu0 %v1222_v21  ;;  %v1267_v62 = vld [vmem:[%s1604_s1 + $0x1a8] sm:$0xff]   ;;  %v1271_v2 = vld [vmem:[%s1604_s1 + $0x1f0] sm:$0xff]   ;;  %v1274_v5 = vld [vmem:[%s1604_s1 + $0x138] sm:$0xff]  }
  0x18   :  { %1071 = vmatprep.subr.bf16.mxu0 %v1225_v24  ;;  %v1272_v3 = vld [vmem:[%s1604_s1 + $0x1b0] sm:$0xff]   ;;  %v1275_v6 = vld [vmem:[%s1604_s1 + $0x1f8] sm:$0xff]   ;;  %v1280_v10 = vld [vmem:[%s1604_s1 + $0x200] sm:$0xff]  }
  0x19   :  { %1098 = vmatpush3.bf16.msra.mxu1 %v1224_v23  ;;  %v1276_v7 = vld [vmem:[%s1605_s0 + $0x10] ss:$36 sps:$4 sm:$0xff]   ;;  %v1279_v9 = vld [vmem:[%s1604_s1 + $0x1b8] sm:$0xff]   ;;  %v1284_v13 = vld [vmem:[%s1604_s1 + $0x208] sm:$0xff]  }
  0x1a   :  { %1099 = vmatprep.subr.bf16.mxu1 %v1227_v26  ;;  %v1278_v8 = vld [vmem:[%s1605_s0 + $0x14] ss:$36 sps:$4 sm:$0xff]   ;;  %v1283_v12 = vld [vmem:[%s1605_s0 + $0x1c] ss:$36 sps:$4 sm:$0xff]   ;;  %v1289_v17 = vld [vmem:[%s1605_s0 + $0x64] ss:$36 sps:$4 sm:$0xff]  }
  0x1b   :  { %1072 = vmatpush3.bf16.msra.mxu0 %v1226_v25  ;;  %v1281_v11 = vld [vmem:[%s1605_s0 + $0x18] ss:$36 sps:$4 sm:$0xff]   ;;  %v1288_v16 = vld [vmem:[%s1604_s1 + $0x210] sm:$0xff]   ;;  %v1291_v18 = vld [vmem:[%s1605_s0 + $0x60] ss:$36 sps:$4 sm:$0xff]  }
  0x1c   :  { %1073 = vmatprep.subr.bf16.mxu0 %v1229_v28  ;;  %v1285_v14 = vld [vmem:[%s1605_s0 + $0x5c] ss:$36 sps:$4 sm:$0xff]   ;;  %v1294_v22 = vld [vmem:[%s1604_s1 + $0x228] sm:$0xff]   ;;  %v1295_v23 = vld [vmem:[%s1604_s1 + $0x230] sm:$0xff]  }
  0x1d   :  { %1100 = vmatpush3.bf16.msra.mxu1 %v1228_v27  ;;  %v1287_v15 = vld [vmem:[%s1605_s0 + $0x58] ss:$36 sps:$4 sm:$0xff]   ;;  %v1293_v20 = vld [vmem:[%s1604_s1 + $0x220] sm:$0xff]   ;;  %v1298_v25 = vld [vmem:[%s1605_s0 + $0x68] ss:$36 sps:$4 sm:$0xff]  }
  0x1e   :  { %1101 = vmatprep.subr.bf16.mxu1 %v1231_v30  ;;  %v1292_v19 = vld [vmem:[%s1604_s1 + $0x218] sm:$0xff]   ;;  %v1297_v21 = vld [vmem:[%s1605_s0 + $0x20] ss:$36 sps:$4 sm:$0xff]  }
  0x1f   :  { %1074 = vmatpush3.bf16.msra.mxu0 %v1230_v29  ;;  %v1296_v24 = vld [vmem:[%s1604_s1 + $0x238] sm:$0xff]   ;;  %v968_v27 = vld [vmem:[%s1606_s2] ss:$0 sm:$0xff] }
  0x20   :  { %1115 = vmatprep.subr.bf16.mxu0 %v1236_v34 }
  0x21   :  { %1102 = vmatpush3.bf16.msra.mxu1 %v1235_v33 }
  0x22   :  { %743 = vmatmul.mubr.bf16.vlgmr.msra.gmra.mrb[0].mxu0 %v1232_v31  ;;  %1143 = vmatprep.subr.bf16.mxu1 %v1241_v38 }
  0x23   :  { %1116 = vmatpush3.bf16.msra.mxu0 %v1240_v37  ;;  %750 = vmatprep.mubr.bf16.mxu0 %v1260_v57 }
  0x24   :  { %792 = vmatmul.mubr.bf16.vlgmr.msra.gmra.mrb[0].mxu1 %v1237_v35  ;;  %1117 = vmatprep.subr.bf16.mxu0 %v1243_v40 }
  0x25   :  { %1144 = vmatpush3.bf16.msra.mxu1 %v1242_v39  ;;  %799 = vmatprep.mubr.bf16.mxu1 %v1265_v61 }
  0x26   :  { %1145 = vmatprep.subr.bf16.mxu1 %v1245_v42 }
  0x27   :  { %1118 = vmatpush3.bf16.msra.mxu0 %v1244_v41 }
  0x28   :  { %1119 = vmatprep.subr.bf16.mxu0 %v1247_v44 }
  0x29   :  { %1146 = vmatpush3.bf16.msra.mxu1 %v1246_v43 }
  0x2a   :  { %1147 = vmatprep.subr.bf16.mxu1 %v1249_v46  ;;  %751 = vmatmul.mubr.bf16.gmra.mrb[4].mxu0 %v1263_v59 }
  0x2b   :  { %1120 = vmatpush3.bf16.msra.mxu0 %v1248_v45  ;;  %840 = vmatprep.mubr.bf16.mxu0 %v1278_v8 }
  0x2c   :  { %1121 = vmatprep.subr.bf16.mxu0 %v1251_v48  ;;  %800 = vmatmul.mubr.bf16.gmra.mrb[4].mxu1 %v1268_v63 }
  0x2d   :  { %1148 = vmatpush3.bf16.msra.mxu1 %v1250_v47  ;;  %889 = vmatprep.mubr.bf16.mxu1 %v1283_v12 }
  0x2e   :  { %1149 = vmatprep.subr.bf16.mxu1 %v1253_v50 }
  0x2f   :  { %1122 = vmatpush3.bf16.msra.mxu0 %v1252_v49 }
  0x30   :  { %1123 = vmatprep.subr.bf16.mxu0 %v1255_v52 }
  0x31   :  { %1150 = vmatpush3.bf16.msra.mxu1 %v1254_v51 }
  0x32   :  { %1151 = vmatprep.subr.bf16.mxu1 %v1257_v54 }
  0x33   :  { %1124 = vmatpush3.bf16.msra.mxu0 %v1256_v53 }
  0x34   :  { %1125 = vmatprep.subr.bf16.mxu0 %v1259_v56 }
  0x35   :  { %1152 = vmatpush3.bf16.msra.mxu1 %v1258_v55 }
  0x36   :  { %1153 = vmatprep.subr.bf16.mxu1 %v1264_v60 }
  0x37   :  { %1126 = vmatpush3.bf16.msra.mxu0 %v1262_v58 }
  0x38   :  { %1127 = vmatprep.subr.bf16.mxu0 %v1269_v0 }
  0x39   :  { %1154 = vmatpush3.bf16.msra.mxu1 %v1267_v62 }
  0x3a   :  { %1155 = vmatprep.subr.bf16.mxu1 %v1271_v2 }
  0x3b   :  { %1128 = vmatpush3.bf16.msra.mxu0 %v1270_v1 }
  0x3c   :  { %1129 = vmatprep.subr.bf16.mxu0 %v1273_v4 }
  0x3d   :  { %1156 = vmatpush3.bf16.msra.mxu1 %v1272_v3 }
  0x3e   :  { %1157 = vmatprep.subr.bf16.mxu1 %v1275_v6 }
  0x3f   :  { %1130 = vmatpush3.bf16.msra.mxu0 %v1274_v5 }
  0x40   :  { %1181 = vmatprep.subr.bf16.mxu0 %v1280_v10 }
  0x41   :  { %1158 = vmatpush3.bf16.msra.mxu1 %v1279_v9 }
  0x42   :  { %841 = vmatmul.mubr.bf16.vlgmr.msra.gmra.mrb[8].mxu0 %v1276_v7 }
  0x43   :  { %1182 = vmatpush3.bf16.msra.mxu0 %v1280_v10  ;;  %848 = vmatprep.mubr.bf16.mxu0 %v1285_v14 }
  0x44   :  { %890 = vmatmul.mubr.bf16.vlgmr.msra.gmra.mrb[8].mxu1 %v1281_v11  ;;  %1183 = vmatprep.subr.bf16.mxu0 %v1284_v13 }
  0x45   :  { %897 = vmatprep.mubr.bf16.mxu1 %v1289_v17 }
  0x47   :  { %1184 = vmatpush3.bf16.msra.mxu0 %v1284_v13 }
  0x48   :  { %1185 = vmatprep.subr.bf16.mxu0 %v1288_v16 }
  0x4a   :  { %849 = vmatmul.mubr.bf16.gmra.mrb[12].mxu0 %v1287_v15 }
  0x4b   :  { %1186 = vmatpush3.bf16.msra.mxu0 %v1288_v16  ;;  %1197 = vmatprep.mubr.bf16.mxu0 %v1297_v21 }
  0x4c   :  { %898 = vmatmul.mubr.bf16.gmra.mrb[12].mxu1 %v1291_v18  ;;  %1187 = vmatprep.subr.bf16.mxu0 %v1292_v19 }
  0x4f   :  { %1188 = vmatpush3.bf16.msra.mxu0 %v1292_v19 }
  0x50   :  { %1189 = vmatprep.subr.bf16.mxu0 %v1293_v20 }
  0x53   :  { %1190 = vmatpush3.bf16.msra.mxu0 %v1293_v20 }
  0x54   :  { %1191 = vmatprep.subr.bf16.mxu0 %v1294_v22 }
  0x57   :  { %1192 = vmatpush3.bf16.msra.mxu0 %v1294_v22 }
  0x58   :  { %1193 = vmatprep.subr.bf16.mxu0 %v1295_v23 }
  0x5b   :  { %1194 = vmatpush3.bf16.msra.mxu0 %v1295_v23 }
  0x5c   :  { %1195 = vmatprep.subr.bf16.mxu0 %v1296_v24 }
  0x5f   :  { %1196 = vmatpush3.bf16.msra.mxu0 %v1296_v24 }
  0x62   :  { %1198 = vmatmul.mubr.bf16.vlgmr.msra.gmra.mrb[16].mxu0 %v1298_v25 }
  0xf5   :  { %v1075_v26 = vpop.f32.mrb[0].mxu0 }
  0xf6   :  { %v1076_v28 = vpop.f32.mrb[1].mxu0 }
  0xf7   :  { %v1077_v29 = vadd.f32 %v1076_v28, %v1075_v26  ;;  %v1078_v30 = vpop.f32.mrb[2].mxu0  ;;  %v1103_v31 = vpop.f32.mrb[0].mxu1 }
  0xf8   :  { %v1079_v32 = vpop.f32.mrb[3].mxu0  ;;  %v1104_v35 = vpop.f32.mrb[1].mxu1 }
  0xf9   :  { %v745_v33 = vadd.f32 %v1077_v29, %v968_v27  ;;  %v1080_v34 = vadd.f32 %v1079_v32, %v1078_v30  ;;  %v1105_v36 = vadd.f32 %v1104_v35, %v1103_v31  ;;  %v1106_v37 = vpop.f32.mrb[2].mxu1 }
  0xfa   :  { %v1107_v39 = vpop.f32.mrb[3].mxu1 }
  0xfb   :  { %v748_v38 = vadd.f32 %v1080_v34, %v968_v27  ;;  %v794_v40 = vadd.f32 %v1105_v36, %v745_v33  ;;  %v1108_v41 = vadd.f32 %v1107_v39, %v1106_v37 }
  0xfd   :  { %v797_v42 = vadd.f32 %v1108_v41, %v748_v38  ;;  %v1081_v43 = vpop.f32.mrb[4].mxu0 }
  0xfe   :  { %v1082_v44 = vpop.f32.mrb[5].mxu0 }
  0xff   :  { %v1083_v45 = vadd.f32 %v1082_v44, %v1081_v43  ;;  %v1084_v46 = vpop.f32.mrb[6].mxu0  ;;  %v1109_v47 = vpop.f32.mrb[4].mxu1 }
 0x100   :  { %v1085_v48 = vpop.f32.mrb[7].mxu0  ;;  %v1110_v51 = vpop.f32.mrb[5].mxu1 }
 0x101   :  { %v753_v49 = vadd.f32 %v1083_v45, %v968_v27  ;;  %v1086_v50 = vadd.f32 %v1085_v48, %v1084_v46  ;;  %v1111_v52 = vadd.f32 %v1110_v51, %v1109_v47  ;;  %v1112_v53 = vpop.f32.mrb[6].mxu1 }
 0x102   :  { %v1113_v55 = vpop.f32.mrb[7].mxu1 }
 0x103   :  { %v756_v54 = vadd.f32 %v1086_v50, %v968_v27  ;;  %v802_v56 = vadd.f32 %v1111_v52, %v753_v49  ;;  %v1114_v57 = vadd.f32 %v1113_v55, %v1112_v53 }
 0x105   :  { %v805_v58 = vadd.f32 %v1114_v57, %v756_v54 }
 0x115   :  { %v1131_v59 = vpop.f32.mrb[8].mxu0 }
 0x116   :  { %v1132_v60 = vpop.f32.mrb[9].mxu0 }
 0x117   :  { %v1133_v61 = vadd.f32 %v1132_v60, %v1131_v59  ;;  %v1134_v62 = vpop.f32.mrb[10].mxu0  ;;  %v1159_v63 = vpop.f32.mrb[8].mxu1 }
 0x118   :  { %v1135_v0 = vpop.f32.mrb[11].mxu0  ;;  %v1160_v3 = vpop.f32.mrb[9].mxu1 }
 0x119   :  { %v843_v1 = vadd.f32 %v1133_v61, %v794_v40  ;;  %v1136_v2 = vadd.f32 %v1135_v0, %v1134_v62  ;;  %v1161_v4 = vadd.f32 %v1160_v3, %v1159_v63  ;;  %v1162_v5 = vpop.f32.mrb[10].mxu1 }
 0x11a   :  { %v1163_v7 = vpop.f32.mrb[11].mxu1 }
 0x11b   :  { %v846_v6 = vadd.f32 %v1136_v2, %v797_v42  ;;  %v1164_v8 = vadd.f32 %v1163_v7, %v1162_v5  ;;  %v892_v9 = vadd.f32 %v1161_v4, %v843_v1 }
 0x11d   :  { %v1137_v10 = vpop.f32.mrb[12].mxu0  ;;  %v895_v12 = vadd.f32 %v1164_v8, %v846_v6 }
 0x11e   :  { %v1138_v11 = vpop.f32.mrb[13].mxu0 }
 0x11f   :  { %v1139_v13 = vadd.f32 %v1138_v11, %v1137_v10  ;;  %v1140_v14 = vpop.f32.mrb[14].mxu0  ;;  %v1165_v15 = vpop.f32.mrb[12].mxu1 }
 0x120   :  { %v1141_v16 = vpop.f32.mrb[15].mxu0  ;;  %v1166_v19 = vpop.f32.mrb[13].mxu1 }
 0x121   :  { %v851_v17 = vadd.f32 %v1139_v13, %v802_v56  ;;  %v1142_v18 = vadd.f32 %v1141_v16, %v1140_v14  ;;  %v1167_v20 = vadd.f32 %v1166_v19, %v1165_v15  ;;  %v1168_v21 = vpop.f32.mrb[14].mxu1 }
 0x122   :  { %v1169_v23 = vpop.f32.mrb[15].mxu1 }
 0x123   :  { %v854_v22 = vadd.f32 %v1142_v18, %v805_v58  ;;  %v1170_v24 = vadd.f32 %v1169_v23, %v1168_v21  ;;  %v900_v25 = vadd.f32 %v1167_v20, %v851_v17 }
 0x125   :  { %v903_v26 = vadd.f32 %v1170_v24, %v854_v22 }
 0x135   :  { %v1199_v27 = vpop.f32.mrb[16].mxu0 }
 0x136   :  { %v949_v28 = vadd.f32 %v1199_v27, %v900_v25  ;;  %v940_v29 = vpop.f32.mrb[17].mxu0 }
 0x137   :  { %v941_v30 = vadd.f32 %v940_v29, %v892_v9  ;;  %v1200_v31 = vpop.f32.mrb[18].mxu0 }
 0x138   :  { %v957_v32 = vmax.f32 %v949_v28, 0.0  ;;  %v952_v33 = vadd.f32 %v1200_v31, %v903_v26  ;;  %v943_v34 = vpop.f32.mrb[19].mxu0 }
 0x139   :  { %v955_v35 = vmax.f32 %v941_v30, 0.0  ;;  %v944_v36 = vadd.f32 %v943_v34, %v895_v12 }
 0x13a   :  { %962 = vst.msk [vmem:[%s1607_s3 + $0x10] sm:$0xff] %vm959_vm0, %v957_v32  ;;  %v958_v37 = vmax.f32 %v952_v33, 0.0 }
 0x13b   :  { %960 = vst.msk [vmem:[%s1607_s3] sm:$0xff] %vm959_vm0, %v955_v35  ;;  %v956_v38 = vmax.f32 %v944_v36, 0.0 }
 0x13c   :  { %963 = vst.msk [vmem:[%s1607_s3 + $0x18] sm:$0xff] %vm959_vm0, %v958_v37 }
 0x13d   :  { %961 = vst.msk [vmem:[%s1607_s3 + $0x8] sm:$0xff] %vm959_vm0, %v956_v38 }

// kernel: rebuildnet_forward.44
= control target key start
LH: loop header
LB: loop body
LE: loop exit
PB: predicated region body
PF: predicated region fallthrough
CT: control target
= control target key end

     0   :  { %vm558_vm0 = vcmask 523264   ;;  %vm890_vm1 = vcmask 261120   ;;  %s1631_s1 = inlined_call_operand.vmem [shape: bf16[576,32], index: 1, kind: input, shape index: {}]   ;;  %s1632_s0 = inlined_call_operand.vmem [shape: bf16[128,576], index: 0, kind: input, shape index: {}]   ;;  %s1633_s2 = inlined_call_operand.vmem [shape: f32[1,32], index: 2, kind: input, shape index: {}]   ;;  %s1634_s3 = inlined_call_operand.vmem [shape: f32[128,32], index: 3, kind: output, shape index: {}]  }
   0x1   :  { %v1168_v0 = vld [vmem:[%s1631_s1 + $0x40] sm:$0xff]   ;;  %v1172_v4 = vld [vmem:[%s1631_s1 + $0x48] sm:$0xff]   ;;  %v1176_v8 = vld [vmem:[%s1631_s1 + $0x50] sm:$0xff]  }
   0x2   :  { %v1169_v1 = vld [vmem:[%s1631_s1 + $0xc0] sm:$0xff]   ;;  %996 = vmatprep.subr.bf16.mxu0 %v1168_v0  ;;  %v1173_v5 = vld [vmem:[%s1631_s1 + $0xc8] sm:$0xff]   ;;  %v1177_v9 = vld [vmem:[%s1631_s1 + $0xd0] sm:$0xff]  }
   0x3   :  { %v1170_v2 = vld [vmem:[%s1631_s1] sm:$0xff]   ;;  %1060 = vmatprep.subr.bf16.mxu1 %v1169_v1  ;;  %v1174_v6 = vld [vmem:[%s1631_s1 + $0x8] sm:$0xff]   ;;  %v1178_v10 = vld [vmem:[%s1631_s1 + $0x10] sm:$0xff]  }
   0x4   :  { %v1171_v3 = vld [vmem:[%s1631_s1 + $0x80] sm:$0xff]   ;;  %997 = vmatpush3.bf16.msra.mxu0 %v1170_v2  ;;  %v1175_v7 = vld [vmem:[%s1631_s1 + $0x88] sm:$0xff]   ;;  %v1179_v11 = vld [vmem:[%s1631_s1 + $0x90] sm:$0xff]  }
   0x5   :  { %1061 = vmatpush3.bf16.msra.mxu1 %v1171_v3  ;;  %998 = vmatprep.subr.bf16.mxu0 %v1172_v4  ;;  %v1180_v12 = vld [vmem:[%s1631_s1 + $0x58] sm:$0xff]   ;;  %v1184_v16 = vld [vmem:[%s1631_s1 + $0x60] sm:$0xff]   ;;  %v1188_v20 = vld [vmem:[%s1631_s1 + $0x68] sm:$0xff]  }
   0x6   :  { %1062 = vmatprep.subr.bf16.mxu1 %v1173_v5  ;;  %v1181_v13 = vld [vmem:[%s1631_s1 + $0xd8] sm:$0xff]   ;;  %v1185_v17 = vld [vmem:[%s1631_s1 + $0xe0] sm:$0xff]   ;;  %v1189_v21 = vld [vmem:[%s1631_s1 + $0xe8] sm:$0xff]  }
   0x7   :  { %v1182_v14 = vld [vmem:[%s1631_s1 + $0x18] sm:$0xff]   ;;  %v1186_v18 = vld [vmem:[%s1631_s1 + $0x20] sm:$0xff]   ;;  %v1190_v22 = vld [vmem:[%s1631_s1 + $0x28] sm:$0xff]  }
   0x8   :  { %999 = vmatpush3.bf16.msra.mxu0 %v1174_v6  ;;  %v1183_v15 = vld [vmem:[%s1631_s1 + $0x98] sm:$0xff]   ;;  %v1187_v19 = vld [vmem:[%s1631_s1 + $0xa0] sm:$0xff]   ;;  %v1191_v23 = vld [vmem:[%s1631_s1 + $0xa8] sm:$0xff]  }
   0x9   :  { %1063 = vmatpush3.bf16.msra.mxu1 %v1175_v7  ;;  %1000 = vmatprep.subr.bf16.mxu0 %v1176_v8  ;;  %v1192_v24 = vld [vmem:[%s1631_s1 + $0x70] sm:$0xff]   ;;  %v1196_v28 = vld [vmem:[%s1631_s1 + $0x78] sm:$0xff]   ;;  %v1205_v35 = vld [vmem:[%s1632_s0 + $0xc] ss:$20 sps:$4 sm:$0xff]  }
   0xa   :  { %1064 = vmatprep.subr.bf16.mxu1 %v1177_v9  ;;  %v1193_v25 = vld [vmem:[%s1631_s1 + $0xf0] sm:$0xff]   ;;  %v1197_v29 = vld [vmem:[%s1631_s1 + $0xf8] sm:$0xff]   ;;  %v1206_v36 = vld [vmem:[%s1631_s1 + $0x100] sm:$0xff]   ;;  %712 = vmatprep.mubr.bf16.mxu1 %v1205_v35 }
   0xb   :  { %v1194_v26 = vld [vmem:[%s1631_s1 + $0x30] sm:$0xff]   ;;  %v1198_v30 = vld [vmem:[%s1631_s1 + $0x38] sm:$0xff]   ;;  %v1207_v37 = vld [vmem:[%s1632_s0 + $0x2c] ss:$20 sps:$4 sm:$0xff]  }
   0xc   :  { %1001 = vmatpush3.bf16.msra.mxu0 %v1178_v10  ;;  %v1195_v27 = vld [vmem:[%s1631_s1 + $0xb0] sm:$0xff]   ;;  %v1199_v31 = vld [vmem:[%s1631_s1 + $0xb8] sm:$0xff]   ;;  %v1219_v42 = vld [vmem:[%s1631_s1 + $0x108] sm:$0xff]  }
   0xd   :  { %1065 = vmatpush3.bf16.msra.mxu1 %v1179_v11  ;;  %1002 = vmatprep.subr.bf16.mxu0 %v1180_v12  ;;  %v1200_v32 = vld [vmem:[%s1632_s0] ss:$20 sps:$4 sm:$0xff]   ;;  %v1202_v33 = vld [vmem:[%s1632_s0 + $0x4] ss:$20 sps:$4 sm:$0xff]   ;;  %v1203_v34 = vld [vmem:[%s1632_s0 + $0x8] ss:$20 sps:$4 sm:$0xff]  }
   0xe   :  { %1066 = vmatprep.subr.bf16.mxu1 %v1181_v13  ;;  %615 = vmatprep.mubr.bf16.mxu0 %v1202_v33  ;;  %v1209_v38 = vld [vmem:[%s1632_s0 + $0x34] ss:$20 sps:$4 sm:$0xff]   ;;  %v1212_v40 = vld [vmem:[%s1632_s0 + $0x30] ss:$20 sps:$4 sm:$0xff]   ;;  %v1218_v45 = vld [vmem:[%s1632_s0 + $0x58] ss:$20 sps:$4 sm:$0xff]  }
   0xf   :  { %v1211_v39 = vld [vmem:[%s1632_s0 + $0x28] ss:$20 sps:$4 sm:$0xff]   ;;  %v1217_v44 = vld [vmem:[%s1632_s0 + $0x50] ss:$20 sps:$4 sm:$0xff]   ;;  %v1224_v50 = vld [vmem:[%s1632_s0 + $0x78] ss:$20 sps:$4 sm:$0xff]  }
  0x10   :  { %1003 = vmatpush3.bf16.msra.mxu0 %v1182_v14  ;;  %v1213_v41 = vld [vmem:[%s1632_s0 + $0x54] ss:$20 sps:$4 sm:$0xff]   ;;  %v1215_v43 = vld [vmem:[%s1632_s0 + $0x5c] ss:$20 sps:$4 sm:$0xff]   ;;  %v1222_v48 = vld [vmem:[%s1632_s0 + $0x84] ss:$20 sps:$4 sm:$0xff]  }
  0x11   :  { %1067 = vmatpush3.bf16.msra.mxu1 %v1183_v15  ;;  %1004 = vmatprep.subr.bf16.mxu0 %v1184_v16  ;;  %v1232_v46 = vld [vmem:[%s1631_s1 + $0x110] sm:$0xff]   ;;  %v1245_v49 = vld [vmem:[%s1631_s1 + $0x118] sm:$0xff]   ;;  %v1228_v53 = vld [vmem:[%s1632_s0 + $0xac] ss:$20 sps:$4 sm:$0xff]  }
  0x12   :  { %1068 = vmatprep.subr.bf16.mxu1 %v1185_v17  ;;  %v1220_v47 = vld [vmem:[%s1632_s0 + $0x7c] ss:$20 sps:$4 sm:$0xff]   ;;  %v1225_v51 = vld [vmem:[%s1632_s0 + $0x80] ss:$20 sps:$4 sm:$0xff]   ;;  %v1226_v52 = vld [vmem:[%s1632_s0 + $0xa4] ss:$20 sps:$4 sm:$0xff]  }
  0x13   :  { %v1230_v54 = vld [vmem:[%s1632_s0 + $0xa0] ss:$20 sps:$4 sm:$0xff]   ;;  %v1231_v55 = vld [vmem:[%s1632_s0 + $0xa8] ss:$20 sps:$4 sm:$0xff]   ;;  %v1238_v59 = vld [vmem:[%s1632_s0 + $0xd0] ss:$20 sps:$4 sm:$0xff]  }
  0x14   :  { %1005 = vmatpush3.bf16.msra.mxu0 %v1186_v18  ;;  %v1233_v56 = vld [vmem:[%s1632_s0 + $0xcc] ss:$20 sps:$4 sm:$0xff]   ;;  %v1235_v57 = vld [vmem:[%s1632_s0 + $0xd4] ss:$20 sps:$4 sm:$0xff]   ;;  %v1241_v61 = vld [vmem:[%s1632_s0 + $0xfc] ss:$20 sps:$4 sm:$0xff]  }
  0x15   :  { %1069 = vmatpush3.bf16.msra.mxu1 %v1187_v19  ;;  %1006 = vmatprep.subr.bf16.mxu0 %v1188_v20  ;;  %v1237_v58 = vld [vmem:[%s1632_s0 + $0xc8] ss:$20 sps:$4 sm:$0xff]   ;;  %v1243_v62 = vld [vmem:[%s1632_s0 + $0xf0] ss:$20 sps:$4 sm:$0xff]   ;;  %v1244_v63 = vld [vmem:[%s1632_s0 + $0xf8] ss:$20 sps:$4 sm:$0xff]  }
  0x16   :  { %1070 = vmatprep.subr.bf16.mxu1 %v1189_v21  ;;  %v1239_v60 = vld [vmem:[%s1632_s0 + $0xf4] ss:$20 sps:$4 sm:$0xff]   ;;  %v1246_v0 = vld [vmem:[%s1632_s0 + $0x11c] ss:$20 sps:$4 sm:$0xff]   ;;  %v1248_v1 = vld [vmem:[%s1632_s0 + $0x124] ss:$20 sps:$4 sm:$0xff]  }
  0x17   :  { %v1250_v2 = vld [vmem:[%s1632_s0 + $0x118] ss:$20 sps:$4 sm:$0xff]   ;;  %v1251_v3 = vld [vmem:[%s1632_s0 + $0x120] ss:$20 sps:$4 sm:$0xff]   ;;  %v1252_v4 = vld [vmem:[%s1632_s0 + $0x10] ss:$20 sps:$4 sm:$0xff]  }
  0x18   :  { %1007 = vmatpush3.bf16.msra.mxu0 %v1190_v22  ;;  %v1253_v5 = vld [vmem:[%s1632_s0 + $0xb0] ss:$20 sps:$4 sm:$0xff]   ;;  %v1254_v6 = vld [vmem:[%s1632_s0 + $0x38] ss:$20 sps:$4 sm:$0xff]   ;;  %v1256_v8 = vld [vmem:[%s1632_s0 + $0x60] ss:$20 sps:$4 sm:$0xff]  }
  0x19   :  { %1071 = vmatpush3.bf16.msra.mxu1 %v1191_v23  ;;  %1008 = vmatprep.subr.bf16.mxu0 %v1192_v24  ;;  %v1255_v7 = vld [vmem:[%s1632_s0 + $0xd8] ss:$20 sps:$4 sm:$0xff]   ;;  %v1257_v9 = vld [vmem:[%s1632_s0 + $0x100] ss:$20 sps:$4 sm:$0xff]   ;;  %v1258_v10 = vld [vmem:[%s1632_s0 + $0x88] ss:$20 sps:$4 sm:$0xff]  }
  0x1a   :  { %1072 = vmatprep.subr.bf16.mxu1 %v1193_v25  ;;  %v1259_v11 = vld [vmem:[%s1632_s0 + $0x128] ss:$20 sps:$4 sm:$0xff]   ;;  %v1519_v14 = vld [vmem:[%s1633_s2] ss:$0 sm:$0xff] }
  0x1c   :  { %1009 = vmatpush3.bf16.msra.mxu0 %v1194_v26 }
  0x1d   :  { %1073 = vmatpush3.bf16.msra.mxu1 %v1195_v27  ;;  %1010 = vmatprep.subr.bf16.mxu0 %v1196_v28 }
  0x1e   :  { %1074 = vmatprep.subr.bf16.mxu1 %v1197_v29 }
  0x20   :  { %1011 = vmatpush3.bf16.msra.mxu0 %v1198_v30 }
  0x21   :  { %1075 = vmatpush3.bf16.msra.mxu1 %v1199_v31  ;;  %1136 = vmatprep.subr.bf16.mxu0 %v1206_v36 }
  0x22   :  { %1160 = vmatprep.subr.bf16.mxu1 %v1206_v36 }
  0x23   :  { %616 = vmatmul.mubr.bf16.vlgmr.msra.gmra.mrb[0].mxu0 %v1200_v32 }
  0x24   :  { %713 = vmatmul.mubr.bf16.vlgmr.msra.gmra.mrb[0].mxu1 %v1203_v34  ;;  %1137 = vmatpush3.bf16.msra.mxu0 %v1206_v36 }
  0x25   :  { %1164 = vmatpush3.bf16.msra.mxu1 %v1206_v36  ;;  %623 = vmatprep.mubr.bf16.mxu0 %v1207_v37 }
  0x26   :  { %720 = vmatprep.mubr.bf16.mxu1 %v1209_v38  ;;  %1138 = vmatprep.subr.bf16.mxu0 %v1219_v42 }
  0x27   :  { %1161 = vmatprep.subr.bf16.mxu1 %v1219_v42 }
  0x28   :  { %1139 = vmatpush3.bf16.msra.mxu0 %v1219_v42 }
  0x29   :  { %1165 = vmatpush3.bf16.msra.mxu1 %v1219_v42  ;;  %1140 = vmatprep.subr.bf16.mxu0 %v1232_v46 }
  0x2a   :  { %1162 = vmatprep.subr.bf16.mxu1 %v1232_v46 }
  0x2b   :  { %624 = vmatmul.mubr.bf16.gmra.mrb[4].mxu0 %v1211_v39 }
  0x2c   :  { %721 = vmatmul.mubr.bf16.gmra.mrb[4].mxu1 %v1212_v40  ;;  %631 = vmatprep.mubr.bf16.mxu0 %v1213_v41 }
  0x2d   :  { %728 = vmatprep.mubr.bf16.mxu1 %v1215_v43  ;;  %1141 = vmatpush3.bf16.msra.mxu0 %v1232_v46 }
  0x2e   :  { %1166 = vmatpush3.bf16.msra.mxu1 %v1232_v46  ;;  %1142 = vmatprep.subr.bf16.mxu0 %v1245_v49 }
  0x2f   :  { %1163 = vmatprep.subr.bf16.mxu1 %v1245_v49 }
  0x31   :  { %1143 = vmatpush3.bf16.msra.mxu0 %v1245_v49 }
  0x32   :  { %1167 = vmatpush3.bf16.msra.mxu1 %v1245_v49 }
  0x33   :  { %632 = vmatmul.mubr.bf16.gmra.mrb[8].mxu0 %v1217_v44 }
  0x34   :  { %729 = vmatmul.mubr.bf16.gmra.mrb[8].mxu1 %v1218_v45  ;;  %639 = vmatprep.mubr.bf16.mxu0 %v1220_v47 }
  0x35   :  { %736 = vmatprep.mubr.bf16.mxu1 %v1222_v48 }
  0x3b   :  { %640 = vmatmul.mubr.bf16.gmra.mrb[12].mxu0 %v1224_v50 }
  0x3c   :  { %737 = vmatmul.mubr.bf16.gmra.mrb[12].mxu1 %v1225_v51  ;;  %647 = vmatprep.mubr.bf16.mxu0 %v1226_v52 }
  0x3d   :  { %744 = vmatprep.mubr.bf16.mxu1 %v1228_v53 }
  0x43   :  { %648 = vmatmul.mubr.bf16.gmra.mrb[16].mxu0 %v1230_v54 }
  0x44   :  { %745 = vmatmul.mubr.bf16.gmra.mrb[16].mxu1 %v1231_v55  ;;  %655 = vmatprep.mubr.bf16.mxu0 %v1233_v56 }
  0x45   :  { %752 = vmatprep.mubr.bf16.mxu1 %v1235_v57 }
  0x4b   :  { %656 = vmatmul.mubr.bf16.gmra.mrb[20].mxu0 %v1237_v58 }
  0x4c   :  { %753 = vmatmul.mubr.bf16.gmra.mrb[20].mxu1 %v1238_v59  ;;  %663 = vmatprep.mubr.bf16.mxu0 %v1239_v60 }
  0x4d   :  { %760 = vmatprep.mubr.bf16.mxu1 %v1241_v61 }
  0x53   :  { %664 = vmatmul.mubr.bf16.gmra.mrb[24].mxu0 %v1243_v62 }
  0x54   :  { %761 = vmatmul.mubr.bf16.gmra.mrb[24].mxu1 %v1244_v63  ;;  %671 = vmatprep.mubr.bf16.mxu0 %v1246_v0 }
  0x55   :  { %768 = vmatprep.mubr.bf16.mxu1 %v1248_v1 }
  0x5b   :  { %672 = vmatmul.mubr.bf16.gmra.mrb[28].mxu0 %v1250_v2 }
  0x5c   :  { %769 = vmatmul.mubr.bf16.gmra.mrb[28].mxu1 %v1251_v3  ;;  %1144 = vmatprep.mubr.msk.bf16.mxu0 %vm558_vm0, %v1252_v4 }
  0x5d   :  { %1152 = vmatprep.mubr.msk.bf16.mxu1 %vm558_vm0, %v1253_v5 }
  0x63   :  { %1145 = vmatmul.mubr.msk.bf16.vlgmr.msra.gmra.mrb[32].mxu0 %vm558_vm0, %v1254_v6 }
  0x64   :  { %1153 = vmatmul.mubr.msk.bf16.vlgmr.msra.gmra.mrb[32].mxu1 %vm558_vm0, %v1255_v7  ;;  %1148 = vmatprep.mubr.msk.bf16.mxu0 %vm558_vm0, %v1256_v8 }
  0x65   :  { %1156 = vmatprep.mubr.msk.bf16.mxu1 %vm558_vm0, %v1257_v9 }
  0x6b   :  { %1149 = vmatmul.mubr.msk.bf16.gmra.mrb[36].mxu0 %vm558_vm0, %v1258_v10 }
  0x6c   :  { %1157 = vmatmul.mubr.msk.bf16.gmra.mrb[36].mxu1 %vm558_vm0, %v1259_v11 }
  0xf6   :  { %v1012_v12 = vpop.f32.mrb[0].mxu0 }
  0xf7   :  { %v1076_v13 = vpop.f32.mrb[0].mxu1  ;;  %v1013_v15 = vpop.f32.mrb[1].mxu0 }
  0xf8   :  { %v1014_v16 = vadd.f32 %v1013_v15, %v1012_v12  ;;  %v1077_v17 = vpop.f32.mrb[1].mxu1  ;;  %v1015_v18 = vpop.f32.mrb[2].mxu0 }
  0xf9   :  { %v1078_v19 = vadd.f32 %v1077_v17, %v1076_v13  ;;  %v1079_v20 = vpop.f32.mrb[2].mxu1  ;;  %v1016_v21 = vpop.f32.mrb[3].mxu0 }
  0xfa   :  { %v618_v22 = vadd.f32 %v1014_v16, %v1519_v14  ;;  %v1017_v23 = vadd.f32 %v1016_v21, %v1015_v18  ;;  %v1080_v24 = vpop.f32.mrb[3].mxu1 }
  0xfb   :  { %v1081_v25 = vadd.f32 %v1080_v24, %v1079_v20 }
  0xfc   :  { %v621_v26 = vadd.f32 %v1017_v23, %v1519_v14  ;;  %v1523_v27 = vadd.f32 %v1078_v19, %v618_v22 }
  0xfe   :  { %v1018_v28 = vpop.f32.mrb[4].mxu0  ;;  %v1525_v29 = vadd.f32 %v1081_v25, %v621_v26 }
  0xff   :  { %v1082_v30 = vpop.f32.mrb[4].mxu1  ;;  %v1019_v31 = vpop.f32.mrb[5].mxu0 }
 0x100   :  { %v1020_v32 = vadd.f32 %v1019_v31, %v1018_v28  ;;  %v1083_v33 = vpop.f32.mrb[5].mxu1  ;;  %v1021_v34 = vpop.f32.mrb[6].mxu0 }
 0x101   :  { %v1084_v35 = vadd.f32 %v1083_v33, %v1082_v30  ;;  %v1085_v36 = vpop.f32.mrb[6].mxu1  ;;  %v1022_v37 = vpop.f32.mrb[7].mxu0 }
 0x102   :  { %v626_v38 = vadd.f32 %v1020_v32, %v1519_v14  ;;  %v1023_v39 = vadd.f32 %v1022_v37, %v1021_v34  ;;  %v1086_v40 = vpop.f32.mrb[7].mxu1 }
 0x103   :  { %v1087_v41 = vadd.f32 %v1086_v40, %v1085_v36 }
 0x104   :  { %v629_v42 = vadd.f32 %v1023_v39, %v1519_v14  ;;  %v1529_v43 = vadd.f32 %v1084_v35, %v626_v38 }
 0x106   :  { %v1024_v44 = vpop.f32.mrb[8].mxu0  ;;  %v1531_v45 = vadd.f32 %v1087_v41, %v629_v42 }
 0x107   :  { %v1088_v46 = vpop.f32.mrb[8].mxu1  ;;  %v1025_v47 = vpop.f32.mrb[9].mxu0 }
 0x108   :  { %v1026_v48 = vadd.f32 %v1025_v47, %v1024_v44  ;;  %v1089_v49 = vpop.f32.mrb[9].mxu1  ;;  %v1027_v50 = vpop.f32.mrb[10].mxu0 }
 0x109   :  { %v1090_v51 = vadd.f32 %v1089_v49, %v1088_v46  ;;  %v1091_v52 = vpop.f32.mrb[10].mxu1  ;;  %v1028_v53 = vpop.f32.mrb[11].mxu0 }
 0x10a   :  { %v634_v54 = vadd.f32 %v1026_v48, %v1519_v14  ;;  %v1029_v55 = vadd.f32 %v1028_v53, %v1027_v50  ;;  %v1092_v56 = vpop.f32.mrb[11].mxu1 }
 0x10b   :  { %v1093_v57 = vadd.f32 %v1092_v56, %v1091_v52 }
 0x10c   :  { %v637_v58 = vadd.f32 %v1029_v55, %v1519_v14  ;;  %v1535_v59 = vadd.f32 %v1090_v51, %v634_v54 }
 0x10e   :  { %v1030_v60 = vpop.f32.mrb[12].mxu0  ;;  %v1537_v61 = vadd.f32 %v1093_v57, %v637_v58 }
 0x10f   :  { %v1094_v62 = vpop.f32.mrb[12].mxu1  ;;  %v1031_v63 = vpop.f32.mrb[13].mxu0 }
 0x110   :  { %v1032_v0 = vadd.f32 %v1031_v63, %v1030_v60  ;;  %v1095_v1 = vpop.f32.mrb[13].mxu1  ;;  %v1033_v2 = vpop.f32.mrb[14].mxu0 }
 0x111   :  { %v1096_v3 = vadd.f32 %v1095_v1, %v1094_v62  ;;  %v1097_v4 = vpop.f32.mrb[14].mxu1  ;;  %v1034_v5 = vpop.f32.mrb[15].mxu0 }
 0x112   :  { %v642_v6 = vadd.f32 %v1032_v0, %v1519_v14  ;;  %v1035_v7 = vadd.f32 %v1034_v5, %v1033_v2  ;;  %v1098_v8 = vpop.f32.mrb[15].mxu1 }
 0x113   :  { %v1099_v9 = vadd.f32 %v1098_v8, %v1097_v4 }
 0x114   :  { %v645_v10 = vadd.f32 %v1035_v7, %v1519_v14  ;;  %v1541_v11 = vadd.f32 %v1096_v3, %v642_v6 }
 0x116   :  { %v1036_v12 = vpop.f32.mrb[16].mxu0  ;;  %v1543_v13 = vadd.f32 %v1099_v9, %v645_v10 }
 0x117   :  { %v1100_v15 = vpop.f32.mrb[16].mxu1  ;;  %v1037_v16 = vpop.f32.mrb[17].mxu0 }
 0x118   :  { %v1038_v17 = vadd.f32 %v1037_v16, %v1036_v12  ;;  %v1101_v18 = vpop.f32.mrb[17].mxu1  ;;  %v1039_v19 = vpop.f32.mrb[18].mxu0 }
 0x119   :  { %v1102_v20 = vadd.f32 %v1101_v18, %v1100_v15  ;;  %v1103_v21 = vpop.f32.mrb[18].mxu1  ;;  %v1040_v22 = vpop.f32.mrb[19].mxu0 }
 0x11a   :  { %v650_v23 = vadd.f32 %v1038_v17, %v1519_v14  ;;  %v1041_v24 = vadd.f32 %v1040_v22, %v1039_v19  ;;  %v1104_v25 = vpop.f32.mrb[19].mxu1 }
 0x11b   :  { %v1105_v26 = vadd.f32 %v1104_v25, %v1103_v21 }
 0x11c   :  { %v653_v28 = vadd.f32 %v1041_v24, %v1519_v14  ;;  %v747_v30 = vadd.f32 %v1102_v20, %v650_v23 }
 0x11e   :  { %v1042_v31 = vpop.f32.mrb[20].mxu0  ;;  %v1547_v32 = vadd.f32 %v1105_v26, %v653_v28 }
 0x11f   :  { %v1106_v33 = vpop.f32.mrb[20].mxu1  ;;  %v1043_v34 = vpop.f32.mrb[21].mxu0 }
 0x120   :  { %v1044_v35 = vadd.f32 %v1043_v34, %v1042_v31  ;;  %v1107_v36 = vpop.f32.mrb[21].mxu1  ;;  %v1045_v37 = vpop.f32.mrb[22].mxu0 }
 0x121   :  { %v1108_v38 = vadd.f32 %v1107_v36, %v1106_v33  ;;  %v1109_v39 = vpop.f32.mrb[22].mxu1  ;;  %v1046_v40 = vpop.f32.mrb[23].mxu0 }
 0x122   :  { %v658_v41 = vadd.f32 %v1044_v35, %v1519_v14  ;;  %v1047_v42 = vadd.f32 %v1046_v40, %v1045_v37  ;;  %v1110_v44 = vpop.f32.mrb[23].mxu1 }
 0x123   :  { %v1111_v46 = vadd.f32 %v1110_v44, %v1109_v39 }
 0x124   :  { %v661_v47 = vadd.f32 %v1047_v42, %v1519_v14  ;;  %v755_v48 = vadd.f32 %v1108_v38, %v658_v41 }
 0x126   :  { %v1048_v49 = vpop.f32.mrb[24].mxu0  ;;  %v758_v50 = vadd.f32 %v1111_v46, %v661_v47 }
 0x127   :  { %v1112_v51 = vpop.f32.mrb[24].mxu1  ;;  %v1049_v52 = vpop.f32.mrb[25].mxu0 }
 0x128   :  { %v1050_v53 = vadd.f32 %v1049_v52, %v1048_v49  ;;  %v1113_v54 = vpop.f32.mrb[25].mxu1  ;;  %v1051_v55 = vpop.f32.mrb[26].mxu0 }
 0x129   :  { %v1114_v56 = vadd.f32 %v1113_v54, %v1112_v51  ;;  %v1115_v57 = vpop.f32.mrb[26].mxu1  ;;  %v1052_v58 = vpop.f32.mrb[27].mxu0 }
 0x12a   :  { %v666_v60 = vadd.f32 %v1050_v53, %v1519_v14  ;;  %v1053_v62 = vadd.f32 %v1052_v58, %v1051_v55  ;;  %v1116_v63 = vpop.f32.mrb[27].mxu1 }
 0x12b   :  { %v1117_v0 = vadd.f32 %v1116_v63, %v1115_v57 }
 0x12c   :  { %v669_v1 = vadd.f32 %v1053_v62, %v1519_v14  ;;  %v763_v2 = vadd.f32 %v1114_v56, %v666_v60 }
 0x12e   :  { %v1054_v3 = vpop.f32.mrb[28].mxu0  ;;  %v1553_v4 = vadd.f32 %v1117_v0, %v669_v1 }
 0x12f   :  { %v1118_v5 = vpop.f32.mrb[28].mxu1  ;;  %v1055_v6 = vpop.f32.mrb[29].mxu0 }
 0x130   :  { %v1056_v7 = vadd.f32 %v1055_v6, %v1054_v3  ;;  %v1119_v8 = vpop.f32.mrb[29].mxu1  ;;  %v1057_v9 = vpop.f32.mrb[30].mxu0 }
 0x131   :  { %v1120_v10 = vadd.f32 %v1119_v8, %v1118_v5  ;;  %v1121_v12 = vpop.f32.mrb[30].mxu1  ;;  %v1058_v15 = vpop.f32.mrb[31].mxu0 }
 0x132   :  { %v674_v16 = vadd.f32 %v1056_v7, %v1519_v14  ;;  %v1059_v17 = vadd.f32 %v1058_v15, %v1057_v9  ;;  %v1122_v18 = vpop.f32.mrb[31].mxu1 }
 0x133   :  { %v1123_v19 = vadd.f32 %v1122_v18, %v1121_v12 }
 0x134   :  { %v677_v20 = vadd.f32 %v1059_v17, %v1519_v14  ;;  %v771_v21 = vadd.f32 %v1120_v10, %v674_v16 }
 0x136   :  { %v1146_v22 = vpop.f32.mrb[32].mxu0  ;;  %v774_v23 = vadd.f32 %v1123_v19, %v677_v20 }
 0x137   :  { %v820_v24 = vadd.f32 %v1146_v22, %v1529_v43  ;;  %v1154_v25 = vpop.f32.mrb[32].mxu1  ;;  %v811_v26 = vpop.f32.mrb[33].mxu0 }
 0x138   :  { %v852_v28 = vadd.f32 %v1154_v25, %v755_v48  ;;  %v812_v31 = vadd.f32 %v811_v26, %v1523_v27  ;;  %v843_v33 = vpop.f32.mrb[33].mxu1  ;;  %v1147_v34 = vpop.f32.mrb[34].mxu0 }
 0x139   :  { %v876_v35 = vmax.f32 %v820_v24, 0.0  ;;  %v844_v36 = vadd.f32 %v843_v33, %v747_v30  ;;  %v823_v37 = vadd.f32 %v1147_v34, %v1531_v45  ;;  %v1155_v38 = vpop.f32.mrb[34].mxu1  ;;  %v814_v39 = vpop.f32.mrb[35].mxu0 }
 0x13a   :  { %v884_v14 = vmax.f32 %v852_v28, 0.0  ;;  %v874_v40 = vmax.f32 %v812_v31, 0.0  ;;  %v855_v41 = vadd.f32 %v1155_v38, %v758_v50  ;;  %v815_v42 = vadd.f32 %v814_v39, %v1525_v29  ;;  %v846_v43 = vpop.f32.mrb[35].mxu1 }
 0x13b   :  { %893 = vst.msk [vmem:[%s1634_s3 + $0x10] sm:$0xff] %vm890_vm1, %v876_v35  ;;  %v882_v27 = vmax.f32 %v844_v36, 0.0  ;;  %v877_v44 = vmax.f32 %v823_v37, 0.0  ;;  %v847_v46 = vadd.f32 %v846_v43, %v1547_v32 }
 0x13c   :  { %901 = vst.msk [vmem:[%s1634_s3 + $0x50] sm:$0xff] %vm890_vm1, %v884_v14  ;;  %891 = vst.msk [vmem:[%s1634_s3] sm:$0xff] %vm890_vm1, %v874_v40  ;;  %v885_v29 = vmax.f32 %v855_v41, 0.0  ;;  %v875_v45 = vmax.f32 %v815_v42, 0.0 }
 0x13d   :  { %899 = vst.msk [vmem:[%s1634_s3 + $0x40] sm:$0xff] %vm890_vm1, %v882_v27  ;;  %894 = vst.msk [vmem:[%s1634_s3 + $0x18] sm:$0xff] %vm890_vm1, %v877_v44  ;;  %v883_v30 = vmax.f32 %v847_v46, 0.0 }
 0x13e   :  { %902 = vst.msk [vmem:[%s1634_s3 + $0x58] sm:$0xff] %vm890_vm1, %v885_v29  ;;  %892 = vst.msk [vmem:[%s1634_s3 + $0x8] sm:$0xff] %vm890_vm1, %v875_v45  ;;  %v1150_v32 = vpop.f32.mrb[36].mxu0 }
 0x13f   :  { %900 = vst.msk [vmem:[%s1634_s3 + $0x48] sm:$0xff] %vm890_vm1, %v883_v30  ;;  %v836_v47 = vadd.f32 %v1150_v32, %v1541_v11  ;;  %v1158_v48 = vpop.f32.mrb[36].mxu1  ;;  %v827_v49 = vpop.f32.mrb[37].mxu0 }
 0x140   :  { %v868_v50 = vadd.f32 %v1158_v48, %v771_v21  ;;  %v828_v51 = vadd.f32 %v827_v49, %v1535_v59  ;;  %v859_v52 = vpop.f32.mrb[37].mxu1  ;;  %v1151_v53 = vpop.f32.mrb[38].mxu0 }
 0x141   :  { %v880_v54 = vmax.f32 %v836_v47, 0.0  ;;  %v860_v55 = vadd.f32 %v859_v52, %v763_v2  ;;  %v839_v56 = vadd.f32 %v1151_v53, %v1543_v13  ;;  %v1159_v57 = vpop.f32.mrb[38].mxu1  ;;  %v830_v58 = vpop.f32.mrb[39].mxu0 }
 0x142   :  { %v888_v60 = vmax.f32 %v868_v50, 0.0  ;;  %v878_v62 = vmax.f32 %v828_v51, 0.0  ;;  %v871_v63 = vadd.f32 %v1159_v57, %v774_v23  ;;  %v831_v0 = vadd.f32 %v830_v58, %v1537_v61  ;;  %v862_v1 = vpop.f32.mrb[39].mxu1 }
 0x143   :  { %897 = vst.msk [vmem:[%s1634_s3 + $0x30] sm:$0xff] %vm890_vm1, %v880_v54  ;;  %v886_v59 = vmax.f32 %v860_v55, 0.0  ;;  %v881_v11 = vmax.f32 %v839_v56, 0.0  ;;  %v863_v3 = vadd.f32 %v862_v1, %v1553_v4 }
 0x144   :  { %905 = vst.msk [vmem:[%s1634_s3 + $0x70] sm:$0xff] %vm890_vm1, %v888_v60  ;;  %895 = vst.msk [vmem:[%s1634_s3 + $0x20] sm:$0xff] %vm890_vm1, %v878_v62  ;;  %v889_v61 = vmax.f32 %v871_v63, 0.0  ;;  %v879_v13 = vmax.f32 %v831_v0, 0.0 }
 0x145   :  { %903 = vst.msk [vmem:[%s1634_s3 + $0x60] sm:$0xff] %vm890_vm1, %v886_v59  ;;  %898 = vst.msk [vmem:[%s1634_s3 + $0x38] sm:$0xff] %vm890_vm1, %v881_v11  ;;  %v887_v2 = vmax.f32 %v863_v3, 0.0 }
 0x146   :  { %906 = vst.msk [vmem:[%s1634_s3 + $0x78] sm:$0xff] %vm890_vm1, %v889_v61  ;;  %896 = vst.msk [vmem:[%s1634_s3 + $0x28] sm:$0xff] %vm890_vm1, %v879_v13 }
 0x147   :  { %904 = vst.msk [vmem:[%s1634_s3 + $0x68] sm:$0xff] %vm890_vm1, %v887_v2 }

// kernel: rebuildnet_forward.46
= control target key start
LH: loop header
LB: loop body
LE: loop exit
PB: predicated region body
PF: predicated region fallthrough
CT: control target
= control target key end

     0   :  { %vm94_vm0 = vcmask 261120   ;;  %vm216_vm1 = vcmask 523264   ;;  %s425_s1 = inlined_call_operand.vmem [shape: bf16[32,64], index: 1, kind: input, shape index: {}]   ;;  %s426_s0 = inlined_call_operand.vmem [shape: bf16[128,32], index: 0, kind: input, shape index: {}]   ;;  %s427_s2 = inlined_call_operand.vmem [shape: f32[1,64], index: 2, kind: input, shape index: {}]   ;;  %s428_s3 = inlined_call_operand.vmem [shape: f32[128,64], index: 3, kind: output, shape index: {}]  }
   0x1   :  { %v290_v0 = vld [vmem:[%s425_s1] sm:$0xff]   ;;  %v291_v1 = vld [vmem:[%s425_s1 + $0x8] sm:$0xff]   ;;  %v296_v6 = vld [vmem:[%s426_s0 + $0x10] sm:$0xff]  }
   0x2   :  { %266 = vmatprep.subr.bf16.mxu0 %v290_v0  ;;  %286 = vmatprep.subr.bf16.mxu1 %v290_v0  ;;  %v292_v2 = vld [vmem:[%s426_s0] sm:$0xff]   ;;  %v294_v4 = vld [vmem:[%s426_s0 + $0x8] sm:$0xff]   ;;  %v297_v7 = vld [vmem:[%s426_s0 + $0x30] sm:$0xff]  }
   0x3   :  { %267 = vmatpush3.bf16.msra.mxu0 %v290_v0  ;;  %288 = vmatpush3.bf16.msra.mxu1 %v290_v0  ;;  %v293_v3 = vld [vmem:[%s426_s0 + $0x20] sm:$0xff]   ;;  %v295_v5 = vld [vmem:[%s426_s0 + $0x28] sm:$0xff]   ;;  %v298_v8 = vld [vmem:[%s426_s0 + $0x18] sm:$0xff]  }
   0x4   :  { %268 = vmatprep.subr.bf16.mxu0 %v291_v1  ;;  %287 = vmatprep.subr.bf16.mxu1 %v291_v1  ;;  %v299_v9 = vld [vmem:[%s426_s0 + $0x38] sm:$0xff]   ;;  %v237_v10 = vld [vmem:[%s427_s2] ss:$0 sm:$0xff] }
   0x5   :  { %270 = vmatprep.mubr.msk.bf16.mxu0 %vm94_vm0, %v292_v2  ;;  %278 = vmatprep.mubr.msk.bf16.mxu1 %vm94_vm0, %v293_v3 }
   0x7   :  { %269 = vmatpush3.bf16.msra.mxu0 %v291_v1  ;;  %289 = vmatpush3.bf16.msra.mxu1 %v291_v1 }
   0xa   :  { %271 = vmatmul.mubr.msk.bf16.vlgmr.msra.gmra.mrb[0].mxu0 %vm94_vm0, %v294_v4  ;;  %279 = vmatmul.mubr.msk.bf16.vlgmr.msra.gmra.mrb[0].mxu1 %vm94_vm0, %v295_v5 }
   0xb   :  { %274 = vmatprep.mubr.msk.bf16.mxu0 %vm94_vm0, %v296_v6  ;;  %282 = vmatprep.mubr.msk.bf16.mxu1 %vm94_vm0, %v297_v7 }
  0x12   :  { %275 = vmatmul.mubr.msk.bf16.gmra.mrb[4].mxu0 %vm94_vm0, %v298_v8  ;;  %283 = vmatmul.mubr.msk.bf16.gmra.mrb[4].mxu1 %vm94_vm0, %v299_v9 }
  0xdd   :  { %v272_v11 = vpop.f32.mrb[0].mxu0  ;;  %v280_v12 = vpop.f32.mrb[0].mxu1 }
  0xde   :  { %v162_v13 = vadd.f32 %v272_v11, %v237_v10  ;;  %v194_v14 = vadd.f32 %v280_v12, %v237_v10  ;;  %v153_v15 = vpop.f32.mrb[1].mxu0  ;;  %v185_v16 = vpop.f32.mrb[1].mxu1 }
  0xdf   :  { %v154_v17 = vadd.f32 %v237_v10, %v153_v15  ;;  %v186_v18 = vadd.f32 %v237_v10, %v185_v16  ;;  %v273_v19 = vpop.f32.mrb[2].mxu0  ;;  %v281_v20 = vpop.f32.mrb[2].mxu1 }
  0xe0   :  { %219 = vst.msk [vmem:[%s428_s3 + $0x10] sm:$0xff] %vm216_vm1, %v162_v13  ;;  %227 = vst.msk [vmem:[%s428_s3 + $0x50] sm:$0xff] %vm216_vm1, %v194_v14  ;;  %v165_v21 = vadd.f32 %v273_v19, %v237_v10  ;;  %v197_v22 = vadd.f32 %v281_v20, %v237_v10  ;;  %v156_v23 = vpop.f32.mrb[3].mxu0  ;;  %v188_v24 = vpop.f32.mrb[3].mxu1 }
  0xe1   :  { %217 = vst.msk [vmem:[%s428_s3] sm:$0xff] %vm216_vm1, %v154_v17  ;;  %225 = vst.msk [vmem:[%s428_s3 + $0x40] sm:$0xff] %vm216_vm1, %v186_v18  ;;  %v157_v25 = vadd.f32 %v237_v10, %v156_v23  ;;  %v189_v26 = vadd.f32 %v237_v10, %v188_v24 }
  0xe2   :  { %220 = vst.msk [vmem:[%s428_s3 + $0x18] sm:$0xff] %vm216_vm1, %v165_v21  ;;  %228 = vst.msk [vmem:[%s428_s3 + $0x58] sm:$0xff] %vm216_vm1, %v197_v22 }
  0xe3   :  { %218 = vst.msk [vmem:[%s428_s3 + $0x8] sm:$0xff] %vm216_vm1, %v157_v25  ;;  %226 = vst.msk [vmem:[%s428_s3 + $0x48] sm:$0xff] %vm216_vm1, %v189_v26 }
  0xe5   :  { %v276_v27 = vpop.f32.mrb[4].mxu0  ;;  %v284_v28 = vpop.f32.mrb[4].mxu1 }
  0xe6   :  { %v178_v29 = vadd.f32 %v276_v27, %v237_v10  ;;  %v210_v30 = vadd.f32 %v284_v28, %v237_v10  ;;  %v169_v31 = vpop.f32.mrb[5].mxu0  ;;  %v201_v32 = vpop.f32.mrb[5].mxu1 }
  0xe7   :  { %v170_v33 = vadd.f32 %v237_v10, %v169_v31  ;;  %v202_v34 = vadd.f32 %v237_v10, %v201_v32  ;;  %v277_v35 = vpop.f32.mrb[6].mxu0  ;;  %v285_v36 = vpop.f32.mrb[6].mxu1 }
  0xe8   :  { %223 = vst.msk [vmem:[%s428_s3 + $0x30] sm:$0xff] %vm216_vm1, %v178_v29  ;;  %231 = vst.msk [vmem:[%s428_s3 + $0x70] sm:$0xff] %vm216_vm1, %v210_v30  ;;  %v181_v37 = vadd.f32 %v277_v35, %v237_v10  ;;  %v213_v38 = vadd.f32 %v285_v36, %v237_v10  ;;  %v172_v39 = vpop.f32.mrb[7].mxu0  ;;  %v204_v40 = vpop.f32.mrb[7].mxu1 }
  0xe9   :  { %221 = vst.msk [vmem:[%s428_s3 + $0x20] sm:$0xff] %vm216_vm1, %v170_v33  ;;  %229 = vst.msk [vmem:[%s428_s3 + $0x60] sm:$0xff] %vm216_vm1, %v202_v34  ;;  %v173_v41 = vadd.f32 %v237_v10, %v172_v39  ;;  %v205_v42 = vadd.f32 %v237_v10, %v204_v40 }
  0xea   :  { %224 = vst.msk [vmem:[%s428_s3 + $0x38] sm:$0xff] %vm216_vm1, %v181_v37  ;;  %232 = vst.msk [vmem:[%s428_s3 + $0x78] sm:$0xff] %vm216_vm1, %v213_v38 }
  0xeb   :  { %222 = vst.msk [vmem:[%s428_s3 + $0x28] sm:$0xff] %vm216_vm1, %v173_v41  ;;  %230 = vst.msk [vmem:[%s428_s3 + $0x68] sm:$0xff] %vm216_vm1, %v205_v42 }

// kernel: rebuildnet_forward.47
= control target key start
LH: loop header
LB: loop body
LE: loop exit
PB: predicated region body
PF: predicated region fallthrough
CT: control target
= control target key end

     0   :  { %s832_s12 = smov 0   ;;  %s834_s13 = smov 0   ;;  %s922_s0 = inlined_call_operand.vmem [shape: bf16[2,288,256], index: 0, kind: input, shape index: {}]   ;;  %s923_s1 = inlined_call_operand.vmem [shape: bf16[16,288], index: 1, kind: input, shape index: {}]   ;;  %s924_s2 = inlined_call_operand.vmem [shape: f32[16,1], index: 2, kind: input, shape index: {}]   ;;  %s925_s3 = inlined_call_operand.vmem [shape: f32[2,16,256], index: 3, kind: output, shape index: {}]  }
   0x1   :  { %s836_s14 = smov 0  }
   0x2 LB: > { %s25_s15 = sadd.s32 1, %s805_s13  ;;  %p647_p0 = scmp.ge.s32.totalorder %s809_s14, 1  ;;  %s809_s14 = sphi %s836_s14, %s13_s14   ;;  %s805_s13 = sphi %s834_s13, %s927_s13   ;;  %s801_s12 = sphi %s832_s12, %s926_s12  }
   0x3   : > { %p27_p1 = scmp.ge.s32.totalorder %s25_s15, 2  ;;  %p158_p2 = scmp.lt.s32.totalorder %s809_s14, 3 }
   0x5   : > { %s929_s15 = smov (%p27_p1, %s25_s15), 0  ;;  %p159_p3 = pnand %p647_p0, %p158_p2 }
   0x6   : > { %p191_p4 = scmp.lt.s32.totalorder (!%p159_p3), %s801_s12, 1  ;;  %v811_v0 = vmov (!%p159_p3), 0   ;;  %v785_v1 = vld [vmem:[%s923_s1 + $0x4] ss:$12 sps:$4 sm:$0xff] (!%p159_p3)   ;;  %v252_v3 = vld [vmem:[%s924_s2 + $0x8] sm:$0xff] (!%p159_p3)  ;;  %vm458_vm0 = vcmask (!%p159_p3), 261120  }
   0x7   : > { %162 = sbr.rel (%p159_p3) target bundleno = 305 (0x131), region = 32  ;;  %537 = vmatprep.mubr.bf16.mxu0 (!%p159_p3), %v811_v0  ;;  %728 = vset.pattern.permute.xlu0 (!%p159_p3), %v811_v0  ;;  %v251_v2 = vld [vmem:[%s924_s2] sm:$0xff] (!%p159_p3)  ;;  %v786_v23 = vld [vmem:[%s923_s1 + $0x8] ss:$12 sps:$4 sm:$0xff] (!%p159_p3)  }
   0x8   : > { %494 = vmatprep.mubr.bf16.mxu1 (!%p159_p3), %v785_v1  ;;  %255 = vperm.xlu0 (!%p159_p3), %728, %v251_v2   ;;  %v783_v41 = vld [vmem:[%s923_s1] ss:$12 sps:$4 sm:$0xff] (!%p159_p3)  }
   0xc   : > { %260 = vperm.xlu0 (!%p159_p3), %728, %v252_v3  }
   0xe   : > { %s931_s12 = smov (!%p191_p4, %s801_s12), 1 }
   0xf   : > { %s702_s20 = smul.u32 288, %s931_s12  ;;  %s693_s30 = sshll.u32 %s931_s12, 5 }
  0x10   : > { %s208_s6 = scalar_lea.vmem %s925_s3, %s693_s30 }
  0x11   : > { %s865_s25 = scalar_lea.vmem %s922_s0, %s702_s20 }
  0x12   : > { %v729_v4 = vld [vmem:[%s865_s25 + $0x4] ss:$8 sps:$4 sm:$0xff]   ;;  %v731_v5 = vld [vmem:[%s865_s25] ss:$8 sps:$4 sm:$0xff]   ;;  %v732_v6 = vld [vmem:[%s865_s25 + $0x14] ss:$8 sps:$4 sm:$0xff]  }
  0x13   : > { %462 = vmatprep.subr.bf16.mxu1 %v729_v4  ;;  %v734_v7 = vld [vmem:[%s865_s25 + $0x10] ss:$8 sps:$4 sm:$0xff]   ;;  %v735_v8 = vld [vmem:[%s865_s25 + $0x24] ss:$8 sps:$4 sm:$0xff]   ;;  %v737_v9 = vld [vmem:[%s865_s25 + $0x20] ss:$8 sps:$4 sm:$0xff]  }
  0x14   : > { %463 = vmatpush1.bf16.msra.mxu1 %v731_v5  ;;  %v738_v10 = vld [vmem:[%s865_s25 + $0x34] ss:$8 sps:$4 sm:$0xff]   ;;  %v740_v11 = vld [vmem:[%s865_s25 + $0x30] ss:$8 sps:$4 sm:$0xff]   ;;  %v741_v12 = vld [vmem:[%s865_s25 + $0x44] ss:$8 sps:$4 sm:$0xff]  }
  0x15   : > { %464 = vmatprep.subr.bf16.mxu1 %v732_v6  ;;  %v743_v13 = vld [vmem:[%s865_s25 + $0x40] ss:$8 sps:$4 sm:$0xff]   ;;  %v744_v14 = vld [vmem:[%s865_s25 + $0x54] ss:$8 sps:$4 sm:$0xff]   ;;  %v746_v15 = vld [vmem:[%s865_s25 + $0x50] ss:$8 sps:$4 sm:$0xff]  }
  0x16   : > { %v771_v16 = vld [vmem:[%s865_s25 + $0x104] ss:$8 sps:$4 sm:$0xff]   ;;  %v775_v18 = vld [vmem:[%s865_s25 + $0x100] ss:$8 sps:$4 sm:$0xff]   ;;  %v777_v19 = vld [vmem:[%s865_s25 + $0x114] ss:$8 sps:$4 sm:$0xff]  }
  0x17   : > { %v747_v17 = vld [vmem:[%s865_s25 + $0x64] ss:$8 sps:$4 sm:$0xff]   ;;  %505 = vmatprep.subr.bf16.mxu0 %v771_v16  ;;  %v749_v20 = vld [vmem:[%s865_s25 + $0x60] ss:$8 sps:$4 sm:$0xff]   ;;  %v781_v21 = vld [vmem:[%s865_s25 + $0x110] ss:$8 sps:$4 sm:$0xff]  }
  0x18   : > { %465 = vmatpush1.bf16.msra.mxu1 %v734_v7  ;;  %506 = vmatpush1.bf16.msra.mxu0 %v775_v18  ;;  %v750_v22 = vld [vmem:[%s865_s25 + $0x74] ss:$8 sps:$4 sm:$0xff]   ;;  %v752_v24 = vld [vmem:[%s865_s25 + $0x70] ss:$8 sps:$4 sm:$0xff]   ;;  %v753_v25 = vld [vmem:[%s865_s25 + $0x84] ss:$8 sps:$4 sm:$0xff]  }
  0x19   : > { %466 = vmatprep.subr.bf16.mxu1 %v735_v8  ;;  %507 = vmatprep.subr.bf16.mxu0 %v777_v19  ;;  %v755_v26 = vld [vmem:[%s865_s25 + $0x80] ss:$8 sps:$4 sm:$0xff]   ;;  %v756_v27 = vld [vmem:[%s865_s25 + $0x94] ss:$8 sps:$4 sm:$0xff]   ;;  %v758_v28 = vld [vmem:[%s865_s25 + $0x90] ss:$8 sps:$4 sm:$0xff]  }
  0x1a   : > { %v759_v29 = vld [vmem:[%s865_s25 + $0xa4] ss:$8 sps:$4 sm:$0xff]   ;;  %v761_v30 = vld [vmem:[%s865_s25 + $0xa0] ss:$8 sps:$4 sm:$0xff]   ;;  %v762_v31 = vld [vmem:[%s865_s25 + $0xb4] ss:$8 sps:$4 sm:$0xff]  }
  0x1b   : > { %v764_v32 = vld [vmem:[%s865_s25 + $0xb0] ss:$8 sps:$4 sm:$0xff]   ;;  %v765_v33 = vld [vmem:[%s865_s25 + $0xc4] ss:$8 sps:$4 sm:$0xff]   ;;  %v767_v34 = vld [vmem:[%s865_s25 + $0xc0] ss:$8 sps:$4 sm:$0xff]  }
  0x1c   : > { %467 = vmatpush1.bf16.msra.mxu1 %v737_v9  ;;  %508 = vmatpush1.bf16.msra.mxu0 %v781_v21  ;;  %v768_v35 = vld [vmem:[%s865_s25 + $0xd4] ss:$8 sps:$4 sm:$0xff]   ;;  %v770_v36 = vld [vmem:[%s865_s25 + $0xd0] ss:$8 sps:$4 sm:$0xff]   ;;  %v773_v37 = vld [vmem:[%s865_s25 + $0xe4] ss:$8 sps:$4 sm:$0xff]  }
  0x1d   : > { %468 = vmatprep.subr.bf16.mxu1 %v738_v10  ;;  %v776_v38 = vld [vmem:[%s865_s25 + $0xe0] ss:$8 sps:$4 sm:$0xff]   ;;  %v779_v39 = vld [vmem:[%s865_s25 + $0xf4] ss:$8 sps:$4 sm:$0xff]   ;;  %v782_v40 = vld [vmem:[%s865_s25 + $0xf0] ss:$8 sps:$4 sm:$0xff]  }
  0x1f   : > { %690 = vmatmul.mubr.msk.bf16.vlgmr.msra.gmra.mrb[0].mxu0 %vm458_vm0, %v786_v23 }
  0x20   : > { %469 = vmatpush1.bf16.msra.mxu1 %v740_v11 }
  0x21   : > { %470 = vmatprep.subr.bf16.mxu1 %v741_v12 }
  0x24   : > { %471 = vmatpush1.bf16.msra.mxu1 %v743_v13 }
  0x25   : > { %472 = vmatprep.subr.bf16.mxu1 %v744_v14 }
  0x28   : > { %473 = vmatpush1.bf16.msra.mxu1 %v746_v15 }
  0x29   : > { %474 = vmatprep.subr.bf16.mxu1 %v747_v17 }
  0x2c   : > { %475 = vmatpush1.bf16.msra.mxu1 %v749_v20 }
  0x2d   : > { %476 = vmatprep.subr.bf16.mxu1 %v750_v22 }
  0x30   : > { %477 = vmatpush1.bf16.msra.mxu1 %v752_v24 }
  0x31   : > { %478 = vmatprep.subr.bf16.mxu1 %v753_v25 }
  0x34   : > { %479 = vmatpush1.bf16.msra.mxu1 %v755_v26 }
  0x35   : > { %480 = vmatprep.subr.bf16.mxu1 %v756_v27 }
  0x38   : > { %481 = vmatpush1.bf16.msra.mxu1 %v758_v28 }
  0x39   : > { %482 = vmatprep.subr.bf16.mxu1 %v759_v29 }
  0x3c   : > { %483 = vmatpush1.bf16.msra.mxu1 %v761_v30 }
  0x3d   : > { %484 = vmatprep.subr.bf16.mxu1 %v762_v31 }
  0x40   : > { %485 = vmatpush1.bf16.msra.mxu1 %v764_v32 }
  0x41   : > { %486 = vmatprep.subr.bf16.mxu1 %v765_v33 }
  0x44   : > { %487 = vmatpush1.bf16.msra.mxu1 %v767_v34 }
  0x45   : > { %488 = vmatprep.subr.bf16.mxu1 %v768_v35 }
  0x48   : > { %489 = vmatpush1.bf16.msra.mxu1 %v770_v36 }
  0x49   : > { %490 = vmatprep.subr.bf16.mxu1 %v773_v37 }
  0x4c   : > { %491 = vmatpush1.bf16.msra.mxu1 %v776_v38 }
  0x4d   : > { %492 = vmatprep.subr.bf16.mxu1 %v779_v39 }
  0x50   : > { %493 = vmatpush1.bf16.msra.mxu1 %v782_v40 }
  0x53   : > { %495 = vmatmul.mubr.bf16.vlgmr.msra.gmra.mrb[0].mxu1 %v783_v41 }
  0x87   : > { %v256_v46 = vpop.permute.xlu0 %255 }
  0x8b   : > { %v261_v50 = vpop.permute.xlu0 %260 }
  0xf2   : > { %v539_v42 = vpop.f32.mrb[0].mxu0 }
  0xf3   : > { %v541_v43 = vpop.f32.mrb[1].mxu0 }
  0xf4   : > { %v543_v44 = vpop.f32.mrb[2].mxu0 }
  0xf5   : > { %v545_v45 = vpop.f32.mrb[3].mxu0 }
 0x126   : > { %v496_v47 = vpop.f32.mrb[0].mxu1 }
 0x127   : > { %v497_v48 = vadd.f32 %v496_v47, %v256_v46  ;;  %v498_v49 = vpop.f32.mrb[1].mxu1 }
 0x128   : > { %v499_v51 = vadd.f32 %v498_v49, %v256_v46  ;;  %v500_v52 = vpop.f32.mrb[2].mxu1 }
 0x129   : > { %v540_v53 = vadd.f32 %v539_v42, %v497_v48  ;;  %v501_v54 = vadd.f32 %v500_v52, %v261_v50  ;;  %v502_v55 = vpop.f32.mrb[3].mxu1 }
 0x12a   : > { %v542_v56 = vadd.f32 %v541_v43, %v499_v51  ;;  %v503_v57 = vadd.f32 %v502_v55, %v261_v50 }
 0x12b   : > { %v548_v58 = vmax.f32 %v540_v53, 0.0  ;;  %v544_v59 = vadd.f32 %v543_v44, %v501_v54 }
 0x12c   : > { %v549_v60 = vmax.f32 %v542_v56, 0.0  ;;  %v546_v61 = vadd.f32 %v545_v45, %v503_v57 }
 0x12d   : > { %552 = vst [vmem:[%s208_s6] sm:$0xff] %v548_v58  ;;  %v550_v62 = vmax.f32 %v544_v59, 0.0 }
 0x12e   : > { %553 = vst [vmem:[%s208_s6 + $0x8] sm:$0xff] %v549_v60  ;;  %v551_v63 = vmax.f32 %v546_v61, 0.0 }
 0x12f   : > { %554 = vst [vmem:[%s208_s6 + $0x10] sm:$0xff] %v550_v62 }
 0x130   : > { %555 = vst [vmem:[%s208_s6 + $0x18] sm:$0xff] %v551_v63 }
 0x131 PF: > { %s13_s14 = sadd.s32 1, %s809_s14   ;;  %s926_s12 = smov %s805_s13 }
 0x132   : > { %p10_p5 = scmp.ge.s32.totalorder %s13_s14, 4   ;;  %s927_s13 = smov %s929_s15 }
 0x134   :  { %12 = sbr.rel (!%p10_p5) target bundleno = 2 (0x2), region = 62 }

// kernel: rebuildnet_forward.49
= control target key start
LH: loop header
LB: loop body
LE: loop exit
PB: predicated region body
PF: predicated region fallthrough
CT: control target
= control target key end

     0   :  { %s469_s12 = smov 0   ;;  %s471_s13 = smov 0   ;;  %s512_s0 = inlined_call_operand.vmem [shape: bf16[2,16,256], index: 0, kind: input, shape index: {}]   ;;  %s513_s1 = inlined_call_operand.vmem [shape: bf16[4,16], index: 1, kind: input, shape index: {}]   ;;  %s514_s2 = inlined_call_operand.vmem [shape: f32[4,1], index: 2, kind: input, shape index: {}]   ;;  %s515_s3 = inlined_call_operand.vmem [shape: f32[2,4,256], index: 3, kind: output, shape index: {}]  }
   0x1   :  { %s473_s14 = smov 0  }
   0x2 LB: > { %s25_s15 = sadd.s32 1, %s442_s13  ;;  %p379_p0 = scmp.ge.s32.totalorder %s446_s14, 1  ;;  %s446_s14 = sphi %s473_s14, %s13_s14   ;;  %s442_s13 = sphi %s471_s13, %s517_s13   ;;  %s438_s12 = sphi %s469_s12, %s516_s12  }
   0x3   : > { %p27_p1 = scmp.ge.s32.totalorder %s25_s15, 2  ;;  %p158_p2 = scmp.lt.s32.totalorder %s446_s14, 3 }
   0x5   : > { %s519_s15 = smov (%p27_p1, %s25_s15), 0  ;;  %p159_p3 = pnand %p379_p0, %p158_p2 }
   0x6   : > { %p191_p4 = scmp.lt.s32.totalorder (!%p159_p3), %s438_s12, 1  ;;  %v448_v0 = vmov (!%p159_p3), 0   ;;  %v214_v1 = vld [vmem:[%s514_s2] sm:$0xf] (!%p159_p3)  ;;  %vm230_vm0 = vcmask (!%p159_p3), 130048  }
   0x7   : > { %162 = sbr.rel (%p159_p3) target bundleno = 257 (0x101), region = 32  ;;  %266 = vmatprep.mubr.bf16.mxu0 (!%p159_p3), %v448_v0  ;;  %416 = vset.pattern.permute.xlu0 (!%p159_p3), %v448_v0  ;;  %v211_v4 = vld [vmem:[%s513_s1] sm:$0x3] (!%p159_p3) }
   0x8   : > { %217 = vperm.xlu0 (!%p159_p3), %416, %v214_v1  }
   0xe   : > { %s521_s12 = smov (!%p191_p4, %s438_s12), 1 }
   0xf   : > { %s389_s18 = sshll.u32 %s521_s12, 4  ;;  %s390_s24 = sshll.u32 %s521_s12, 3 }
  0x10   : > { %s198_s21 = scalar_lea.vmem %s512_s0, %s389_s18  ;;  %s208_s27 = scalar_lea.vmem %s515_s3, %s390_s24 }
  0x11   : > { %v417_v2 = vld [vmem:[%s198_s21 + $0x4] ss:$8 sps:$4 sm:$0xff]   ;;  %v419_v3 = vld [vmem:[%s198_s21] ss:$8 sps:$4 sm:$0xff]  }
  0x12   : > { %234 = vmatprep.subr.bf16.mxu0 %v417_v2 }
  0x13   : > { %235 = vmatpush1.bf16.msra.mxu0 %v419_v3 }
  0x16   : > { %386 = vmatmul.mubr.msk.bf16.vlgmr.msra.gmra.mrb[0].mxu0 %vm230_vm0, %v211_v4 }
  0x87   : > { %v218_v5 = vpop.permute.xlu0 %217 }
  0xe9   : > { %v268_v6 = vpop.f32.mrb[0].mxu0 }
  0xea   : > { %v269_v7 = vadd.f32 %v268_v6, %v218_v5  ;;  %v270_v8 = vpop.f32.mrb[1].mxu0 }
  0xeb   : > { %v271_v9 = vadd.f32 %v270_v8, %v218_v5  ;;  %v272_v10 = vpop.f32.mrb[2].mxu0 }
  0xec   : > { %v275_v11 = vmul.f32 0.5, %v269_v7  ;;  %v273_v12 = vpop.f32.mrb[3].mxu0 }
  0xed   : > { %v276_v13 = vmul.f32 0.5, %v271_v9 }
  0xee   : > { %420 = vtanh.f32 %v275_v11 }
  0xef   : > { %422 = vtanh.f32 %v276_v13 }
  0xf8   : > { %v421_v14 = vpop.eup %420 }
  0xf9   : > { %v423_v15 = vpop.eup %422  ;;  %v279_v16 = vadd.f32 1.0, %v421_v14 }
  0xfa   : > { %v280_v17 = vadd.f32 1.0, %v423_v15 }
  0xfb   : > { %v281_v18 = vmul.f32 0.5, %v279_v16 }
  0xfc   : > { %v282_v19 = vmul.f32 0.5, %v280_v17 }
  0xfe   : > { %v285_v20 = vcombine.low %v281_v18, %v282_v19 }
 0x100   : > { %287 = vst [vmem:[%s208_s27] sm:$0xff] %v285_v20 }
 0x101 PF: > { %s13_s14 = sadd.s32 1, %s446_s14   ;;  %s516_s12 = smov %s442_s13 }
 0x102   : > { %p10_p5 = scmp.ge.s32.totalorder %s13_s14, 4   ;;  %s517_s13 = smov %s519_s15 }
 0x104   :  { %12 = sbr.rel (!%p10_p5) target bundleno = 2 (0x2), region = 62 }

</bundles_post_ra>
